<compile_context>
chip_gen: v6e
topology: v6e:2x2x1
jax: 0.10.0
libtpu: 0.0.40
codegen_flags: <defaults>
</compile_context>

<pallas_src>
import jax
import jax.numpy as jnp
import numpy as np
from jax import lax
from jax.experimental import pallas as pl
from jax.experimental.pallas import tpu as pltpu


def _round_up(x, m):
    return ((x + m - 1) // m) * m


def point_head_forward(x_nchw, params, tile_h=32):
    """x_nchw: (B, Cin, H, W) float32 -> (B, H*W*point_count, 2) float32."""
    w1, b1, w2, b2, w3, b3 = params      # (9,Cin,F) (1,F) (9,F,F) (1,F) (F,2P) (1,2P)
    B, Cin, H, W = x_nchw.shape
    F = w1.shape[2]
    P2 = w3.shape[1]

    T = max(1, min(int(tile_h), H))       # image rows per grid step
    nT = -(-H // T)                       # number of H tiles (ceil)
    Hp = nT * T                           # padded image height (extra rows -> junk, dropped)
    Wp = _round_up(W + 2, 8)              # embedded row stride (>=2 halo cols, 8-aligned)
    LANES = 128                           # lane-dense output width (P2 zero-padded to 128)
    K1 = 3 * Cin                          # conv1 contraction (dx folded into channels)
    Tin = (T + 4) * Wp                    # flat rows of one input slab  (T+4 image rows)
    Nf1 = (T + 2) * Wp                    # flat rows of one f1 tile     (T+2 image rows)
    Nout = T * Wp                         # flat rows of one output tile (T   image rows)

    # ---- wrapper-side layout plumbing (no compute) --------------------------------
    x = jnp.transpose(x_nchw, (0, 2, 3, 1)).astype(jnp.float32)     # NCHW -> NHWC
    xs = jnp.zeros((B, Hp + 4, Wp, Cin), jnp.float32)
    xs = xs.at[:, 2:H + 2, 1:W + 1, :].set(x)                       # embed + zero halo
    xs = xs.reshape(B, (Hp + 4) * Wp, Cin)
    # fold the 3 horizontal taps into channels: xs3[:, j] = [xs[j-1], xs[j], xs[j+1]]
    xs3 = jnp.concatenate([
        jnp.pad(xs[:, :-1, :], ((0, 0), (1, 0), (0, 0))),
        xs,
        jnp.pad(xs[:, 1:, :], ((0, 0), (0, 1), (0, 0))),
    ], axis=-1)                                                     # (B, (Hp+4)*Wp, 3*Cin)
    # per-tile overlapping input slabs (4 halo image rows duplicated per tile; ~6% extra
    # HBM reads at T=64, lets BlockSpec auto-pipelining express the overlapping windows)
    xt = jnp.stack([xs3[:, t * T * Wp: t * T * Wp + Tin, :] for t in range(nT)],
                   axis=1)                                          # (B, nT, Tin, 3*Cin)

    w1r = w1.reshape(3, 3 * Cin, F).astype(jnp.bfloat16)            # (dy, dx*Cin -> K1, F)
    w2b = w2.astype(jnp.bfloat16)                                   # (9, F, F)
    w3p = (jnp.zeros((F, LANES), jnp.float32).at[:, :P2].set(w3)
           ).astype(jnp.bfloat16)                                   # lane-dense 1x1 weights
    b3p = jnp.zeros((1, LANES), jnp.float32).at[:, :P2].set(b3)
    b1f = b1.astype(jnp.float32)
    b2f = b2.astype(jnp.float32)

    def kernel(xt_ref, w1_ref, b1_ref, w2_ref, b2_ref, w3_ref, b3_ref,
               out_ref, f1s_ref):
        # xt_ref : (1, 1, Tin, 3*Cin) f32  input slab, dx taps folded into channels
        # w*_ref : bf16 weights; b*_ref : f32 biases
        # out_ref: (1, Nout, 128) f32      lane-dense embedded output tile
        # f1s_ref: ((T+4)*Wp, F) f32       conv1 activations (+1 pad row-band each side)
        t = pl.program_id(1)
        r0 = t * T                                       # first image row of this tile

        # ---- conv1: 3 aligned dy slices, K = 3*Cin, bf16 matmul, f32 accumulate ----
        acc1 = jnp.zeros((Nf1, F), jnp.float32)
        for dy in range(3):
            patch = xt_ref[0, 0, dy * Wp: dy * Wp + Nf1, :].astype(jnp.bfloat16)
            acc1 = acc1 + jnp.dot(patch, w1_ref[dy],
                                  preferred_element_type=jnp.float32)
        f1 = jnp.maximum(acc1 + b1_ref[...], 0.0)

        # Zero halo columns (col 0 / cols > W) and out-of-image rows so they act as conv2's
        # zero padding.  Row validity is a flat-index range check (no integer division);
        # the (Nf1,1)-shaped mask is cheap VPU filler next to the 9 MXU matmuls below.
        flat = lax.broadcasted_iota(jnp.int32, (Nf1, 1), 0)
        col = flat % Wp
        valid = ((col >= 1) & (col <= W) &
                 (flat >= (1 - r0) * Wp) & (flat < (H + 1 - r0) * Wp))
        f1 = jnp.where(valid, f1, 0.0)

        # The pad row-bands are only ever read for dropped output positions, but zero them
        # so every grid step fully owns its scratch contents ("parallel"-safe on both axes).
        zband = jnp.zeros((Wp, F), jnp.float32)
        f1s_ref[0:Wp, :] = zband
        f1s_ref[(T + 3) * Wp:(T + 4) * Wp, :] = zband
        f1s_ref[Wp:Wp + Nf1, :] = f1                     # aligned interior store

        # ---- conv2: 9 taps, each one contiguous static-offset slice of the f32 scratch ----
        acc2 = jnp.zeros((Nout, F), jnp.float32)
        for dy in range(3):
            for dx in range(3):
                start = (dy + 1) * Wp + dx - 1
                patch = f1s_ref[start:start + Nout, :].astype(jnp.bfloat16)
                acc2 = acc2 + jnp.dot(patch, w2_ref[dy * 3 + dx],
                                      preferred_element_type=jnp.float32)
        f2 = jnp.maximum(acc2 + b2_ref[...], 0.0)

        # ---- 1x1 output conv; full 128-lane (unmasked) store ----
        out = jnp.dot(f2.astype(jnp.bfloat16), w3_ref[...],
                      preferred_element_type=jnp.float32) + b3_ref[...]
        out_ref[0] = out.astype(out_ref.dtype)

    def run(single_buffer_weights):
        # Constant-index operands need only one VMEM buffer (saves ~5 MB at F=512).
        wkw = (dict(pipeline_mode=pl.Buffered(buffer_count=1))
               if single_buffer_weights else {})
        grid_spec = pltpu.PrefetchScalarGridSpec(
            num_scalar_prefetch=0,
            grid=(B, nT),
            in_specs=[
                pl.BlockSpec((1, 1, Tin, K1), lambda b, t: (b, t, 0, 0)),
                pl.BlockSpec((3, K1, F), lambda b, t: (0, 0, 0), **wkw),
                pl.BlockSpec((1, F), lambda b, t: (0, 0), **wkw),
                pl.BlockSpec((9, F, F), lambda b, t: (0, 0, 0), **wkw),
                pl.BlockSpec((1, F), lambda b, t: (0, 0), **wkw),
                pl.BlockSpec((F, LANES), lambda b, t: (0, 0), **wkw),
                pl.BlockSpec((1, LANES), lambda b, t: (0, 0), **wkw),
            ],
            out_specs=pl.BlockSpec((1, Nout, LANES), lambda b, t: (b, t, 0)),
            scratch_shapes=[pltpu.VMEM(((T + 4) * Wp, F), jnp.float32)],
        )
        # At production sizes (F=512, W=128, T=32) resident VMEM is ~25 MB
        # (5 MB input + 4.5 MB output double-buffered, 4.7 MB bf16 w2, 10 MB f32 scratch),
        # comfortably under the 64 MiB limit below on all of v5e/v6e/v7x.
        return pl.pallas_call(
            kernel,
            out_shape=jax.ShapeDtypeStruct((B, Hp * Wp, LANES), jnp.float32),
            grid_spec=grid_spec,
            compiler_params=pltpu.CompilerParams(
                dimension_semantics=("parallel", "parallel"),
                vmem_limit_bytes=64 * 1024 * 1024),
        )(xt, w1r, b1f, w2b, b2f, w3p, b3p)

    try:
        out = run(True)
    except Exception:
        # pipeline_mode / Buffered(1) not honored on this JAX build -> default buffering.
        out = run(False)

    # drop padded rows / halo columns / pad lanes; layout matches permute(0,2,3,1).view(B,-1,2)
    out = out.reshape(B, Hp, Wp, LANES)[:, :H, 1:W + 1, :P2]
    return out.reshape(B, H * W * (P2 // 2), 2)


def ref_forward(x_nchw, params):
    """Pure-JAX f32 reference matching the PyTorch forward semantics."""
    w1, b1, w2, b2, w3, b3 = params
    x = jnp.transpose(x_nchw, (0, 2, 3, 1))  # NHWC

    def conv3x3(inp, w, b):
        hwio = w.reshape(3, 3, w.shape[1], w.shape[2])
        dn = lax.conv_dimension_numbers(inp.shape, hwio.shape,
                                        ('NHWC', 'HWIO', 'NHWC'))
        y = lax.conv_general_dilated(inp, hwio, (1, 1), 'SAME',
                                     dimension_numbers=dn)
        return y + b.reshape(1, 1, 1, -1)

    f = jnp.maximum(conv3x3(x, w1, b1), 0.0)
    f = jnp.maximum(conv3x3(f, w2, b2), 0.0)
    o = jnp.einsum('bhwc,co->bhwo', f, w3) + b3.reshape(1, 1, 1, -1)
    return o.reshape(o.shape[0], -1, 2)


if __name__ == "__main__":
    # Small shapes consistent with the module: in_channels=4, point_count=4,
    # feature_size=32 (scaled down from 512), spatial 16x16, batch 2.
    B, Cin, H, W = 2, 4, 16, 16
    F = 32
    P = 4
    P2 = 2 * P

    key = jax.random.PRNGKey(0)
    ks = jax.random.split(key, 7)
    x = jax.random.normal(ks[0], (B, Cin, H, W), jnp.float32)
    # PyTorch weight (Cout,Cin,3,3) is stored here tap-major as (9, Cin, Cout).
    w1 = jax.random.normal(ks[1], (9, Cin, F), jnp.float32) * 0.10
    b1 = jax.random.normal(ks[2], (1, F), jnp.float32) * 0.10
    w2 = jax.random.normal(ks[3], (9, F, F), jnp.float32) * 0.05
    b2 = jax.random.normal(ks[4], (1, F), jnp.float32) * 0.10
    w3 = jax.random.normal(ks[5], (F, P2), jnp.float32) * 0.10
    b3 = jax.random.normal(ks[6], (1, P2), jnp.float32) * 0.10
    params = (w1, b1, w2, b2, w3, b3)

    ref = jax.block_until_ready(ref_forward(x, params))

    # Multi-tile path: 2 H-tiles per image (bf16 matmuls -> loose tolerance).
    out = jax.block_until_ready(point_head_forward(x, params, tile_h=8))
    assert out.shape == (B, H * W * P, 2), out.shape
    np.testing.assert_allclose(np.asarray(out), np.asarray(ref),
                               rtol=2e-2, atol=2e-2)

    # Ragged path: tile does not divide H (padded rows computed and dropped).
    out2 = jax.block_until_ready(point_head_forward(x, params, tile_h=6))
    np.testing.assert_allclose(np.asarray(out2), np.asarray(ref),
                               rtol=2e-2, atol=2e-2)

    print("KERNEL_OK")
</pallas_src>

<mosaic_0001>
module attributes {stable_mosaic.version = 11 : i64} {
  func.func @kernel(%arg0: i32, %arg1: i32, %arg2: memref<1x1x288x12xf32, #tpu.memory_space<vmem>>, %arg3: memref<3x12x32xbf16, #tpu.memory_space<vmem>>, %arg4: memref<1x32xf32, #tpu.memory_space<vmem>>, %arg5: memref<9x32x32xbf16, #tpu.memory_space<vmem>>, %arg6: memref<1x32xf32, #tpu.memory_space<vmem>>, %arg7: memref<32x128xbf16, #tpu.memory_space<vmem>>, %arg8: memref<1x128xf32, #tpu.memory_space<vmem>>, %arg9: memref<1x192x128xf32, #tpu.memory_space<vmem>>, %arg10: memref<288x32xf32, #tpu.memory_space<vmem>>) attributes {dimension_semantics = [#tpu.dimension_semantics<parallel>, #tpu.dimension_semantics<parallel>], iteration_bounds = array<i64: 2, 2>, scalar_prefetch = 0 : i64, scratch_operands = 1 : i64, tpu.core_type = #tpu.core_type<tc>, window_params = [{transform_indices = @transform_0, window_bounds = array<i64: 1, 1, 288, 12>}, {pipeline_mode = #tpu.pipeline_mode<synchronous>, transform_indices = @transform_1, window_bounds = array<i64: 3, 12, 32>}, {pipeline_mode = #tpu.pipeline_mode<synchronous>, transform_indices = @transform_2, window_bounds = array<i64: 1, 32>}, {pipeline_mode = #tpu.pipeline_mode<synchronous>, transform_indices = @transform_3, window_bounds = array<i64: 9, 32, 32>}, {pipeline_mode = #tpu.pipeline_mode<synchronous>, transform_indices = @transform_4, window_bounds = array<i64: 1, 32>}, {pipeline_mode = #tpu.pipeline_mode<synchronous>, transform_indices = @transform_5, window_bounds = array<i64: 32, 128>}, {pipeline_mode = #tpu.pipeline_mode<synchronous>, transform_indices = @transform_6, window_bounds = array<i64: 1, 128>}, {transform_indices = @transform_7, window_bounds = array<i64: 1, 192, 128>}]} {
    %c8_i32 = arith.constant 8 : i32
    %0 = arith.muli %arg1, %c8_i32 : i32
    %cst = arith.constant 0.000000e+00 : f32
    %1 = vector.broadcast %cst : f32 to vector<240x32xf32>
    %c0 = arith.constant 0 : index
    %c0_0 = arith.constant 0 : index
    %c0_1 = arith.constant 0 : index
    %c0_2 = arith.constant 0 : index
    %2 = vector.load %arg2[%c0, %c0_0, %c0_1, %c0_2] : memref<1x1x288x12xf32, #tpu.memory_space<vmem>>, vector<1x1x240x12xf32>
    %3 = vector.shape_cast %2 : vector<1x1x240x12xf32> to vector<240x12xf32>
    %4 = arith.truncf %3 : vector<240x12xf32> to vector<240x12xbf16>
    %c0_3 = arith.constant 0 : index
    %c0_4 = arith.constant 0 : index
    %c0_5 = arith.constant 0 : index
    %5 = vector.load %arg3[%c0_3, %c0_4, %c0_5] : memref<3x12x32xbf16, #tpu.memory_space<vmem>>, vector<1x12x32xbf16>
    %6 = vector.shape_cast %5 : vector<1x12x32xbf16> to vector<12x32xbf16>
    %cst_6 = arith.constant dense<0.000000e+00> : vector<240x32xf32>
    %7 = tpu.matmul %4, %6, %cst_6 {dimension_numbers = #tpu.dot_dimension_numbers<[1], [0], [0], [1], [0, 0, 1, 1], [], []>} : vector<240x12xbf16>, vector<12x32xbf16>, vector<240x32xf32> -> vector<240x32xf32>
    %8 = arith.addf %1, %7 : vector<240x32xf32>
    %c0_7 = arith.constant 0 : index
    %c0_8 = arith.constant 0 : index
    %c24 = arith.constant 24 : index
    %c0_9 = arith.constant 0 : index
    %9 = vector.load %arg2[%c0_7, %c0_8, %c24, %c0_9] : memref<1x1x288x12xf32, #tpu.memory_space<vmem>>, vector<1x1x240x12xf32>
    %10 = vector.shape_cast %9 : vector<1x1x240x12xf32> to vector<240x12xf32>
    %11 = arith.truncf %10 : vector<240x12xf32> to vector<240x12xbf16>
    %c1 = arith.constant 1 : index
    %c0_10 = arith.constant 0 : index
    %c0_11 = arith.constant 0 : index
    %12 = vector.load %arg3[%c1, %c0_10, %c0_11] : memref<3x12x32xbf16, #tpu.memory_space<vmem>>, vector<1x12x32xbf16>
    %13 = vector.shape_cast %12 : vector<1x12x32xbf16> to vector<12x32xbf16>
    %cst_12 = arith.constant dense<0.000000e+00> : vector<240x32xf32>
    %14 = tpu.matmul %11, %13, %cst_12 {dimension_numbers = #tpu.dot_dimension_numbers<[1], [0], [0], [1], [0, 0, 1, 1], [], []>} : vector<240x12xbf16>, vector<12x32xbf16>, vector<240x32xf32> -> vector<240x32xf32>
    %15 = arith.addf %8, %14 : vector<240x32xf32>
    %c0_13 = arith.constant 0 : index
    %c0_14 = arith.constant 0 : index
    %c48 = arith.constant 48 : index
    %c0_15 = arith.constant 0 : index
    %16 = vector.load %arg2[%c0_13, %c0_14, %c48, %c0_15] : memref<1x1x288x12xf32, #tpu.memory_space<vmem>>, vector<1x1x240x12xf32>
    %17 = vector.shape_cast %16 : vector<1x1x240x12xf32> to vector<240x12xf32>
    %18 = arith.truncf %17 : vector<240x12xf32> to vector<240x12xbf16>
    %c2 = arith.constant 2 : index
    %c0_16 = arith.constant 0 : index
    %c0_17 = arith.constant 0 : index
    %19 = vector.load %arg3[%c2, %c0_16, %c0_17] : memref<3x12x32xbf16, #tpu.memory_space<vmem>>, vector<1x12x32xbf16>
    %20 = vector.shape_cast %19 : vector<1x12x32xbf16> to vector<12x32xbf16>
    %cst_18 = arith.constant dense<0.000000e+00> : vector<240x32xf32>
    %21 = tpu.matmul %18, %20, %cst_18 {dimension_numbers = #tpu.dot_dimension_numbers<[1], [0], [0], [1], [0, 0, 1, 1], [], []>} : vector<240x12xbf16>, vector<12x32xbf16>, vector<240x32xf32> -> vector<240x32xf32>
    %22 = arith.addf %15, %21 : vector<240x32xf32>
    %c0_19 = arith.constant 0 : index
    %c0_20 = arith.constant 0 : index
    %23 = vector.load %arg4[%c0_19, %c0_20] : memref<1x32xf32, #tpu.memory_space<vmem>>, vector<1x32xf32>
    %24 = vector.broadcast %23 : vector<1x32xf32> to vector<240x32xf32>
    %25 = arith.addf %22, %24 : vector<240x32xf32>
    %cst_21 = arith.constant 0.000000e+00 : f32
    %26 = vector.broadcast %cst_21 : f32 to vector<240x32xf32>
    %27 = arith.maximumf %25, %26 : vector<240x32xf32>
    %28 = tpu.iota {dimensions = array<i32: 0>} : vector<240x1xi32>
    %c24_i32 = arith.constant 24 : i32
    %c0_i32 = arith.constant 0 : i32
    %29 = arith.cmpi eq, %c24_i32, %c0_i32 : i32
    %c1_i32 = arith.constant 1 : i32
    %30 = arith.select %29, %c1_i32, %c24_i32 : i32
    %31 = vector.broadcast %30 : i32 to vector<240x1xi32>
    %32 = arith.remsi %28, %31 : vector<240x1xi32>
    %c0_i32_22 = arith.constant 0 : i32
    %33 = vector.broadcast %c0_i32_22 : i32 to vector<240x1xi32>
    %34 = arith.cmpi ne, %32, %33 : vector<240x1xi32>
    %c0_i32_23 = arith.constant 0 : i32
    %35 = vector.broadcast %c0_i32_23 : i32 to vector<240x1xi32>
    %36 = arith.cmpi slt, %32, %35 : vector<240x1xi32>
    %c0_i32_24 = arith.constant 0 : i32
    %37 = arith.cmpi slt, %30, %c0_i32_24 : i32
    %38 = vector.broadcast %37 : i1 to vector<240x1xi1>
    %39 = vector.broadcast %38 : vector<240x1xi1> to vector<240x1xi1>
    %40 = arith.xori %36, %39 : vector<240x1xi1>
    %41 = arith.andi %40, %34 : vector<240x1xi1>
    %42 = vector.broadcast %30 : i32 to vector<240x1xi32>
    %43 = arith.addi %32, %42 : vector<240x1xi32>
    %44 = arith.select %41, %43, %32 : vector<240x1xi1>, vector<240x1xi32>
    %c1_i32_25 = arith.constant 1 : i32
    %45 = vector.broadcast %c1_i32_25 : i32 to vector<240x1xi32>
    %46 = arith.cmpi sge, %44, %45 : vector<240x1xi32>
    %c16_i32 = arith.constant 16 : i32
    %47 = vector.broadcast %c16_i32 : i32 to vector<240x1xi32>
    %48 = arith.cmpi sle, %44, %47 : vector<240x1xi32>
    %49 = arith.andi %46, %48 : vector<240x1xi1>
    %c1_i32_26 = arith.constant 1 : i32
    %50 = arith.subi %c1_i32_26, %0 : i32
    %c24_i32_27 = arith.constant 24 : i32
    %51 = arith.muli %50, %c24_i32_27 : i32
    %52 = vector.broadcast %51 : i32 to vector<240x1xi32>
    %53 = arith.cmpi sge, %28, %52 : vector<240x1xi32>
    %54 = arith.andi %49, %53 : vector<240x1xi1>
    %c17_i32 = arith.constant 17 : i32
    %55 = arith.subi %c17_i32, %0 : i32
    %c24_i32_28 = arith.constant 24 : i32
    %56 = arith.muli %55, %c24_i32_28 : i32
    %57 = vector.broadcast %56 : i32 to vector<240x1xi32>
    %58 = arith.cmpi slt, %28, %57 : vector<240x1xi32>
    %59 = arith.andi %54, %58 : vector<240x1xi1>
    %cst_29 = arith.constant 0.000000e+00 : f32
    %60 = vector.shape_cast %59 : vector<240x1xi1> to vector<240x1xi1>
    %61 = vector.broadcast %60 : vector<240x1xi1> to vector<240x32xi1>
    %62 = vector.broadcast %cst_29 : f32 to vector<240x32xf32>
    %63 = arith.select %61, %27, %62 : vector<240x32xi1>, vector<240x32xf32>
    %cst_30 = arith.constant 0.000000e+00 : f32
    %64 = vector.broadcast %cst_30 : f32 to vector<24x32xf32>
    %c0_31 = arith.constant 0 : index
    %c0_32 = arith.constant 0 : index
    %65 = vector.load %arg10[%c0_31, %c0_32] : memref<288x32xf32, #tpu.memory_space<vmem>>, vector<24x32xf32>
    tpu.vector_store %arg10[%c0_31, %c0_32], %64 {strides = array<i32>} : memref<288x32xf32, #tpu.memory_space<vmem>>, vector<24x32xf32>,
    %c264 = arith.constant 264 : index
    %c0_33 = arith.constant 0 : index
    %66 = vector.load %arg10[%c264, %c0_33] : memref<288x32xf32, #tpu.memory_space<vmem>>, vector<24x32xf32>
    tpu.vector_store %arg10[%c264, %c0_33], %64 {strides = array<i32>} : memref<288x32xf32, #tpu.memory_space<vmem>>, vector<24x32xf32>,
    %c24_34 = arith.constant 24 : index
    %c0_35 = arith.constant 0 : index
    %67 = vector.load %arg10[%c24_34, %c0_35] : memref<288x32xf32, #tpu.memory_space<vmem>>, vector<240x32xf32>
    tpu.vector_store %arg10[%c24_34, %c0_35], %63 {strides = array<i32>} : memref<288x32xf32, #tpu.memory_space<vmem>>, vector<240x32xf32>,
    %cst_36 = arith.constant 0.000000e+00 : f32
    %68 = vector.broadcast %cst_36 : f32 to vector<192x32xf32>
    %c23 = arith.constant 23 : index
    %c0_37 = arith.constant 0 : index
    %69 = vector.load %arg10[%c23, %c0_37] : memref<288x32xf32, #tpu.memory_space<vmem>>, vector<192x32xf32>
    %70 = arith.truncf %69 : vector<192x32xf32> to vector<192x32xbf16>
    %c0_38 = arith.constant 0 : index
    %c0_39 = arith.constant 0 : index
    %c0_40 = arith.constant 0 : index
    %71 = vector.load %arg5[%c0_38, %c0_39, %c0_40] : memref<9x32x32xbf16, #tpu.memory_space<vmem>>, vector<1x32x32xbf16>
    %72 = vector.shape_cast %71 : vector<1x32x32xbf16> to vector<32x32xbf16>
    %cst_41 = arith.constant dense<0.000000e+00> : vector<192x32xf32>
    %73 = tpu.matmul %70, %72, %cst_41 {dimension_numbers = #tpu.dot_dimension_numbers<[1], [0], [0], [1], [0, 0, 1, 1], [], []>} : vector<192x32xbf16>, vector<32x32xbf16>, vector<192x32xf32> -> vector<192x32xf32>
    %74 = arith.addf %68, %73 : vector<192x32xf32>
    %c24_42 = arith.constant 24 : index
    %c0_43 = arith.constant 0 : index
    %75 = vector.load %arg10[%c24_42, %c0_43] : memref<288x32xf32, #tpu.memory_space<vmem>>, vector<192x32xf32>
    %76 = arith.truncf %75 : vector<192x32xf32> to vector<192x32xbf16>
    %c1_44 = arith.constant 1 : index
    %c0_45 = arith.constant 0 : index
    %c0_46 = arith.constant 0 : index
    %77 = vector.load %arg5[%c1_44, %c0_45, %c0_46] : memref<9x32x32xbf16, #tpu.memory_space<vmem>>, vector<1x32x32xbf16>
    %78 = vector.shape_cast %77 : vector<1x32x32xbf16> to vector<32x32xbf16>
    %cst_47 = arith.constant dense<0.000000e+00> : vector<192x32xf32>
    %79 = tpu.matmul %76, %78, %cst_47 {dimension_numbers = #tpu.dot_dimension_numbers<[1], [0], [0], [1], [0, 0, 1, 1], [], []>} : vector<192x32xbf16>, vector<32x32xbf16>, vector<192x32xf32> -> vector<192x32xf32>
    %80 = arith.addf %74, %79 : vector<192x32xf32>
    %c25 = arith.constant 25 : index
    %c0_48 = arith.constant 0 : index
    %81 = vector.load %arg10[%c25, %c0_48] : memref<288x32xf32, #tpu.memory_space<vmem>>, vector<192x32xf32>
    %82 = arith.truncf %81 : vector<192x32xf32> to vector<192x32xbf16>
    %c2_49 = arith.constant 2 : index
    %c0_50 = arith.constant 0 : index
    %c0_51 = arith.constant 0 : index
    %83 = vector.load %arg5[%c2_49, %c0_50, %c0_51] : memref<9x32x32xbf16, #tpu.memory_space<vmem>>, vector<1x32x32xbf16>
    %84 = vector.shape_cast %83 : vector<1x32x32xbf16> to vector<32x32xbf16>
    %cst_52 = arith.constant dense<0.000000e+00> : vector<192x32xf32>
    %85 = tpu.matmul %82, %84, %cst_52 {dimension_numbers = #tpu.dot_dimension_numbers<[1], [0], [0], [1], [0, 0, 1, 1], [], []>} : vector<192x32xbf16>, vector<32x32xbf16>, vector<192x32xf32> -> vector<192x32xf32>
    %86 = arith.addf %80, %85 : vector<192x32xf32>
    %c47 = arith.constant 47 : index
    %c0_53 = arith.constant 0 : index
    %87 = vector.load %arg10[%c47, %c0_53] : memref<288x32xf32, #tpu.memory_space<vmem>>, vector<192x32xf32>
    %88 = arith.truncf %87 : vector<192x32xf32> to vector<192x32xbf16>
    %c3 = arith.constant 3 : index
    %c0_54 = arith.constant 0 : index
    %c0_55 = arith.constant 0 : index
    %89 = vector.load %arg5[%c3, %c0_54, %c0_55] : memref<9x32x32xbf16, #tpu.memory_space<vmem>>, vector<1x32x32xbf16>
    %90 = vector.shape_cast %89 : vector<1x32x32xbf16> to vector<32x32xbf16>
    %cst_56 = arith.constant dense<0.000000e+00> : vector<192x32xf32>
    %91 = tpu.matmul %88, %90, %cst_56 {dimension_numbers = #tpu.dot_dimension_numbers<[1], [0], [0], [1], [0, 0, 1, 1], [], []>} : vector<192x32xbf16>, vector<32x32xbf16>, vector<192x32xf32> -> vector<192x32xf32>
    %92 = arith.addf %86, %91 : vector<192x32xf32>
    %c48_57 = arith.constant 48 : index
    %c0_58 = arith.constant 0 : index
    %93 = vector.load %arg10[%c48_57, %c0_58] : memref<288x32xf32, #tpu.memory_space<vmem>>, vector<192x32xf32>
    %94 = arith.truncf %93 : vector<192x32xf32> to vector<192x32xbf16>
    %c4 = arith.constant 4 : index
    %c0_59 = arith.constant 0 : index
    %c0_60 = arith.constant 0 : index
    %95 = vector.load %arg5[%c4, %c0_59, %c0_60] : memref<9x32x32xbf16, #tpu.memory_space<vmem>>, vector<1x32x32xbf16>
    %96 = vector.shape_cast %95 : vector<1x32x32xbf16> to vector<32x32xbf16>
    %cst_61 = arith.constant dense<0.000000e+00> : vector<192x32xf32>
    %97 = tpu.matmul %94, %96, %cst_61 {dimension_numbers = #tpu.dot_dimension_numbers<[1], [0], [0], [1], [0, 0, 1, 1], [], []>} : vector<192x32xbf16>, vector<32x32xbf16>, vector<192x32xf32> -> vector<192x32xf32>
    %98 = arith.addf %92, %97 : vector<192x32xf32>
    %c49 = arith.constant 49 : index
    %c0_62 = arith.constant 0 : index
    %99 = vector.load %arg10[%c49, %c0_62] : memref<288x32xf32, #tpu.memory_space<vmem>>, vector<192x32xf32>
    %100 = arith.truncf %99 : vector<192x32xf32> to vector<192x32xbf16>
    %c5 = arith.constant 5 : index
    %c0_63 = arith.constant 0 : index
    %c0_64 = arith.constant 0 : index
    %101 = vector.load %arg5[%c5, %c0_63, %c0_64] : memref<9x32x32xbf16, #tpu.memory_space<vmem>>, vector<1x32x32xbf16>
    %102 = vector.shape_cast %101 : vector<1x32x32xbf16> to vector<32x32xbf16>
    %cst_65 = arith.constant dense<0.000000e+00> : vector<192x32xf32>
    %103 = tpu.matmul %100, %102, %cst_65 {dimension_numbers = #tpu.dot_dimension_numbers<[1], [0], [0], [1], [0, 0, 1, 1], [], []>} : vector<192x32xbf16>, vector<32x32xbf16>, vector<192x32xf32> -> vector<192x32xf32>
    %104 = arith.addf %98, %103 : vector<192x32xf32>
    %c71 = arith.constant 71 : index
    %c0_66 = arith.constant 0 : index
    %105 = vector.load %arg10[%c71, %c0_66] : memref<288x32xf32, #tpu.memory_space<vmem>>, vector<192x32xf32>
    %106 = arith.truncf %105 : vector<192x32xf32> to vector<192x32xbf16>
    %c6 = arith.constant 6 : index
    %c0_67 = arith.constant 0 : index
    %c0_68 = arith.constant 0 : index
    %107 = vector.load %arg5[%c6, %c0_67, %c0_68] : memref<9x32x32xbf16, #tpu.memory_space<vmem>>, vector<1x32x32xbf16>
    %108 = vector.shape_cast %107 : vector<1x32x32xbf16> to vector<32x32xbf16>
    %cst_69 = arith.constant dense<0.000000e+00> : vector<192x32xf32>
    %109 = tpu.matmul %106, %108, %cst_69 {dimension_numbers = #tpu.dot_dimension_numbers<[1], [0], [0], [1], [0, 0, 1, 1], [], []>} : vector<192x32xbf16>, vector<32x32xbf16>, vector<192x32xf32> -> vector<192x32xf32>
    %110 = arith.addf %104, %109 : vector<192x32xf32>
    %c72 = arith.constant 72 : index
    %c0_70 = arith.constant 0 : index
    %111 = vector.load %arg10[%c72, %c0_70] : memref<288x32xf32, #tpu.memory_space<vmem>>, vector<192x32xf32>
    %112 = arith.truncf %111 : vector<192x32xf32> to vector<192x32xbf16>
    %c7 = arith.constant 7 : index
    %c0_71 = arith.constant 0 : index
    %c0_72 = arith.constant 0 : index
    %113 = vector.load %arg5[%c7, %c0_71, %c0_72] : memref<9x32x32xbf16, #tpu.memory_space<vmem>>, vector<1x32x32xbf16>
    %114 = vector.shape_cast %113 : vector<1x32x32xbf16> to vector<32x32xbf16>
    %cst_73 = arith.constant dense<0.000000e+00> : vector<192x32xf32>
    %115 = tpu.matmul %112, %114, %cst_73 {dimension_numbers = #tpu.dot_dimension_numbers<[1], [0], [0], [1], [0, 0, 1, 1], [], []>} : vector<192x32xbf16>, vector<32x32xbf16>, vector<192x32xf32> -> vector<192x32xf32>
    %116 = arith.addf %110, %115 : vector<192x32xf32>
    %c73 = arith.constant 73 : index
    %c0_74 = arith.constant 0 : index
    %117 = vector.load %arg10[%c73, %c0_74] : memref<288x32xf32, #tpu.memory_space<vmem>>, vector<192x32xf32>
    %118 = arith.truncf %117 : vector<192x32xf32> to vector<192x32xbf16>
    %c8 = arith.constant 8 : index
    %c0_75 = arith.constant 0 : index
    %c0_76 = arith.constant 0 : index
    %119 = vector.load %arg5[%c8, %c0_75, %c0_76] : memref<9x32x32xbf16, #tpu.memory_space<vmem>>, vector<1x32x32xbf16>
    %120 = vector.shape_cast %119 : vector<1x32x32xbf16> to vector<32x32xbf16>
    %cst_77 = arith.constant dense<0.000000e+00> : vector<192x32xf32>
    %121 = tpu.matmul %118, %120, %cst_77 {dimension_numbers = #tpu.dot_dimension_numbers<[1], [0], [0], [1], [0, 0, 1, 1], [], []>} : vector<192x32xbf16>, vector<32x32xbf16>, vector<192x32xf32> -> vector<192x32xf32>
    %122 = arith.addf %116, %121 : vector<192x32xf32>
    %c0_78 = arith.constant 0 : index
    %c0_79 = arith.constant 0 : index
    %123 = vector.load %arg6[%c0_78, %c0_79] : memref<1x32xf32, #tpu.memory_space<vmem>>, vector<1x32xf32>
    %124 = vector.broadcast %123 : vector<1x32xf32> to vector<192x32xf32>
    %125 = arith.addf %122, %124 : vector<192x32xf32>
    %cst_80 = arith.constant 0.000000e+00 : f32
    %126 = vector.broadcast %cst_80 : f32 to vector<192x32xf32>
    %127 = arith.maximumf %125, %126 : vector<192x32xf32>
    %128 = arith.truncf %127 : vector<192x32xf32> to vector<192x32xbf16>
    %c0_81 = arith.constant 0 : index
    %c0_82 = arith.constant 0 : index
    %129 = vector.load %arg7[%c0_81, %c0_82] : memref<32x128xbf16, #tpu.memory_space<vmem>>, vector<32x128xbf16>
    %cst_83 = arith.constant dense<0.000000e+00> : vector<192x128xf32>
    %130 = tpu.matmul %128, %129, %cst_83 {dimension_numbers = #tpu.dot_dimension_numbers<[1], [0], [0], [1], [0, 0, 1, 1], [], []>} : vector<192x32xbf16>, vector<32x128xbf16>, vector<192x128xf32> -> vector<192x128xf32>
    %c0_84 = arith.constant 0 : index
    %c0_85 = arith.constant 0 : index
    %131 = vector.load %arg8[%c0_84, %c0_85] : memref<1x128xf32, #tpu.memory_space<vmem>>, vector<1x128xf32>
    %132 = vector.broadcast %131 : vector<1x128xf32> to vector<192x128xf32>
    %133 = arith.addf %130, %132 : vector<192x128xf32>
    %c0_86 = arith.constant 0 : index
    %c0_87 = arith.constant 0 : index
    %c0_88 = arith.constant 0 : index
    %134 = vector.load %arg9[%c0_86, %c0_87, %c0_88] : memref<1x192x128xf32, #tpu.memory_space<vmem>>, vector<1x192x128xf32>
    %135 = vector.shape_cast %134 : vector<1x192x128xf32> to vector<192x128xf32>
    %136 = vector.shape_cast %133 : vector<192x128xf32> to vector<1x192x128xf32>
    tpu.vector_store %arg9[%c0_86, %c0_87, %c0_88], %136 {strides = array<i32>} : memref<1x192x128xf32, #tpu.memory_space<vmem>>, vector<1x192x128xf32>,
    return
  }
  func.func @transform_0(%arg0: i32, %arg1: i32) -> (i32, i32, i32, i32) {
    %c0_i32 = arith.constant 0 : i32
    %c0_i32_0 = arith.constant 0 : i32
    %c0_i32_1 = arith.constant 0 : i32
    return %arg0, %arg1, %c0_i32, %c0_i32_0 : i32, i32, i32, i32
  }
  func.func @transform_1(%arg0: i32, %arg1: i32) -> (i32, i32, i32) {
    %c0_i32 = arith.constant 0 : i32
    %c0_i32_0 = arith.constant 0 : i32
    %c0_i32_1 = arith.constant 0 : i32
    %c0_i32_2 = arith.constant 0 : i32
    return %c0_i32, %c0_i32_0, %c0_i32_1 : i32, i32, i32
  }
  func.func @transform_2(%arg0: i32, %arg1: i32) -> (i32, i32) {
    %c0_i32 = arith.constant 0 : i32
    %c0_i32_0 = arith.constant 0 : i32
    %c0_i32_1 = arith.constant 0 : i32
    return %c0_i32, %c0_i32_0 : i32, i32
  }
  func.func @transform_3(%arg0: i32, %arg1: i32) -> (i32, i32, i32) {
    %c0_i32 = arith.constant 0 : i32
    %c0_i32_0 = arith.constant 0 : i32
    %c0_i32_1 = arith.constant 0 : i32
    %c0_i32_2 = arith.constant 0 : i32
    return %c0_i32, %c0_i32_0, %c0_i32_1 : i32, i32, i32
  }
  func.func @transform_4(%arg0: i32, %arg1: i32) -> (i32, i32) {
    %c0_i32 = arith.constant 0 : i32
    %c0_i32_0 = arith.constant 0 : i32
    %c0_i32_1 = arith.constant 0 : i32
    return %c0_i32, %c0_i32_0 : i32, i32
  }
  func.func @transform_5(%arg0: i32, %arg1: i32) -> (i32, i32) {
    %c0_i32 = arith.constant 0 : i32
    %c0_i32_0 = arith.constant 0 : i32
    %c0_i32_1 = arith.constant 0 : i32
    return %c0_i32, %c0_i32_0 : i32, i32
  }
  func.func @transform_6(%arg0: i32, %arg1: i32) -> (i32, i32) {
    %c0_i32 = arith.constant 0 : i32
    %c0_i32_0 = arith.constant 0 : i32
    %c0_i32_1 = arith.constant 0 : i32
    return %c0_i32, %c0_i32_0 : i32, i32
  }
  func.func @transform_7(%arg0: i32, %arg1: i32) -> (i32, i32, i32) {
    %c0_i32 = arith.constant 0 : i32
    %c0_i32_0 = arith.constant 0 : i32
    return %arg0, %arg1, %c0_i32 : i32, i32, i32
  }
}

module attributes {stable_mosaic.version = 11 : i64} {
  func.func @kernel(%arg0: i32, %arg1: i32, %arg2: memref<1x1x288x12xf32, #tpu.memory_space<vmem>>, %arg3: memref<3x12x32xbf16, #tpu.memory_space<vmem>>, %arg4: memref<1x32xf32, #tpu.memory_space<vmem>>, %arg5: memref<9x32x32xbf16, #tpu.memory_space<vmem>>, %arg6: memref<1x32xf32, #tpu.memory_space<vmem>>, %arg7: memref<32x128xbf16, #tpu.memory_space<vmem>>, %arg8: memref<1x128xf32, #tpu.memory_space<vmem>>, %arg9: memref<1x192x128xf32, #tpu.memory_space<vmem>>, %arg10: memref<288x32xf32, #tpu.memory_space<vmem>>) attributes {dimension_semantics = [#tpu.dimension_semantics<parallel>, #tpu.dimension_semantics<parallel>], iteration_bounds = array<i64: 2, 2>, scalar_prefetch = 0 : i64, scratch_operands = 1 : i64, tpu.core_type = #tpu.core_type<tc>, window_params = [{transform_indices = @transform_0, window_bounds = array<i64: 1, 1, 288, 12>}, {pipeline_mode = #tpu.pipeline_mode<synchronous>, transform_indices = @transform_1, window_bounds = array<i64: 3, 12, 32>}, {pipeline_mode = #tpu.pipeline_mode<synchronous>, transform_indices = @transform_2, window_bounds = array<i64: 1, 32>}, {pipeline_mode = #tpu.pipeline_mode<synchronous>, transform_indices = @transform_3, window_bounds = array<i64: 9, 32, 32>}, {pipeline_mode = #tpu.pipeline_mode<synchronous>, transform_indices = @transform_4, window_bounds = array<i64: 1, 32>}, {pipeline_mode = #tpu.pipeline_mode<synchronous>, transform_indices = @transform_5, window_bounds = array<i64: 32, 128>}, {pipeline_mode = #tpu.pipeline_mode<synchronous>, transform_indices = @transform_6, window_bounds = array<i64: 1, 128>}, {transform_indices = @transform_7, window_bounds = array<i64: 1, 192, 128>}]} {
    %c8_i32 = arith.constant 8 : i32
    %0 = arith.muli %arg1, %c8_i32 : i32
    %cst = arith.constant 0.000000e+00 : f32
    %1 = vector.broadcast %cst : f32 to vector<240x32xf32>
    %c0 = arith.constant 0 : index
    %c0_0 = arith.constant 0 : index
    %c0_1 = arith.constant 0 : index
    %c0_2 = arith.constant 0 : index
    %2 = vector.load %arg2[%c0, %c0_0, %c0_1, %c0_2] : memref<1x1x288x12xf32, #tpu.memory_space<vmem>>, vector<1x1x240x12xf32>
    %3 = vector.shape_cast %2 : vector<1x1x240x12xf32> to vector<240x12xf32>
    %4 = arith.truncf %3 : vector<240x12xf32> to vector<240x12xbf16>
    %c0_3 = arith.constant 0 : index
    %c0_4 = arith.constant 0 : index
    %c0_5 = arith.constant 0 : index
    %5 = vector.load %arg3[%c0_3, %c0_4, %c0_5] : memref<3x12x32xbf16, #tpu.memory_space<vmem>>, vector<1x12x32xbf16>
    %6 = vector.shape_cast %5 : vector<1x12x32xbf16> to vector<12x32xbf16>
    %cst_6 = arith.constant dense<0.000000e+00> : vector<240x32xf32>
    %7 = tpu.matmul %4, %6, %cst_6 {dimension_numbers = #tpu.dot_dimension_numbers<[1], [0], [0], [1], [0, 0, 1, 1], [], []>} : vector<240x12xbf16>, vector<12x32xbf16>, vector<240x32xf32> -> vector<240x32xf32>
    %8 = arith.addf %1, %7 : vector<240x32xf32>
    %c0_7 = arith.constant 0 : index
    %c0_8 = arith.constant 0 : index
    %c24 = arith.constant 24 : index
    %c0_9 = arith.constant 0 : index
    %9 = vector.load %arg2[%c0_7, %c0_8, %c24, %c0_9] : memref<1x1x288x12xf32, #tpu.memory_space<vmem>>, vector<1x1x240x12xf32>
    %10 = vector.shape_cast %9 : vector<1x1x240x12xf32> to vector<240x12xf32>
    %11 = arith.truncf %10 : vector<240x12xf32> to vector<240x12xbf16>
    %c1 = arith.constant 1 : index
    %c0_10 = arith.constant 0 : index
    %c0_11 = arith.constant 0 : index
    %12 = vector.load %arg3[%c1, %c0_10, %c0_11] : memref<3x12x32xbf16, #tpu.memory_space<vmem>>, vector<1x12x32xbf16>
    %13 = vector.shape_cast %12 : vector<1x12x32xbf16> to vector<12x32xbf16>
    %cst_12 = arith.constant dense<0.000000e+00> : vector<240x32xf32>
    %14 = tpu.matmul %11, %13, %cst_12 {dimension_numbers = #tpu.dot_dimension_numbers<[1], [0], [0], [1], [0, 0, 1, 1], [], []>} : vector<240x12xbf16>, vector<12x32xbf16>, vector<240x32xf32> -> vector<240x32xf32>
    %15 = arith.addf %8, %14 : vector<240x32xf32>
    %c0_13 = arith.constant 0 : index
    %c0_14 = arith.constant 0 : index
    %c48 = arith.constant 48 : index
    %c0_15 = arith.constant 0 : index
    %16 = vector.load %arg2[%c0_13, %c0_14, %c48, %c0_15] : memref<1x1x288x12xf32, #tpu.memory_space<vmem>>, vector<1x1x240x12xf32>
    %17 = vector.shape_cast %16 : vector<1x1x240x12xf32> to vector<240x12xf32>
    %18 = arith.truncf %17 : vector<240x12xf32> to vector<240x12xbf16>
    %c2 = arith.constant 2 : index
    %c0_16 = arith.constant 0 : index
    %c0_17 = arith.constant 0 : index
    %19 = vector.load %arg3[%c2, %c0_16, %c0_17] : memref<3x12x32xbf16, #tpu.memory_space<vmem>>, vector<1x12x32xbf16>
    %20 = vector.shape_cast %19 : vector<1x12x32xbf16> to vector<12x32xbf16>
    %cst_18 = arith.constant dense<0.000000e+00> : vector<240x32xf32>
    %21 = tpu.matmul %18, %20, %cst_18 {dimension_numbers = #tpu.dot_dimension_numbers<[1], [0], [0], [1], [0, 0, 1, 1], [], []>} : vector<240x12xbf16>, vector<12x32xbf16>, vector<240x32xf32> -> vector<240x32xf32>
    %22 = arith.addf %15, %21 : vector<240x32xf32>
    %c0_19 = arith.constant 0 : index
    %c0_20 = arith.constant 0 : index
    %23 = vector.load %arg4[%c0_19, %c0_20] : memref<1x32xf32, #tpu.memory_space<vmem>>, vector<1x32xf32>
    %24 = vector.broadcast %23 : vector<1x32xf32> to vector<240x32xf32>
    %25 = arith.addf %22, %24 : vector<240x32xf32>
    %cst_21 = arith.constant 0.000000e+00 : f32
    %26 = vector.broadcast %cst_21 : f32 to vector<240x32xf32>
    %27 = arith.maximumf %25, %26 : vector<240x32xf32>
    %28 = tpu.iota {dimensions = array<i32: 0>} : vector<240x1xi32>
    %c24_i32 = arith.constant 24 : i32
    %c0_i32 = arith.constant 0 : i32
    %29 = arith.cmpi eq, %c24_i32, %c0_i32 : i32
    %c1_i32 = arith.constant 1 : i32
    %30 = arith.select %29, %c1_i32, %c24_i32 : i32
    %31 = vector.broadcast %30 : i32 to vector<240x1xi32>
    %32 = arith.remsi %28, %31 : vector<240x1xi32>
    %c0_i32_22 = arith.constant 0 : i32
    %33 = vector.broadcast %c0_i32_22 : i32 to vector<240x1xi32>
    %34 = arith.cmpi ne, %32, %33 : vector<240x1xi32>
    %c0_i32_23 = arith.constant 0 : i32
    %35 = vector.broadcast %c0_i32_23 : i32 to vector<240x1xi32>
    %36 = arith.cmpi slt, %32, %35 : vector<240x1xi32>
    %c0_i32_24 = arith.constant 0 : i32
    %37 = arith.cmpi slt, %30, %c0_i32_24 : i32
    %38 = vector.broadcast %37 : i1 to vector<240x1xi1>
    %39 = vector.broadcast %38 : vector<240x1xi1> to vector<240x1xi1>
    %40 = arith.xori %36, %39 : vector<240x1xi1>
    %41 = arith.andi %40, %34 : vector<240x1xi1>
    %42 = vector.broadcast %30 : i32 to vector<240x1xi32>
    %43 = arith.addi %32, %42 : vector<240x1xi32>
    %44 = arith.select %41, %43, %32 : vector<240x1xi1>, vector<240x1xi32>
    %c1_i32_25 = arith.constant 1 : i32
    %45 = vector.broadcast %c1_i32_25 : i32 to vector<240x1xi32>
    %46 = arith.cmpi sge, %44, %45 : vector<240x1xi32>
    %c16_i32 = arith.constant 16 : i32
    %47 = vector.broadcast %c16_i32 : i32 to vector<240x1xi32>
    %48 = arith.cmpi sle, %44, %47 : vector<240x1xi32>
    %49 = arith.andi %46, %48 : vector<240x1xi1>
    %c1_i32_26 = arith.constant 1 : i32
    %50 = arith.subi %c1_i32_26, %0 : i32
    %c24_i32_27 = arith.constant 24 : i32
    %51 = arith.muli %50, %c24_i32_27 : i32
    %52 = vector.broadcast %51 : i32 to vector<240x1xi32>
    %53 = arith.cmpi sge, %28, %52 : vector<240x1xi32>
    %54 = arith.andi %49, %53 : vector<240x1xi1>
    %c17_i32 = arith.constant 17 : i32
    %55 = arith.subi %c17_i32, %0 : i32
    %c24_i32_28 = arith.constant 24 : i32
    %56 = arith.muli %55, %c24_i32_28 : i32
    %57 = vector.broadcast %56 : i32 to vector<240x1xi32>
    %58 = arith.cmpi slt, %28, %57 : vector<240x1xi32>
    %59 = arith.andi %54, %58 : vector<240x1xi1>
    %cst_29 = arith.constant 0.000000e+00 : f32
    %60 = vector.shape_cast %59 : vector<240x1xi1> to vector<240x1xi1>
    %61 = vector.broadcast %60 : vector<240x1xi1> to vector<240x32xi1>
    %62 = vector.broadcast %cst_29 : f32 to vector<240x32xf32>
    %63 = arith.select %61, %27, %62 : vector<240x32xi1>, vector<240x32xf32>
    %cst_30 = arith.constant 0.000000e+00 : f32
    %64 = vector.broadcast %cst_30 : f32 to vector<24x32xf32>
    %c0_31 = arith.constant 0 : index
    %c0_32 = arith.constant 0 : index
    %65 = vector.load %arg10[%c0_31, %c0_32] : memref<288x32xf32, #tpu.memory_space<vmem>>, vector<24x32xf32>
    tpu.vector_store %arg10[%c0_31, %c0_32], %64 {strides = array<i32>} : memref<288x32xf32, #tpu.memory_space<vmem>>, vector<24x32xf32>,
    %c264 = arith.constant 264 : index
    %c0_33 = arith.constant 0 : index
    %66 = vector.load %arg10[%c264, %c0_33] : memref<288x32xf32, #tpu.memory_space<vmem>>, vector<24x32xf32>
    tpu.vector_store %arg10[%c264, %c0_33], %64 {strides = array<i32>} : memref<288x32xf32, #tpu.memory_space<vmem>>, vector<24x32xf32>,
    %c24_34 = arith.constant 24 : index
    %c0_35 = arith.constant 0 : index
    %67 = vector.load %arg10[%c24_34, %c0_35] : memref<288x32xf32, #tpu.memory_space<vmem>>, vector<240x32xf32>
    tpu.vector_store %arg10[%c24_34, %c0_35], %63 {strides = array<i32>} : memref<288x32xf32, #tpu.memory_space<vmem>>, vector<240x32xf32>,
    %cst_36 = arith.constant 0.000000e+00 : f32
    %68 = vector.broadcast %cst_36 : f32 to vector<192x32xf32>
    %c23 = arith.constant 23 : index
    %c0_37 = arith.constant 0 : index
    %69 = vector.load %arg10[%c23, %c0_37] : memref<288x32xf32, #tpu.memory_space<vmem>>, vector<192x32xf32>
    %70 = arith.truncf %69 : vector<192x32xf32> to vector<192x32xbf16>
    %c0_38 = arith.constant 0 : index
    %c0_39 = arith.constant 0 : index
    %c0_40 = arith.constant 0 : index
    %71 = vector.load %arg5[%c0_38, %c0_39, %c0_40] : memref<9x32x32xbf16, #tpu.memory_space<vmem>>, vector<1x32x32xbf16>
    %72 = vector.shape_cast %71 : vector<1x32x32xbf16> to vector<32x32xbf16>
    %cst_41 = arith.constant dense<0.000000e+00> : vector<192x32xf32>
    %73 = tpu.matmul %70, %72, %cst_41 {dimension_numbers = #tpu.dot_dimension_numbers<[1], [0], [0], [1], [0, 0, 1, 1], [], []>} : vector<192x32xbf16>, vector<32x32xbf16>, vector<192x32xf32> -> vector<192x32xf32>
    %74 = arith.addf %68, %73 : vector<192x32xf32>
    %c24_42 = arith.constant 24 : index
    %c0_43 = arith.constant 0 : index
    %75 = vector.load %arg10[%c24_42, %c0_43] : memref<288x32xf32, #tpu.memory_space<vmem>>, vector<192x32xf32>
    %76 = arith.truncf %75 : vector<192x32xf32> to vector<192x32xbf16>
    %c1_44 = arith.constant 1 : index
    %c0_45 = arith.constant 0 : index
    %c0_46 = arith.constant 0 : index
    %77 = vector.load %arg5[%c1_44, %c0_45, %c0_46] : memref<9x32x32xbf16, #tpu.memory_space<vmem>>, vector<1x32x32xbf16>
    %78 = vector.shape_cast %77 : vector<1x32x32xbf16> to vector<32x32xbf16>
    %cst_47 = arith.constant dense<0.000000e+00> : vector<192x32xf32>
    %79 = tpu.matmul %76, %78, %cst_47 {dimension_numbers = #tpu.dot_dimension_numbers<[1], [0], [0], [1], [0, 0, 1, 1], [], []>} : vector<192x32xbf16>, vector<32x32xbf16>, vector<192x32xf32> -> vector<192x32xf32>
    %80 = arith.addf %74, %79 : vector<192x32xf32>
    %c25 = arith.constant 25 : index
    %c0_48 = arith.constant 0 : index
    %81 = vector.load %arg10[%c25, %c0_48] : memref<288x32xf32, #tpu.memory_space<vmem>>, vector<192x32xf32>
    %82 = arith.truncf %81 : vector<192x32xf32> to vector<192x32xbf16>
    %c2_49 = arith.constant 2 : index
    %c0_50 = arith.constant 0 : index
    %c0_51 = arith.constant 0 : index
    %83 = vector.load %arg5[%c2_49, %c0_50, %c0_51] : memref<9x32x32xbf16, #tpu.memory_space<vmem>>, vector<1x32x32xbf16>
    %84 = vector.shape_cast %83 : vector<1x32x32xbf16> to vector<32x32xbf16>
    %cst_52 = arith.constant dense<0.000000e+00> : vector<192x32xf32>
    %85 = tpu.matmul %82, %84, %cst_52 {dimension_numbers = #tpu.dot_dimension_numbers<[1], [0], [0], [1], [0, 0, 1, 1], [], []>} : vector<192x32xbf16>, vector<32x32xbf16>, vector<192x32xf32> -> vector<192x32xf32>
    %86 = arith.addf %80, %85 : vector<192x32xf32>
    %c47 = arith.constant 47 : index
    %c0_53 = arith.constant 0 : index
    %87 = vector.load %arg10[%c47, %c0_53] : memref<288x32xf32, #tpu.memory_space<vmem>>, vector<192x32xf32>
    %88 = arith.truncf %87 : vector<192x32xf32> to vector<192x32xbf16>
    %c3 = arith.constant 3 : index
    %c0_54 = arith.constant 0 : index
    %c0_55 = arith.constant 0 : index
    %89 = vector.load %arg5[%c3, %c0_54, %c0_55] : memref<9x32x32xbf16, #tpu.memory_space<vmem>>, vector<1x32x32xbf16>
    %90 = vector.shape_cast %89 : vector<1x32x32xbf16> to vector<32x32xbf16>
    %cst_56 = arith.constant dense<0.000000e+00> : vector<192x32xf32>
    %91 = tpu.matmul %88, %90, %cst_56 {dimension_numbers = #tpu.dot_dimension_numbers<[1], [0], [0], [1], [0, 0, 1, 1], [], []>} : vector<192x32xbf16>, vector<32x32xbf16>, vector<192x32xf32> -> vector<192x32xf32>
    %92 = arith.addf %86, %91 : vector<192x32xf32>
    %c48_57 = arith.constant 48 : index
    %c0_58 = arith.constant 0 : index
    %93 = vector.load %arg10[%c48_57, %c0_58] : memref<288x32xf32, #tpu.memory_space<vmem>>, vector<192x32xf32>
    %94 = arith.truncf %93 : vector<192x32xf32> to vector<192x32xbf16>
    %c4 = arith.constant 4 : index
    %c0_59 = arith.constant 0 : index
    %c0_60 = arith.constant 0 : index
    %95 = vector.load %arg5[%c4, %c0_59, %c0_60] : memref<9x32x32xbf16, #tpu.memory_space<vmem>>, vector<1x32x32xbf16>
    %96 = vector.shape_cast %95 : vector<1x32x32xbf16> to vector<32x32xbf16>
    %cst_61 = arith.constant dense<0.000000e+00> : vector<192x32xf32>
    %97 = tpu.matmul %94, %96, %cst_61 {dimension_numbers = #tpu.dot_dimension_numbers<[1], [0], [0], [1], [0, 0, 1, 1], [], []>} : vector<192x32xbf16>, vector<32x32xbf16>, vector<192x32xf32> -> vector<192x32xf32>
    %98 = arith.addf %92, %97 : vector<192x32xf32>
    %c49 = arith.constant 49 : index
    %c0_62 = arith.constant 0 : index
    %99 = vector.load %arg10[%c49, %c0_62] : memref<288x32xf32, #tpu.memory_space<vmem>>, vector<192x32xf32>
    %100 = arith.truncf %99 : vector<192x32xf32> to vector<192x32xbf16>
    %c5 = arith.constant 5 : index
    %c0_63 = arith.constant 0 : index
    %c0_64 = arith.constant 0 : index
    %101 = vector.load %arg5[%c5, %c0_63, %c0_64] : memref<9x32x32xbf16, #tpu.memory_space<vmem>>, vector<1x32x32xbf16>
    %102 = vector.shape_cast %101 : vector<1x32x32xbf16> to vector<32x32xbf16>
    %cst_65 = arith.constant dense<0.000000e+00> : vector<192x32xf32>
    %103 = tpu.matmul %100, %102, %cst_65 {dimension_numbers = #tpu.dot_dimension_numbers<[1], [0], [0], [1], [0, 0, 1, 1], [], []>} : vector<192x32xbf16>, vector<32x32xbf16>, vector<192x32xf32> -> vector<192x32xf32>
    %104 = arith.addf %98, %103 : vector<192x32xf32>
    %c71 = arith.constant 71 : index
    %c0_66 = arith.constant 0 : index
    %105 = vector.load %arg10[%c71, %c0_66] : memref<288x32xf32, #tpu.memory_space<vmem>>, vector<192x32xf32>
    %106 = arith.truncf %105 : vector<192x32xf32> to vector<192x32xbf16>
    %c6 = arith.constant 6 : index
    %c0_67 = arith.constant 0 : index
    %c0_68 = arith.constant 0 : index
    %107 = vector.load %arg5[%c6, %c0_67, %c0_68] : memref<9x32x32xbf16, #tpu.memory_space<vmem>>, vector<1x32x32xbf16>
    %108 = vector.shape_cast %107 : vector<1x32x32xbf16> to vector<32x32xbf16>
    %cst_69 = arith.constant dense<0.000000e+00> : vector<192x32xf32>
    %109 = tpu.matmul %106, %108, %cst_69 {dimension_numbers = #tpu.dot_dimension_numbers<[1], [0], [0], [1], [0, 0, 1, 1], [], []>} : vector<192x32xbf16>, vector<32x32xbf16>, vector<192x32xf32> -> vector<192x32xf32>
    %110 = arith.addf %104, %109 : vector<192x32xf32>
    %c72 = arith.constant 72 : index
    %c0_70 = arith.constant 0 : index
    %111 = vector.load %arg10[%c72, %c0_70] : memref<288x32xf32, #tpu.memory_space<vmem>>, vector<192x32xf32>
    %112 = arith.truncf %111 : vector<192x32xf32> to vector<192x32xbf16>
    %c7 = arith.constant 7 : index
    %c0_71 = arith.constant 0 : index
    %c0_72 = arith.constant 0 : index
    %113 = vector.load %arg5[%c7, %c0_71, %c0_72] : memref<9x32x32xbf16, #tpu.memory_space<vmem>>, vector<1x32x32xbf16>
    %114 = vector.shape_cast %113 : vector<1x32x32xbf16> to vector<32x32xbf16>
    %cst_73 = arith.constant dense<0.000000e+00> : vector<192x32xf32>
    %115 = tpu.matmul %112, %114, %cst_73 {dimension_numbers = #tpu.dot_dimension_numbers<[1], [0], [0], [1], [0, 0, 1, 1], [], []>} : vector<192x32xbf16>, vector<32x32xbf16>, vector<192x32xf32> -> vector<192x32xf32>
    %116 = arith.addf %110, %115 : vector<192x32xf32>
    %c73 = arith.constant 73 : index
    %c0_74 = arith.constant 0 : index
    %117 = vector.load %arg10[%c73, %c0_74] : memref<288x32xf32, #tpu.memory_space<vmem>>, vector<192x32xf32>
    %118 = arith.truncf %117 : vector<192x32xf32> to vector<192x32xbf16>
    %c8 = arith.constant 8 : index
    %c0_75 = arith.constant 0 : index
    %c0_76 = arith.constant 0 : index
    %119 = vector.load %arg5[%c8, %c0_75, %c0_76] : memref<9x32x32xbf16, #tpu.memory_space<vmem>>, vector<1x32x32xbf16>
    %120 = vector.shape_cast %119 : vector<1x32x32xbf16> to vector<32x32xbf16>
    %cst_77 = arith.constant dense<0.000000e+00> : vector<192x32xf32>
    %121 = tpu.matmul %118, %120, %cst_77 {dimension_numbers = #tpu.dot_dimension_numbers<[1], [0], [0], [1], [0, 0, 1, 1], [], []>} : vector<192x32xbf16>, vector<32x32xbf16>, vector<192x32xf32> -> vector<192x32xf32>
    %122 = arith.addf %116, %121 : vector<192x32xf32>
    %c0_78 = arith.constant 0 : index
    %c0_79 = arith.constant 0 : index
    %123 = vector.load %arg6[%c0_78, %c0_79] : memref<1x32xf32, #tpu.memory_space<vmem>>, vector<1x32xf32>
    %124 = vector.broadcast %123 : vector<1x32xf32> to vector<192x32xf32>
    %125 = arith.addf %122, %124 : vector<192x32xf32>
    %cst_80 = arith.constant 0.000000e+00 : f32
    %126 = vector.broadcast %cst_80 : f32 to vector<192x32xf32>
    %127 = arith.maximumf %125, %126 : vector<192x32xf32>
    %128 = arith.truncf %127 : vector<192x32xf32> to vector<192x32xbf16>
    %c0_81 = arith.constant 0 : index
    %c0_82 = arith.constant 0 : index
    %129 = vector.load %arg7[%c0_81, %c0_82] : memref<32x128xbf16, #tpu.memory_space<vmem>>, vector<32x128xbf16>
    %cst_83 = arith.constant dense<0.000000e+00> : vector<192x128xf32>
    %130 = tpu.matmul %128, %129, %cst_83 {dimension_numbers = #tpu.dot_dimension_numbers<[1], [0], [0], [1], [0, 0, 1, 1], [], []>} : vector<192x32xbf16>, vector<32x128xbf16>, vector<192x128xf32> -> vector<192x128xf32>
    %c0_84 = arith.constant 0 : index
    %c0_85 = arith.constant 0 : index
    %131 = vector.load %arg8[%c0_84, %c0_85] : memref<1x128xf32, #tpu.memory_space<vmem>>, vector<1x128xf32>
    %132 = vector.broadcast %131 : vector<1x128xf32> to vector<192x128xf32>
    %133 = arith.addf %130, %132 : vector<192x128xf32>
    %c0_86 = arith.constant 0 : index
    %c0_87 = arith.constant 0 : index
    %c0_88 = arith.constant 0 : index
    %134 = vector.load %arg9[%c0_86, %c0_87, %c0_88] : memref<1x192x128xf32, #tpu.memory_space<vmem>>, vector<1x192x128xf32>
    %135 = vector.shape_cast %134 : vector<1x192x128xf32> to vector<192x128xf32>
    %136 = vector.shape_cast %133 : vector<192x128xf32> to vector<1x192x128xf32>
    tpu.vector_store %arg9[%c0_86, %c0_87, %c0_88], %136 {strides = array<i32>} : memref<1x192x128xf32, #tpu.memory_space<vmem>>, vector<1x192x128xf32>,
    return
  }
  func.func @transform_0(%arg0: i32, %arg1: i32) -> (i32, i32, i32, i32) {
    %c0_i32 = arith.constant 0 : i32
    %c0_i32_0 = arith.constant 0 : i32
    %c0_i32_1 = arith.constant 0 : i32
    return %arg0, %arg1, %c0_i32, %c0_i32_0 : i32, i32, i32, i32
  }
  func.func @transform_1(%arg0: i32, %arg1: i32) -> (i32, i32, i32) {
    %c0_i32 = arith.constant 0 : i32
    %c0_i32_0 = arith.constant 0 : i32
    %c0_i32_1 = arith.constant 0 : i32
    %c0_i32_2 = arith.constant 0 : i32
    return %c0_i32, %c0_i32_0, %c0_i32_1 : i32, i32, i32
  }
  func.func @transform_2(%arg0: i32, %arg1: i32) -> (i32, i32) {
    %c0_i32 = arith.constant 0 : i32
    %c0_i32_0 = arith.constant 0 : i32
    %c0_i32_1 = arith.constant 0 : i32
    return %c0_i32, %c0_i32_0 : i32, i32
  }
  func.func @transform_3(%arg0: i32, %arg1: i32) -> (i32, i32, i32) {
    %c0_i32 = arith.constant 0 : i32
    %c0_i32_0 = arith.constant 0 : i32
    %c0_i32_1 = arith.constant 0 : i32
    %c0_i32_2 = arith.constant 0 : i32
    return %c0_i32, %c0_i32_0, %c0_i32_1 : i32, i32, i32
  }
  func.func @transform_4(%arg0: i32, %arg1: i32) -> (i32, i32) {
    %c0_i32 = arith.constant 0 : i32
    %c0_i32_0 = arith.constant 0 : i32
    %c0_i32_1 = arith.constant 0 : i32
    return %c0_i32, %c0_i32_0 : i32, i32
  }
  func.func @transform_5(%arg0: i32, %arg1: i32) -> (i32, i32) {
    %c0_i32 = arith.constant 0 : i32
    %c0_i32_0 = arith.constant 0 : i32
    %c0_i32_1 = arith.constant 0 : i32
    return %c0_i32, %c0_i32_0 : i32, i32
  }
  func.func @transform_6(%arg0: i32, %arg1: i32) -> (i32, i32) {
    %c0_i32 = arith.constant 0 : i32
    %c0_i32_0 = arith.constant 0 : i32
    %c0_i32_1 = arith.constant 0 : i32
    return %c0_i32, %c0_i32_0 : i32, i32
  }
  func.func @transform_7(%arg0: i32, %arg1: i32) -> (i32, i32, i32) {
    %c0_i32 = arith.constant 0 : i32
    %c0_i32_0 = arith.constant 0 : i32
    return %arg0, %arg1, %c0_i32 : i32, i32, i32
  }
}

</mosaic_0001>

<bundles_post_ra>
// kernel: tpu_custom_call.1
= control target key start
LH: loop header
LB: loop body
LE: loop exit
PB: predicated region body
PF: predicated region fallthrough
CT: control target
= control target key end

     0   :  { %12 = vsyncpa [#allocation4], 0  ;;  %s8930_s0 = inlined_call_operand.vmem [shape: f32[2,2,288,12], index: 0, kind: input, shape index: {}]   ;;  %s8931_s1 = inlined_call_operand.vmem [shape: bf16[3,12,32], index: 1, kind: input, shape index: {}]   ;;  %s8932_s2 = inlined_call_operand.vmem [shape: f32[1,32], index: 2, kind: input, shape index: {}]   ;;  %s8933_s3 = inlined_call_operand.vmem [shape: bf16[9,32,32], index: 3, kind: input, shape index: {}]   ;;  %s8934_s4 = inlined_call_operand.vmem [shape: f32[1,32], index: 4, kind: input, shape index: {}]   ;;  %s8935_s5 = inlined_call_operand.vmem [shape: bf16[32,128], index: 5, kind: input, shape index: {}]   ;;  %s8936_s6 = inlined_call_operand.vmem [shape: f32[1,128], index: 6, kind: input, shape index: {}]   ;;  %s8937_s7 = inlined_call_operand.hbm [shape: f32[2,384,128], index: 7, kind: output, shape index: {}]  }
   0x1   :  { %14 = vsyncpa [#allocation4 + $0x1], 0  ;;  %s5700_s24 = smov 0   ;;  %s5702_s25 = smov 0  }
   0x2   :  { %s5704_s26 = smov 0   ;;  %s5706_s27 = smov 0  }
   0x3   :  { %s5708_s28 = smov 0   ;;  %s5710_s29 = smov 0  }
   0x4   :  { %s5712_s30 = smov 0   ;;  %s5714_s8 = smov 0  }
   0x5 LB: > { %8942 = sst [smem:[#allocation6_spill]] %s5649_s30  ;;  %s4504_s9 = sadd.s32 4294967295, %s5653_s8   ;;  %s5653_s8 = sphi %s5714_s8, %s20_s8   ;;  %s5649_s30 = sphi %s5712_s30, %s9423_s30   ;;  %s5645_s29 = sphi %s5710_s29, %s9428_s29   ;;  %s5641_s28 = sphi %s5708_s28, %s9421_s28   ;;  %s5637_s27 = sphi %s5706_s27, %s9427_s27   ;;  %s5633_s26 = sphi %s5704_s26, %s9426_s26   ;;  %s5629_s25 = sphi %s5702_s25, %s9425_s25   ;;  %s5625_s24 = sphi %s5700_s24, %s9424_s24  }
   0x6   : > { %s4505_s10 = sadd.s32 4294967294, %s5653_s8   ;;  %s29_s11 = sadd.s32 1, %s5645_s29 }
   0x7   : > { %p30_p0 = scmp.ge.s32.totalorder %s29_s11, 2  ;;  %s32_s12 = sadd.s32 1, %s5649_s30 }
   0x8   : > { %p205_p1 = scmp.ne.s32.totalorder %s5633_s26, %s5629_s25  ;;  %p206_p2 = scmp.eq.s32.totalorder %s4504_s9, 3 }
   0x9   : > { %s9430_s11 = smov (%p30_p0, %s29_s11), 0  ;;  %s9432_s12 = smov (!%p30_p0, %s32_s12), %s5649_s30 }
   0xa   : > { %8943 = sst [smem:[#allocation7_spill]] %s9430_s11  ;;  %s191_s13 = ssub.s32 %s5645_s29, %s9430_s11 }
   0xb   : > { %p5751_p3 = por %p206_p2, %p205_p1  ;;  %p34_p4 = scmp.ge.s32.totalorder %s9432_s12, 2 }
   0xc   : > { %p211_p5 = scmp.ne.s32.totalorder %s5629_s25, %s5625_s24  ;;  %p212_p6 = scmp.eq.s32.totalorder %s4505_s10, 3 }
   0xd   : > { %p4508_p7 = scmp.ge.s32.totalorder %s5653_s8, 1  ;;  %s9434_s12 = smov (%p34_p4, %s9432_s12), 0 }
   0xe   : > { %8945 = sst [smem:[#allocation8_spill]] %s9434_s12  ;;  %p5760_p8 = por %p212_p6, %p211_p5 }
   0xf   : > { %p260_p9 = scmp.lt.s32.totalorder %s5653_s8, 5  ;;  %s190_s16 = ssub.s32 %s5649_s30, %s9434_s12 }
  0x10   : > { %s195_s17 = sadd.s32 1, %s5633_s26  ;;  %s192_s18 = sor.u32 %s191_s13, %s190_s16 }
  0x11   : > { %p261_p10 = pnand %p4508_p7, %p260_p9  ;;  %p193_p11 = scmp.eq.s32.totalorder %s192_s18, 0 }
  0x13   : > { %s5769_s19 = scalar_select %p193_p11, %s5633_s26, %s195_s17  }
  0x14   : > { %264 = sbr.rel (%p261_p10) target bundleno = 1145 (0x479), region = 48 }
  0x19   : > { %vm427_vm0 = vcmask 1045504   ;;  %v5655_v0 = vmov 0.0   ;;  %v5536_v1 = vld [vmem:[%s8931_s1 + $0x8] sm:$0x3f]   ;;  %p296_p12 = scmp.lt.s32.totalorder %s5641_s28, 1  ;;  %p298_p13 = scmp.lt.s32.totalorder %s5637_s27, 1 }
  0x1a   : > { %4929 = vmatprep.subr.bf16.mxu0 %v5655_v0  ;;  %5395 = vmatprep.subr.bf16.mxu1 %v5655_v0  ;;  %vm5656_vm1 = vmmov 0   ;;  %v429_v2 = vsel %vm427_vm0, %v5536_v1, 0  ;;  %v5537_v3 = vld [vmem:[%s8931_s1 + $0x10] sm:$0x3f]   ;;  %v5538_v4 = vld [vmem:[%s8931_s1] sm:$0x3f]  }
  0x1b   : > { %4931 = vmatprep.mubr.msk.bf16.mxu0 %vm5656_vm1, %v5655_v0  ;;  %4987 = vmatprep.mubr.msk.bf16.mxu1 %vm5656_vm1, %v5655_v0  ;;  %s297_s22 = scalar_select %p296_p12, %s5641_s28, 1  ;;  %vm381_vm2 = vcmask 97280   ;;  %v889_v10 = vsel %vm427_vm0, %v5537_v3, 0  ;;  %v635_v12 = vsel %vm427_vm0, %v5538_v4, 0  ;;  %vm8941_vm3 = vcmask 261120  }
  0x1c   : > { %4930 = vmatpush3.bf16.msra.mxu0 %v429_v2  ;;  %5396 = vmatpush3.bf16.msra.mxu1 %v429_v2  ;;  %s299_s23 = scalar_select %p298_p13, %s5637_s27, 1  ;;  %1961 = vst.msk [vmem:[#allocation2 + $0x10] sm:$0xff] %vm8941_vm3, %v5655_v0  ;;  %1962 = vst.msk [vmem:[#allocation2 + $0x108] sm:$0xff] %vm8941_vm3, %v5655_v0 }
  0x1d   : > { %5053 = vmatprep.subr.bf16.mxu0 %v5655_v0  ;;  %s5399_s9 = smul.u32 72, %s297_s22  ;;  %4991 = vmatprep.subr.bf16.mxu1 %v5655_v0  ;;  %s4510_s18 = sshll.u32 %s5637_s27, 3 }
  0x1e   : > { %s5398_s10 = smul.u32 36, %s299_s23 }
  0x1f   : > { %s4411_s13 = smul.u32 24, %s5637_s27 }
  0x20   : > { %s302_s20 = sadd.s32 %s5399_s9, %s5398_s10  ;;  %s5460_s16 = smul.u32 48, %s5641_s28 }
  0x21   : > { %s4509_s21 = sshll.u32 %s302_s20, 3  ;;  %s6114_s20 = ssub.s32 1, %s4510_s18 }
  0x22   : > { %s5796_s30 = scalar_lea.vmem %s8930_s0, %s4509_s21  ;;  %s6116_s21 = ssub.s32 17, %s4510_s18 }
  0x23   : > { %v311_v5 = vld [vmem:[%s5796_s30 + $0x18] sm:$0xff]  ;;  %v312_v6 = vld [vmem:[%s5796_s30 + $0x20] sm:$0xff]  ;;  %v313_v13 = vld [vmem:[%s5796_s30 + $0x28] sm:$0xff]  ;;  %s1743_s11 = smul.u32 24, %s6114_s20 }
  0x24   : > { %v5801_v7 = vld [vmem:[%s5796_s30 + $0xf8] sm:$0xff]  ;;  %v358_v8 = vpack.c.bf16 %v312_v6, %v311_v5  ;;  %v5804_v9 = vld [vmem:[%s5796_s30 + $0x100] sm:$0xff]  ;;  %v314_v14 = vld [vmem:[%s5796_s30 + $0x30] sm:$0xff]  ;;  %v340_v27 = vpack.c.bf16 %v313_v13, %v312_v6  ;;  %s1806_s12 = smul.u32 24, %s6116_s21 }
  0x25   : > { %v372_v11 = vpack.c.bf16 %v5804_v9, %v5801_v7  ;;  %v308_v15 = vld [vmem:[%s5796_s30] sm:$0xff]  ;;  %v309_v16 = vld [vmem:[%s5796_s30 + $0x8] sm:$0xff]  ;;  %v359_v17 = vpack.c.bf16 %v314_v14, %v313_v13  ;;  %v315_v19 = vld [vmem:[%s5796_s30 + $0x38] sm:$0xff] }
  0x26   : > { %4932 = vmatmul.mubr.msk.bf16.vlgmr.msra.gmra.mxu0 %vm381_vm2, %v358_v8  ;;  %v338_v18 = vpack.c.bf16 %v309_v16, %v308_v15  ;;  %v316_v20 = vld [vmem:[%s5796_s30 + $0x40] sm:$0xff]  ;;  %v310_v21 = vld [vmem:[%s5796_s30 + $0x10] sm:$0xff]  ;;  %v317_v24 = vld [vmem:[%s5796_s30 + $0x48] sm:$0xff]  ;;  %v5845_v31 = vpack.c.bf16 %v315_v19, %v314_v14 }
  0x27   : > { %4988 = vmatmul.mubr.msk.bf16.vlgmr.msra.gmra.mxu1 %vm381_vm2, %v372_v11  ;;  %5054 = vmatpush3.bf16.msra.mxu0 %v889_v10  ;;  %v360_v22 = vpack.c.bf16 %v316_v20, %v315_v19  ;;  %v339_v23 = vpack.c.bf16 %v311_v5, %v310_v21  ;;  %v318_v25 = vld [vmem:[%s5796_s30 + $0x50] sm:$0xff]  ;;  %v319_v28 = vld [vmem:[%s5796_s30 + $0x58] sm:$0xff]  ;;  %v320_v29 = vld [vmem:[%s5796_s30 + $0x60] sm:$0xff]  ;;  %v5856_v35 = vpack.c.bf16 %v317_v24, %v316_v20 }
  0x28   : > { %4992 = vmatpush3.bf16.msra.mxu1 %v635_v12  ;;  %4935 = vmatprep.mubr.msk.bf16.mxu0 %vm5656_vm1, %v5655_v0  ;;  %v361_v26 = vpack.c.bf16 %v318_v25, %v317_v24  ;;  %v362_v30 = vpack.c.bf16 %v320_v29, %v319_v28  ;;  %v321_v32 = vld [vmem:[%s5796_s30 + $0x68] sm:$0xff]  ;;  %v322_v33 = vld [vmem:[%s5796_s30 + $0x70] sm:$0xff]  ;;  %v323_v36 = vld [vmem:[%s5796_s30 + $0x78] sm:$0xff]  ;;  %v5867_v39 = vpack.c.bf16 %v319_v28, %v318_v25 }
  0x29   : > { %4993 = vmatprep.mubr.msk.bf16.mxu1 %vm5656_vm1, %v5655_v0  ;;  %v363_v34 = vpack.c.bf16 %v322_v33, %v321_v32  ;;  %v324_v37 = vld [vmem:[%s5796_s30 + $0x80] sm:$0xff]  ;;  %v325_v40 = vld [vmem:[%s5796_s30 + $0x88] sm:$0xff]  ;;  %v326_v41 = vld [vmem:[%s5796_s30 + $0x90] sm:$0xff]  ;;  %v5878_v43 = vpack.c.bf16 %v321_v32, %v320_v29  ;;  %v345_v47 = vpack.c.bf16 %v323_v36, %v322_v33 }
  0x2a   : > { %v364_v38 = vpack.c.bf16 %v324_v37, %v323_v36  ;;  %v365_v42 = vpack.c.bf16 %v326_v41, %v325_v40  ;;  %v327_v44 = vld [vmem:[%s5796_s30 + $0x98] sm:$0xff]  ;;  %v328_v45 = vld [vmem:[%s5796_s30 + $0xa0] sm:$0xff]  ;;  %v329_v48 = vld [vmem:[%s5796_s30 + $0xa8] sm:$0xff]  ;;  %v346_v51 = vpack.c.bf16 %v325_v40, %v324_v37 }
  0x2b   : > { %v366_v46 = vpack.c.bf16 %v328_v45, %v327_v44  ;;  %v330_v49 = vld [vmem:[%s5796_s30 + $0xb0] sm:$0xff]  ;;  %v331_v52 = vld [vmem:[%s5796_s30 + $0xb8] sm:$0xff]  ;;  %v332_v53 = vld [vmem:[%s5796_s30 + $0xc0] sm:$0xff]  ;;  %v347_v55 = vpack.c.bf16 %v327_v44, %v326_v41  ;;  %v348_v59 = vpack.c.bf16 %v329_v48, %v328_v45 }
  0x2c   : > { %v367_v50 = vpack.c.bf16 %v330_v49, %v329_v48  ;;  %v368_v54 = vpack.c.bf16 %v332_v53, %v331_v52  ;;  %v333_v56 = vld [vmem:[%s5796_s30 + $0xc8] sm:$0xff]  ;;  %v334_v57 = vld [vmem:[%s5796_s30 + $0xd0] sm:$0xff]  ;;  %v335_v60 = vld [vmem:[%s5796_s30 + $0xd8] sm:$0xff]  ;;  %v349_v63 = vpack.c.bf16 %v331_v52, %v330_v49 }
  0x2d   : > { %v369_v58 = vpack.c.bf16 %v334_v57, %v333_v56  ;;  %v336_v61 = vld [vmem:[%s5796_s30 + $0xe0] sm:$0xff]  ;;  %v337_v1 = vld [vmem:[%s5796_s30 + $0xe8] sm:$0xff]  ;;  %v5927_v2 = vld [vmem:[%s5796_s30 + $0xf0] sm:$0xff]  ;;  %v350_v4 = vpack.c.bf16 %v333_v56, %v332_v53  ;;  %v351_v5 = vpack.c.bf16 %v335_v60, %v334_v57 }
  0x2e   : > { %4936 = vmatmul.mubr.msk.bf16.gmra.mxu0 %vm381_vm2, %v359_v17  ;;  %v370_v62 = vpack.c.bf16 %v336_v61, %v335_v60  ;;  %v371_v3 = vpack.c.bf16 %v5927_v2, %v337_v1  ;;  %v352_v6 = vpack.c.bf16 %v337_v1, %v336_v61  ;;  %v5539_v8 = vld [vmem:[%s8933_s3 + $0x18] sm:$0xff]   ;;  %v5540_v11 = vld [vmem:[%s8933_s3 + $0x10] sm:$0xff]   ;;  %v832_v25 = vpack.c.bf16 %v5801_v7, %v5927_v2  ;;  %v817_v32 = vld [vmem:[%s5796_s30 + $0x108] sm:$0xff] }
  0x2f   : > { %4994 = vmatmul.mubr.msk.bf16.vlgmr.msra.gmra.mxu1 %vm381_vm2, %v338_v18  ;;  %4939 = vmatprep.mubr.msk.bf16.mxu0 %vm5656_vm1, %v5655_v0  ;;  %v5541_v33 = vld [vmem:[%s8933_s3 + $0x38] sm:$0xff]   ;;  %v833_v37 = vpack.c.bf16 %v817_v32, %v5804_v9  ;;  %v818_v45 = vld [vmem:[%s5796_s30 + $0x110] sm:$0xff] }
  0x30   : > { %4997 = vmatprep.mubr.msk.bf16.mxu1 %vm5656_vm1, %v5655_v0  ;;  %5115 = vmatprep.subr.bf16.mxu1 %v5539_v8  ;;  %v819_v9 = vld [vmem:[%s5796_s30 + $0x118] sm:$0xff]  ;;  %s4416_s30 = sadd.s32 %s5460_s16, %s4411_s13 }
  0x31   : > { %5116 = vmatpush3.bf16.msra.mxu1 %v5539_v8  ;;  %5199 = vmatprep.subr.bf16.mxu0 %v5541_v33  ;;  %s4738_s27 = sshll.u32 %s4416_s30, 7 }
  0x32   : > { %5117 = vmatprep.subr.bf16.mxu1 %v5540_v11  ;;  %s8870_s20 = scalar_lea.hbm %s8937_s7, %s4738_s27 }
  0x35   : > { %5118 = vmatpush3.bf16.msra.mxu1 %v5540_v11 }
  0x36   : > { %4940 = vmatmul.mubr.msk.bf16.gmra.mxu0 %vm381_vm2, %v360_v22 }
  0x37   : > { %4998 = vmatmul.mubr.msk.bf16.gmra.mxu1 %vm381_vm2, %v339_v23  ;;  %4943 = vmatprep.mubr.msk.bf16.mxu0 %vm5656_vm1, %v5655_v0 }
  0x38   : > { %5001 = vmatprep.mubr.msk.bf16.mxu1 %vm5656_vm1, %v5655_v0 }
  0x3e   : > { %4944 = vmatmul.mubr.msk.bf16.gmra.mxu0 %vm381_vm2, %v361_v26 }
  0x3f   : > { %5002 = vmatmul.mubr.msk.bf16.gmra.mxu1 %vm381_vm2, %v340_v27  ;;  %4947 = vmatprep.mubr.msk.bf16.mxu0 %vm5656_vm1, %v5655_v0 }
  0x40   : > { %5005 = vmatprep.mubr.msk.bf16.mxu1 %vm5656_vm1, %v5655_v0 }
  0x46   : > { %4948 = vmatmul.mubr.msk.bf16.gmra.mxu0 %vm381_vm2, %v362_v30 }
  0x47   : > { %5006 = vmatmul.mubr.msk.bf16.gmra.mxu1 %vm381_vm2, %v5845_v31  ;;  %4951 = vmatprep.mubr.msk.bf16.mxu0 %vm5656_vm1, %v5655_v0 }
  0x48   : > { %5009 = vmatprep.mubr.msk.bf16.mxu1 %vm5656_vm1, %v5655_v0 }
  0x4e   : > { %4952 = vmatmul.mubr.msk.bf16.gmra.mxu0 %vm381_vm2, %v363_v34 }
  0x4f   : > { %5010 = vmatmul.mubr.msk.bf16.gmra.mxu1 %vm381_vm2, %v5856_v35  ;;  %4955 = vmatprep.mubr.msk.bf16.mxu0 %vm5656_vm1, %v5655_v0 }
  0x50   : > { %5013 = vmatprep.mubr.msk.bf16.mxu1 %vm5656_vm1, %v5655_v0 }
  0x56   : > { %4956 = vmatmul.mubr.msk.bf16.gmra.mxu0 %vm381_vm2, %v364_v38 }
  0x57   : > { %5014 = vmatmul.mubr.msk.bf16.gmra.mxu1 %vm381_vm2, %v5867_v39  ;;  %4959 = vmatprep.mubr.msk.bf16.mxu0 %vm5656_vm1, %v5655_v0 }
  0x58   : > { %5017 = vmatprep.mubr.msk.bf16.mxu1 %vm5656_vm1, %v5655_v0 }
  0x5e   : > { %4960 = vmatmul.mubr.msk.bf16.gmra.mxu0 %vm381_vm2, %v365_v42 }
  0x5f   : > { %5018 = vmatmul.mubr.msk.bf16.gmra.mxu1 %vm381_vm2, %v5878_v43  ;;  %4963 = vmatprep.mubr.msk.bf16.mxu0 %vm5656_vm1, %v5655_v0 }
  0x60   : > { %5021 = vmatprep.mubr.msk.bf16.mxu1 %vm5656_vm1, %v5655_v0 }
  0x66   : > { %4964 = vmatmul.mubr.msk.bf16.gmra.mxu0 %vm381_vm2, %v366_v46 }
  0x67   : > { %5022 = vmatmul.mubr.msk.bf16.gmra.mxu1 %vm381_vm2, %v345_v47  ;;  %4967 = vmatprep.mubr.msk.bf16.mxu0 %vm5656_vm1, %v5655_v0 }
  0x68   : > { %5025 = vmatprep.mubr.msk.bf16.mxu1 %vm5656_vm1, %v5655_v0 }
  0x6e   : > { %4968 = vmatmul.mubr.msk.bf16.gmra.mxu0 %vm381_vm2, %v367_v50  ;;  %v834_v50 = vpack.c.bf16 %v819_v9, %v818_v45 }
  0x6f   : > { %5026 = vmatmul.mubr.msk.bf16.gmra.mxu1 %vm381_vm2, %v346_v51  ;;  %4971 = vmatprep.mubr.msk.bf16.mxu0 %vm5656_vm1, %v5655_v0 }
  0x70   : > { %5029 = vmatprep.mubr.msk.bf16.mxu1 %vm5656_vm1, %v5655_v0 }
  0x76   : > { %4972 = vmatmul.mubr.msk.bf16.gmra.mxu0 %vm381_vm2, %v368_v54 }
  0x77   : > { %5030 = vmatmul.mubr.msk.bf16.gmra.mxu1 %vm381_vm2, %v347_v55  ;;  %4975 = vmatprep.mubr.msk.bf16.mxu0 %vm5656_vm1, %v5655_v0 }
  0x78   : > { %5033 = vmatprep.mubr.msk.bf16.mxu1 %vm5656_vm1, %v5655_v0 }
  0x7e   : > { %4976 = vmatmul.mubr.msk.bf16.gmra.mxu0 %vm381_vm2, %v369_v58 }
  0x7f   : > { %5034 = vmatmul.mubr.msk.bf16.gmra.mxu1 %vm381_vm2, %v348_v59  ;;  %4979 = vmatprep.mubr.msk.bf16.mxu0 %vm5656_vm1, %v5655_v0 }
  0x80   : > { %5037 = vmatprep.mubr.msk.bf16.mxu1 %vm5656_vm1, %v5655_v0 }
  0x86   : > { %4980 = vmatmul.mubr.msk.bf16.gmra.mxu0 %vm381_vm2, %v370_v62 }
  0x87   : > { %5038 = vmatmul.mubr.msk.bf16.gmra.mxu1 %vm381_vm2, %v349_v63  ;;  %4983 = vmatprep.mubr.msk.bf16.mxu0 %vm5656_vm1, %v5655_v0 }
  0x88   : > { %5041 = vmatprep.mubr.msk.bf16.mxu1 %vm5656_vm1, %v5655_v0 }
  0x8e   : > { %4984 = vmatmul.mubr.msk.bf16.gmra.mxu0 %vm381_vm2, %v371_v3 }
  0x8f   : > { %5042 = vmatmul.mubr.msk.bf16.gmra.mxu1 %vm381_vm2, %v350_v4  ;;  %5055 = vmatprep.mubr.msk.bf16.mxu0 %vm5656_vm1, %v5655_v0 }
  0x90   : > { %5045 = vmatprep.mubr.msk.bf16.mxu1 %vm5656_vm1, %v5655_v0 }
  0x96   : > { %5056 = vmatmul.mubr.msk.bf16.vlgmr.msra.gmra.mxu0 %vm381_vm2, %v5845_v31 }
  0x97   : > { %5046 = vmatmul.mubr.msk.bf16.gmra.mxu1 %vm381_vm2, %v351_v5  ;;  %5059 = vmatprep.mubr.msk.bf16.mxu0 %vm5656_vm1, %v5655_v0 }
  0x98   : > { %5049 = vmatprep.mubr.msk.bf16.mxu1 %vm5656_vm1, %v5655_v0  ;;  %5200 = vmatpush3.bf16.msra.mxu0 %v5541_v33 }
  0x9e   : > { %5060 = vmatmul.mubr.msk.bf16.gmra.mxu0 %vm381_vm2, %v5856_v35 }
  0x9f   : > { %5050 = vmatmul.mubr.msk.bf16.gmra.mxu1 %vm381_vm2, %v352_v6  ;;  %5063 = vmatprep.mubr.msk.bf16.mxu0 %vm5656_vm1, %v5655_v0 }
  0xa6   : > { %5064 = vmatmul.mubr.msk.bf16.gmra.mxu0 %vm381_vm2, %v5867_v39  ;;  %v5542_v39 = vld [vmem:[%s8933_s3 + $0x30] sm:$0xff]  }
  0xa7   : > { %5067 = vmatprep.mubr.msk.bf16.mxu0 %vm5656_vm1, %v5655_v0  ;;  %5201 = vmatprep.subr.bf16.mxu0 %v5542_v39 }
  0xa8   : > { %5202 = vmatpush3.bf16.msra.mxu0 %v5542_v39 }
  0xae   : > { %5068 = vmatmul.mubr.msk.bf16.gmra.mxu0 %vm381_vm2, %v5878_v43 }
  0xaf   : > { %5071 = vmatprep.mubr.msk.bf16.mxu0 %vm5656_vm1, %v5655_v0 }
  0xb6   : > { %5072 = vmatmul.mubr.msk.bf16.gmra.mxu0 %vm381_vm2, %v345_v47 }
  0xb7   : > { %5075 = vmatprep.mubr.msk.bf16.mxu0 %vm5656_vm1, %v5655_v0 }
  0xbe   : > { %5076 = vmatmul.mubr.msk.bf16.gmra.mxu0 %vm381_vm2, %v346_v51 }
  0xbf   : > { %5079 = vmatprep.mubr.msk.bf16.mxu0 %vm5656_vm1, %v5655_v0 }
  0xc6   : > { %5080 = vmatmul.mubr.msk.bf16.gmra.mxu0 %vm381_vm2, %v347_v55 }
  0xc7   : > { %5083 = vmatprep.mubr.msk.bf16.mxu0 %vm5656_vm1, %v5655_v0 }
  0xce   : > { %5084 = vmatmul.mubr.msk.bf16.gmra.mxu0 %vm381_vm2, %v348_v59 }
  0xcf   : > { %5087 = vmatprep.mubr.msk.bf16.mxu0 %vm5656_vm1, %v5655_v0 }
  0xd6   : > { %5088 = vmatmul.mubr.msk.bf16.gmra.mxu0 %vm381_vm2, %v349_v63 }
  0xd7   : > { %5091 = vmatprep.mubr.msk.bf16.mxu0 %vm5656_vm1, %v5655_v0 }
  0xde   : > { %5092 = vmatmul.mubr.msk.bf16.gmra.mxu0 %vm381_vm2, %v350_v4 }
  0xdf   : > { %5095 = vmatprep.mubr.msk.bf16.mxu0 %vm5656_vm1, %v5655_v0 }
  0xe6   : > { %v465_v10 = vpop.f32.mrf.mxu0  ;;  %5096 = vmatmul.mubr.msk.bf16.gmra.mxu0 %vm381_vm2, %v351_v5 }
  0xe7   : > { %v5987_v12 = vpop.f32.mrf.mxu1  ;;  %5099 = vmatprep.mubr.msk.bf16.mxu0 %vm5656_vm1, %v5655_v0 }
  0xe8   : > { %8947 = vst [vmem:[#allocation9_spill] sm:$0xff] %v5987_v12  ;;  %v4933_v13 = vpop.f32.mrf.mxu0 }
  0xe9   : > { %v4989_v14 = vpop.f32.mrf.mxu1 }
  0xea   : > { %v468_v15 = vpop.f32.mrf.mxu0 }
  0xeb   : > { %v5991_v16 = vpop.f32.mrf.mxu1 }
  0xec   : > { %8948 = vst [vmem:[#allocation10_spill] sm:$0xff] %v5991_v16  ;;  %v4934_v17 = vpop.f32.mrf.mxu0 }
  0xed   : > { %v4990_v18 = vpop.f32.mrf.mxu1 }
  0xee   : > { %v473_v19 = vpop.f32.mrf.mxu0  ;;  %5100 = vmatmul.mubr.msk.bf16.gmra.mxu0 %vm381_vm2, %v352_v6 }
  0xef   : > { %v671_v20 = vpop.f32.mrf.mxu1  ;;  %5103 = vmatprep.mubr.msk.bf16.mxu0 %vm5656_vm1, %v5655_v0 }
  0xf0   : > { %v5996_v21 = vadd.f32 %v671_v20, %v465_v10  ;;  %v4937_v22 = vpop.f32.mrf.mxu0 }
  0xf1   : > { %v4995_v23 = vpop.f32.mrf.mxu1 }
  0xf2   : > { %v476_v24 = vpop.f32.mrf.mxu0 }
  0xf3   : > { %v674_v26 = vpop.f32.mrf.mxu1 }
  0xf4   : > { %v6000_v27 = vadd.f32 %v674_v26, %v468_v15  ;;  %v4938_v28 = vpop.f32.mrf.mxu0 }
  0xf5   : > { %v4996_v29 = vpop.f32.mrf.mxu1 }
  0xf6   : > { %v481_v30 = vpop.f32.mrf.mxu0  ;;  %5104 = vmatmul.mubr.msk.bf16.gmra.mxu0 %vm381_vm2, %v832_v25  ;;  %v1141_v29 = vlaneseq }
  0xf7   : > { %v679_v31 = vpop.f32.mrf.mxu1  ;;  %5107 = vmatprep.mubr.msk.bf16.mxu0 %vm5656_vm1, %v5655_v0 }
  0xf8   : > { %v6009_v34 = vadd.f32 %v679_v31, %v473_v19  ;;  %v4941_v7 = vpop.f32.mrf.mxu0 }
  0xf9   : > { %v4999_v35 = vpop.f32.mrf.mxu1  ;;  %v6044_v7 = vld [vmem:[%s8933_s3 + $0x8] sm:$0xff]  }
  0xfa   : > { %v484_v36 = vpop.f32.mrf.mxu0  ;;  %5143 = vmatprep.subr.bf16.mxu1 %v6044_v7 }
  0xfb   : > { %v682_v38 = vpop.f32.mrf.mxu1 }
  0xfc   : > { %v6015_v40 = vadd.f32 %v682_v38, %v476_v24  ;;  %v4942_v41 = vpop.f32.mrf.mxu0 }
  0xfd   : > { %v5000_v42 = vpop.f32.mrf.mxu1 }
  0xfe   : > { %v489_v43 = vpop.f32.mrf.mxu0  ;;  %5108 = vmatmul.mubr.msk.bf16.gmra.mxu0 %vm381_vm2, %v833_v37 }
  0xff   : > { %v687_v44 = vpop.f32.mrf.mxu1  ;;  %5111 = vmatprep.mubr.msk.bf16.mxu0 %vm5656_vm1, %v5655_v0 }
 0x100   : > { %v6022_v46 = vadd.f32 %v687_v44, %v481_v30  ;;  %v4945_v47 = vpop.f32.mrf.mxu0 }
 0x101   : > { %v5003_v48 = vpop.f32.mrf.mxu1 }
 0x102   : > { %v492_v49 = vpop.f32.mrf.mxu0 }
 0x103   : > { %v690_v51 = vpop.f32.mrf.mxu1 }
 0x104   : > { %v6024_v52 = vadd.f32 %v690_v51, %v484_v36  ;;  %v4946_v53 = vpop.f32.mrf.mxu0  ;;  %v6046_v36 = vshrl.u32 %v1141_v29, 7 }
 0x105   : > { %v5004_v54 = vpop.f32.mrf.mxu1 }
 0x106   : > { %v497_v55 = vpop.f32.mrf.mxu0  ;;  %5112 = vmatmul.mubr.msk.bf16.gmra.mxu0 %vm381_vm2, %v834_v50 }
 0x107   : > { %v695_v56 = vpop.f32.mrf.mxu1 }
 0x108   : > { %v6027_v57 = vadd.f32 %v695_v56, %v489_v43  ;;  %v4949_v0 = vpop.f32.mrf.mxu0  ;;  %v6052_v43 = vmul.u32.u64.low 2863311531, %v6046_v36  ;;  %v6053_v44 = vmul.u32.u64.high 2863311531, %v6046_v36, %v6052_v43 }
 0x109   : > { %v5007_v58 = vpop.f32.mrf.mxu1 }
 0x10a   : > { %v500_v59 = vpop.f32.mrf.mxu0 }
 0x10b   : > { %v698_v60 = vpop.f32.mrf.mxu1 }
 0x10c   : > { %v6029_v61 = vadd.f32 %v698_v60, %v492_v49  ;;  %v4950_v62 = vpop.f32.mrf.mxu0  ;;  %v6058_v49 = vadd.s32 8, %v6046_v36 }
 0x10d   : > { %v5008_v63 = vpop.f32.mrf.mxu1 }
 0x10e   : > { %v505_v1 = vpop.f32.mrf.mxu0  ;;  %v6063_v56 = vmul.u32.u64.low 2863311531, %v6058_v49  ;;  %v6064_v0 = vmul.u32.u64.high 2863311531, %v6058_v49, %v6063_v56 }
 0x10f   : > { %v703_v2 = vpop.f32.mrf.mxu1 }
 0x110   : > { %v6031_v3 = vadd.f32 %v703_v2, %v497_v55  ;;  %v4953_v4 = vpop.f32.mrf.mxu0 }
 0x111   : > { %v5011_v5 = vpop.f32.mrf.mxu1  ;;  %v6073_v4 = vadd.s32 24, %v6046_v36 }
 0x112   : > { %v508_v6 = vpop.f32.mrf.mxu0 }
 0x113   : > { %v706_v8 = vpop.f32.mrf.mxu1 }
 0x114   : > { %v6033_v10 = vadd.f32 %v706_v8, %v500_v59  ;;  %v4954_v11 = vpop.f32.mrf.mxu0  ;;  %v1178_v59 = vshrl.u32 %v6053_v44, 4 }
 0x115   : > { %v5012_v13 = vpop.f32.mrf.mxu1 }
 0x116   : > { %v513_v14 = vpop.f32.mrf.mxu0 }
 0x117   : > { %v711_v15 = vpop.f32.mrf.mxu1 }
 0x118   : > { %v6035_v17 = vadd.f32 %v711_v15, %v505_v1  ;;  %v4957_v18 = vpop.f32.mrf.mxu0  ;;  %v6070_v1 = vadd.s32 16, %v6046_v36 }
 0x119   : > { %v5015_v19 = vpop.f32.mrf.mxu1 }
 0x11a   : > { %v516_v20 = vpop.f32.mrf.mxu0  ;;  %v1189_v19 = vshrl.u32 %v6064_v0, 4 }
 0x11b   : > { %v714_v22 = vpop.f32.mrf.mxu1 }
 0x11c   : > { %v6037_v23 = vadd.f32 %v714_v22, %v508_v6  ;;  %v4958_v24 = vpop.f32.mrf.mxu0  ;;  %v1179_v6 = vmul.u32 24, %v1178_v59 }
 0x11d   : > { %v5016_v25 = vpop.f32.mrf.mxu1  ;;  %v6087_v24 = vadd.s32 32, %v6046_v36 }
 0x11e   : > { %v521_v26 = vpop.f32.mrf.mxu0 }
 0x11f   : > { %v719_v28 = vpop.f32.mrf.mxu1 }
 0x120   : > { %v6039_v30 = vadd.f32 %v719_v28, %v513_v14  ;;  %v4961_v31 = vpop.f32.mrf.mxu0  ;;  %v6078_v14 = vmul.u32.u64.low 2863311531, %v6070_v1  ;;  %v6079_v15 = vmul.u32.u64.high 2863311531, %v6070_v1, %v6078_v14  ;;  %v6091_v28 = vadd.s32 40, %v6046_v36 }
 0x121   : > { %v5019_v32 = vpop.f32.mrf.mxu1 }
 0x122   : > { %v524_v33 = vpop.f32.mrf.mxu0 }
 0x123   : > { %v722_v35 = vpop.f32.mrf.mxu1 }
 0x124   : > { %v6048_v37 = vadd.f32 %v722_v35, %v516_v20  ;;  %v4962_v38 = vpop.f32.mrf.mxu0  ;;  %v6083_v20 = vmul.u32.u64.low 2863311531, %v6073_v4  ;;  %v6084_v22 = vmul.u32.u64.high 2863311531, %v6073_v4, %v6083_v20  ;;  %v1190_v35 = vmul.u32 24, %v1189_v19 }
 0x125   : > { %v5020_v39 = vpop.f32.mrf.mxu1  ;;  %v6126_v19 = vadd.s32 56, %v6046_v36 }
 0x126   : > { %v529_v41 = vpop.f32.mrf.mxu0  ;;  %v6096_v38 = vmul.u32.u64.low 2863311531, %v6087_v24  ;;  %v6097_v39 = vmul.u32.u64.high 2863311531, %v6087_v24, %v6096_v38  ;;  %v1211_v56 = vshrl.u32 %v6084_v22, 4 }
 0x127   : > { %v727_v42 = vpop.f32.mrf.mxu1 }
 0x128   : > { %v6055_v45 = vadd.f32 %v727_v42, %v521_v26  ;;  %v4965_v9 = vpop.f32.mrf.mxu0  ;;  %v1180_v26 = vsub.s32 %v6046_v36, %v1179_v6  ;;  %v6100_v42 = vmul.u32.u64.low 2863311531, %v6091_v28  ;;  %v6101_v43 = vmul.u32.u64.high 2863311531, %v6091_v28, %v6100_v42 }
 0x129   : > { %v5023_v47 = vpop.f32.mrf.mxu1  ;;  %v1222_v14 = vshrl.u32 %v6097_v39, 4 }
 0x12a   : > { %v532_v48 = vpop.f32.mrf.mxu0  ;;  %vm1502_vm4 = vcmp.ne.s32.totalorder %v1180_v26, 0  ;;  %vm1532_vm5 = vcmp.lt.s32.totalorder %v1180_v26, 0 }
 0x12b   : > { %v730_v50 = vpop.f32.mrf.mxu1  ;;  %vm1562_vm6 = vmand %vm1532_vm5, %vm1502_vm4  ;;  %v1223_v39 = vmul.u32 24, %v1222_v14 }
 0x12c   : > { %v6060_v51 = vadd.f32 %v730_v50, %v524_v33  ;;  %v4966_v53 = vpop.f32.mrf.mxu0  ;;  %v1200_v50 = vshrl.u32 %v6079_v15, 4 }
 0x12d   : > { %v5024_v54 = vpop.f32.mrf.mxu1  ;;  %v6108_v53 = vadd.s32 48, %v6046_v36 }
 0x12e   : > { %v537_v55 = vpop.f32.mrf.mxu0 }
 0x12f   : > { %v735_v58 = vpop.f32.mrf.mxu1 }
 0x130   : > { %v6067_v60 = vadd.f32 %v735_v58, %v529_v41  ;;  %v4969_v62 = vpop.f32.mrf.mxu0 }
 0x131   : > { %v5027_v63 = vpop.f32.mrf.mxu1 }
 0x132   : > { %v540_v2 = vpop.f32.mrf.mxu0 }
 0x133   : > { %v738_v5 = vpop.f32.mrf.mxu1 }
 0x134   : > { %v6075_v8 = vadd.f32 %v738_v5, %v532_v48  ;;  %v4970_v11 = vpop.f32.mrf.mxu0  ;;  %v1592_v48 = vadd.s32 24, %v1180_v26  ;;  %v6119_v5 = vmul.u32.u64.low 2863311531, %v6108_v53  ;;  %v6120_v6 = vmul.u32.u64.high 2863311531, %v6108_v53, %v6119_v5 }
 0x135   : > { %v5028_v13 = vpop.f32.mrf.mxu1 }
 0x136   : > { %v545_v18 = vpop.f32.mrf.mxu0  ;;  %v1622_v63 = vsel %vm1562_vm6, %v1592_v48, %v1180_v26  ;;  %v1212_v13 = vmul.u32 24, %v1211_v56  ;;  %v6149_v56 = vstv %s1743_s11  ;;  %v1244_v5 = vshrl.u32 %v6120_v6, 4 }
 0x137   : > { %v743_v25 = vpop.f32.mrf.mxu1  ;;  %vm1652_vm9 = vcmp.ge.s32.totalorder %v1622_v63, 1  ;;  %vm1682_vm11 = vcmp.le.s32.totalorder %v1622_v63, 16  ;;  %vm1745_vm2 = vcmp.ge.s32.totalorder %v6046_v36, %v6149_v56  ;;  %v6254_v63 = vadd.s32 88, %v6046_v36 }
 0x138   : > { %v6093_v29 = vadd.f32 %v743_v25, %v537_v55  ;;  %v4973_v31 = vpop.f32.mrf.mxu0  ;;  %v1191_v55 = vsub.s32 %v6058_v49, %v1190_v35  ;;  %v1213_v38 = vsub.s32 %v6073_v4, %v1212_v13  ;;  %vm6182_vm1 = vmand %vm1652_vm9, %vm1682_vm11 }
 0x139   : > { %v5031_v32 = vpop.f32.mrf.mxu1 }
 0x13a   : > { %v548_v33 = vpop.f32.mrf.mxu0  ;;  %vm1503_vm7 = vcmp.ne.s32.totalorder %v1191_v55, 0  ;;  %vm1533_vm8 = vcmp.lt.s32.totalorder %v1191_v55, 0  ;;  %v1593_v25 = vadd.s32 24, %v1191_v55  ;;  %vm1505_vm14 = vcmp.ne.s32.totalorder %v1213_v38, 0 }
 0x13b   : > { %v746_v41 = vpop.f32.mrf.mxu1  ;;  %vm6131_vm10 = vmand %vm1533_vm8, %vm1503_vm7  ;;  %vm1535_vm15 = vcmp.lt.s32.totalorder %v1213_v38, 0  ;;  %vm1746_vm7 = vcmp.ge.s32.totalorder %v6058_v49, %v6149_v56 }
 0x13c   : > { %v6103_v44 = vadd.f32 %v746_v41, %v540_v2  ;;  %v4974_v9 = vpop.f32.mrf.mxu0  ;;  %v1201_v2 = vmul.u32 24, %v1200_v50  ;;  %v6138_v41 = vadd.s32 64, %v6046_v36  ;;  %vm6198_vm8 = vmand %vm1535_vm15, %vm1505_vm14  ;;  %vm1747_vm14 = vcmp.ge.s32.totalorder %v6070_v1, %v6149_v56 }
 0x13d   : > { %v5032_v47 = vpop.f32.mrf.mxu1 }
 0x13e   : > { %8949 = vst [vmem:[#allocation11_spill] sm:$0xff] %v6103_v44  ;;  %v553_v54 = vpop.f32.mrf.mxu0  ;;  %v1202_v32 = vsub.s32 %v6070_v1, %v1201_v2  ;;  %v6145_v47 = vadd.s32 72, %v6046_v36 }
 0x13f   : > { %v751_v0 = vpop.f32.mrf.mxu1 }
 0x140   : > { %v6112_v58 = vadd.f32 %v751_v0, %v545_v18  ;;  %v4977_v59 = vpop.f32.mrf.mxu0  ;;  %v1233_v18 = vshrl.u32 %v6101_v43, 4  ;;  %v6141_v43 = vmul.u32.u64.low 2863311531, %v6126_v19  ;;  %v6142_v9 = vmul.u32.u64.high 2863311531, %v6126_v19, %v6141_v43 }
 0x141   : > { %v5035_v62 = vpop.f32.mrf.mxu1  ;;  %v6151_v0 = vstv %s1806_s12  ;;  %v6155_v59 = vsel %vm6131_vm10, %v1593_v25, %v1191_v55  ;;  %vm1504_vm12 = vcmp.ne.s32.totalorder %v1202_v32, 0  ;;  %vm1534_vm13 = vcmp.lt.s32.totalorder %v1202_v32, 0  ;;  %s293_s12 = sand.u32 1, %s5629_s25  }
 0x142   : > { %8950 = vst [vmem:[#allocation12_spill] sm:$0xff] %v6112_v58  ;;  %v556_v11 = vpop.f32.mrf.mxu0  ;;  %v1234_v42 = vmul.u32 24, %v1233_v18  ;;  %v1594_v2 = vadd.s32 24, %v1202_v32  ;;  %vm6173_vm0 = vmand %vm1534_vm13, %vm1504_vm12  ;;  %vm1808_vm4 = vcmp.lt.s32.totalorder %v6046_v36, %v6151_v0  ;;  %v1245_v43 = vmul.u32 24, %v1244_v5  ;;  %s5397_s22 = smul.u32 192, %s293_s12  ;;  %s8879_s21 = scalar_lea.sflag [#allocation4], %s293_s12 }
 0x143   : > { %v754_v15 = vpop.f32.mrf.mxu1  ;;  %vm1653_vm5 = vcmp.ge.s32.totalorder %v6155_v59, 1  ;;  %vm1683_vm6 = vcmp.le.s32.totalorder %v6155_v59, 16  ;;  %vm6219_vm13 = vmand %vm6182_vm1, %vm1745_vm2  ;;  %vm1809_vm15 = vcmp.lt.s32.totalorder %v6058_v49, %v6151_v0 }
 0x144   : > { %v6128_v20 = vadd.f32 %v754_v15, %v548_v33  ;;  %v4978_v22 = vpop.f32.mrf.mxu0  ;;  %v6162_v14 = vmul.u32.u64.low 2863311531, %v6138_v41  ;;  %v6163_v15 = vmul.u32.u64.high 2863311531, %v6138_v41, %v6162_v14  ;;  %v1235_v55 = vsub.s32 %v6091_v28, %v1234_v42  ;;  %vm6269_vm3 = vmand %vm6219_vm13, %vm1808_vm4  ;;  %s8818_s10 = scalar_lea.vmem [#allocation3], %s5397_s22  ;;  %s5657_s22 = smov [#allocation3]  }
 0x145   : > { %v5036_v26 = vpop.f32.mrf.mxu1  ;;  %v6167_v22 = vmul.u32.u64.low 2863311531, %v6145_v47  ;;  %v6168_v25 = vmul.u32.u64.high 2863311531, %v6145_v47, %v6167_v22  ;;  %v1624_v5 = vsel %vm6173_vm0, %v1594_v2, %v1202_v32  ;;  %v1255_v14 = vshrl.u32 %v6142_v9, 4  ;;  %vm6291_vm4 = vmand %vm1653_vm5, %vm1683_vm6  ;;  %s4419_s28 = sshll.u32 %s8818_s10, 4  ;;  %s5565_s23 = sshll.u32 %s5657_s22, 4  ;;  %s8872_s28 = int_to_ptr.vmem [resolvable:$true] %s4419_s28  ;;  %s5566_s23 = int_to_ptr.vmem [resolvable:$false] %s5565_s23 }
 0x146   : > { %8951 = vst [vmem:[#allocation13_spill] sm:$0xff] %v6128_v20  ;;  %v561_v35 = vpop.f32.mrf.mxu0  ;;  %vm1507_vm11 = vcmp.ne.s32.totalorder %v1235_v55, 0  ;;  %vm1537_vm12 = vcmp.lt.s32.totalorder %v1235_v55, 0  ;;  %vm1654_vm1 = vcmp.ge.s32.totalorder %v1624_v5, 1  ;;  %vm1811_vm5 = vcmp.lt.s32.totalorder %v6073_v4, %v6151_v0  ;;  %s5561_s11 = scalar_lea.vmem %s8872_s28, 3072  ;;  %s5567_s9 = scalar_lea.vmem %s5566_s23, 6144 }
 0x147   : > { %v759_v33 = vpop.f32.mrf.mxu1  ;;  %v1277_v16 = vshrl.u32 %v6168_v25, 4  ;;  %p5562_p0 = scmp.ne.s32.totalorder %s8872_s28, %s5561_s11  ;;  %p5568_p4 = scmp.lt.s32.totalorder %s8872_s28, %s5566_s23 }
 0x148   : > { %v6147_v48 = vadd.f32 %v759_v33, %v553_v54  ;;  %v4981_v50 = vpop.f32.mrf.mxu0  ;;  %v6159_v54 = vsub.s32 %v6087_v24, %v1223_v39  ;;  %v6178_v39 = vadd.s32 80, %v6046_v36  ;;  %p5569_p5 = scmp.lt.s32.totalorder %s5567_s9, %s5561_s11 }
 0x149   : > { %v5039_v62 = vpop.f32.mrf.mxu1  ;;  %p5563_p1 = pnand %p5562_p0, %p5751_p3 }
 0x14a   : > { %8954 = vst [vmem:[#allocation14_spill] sm:$0xff] %v6147_v48  ;;  %v564_v13 = vpop.f32.mrf.mxu0  ;;  %vm1506_vm9 = vcmp.ne.s32.totalorder %v6159_v54, 0  ;;  %vm1536_vm10 = vcmp.lt.s32.totalorder %v6159_v54, 0  ;;  %v6226_v32 = vmul.u32.u64.low 2863311531, %v6178_v39  ;;  %v6227_v9 = vmul.u32.u64.high 2863311531, %v6178_v39, %v6226_v32  ;;  %p5570_p6 = por %p5569_p5, %p5568_p4 }
 0x14b   : > { %v762_v18 = vpop.f32.mrf.mxu1  ;;  %vm6237_vm0 = vmand %vm1536_vm10, %vm1506_vm9  ;;  %v1596_v42 = vadd.s32 24, %v6159_v54  ;;  %vm1684_vm9 = vcmp.le.s32.totalorder %v1624_v5, 16  ;;  %p5564_p2 = pneg %p5563_p1 }
 0x14c   : > { %v6170_v26 = vadd.f32 %v762_v18, %v556_v11  ;;  %v4982_v6 = vpop.f32.mrf.mxu0  ;;  %v1595_v11 = vadd.s32 24, %v1213_v38  ;;  %v6210_v18 = vld [vmem:[%s8933_s3 + $0x58] sm:$0xff]   ;;  %vm6305_vm13 = vmand %vm1654_vm1, %vm1684_vm9  ;;  %v1288_v5 = vshrl.u32 %v6227_v9, 4 }
 0x14d   : > { %v5040_v33 = vpop.f32.mrf.mxu1  ;;  %5255 = vmatprep.subr.bf16.mxu0 %v6210_v18  ;;  %vm6347_vm9 = vmand %vm6305_vm13, %vm1747_vm14  ;;  %p5571_p7 = pnand %p5570_p6, %p5564_p2 }
 0x14e   : > { %8955 = vst [vmem:[#allocation15_spill] sm:$0xff] %v6170_v26  ;;  %v6190_v50 = vpop.f32.mrf.mxu0  ;;  %v6262_v26 = vadd.s32 96, %v6046_v36 }
 0x14f   : > { %v767_v62 = vpop.f32.mrf.mxu1 }
 0x150   : > { %v6212_v22 = vadd.f32 %v767_v62, %v561_v35  ;;  %v4985_v6 = vpop.f32.mrf.mxu0  ;;  %v1625_v35 = vsel %vm6198_vm8, %v1595_v11, %v1213_v38  ;;  %v1597_v62 = vadd.s32 24, %v1235_v55  ;;  %vm6248_vm8 = vmand %vm1537_vm12, %vm1507_vm11  ;;  %v1266_v11 = vshrl.u32 %v6163_v15, 4 }
 0x151   : > { %v5043_v2 = vpop.f32.mrf.mxu1  ;;  %v1246_v6 = vsub.s32 %v6108_v53, %v1245_v43  ;;  %v1256_v43 = vmul.u32 24, %v1255_v14  ;;  %vm1655_vm11 = vcmp.ge.s32.totalorder %v1625_v35, 1  ;;  %vm1685_vm12 = vcmp.le.s32.totalorder %v1625_v35, 16 }
 0x152   : > { %8962 = vst [vmem:[#allocation16_spill] sm:$0xff] %v6212_v22  ;;  %v572_v32 = vpop.f32.mrf.mxu0  ;;  %v6280_v25 = vsel %vm6248_vm8, %v1597_v62, %v1235_v55  ;;  %v6296_v55 = vmul.u32.u64.low 2863311531, %v6254_v63  ;;  %v6297_v33 = vmul.u32.u64.high 2863311531, %v6254_v63, %v6296_v55  ;;  %vm1749_vm8 = vcmp.ge.s32.totalorder %v6087_v24, %v6149_v56 }
 0x153   : > { %v770_v2 = vpop.f32.mrf.mxu1  ;;  %vm1508_vm10 = vcmp.ne.s32.totalorder %v1246_v6, 0  ;;  %vm1538_vm2 = vcmp.lt.s32.totalorder %v1246_v6, 0  ;;  %v1598_v59 = vadd.s32 24, %v1246_v6 }
 0x154   : > { %v6259_v12 = vadd.f32 %v770_v2, %v564_v13  ;;  %v4986_v22 = vpop.f32.mrf.mxu0  ;;  %v6276_v13 = vsel %vm6237_vm0, %v1596_v42, %v6159_v54  ;;  %v1267_v54 = vmul.u32 24, %v1266_v11  ;;  %v6300_v42 = vadd.s32 104, %v6046_v36  ;;  %vm6319_vm6 = vmand %vm1538_vm2, %vm1508_vm10 }
 0x155   : > { %v5044_v15 = vpop.f32.mrf.mxu1  ;;  %v6285_v22 = vld [vmem:[%s8932_s2] ss:$0 sm:$0xff]  ;;  %v6312_v11 = vsub.s32 %v6126_v19, %v1256_v43  ;;  %vm6334_vm0 = vmand %vm6291_vm4, %vm1746_vm7  ;;  %vm1656_vm1 = vcmp.ge.s32.totalorder %v6276_v13, 1  ;;  %vm1686_vm2 = vcmp.le.s32.totalorder %v6276_v13, 16  ;;  %vm1657_vm7 = vcmp.ge.s32.totalorder %v6280_v25, 1 }
 0x156   : > { %8969 = vst [vmem:[#allocation17_spill] sm:$0xff] %v6259_v12  ;;  %v925_v14 = vpop.f32.mrf.mxu0  ;;  %v1278_v15 = vmul.u32 24, %v1277_v16  ;;  %v6356_v9 = vmul.u32.u64.low 2863311531, %v6300_v42  ;;  %v6357_v31 = vmul.u32.u64.high 2863311531, %v6300_v42, %v6356_v9  ;;  %vm6362_vm10 = vmand %vm1655_vm11, %vm1685_vm12  ;;  %vm8987_vm12 = vcmp.lt.s32.totalorder %v6070_v1, %v6151_v0 }
 0x157   : > { %v775_v62 = vpop.f32.mrf.mxu1  ;;  %v1044_v38 = vadd.f32 %v925_v14, %v5996_v21  ;;  %v6325_v14 = vmul.u32.u64.low 2863311531, %v6262_v26  ;;  %v6326_v20 = vmul.u32.u64.high 2863311531, %v6262_v26, %v6325_v14  ;;  %vm6380_vm14 = vmand %vm6334_vm0, %vm1809_vm15  ;;  %vm1509_vm11 = vcmp.ne.s32.totalorder %v6312_v11, 0 }
 0x158   : > { %v6315_v55 = vadd.f32 %v775_v62, %v6190_v50  ;;  %v5057_v12 = vpop.f32.mrf.mxu0  ;;  %v6353_v50 = vsub.s32 %v6138_v41, %v1267_v54  ;;  %v6371_v54 = vadd.s32 112, %v6046_v36  ;;  %vm6396_vm15 = vmand %vm6347_vm9, %vm8987_vm12  ;;  %vm1539_vm13 = vcmp.lt.s32.totalorder %v6312_v11, 0 }
 0x159   : > { %v1081_v43 = vadd.f32 %v6285_v22, %v1044_v38  ;;  %v5047_v58 = vpop.f32.mrf.mxu1  ;;  %v1599_v48 = vadd.s32 24, %v6312_v11  ;;  %v1299_v12 = vshrl.u32 %v6297_v33, 4  ;;  %vm6443_vm9 = vmand %vm1539_vm13, %vm1509_vm11  ;;  %v1310_v2 = vshrl.u32 %v6326_v20, 4 }
 0x15a   : > { %8976 = vst [vmem:[#allocation18_spill] sm:$0xff] %v6315_v55  ;;  %v928_v16 = vpop.f32.mrf.mxu0  ;;  %v6368_v55 = vsel %vm6319_vm6, %v1598_v59, %v1246_v6  ;;  %v6386_v6 = vsub.s32 %v6145_v47, %v1278_v15  ;;  %v1289_v59 = vmul.u32 24, %v1288_v5  ;;  %vm8991_vm6 = vcmp.ge.s32.totalorder %v6073_v4, %v6149_v56 }
 0x15b   : > { %v1111_v62 = vmax.f32 %v1081_v43, 0.0  ;;  %v778_v38 = vpop.f32.mrf.mxu1  ;;  %v1045_v14 = vadd.f32 %v928_v16, %v6000_v27  ;;  %vm6410_vm0 = vmand %vm6362_vm10, %vm8991_vm6  ;;  %vm1510_vm12 = vcmp.ne.s32.totalorder %v6353_v50, 0  ;;  %vm1540_vm4 = vcmp.lt.s32.totalorder %v6353_v50, 0 }
 0x15c   : > { %v6373_v44 = vadd.f32 %v778_v38, %v572_v32  ;;  %v5058_v35 = vpop.f32.mrf.mxu0  ;;  %v1600_v5 = vadd.s32 24, %v6353_v50  ;;  %vm6427_vm10 = vmand %vm1656_vm1, %vm1686_vm2  ;;  %vm1511_vm1 = vcmp.ne.s32.totalorder %v6386_v6, 0  ;;  %vm1541_vm2 = vcmp.lt.s32.totalorder %v6386_v6, 0 }
 0x15d   : > { %v1928_v32 = vsel %vm6269_vm3, %v1111_v62, 0.0  ;;  %v1082_v21 = vadd.f32 %v6285_v22, %v1045_v14  ;;  %v5048_v43 = vpop.f32.mrf.mxu1  ;;  %vm8990_vm3 = vcmask 261120   ;;  %v6450_v13 = vsub.s32 %v6178_v39, %v1289_v59  ;;  %vm6463_vm6 = vmand %vm1540_vm4, %vm1510_vm12 }
 0x15e   : > { %1965 = vst.msk [vmem:[#allocation2 + $0x18] sm:$0xff] %vm8990_vm3, %v1928_v32  ;;  %v933_v15 = vpop.f32.mrf.mxu0  ;;  %vm1812_vm3 = vcmp.lt.s32.totalorder %v6087_v24, %v6151_v0  ;;  %v6434_v38 = vmul.u32.u64.low 2863311531, %v6371_v54  ;;  %v6435_v14 = vmul.u32.u64.high 2863311531, %v6371_v54, %v6434_v38  ;;  %vm1687_vm11 = vcmp.le.s32.totalorder %v6280_v25, 16  ;;  %vm6476_vm13 = vmand %vm6410_vm0, %vm1811_vm5 }
 0x15f   : > { %v1112_v16 = vmax.f32 %v1082_v21, 0.0  ;;  %v6420_v58 = vpop.f32.mrf.mxu1  ;;  %v1046_v9 = vadd.f32 %v933_v15, %v6009_v34  ;;  %v6468_v20 = vadd.s32 120, %v6046_v36  ;;  %vm1658_vm4 = vcmp.ge.s32.totalorder %v6368_v55, 1  ;;  %vm6496_vm5 = vmand %vm1541_vm2, %vm1511_vm1 }
 0x160   : > { %v5061_v33 = vpop.f32.mrf.mxu0  ;;  %vm1688_vm12 = vcmp.le.s32.totalorder %v6368_v55, 16  ;;  %v1601_v15 = vadd.s32 24, %v6386_v6  ;;  %v6490_v4 = vsel %vm6443_vm9, %v1599_v48, %v6312_v11  ;;  %vm6505_vm0 = vmand %vm6427_vm10, %vm1749_vm8  ;;  %v6512_v11 = vsel %vm6463_vm6, %v1600_v5, %v6353_v50 }
 0x161   : > { %v1929_v35 = vsel %vm6380_vm14, %v1112_v16, 0.0  ;;  %v1083_v32 = vadd.f32 %v6285_v22, %v1046_v9  ;;  %v5051_v21 = vpop.f32.mrf.mxu1  ;;  %vm9000_vm14 = vcmask 261120   ;;  %v1321_v16 = vshrl.u32 %v6357_v31, 4  ;;  %vm6523_vm8 = vmand %vm1657_vm7, %vm1687_vm11 }
 0x162   : > { %1966 = vst.msk [vmem:[#allocation2 + $0x20] sm:$0xff] %vm9000_vm14, %v1929_v35  ;;  %v936_v27 = vpop.f32.mrf.mxu0  ;;  %v1300_v35 = vmul.u32 24, %v1299_v12  ;;  %vm1512_vm9 = vcmp.ne.s32.totalorder %v6450_v13, 0  ;;  %vm1542_vm1 = vcmp.lt.s32.totalorder %v6450_v13, 0  ;;  %v1311_v48 = vmul.u32 24, %v1310_v2  ;;  %vm9009_vm10 = vmmov %vm9000_vm14 }
 0x163   : > { %v1113_v9 = vmax.f32 %v1083_v32, 0.0  ;;  %v6484_v38 = vpop.f32.mrf.mxu1  ;;  %v1047_v33 = vadd.f32 %v936_v27, %v6015_v40  ;;  %v6528_v50 = vmul.u32.u64.low 2863311531, %v6468_v20  ;;  %v6529_v5 = vmul.u32.u64.high 2863311531, %v6468_v20, %v6528_v50  ;;  %vm6556_vm11 = vmand %vm1542_vm1, %vm1512_vm9 }
 0x164   : > { %v5062_v31 = vpop.f32.mrf.mxu0  ;;  %vm1659_vm7 = vcmp.ge.s32.totalorder %v6490_v4, 1  ;;  %vm1752_vm6 = vcmp.ge.s32.totalorder %v6126_v19, %v6149_v56  ;;  %v6546_v25 = vsel %vm6496_vm5, %v1601_v15, %v6386_v6  ;;  %v1602_v21 = vadd.s32 24, %v6450_v13  ;;  %vm6603_vm2 = vmand %vm6505_vm0, %vm1812_vm3 }
 0x165   : > { %v1930_v12 = vsel %vm6396_vm15, %v1113_v9, 0.0  ;;  %v1084_v34 = vadd.f32 %v6285_v22, %v1047_v33  ;;  %v5052_v32 = vpop.f32.mrf.mxu1  ;;  %vm6536_vm15 = vmand %vm1658_vm4, %vm1688_vm12  ;;  %v1322_v59 = vmul.u32 24, %v1321_v16  ;;  %v6561_v6 = vsub.s32 %v6254_v63, %v1300_v35  ;;  %v2035_v31 = vld [vmem:[#allocation2 + $0x18] sm:$0xff] }
 0x166   : > { %1967 = vst.msk [vmem:[#allocation2 + $0x28] sm:$0xff] %vm9009_vm10, %v1930_v12  ;;  %v941_v2 = vpop.f32.mrf.mxu0  ;;  %v1332_v15 = vshrl.u32 %v6435_v14, 4  ;;  %vm9014_vm14 = vcmp.ge.s32.totalorder %v6091_v28, %v6149_v56  ;;  %vm1689_vm12 = vcmp.le.s32.totalorder %v6490_v4, 16  ;;  %vm1660_vm5 = vcmp.ge.s32.totalorder %v6512_v11, 1 }
 0x167   : > { %v1114_v27 = vmax.f32 %v1084_v34, 0.0  ;;  %v1048_v55 = vadd.f32 %v941_v2, %v6022_v46  ;;  %vm6569_vm4 = vmand %vm6523_vm8, %vm9014_vm14  ;;  %v6576_v33 = vsub.s32 %v6262_v26, %v1311_v48  ;;  %v6579_v1 = vadd.s32 128, %v6046_v36 }
 0x168   : > { %v5065_v16 = vpop.f32.mrf.mxu0  ;;  %vm9017_vm9 = vcmp.ge.s32.totalorder %v6108_v53, %v6149_v56  ;;  %vm1690_vm10 = vcmp.le.s32.totalorder %v6512_v11, 16  ;;  %vm9020_vm14 = vcmask 261120   ;;  %v6612_v50 = vsel %vm6556_vm11, %v1602_v21, %v6450_v13 }
 0x169   : > { %v1931_v14 = vsel %vm6476_vm13, %v1114_v27, 0.0  ;;  %v1085_v35 = vadd.f32 %v6285_v22, %v1048_v55  ;;  %v2036_v12 = vld [vmem:[#allocation2 + $0x20] sm:$0xff]  ;;  %vm6589_vm1 = vmand %vm6536_vm15, %vm9017_vm9  ;;  %vm1661_vm13 = vcmp.ge.s32.totalorder %v6546_v25, 1  ;;  %v6615_v32 = vsub.s32 %v6300_v42, %v1322_v59 }
 0x16a   : > { %1968 = vst.msk [vmem:[#allocation2 + $0x30] sm:$0xff] %vm9020_vm14, %v1931_v14  ;;  %v944_v48 = vpop.f32.mrf.mxu0  ;;  %v2059_v62 = vpack.c.bf16 %v2036_v12, %v2035_v31  ;;  %v6618_v24 = vadd.s32 136, %v6046_v36  ;;  %vm9023_vm3 = vcmp.lt.s32.totalorder %v6091_v28, %v6151_v0  ;;  %vm1754_vm11 = vcmp.ge.s32.totalorder %v6145_v47, %v6149_v56 }
 0x16b   : > { %v1115_v40 = vmax.f32 %v1085_v35, 0.0  ;;  %v1049_v2 = vadd.f32 %v944_v48, %v6024_v52  ;;  %vm6626_vm0 = vmand %vm6569_vm4, %vm9023_vm3  ;;  %vm1513_vm9 = vcmp.ne.s32.totalorder %v6561_v6, 0  ;;  %v1333_v13 = vmul.u32 24, %v1332_v15 }
 0x16c   : > { %v5066_v21 = vpop.f32.mrf.mxu0  ;;  %5119 = vmatprep.mubr.msk.bf16.mxu1 %vm9020_vm14, %v2059_v62  ;;  %vm9026_vm15 = vcmp.lt.s32.totalorder %v6108_v53, %v6151_v0  ;;  %vm1543_vm4 = vcmp.lt.s32.totalorder %v6561_v6, 0  ;;  %vm1514_vm3 = vcmp.ne.s32.totalorder %v6576_v33, 0  ;;  %v1343_v9 = vshrl.u32 %v6529_v5, 4 }
 0x16d   : > { %vm6639_vm8 = vmand %vm6589_vm1, %vm9026_vm15  ;;  %v6646_v28 = vmul.u32.u64.low 2863311531, %v6579_v1  ;;  %v6647_v59 = vmul.u32.u64.high 2863311531, %v6579_v1, %v6646_v28  ;;  %v1932_v27 = vsel %vm6603_vm2, %v1115_v40, 0.0  ;;  %v1086_v55 = vadd.f32 %v6285_v22, %v1049_v2  ;;  %v2037_v2 = vld [vmem:[#allocation2 + $0x28] sm:$0xff] }
 0x16e   : > { %vm6656_vm1 = vmand %vm1659_vm7, %vm1689_vm12  ;;  %vm1544_vm15 = vcmp.lt.s32.totalorder %v6576_v33, 0  ;;  %1969 = vst.msk [vmem:[#allocation2 + $0x38] sm:$0xff] %vm9020_vm14, %v1932_v27  ;;  %v949_v15 = vpop.f32.mrf.mxu0  ;;  %vm1691_vm7 = vcmp.le.s32.totalorder %v6546_v25, 16  ;;  %v1603_v4 = vadd.s32 24, %v6561_v6  ;;  %v1604_v31 = vadd.s32 24, %v6576_v33 }
 0x16f   : > { %vm6667_vm2 = vmand %vm1660_vm5, %vm1690_vm10  ;;  %v6674_v46 = vmul.u32.u64.low 2863311531, %v6618_v24  ;;  %v6675_v14 = vmul.u32.u64.high 2863311531, %v6618_v24, %v6674_v46  ;;  %v1116_v5 = vmax.f32 %v1086_v55, 0.0  ;;  %v1050_v35 = vadd.f32 %v949_v15, %v6027_v57 }
 0x170   : > { %vm6682_vm12 = vmand %vm1543_vm4, %vm1513_vm9  ;;  %v6688_v12 = vsub.s32 %v6371_v54, %v1333_v13  ;;  %v5069_v34 = vpop.f32.mrf.mxu0  ;;  %vm1817_vm5 = vcmp.lt.s32.totalorder %v6145_v47, %v6151_v0  ;;  %vm1692_vm14 = vcmp.le.s32.totalorder %v6612_v50, 16  ;;  %v6703_v43 = vadd.s32 144, %v6046_v36 }
 0x171   : > { %vm6698_vm9 = vmand %vm1544_vm15, %vm1514_vm3  ;;  %v1933_v48 = vsel %vm6626_vm0, %v1116_v5, 0.0  ;;  %v1087_v62 = vadd.f32 %v6285_v22, %v1050_v35  ;;  %v2038_v13 = vld [vmem:[#allocation2 + $0x30] sm:$0xff]  ;;  %vm1515_vm3 = vcmp.ne.s32.totalorder %v6615_v32, 0  ;;  %v1344_v21 = vmul.u32 24, %v1343_v9  ;;  %v5544_v9 = vld [vmem:[%s8933_s3] sm:$0xff]  }
 0x172   : > { %vm6713_vm4 = vmand %vm6656_vm1, %vm1752_vm6  ;;  %vm9039_vm15 = vcmask 261120   ;;  %v952_v49 = vpop.f32.mrf.mxu0  ;;  %v2060_v28 = vpack.c.bf16 %v2038_v13, %v2037_v2  ;;  %vm9040_vm0 = vcmp.ge.s32.totalorder %v6138_v41, %v6149_v56  ;;  %v6733_v55 = vsel %vm6682_vm12, %v1603_v4, %v6561_v6 }
 0x173   : > { %1970 = vst.msk [vmem:[#allocation2 + $0x40] sm:$0xff] %vm9039_vm15, %v1933_v48  ;;  %vm6724_vm10 = vmand %vm6667_vm2, %vm9040_vm0  ;;  %vm1545_vm1 = vcmp.lt.s32.totalorder %v6615_v32, 0  ;;  %v1605_v53 = vadd.s32 24, %v6615_v32  ;;  %v1117_v15 = vmax.f32 %v1087_v62, 0.0  ;;  %v1051_v16 = vadd.f32 %v952_v49, %v6029_v61  ;;  %v5545_v62 = vld [vmem:[%s8933_s3 + $0x28] sm:$0xff]  }
 0x174   : > { %vm6745_vm2 = vmand %vm1661_vm13, %vm1691_vm7  ;;  %vm1756_vm12 = vcmp.ge.s32.totalorder %v6254_v63, %v6149_v56  ;;  %v6754_v6 = vsel %vm6698_vm9, %v1604_v31, %v6576_v33  ;;  %vm1516_vm15 = vcmp.ne.s32.totalorder %v6688_v12, 0  ;;  %vm9045_vm0 = vcmp.lt.s32.totalorder %v6126_v19, %v6151_v0  ;;  %v5070_v25 = vpop.f32.mrf.mxu0 }
 0x175   : > { %vm6762_vm6 = vmand %vm6713_vm4, %vm9045_vm0  ;;  %vm9048_vm13 = vcmask 261120   ;;  %v1354_v4 = vshrl.u32 %v6647_v59, 4  ;;  %v6769_v5 = vmul.u32.u64.low 2863311531, %v6703_v43  ;;  %v6770_v33 = vmul.u32.u64.high 2863311531, %v6703_v43, %v6769_v5  ;;  %v2672_v59 = vld [vmem:[#allocation2 + $0x2f] sm:$0xff]  ;;  %v2673_v34 = vld [vmem:[#allocation2 + $0x37] sm:$0xff] }
 0x176   : > { %5120 = vmatmul.mubr.msk.bf16.vlgmr.msra.gmra.mxu1 %vm9048_vm13, %v2060_v28  ;;  %v6773_v35 = vadd.s32 152, %v6046_v36  ;;  %v1934_v19 = vsel %vm6639_vm8, %v1117_v15, 0.0  ;;  %v1088_v11 = vadd.f32 %v6285_v22, %v1051_v16  ;;  %vm9049_vm7 = vcmp.lt.s32.totalorder %v6138_v41, %v6151_v0  ;;  %vm9052_vm8 = vmmov %vm9048_vm13  ;;  %v957_v41 = vpop.f32.mrf.mxu0 }
 0x177   : > { %vm6783_vm9 = vmand %vm6724_vm10, %vm9049_vm7  ;;  %vm1546_vm0 = vcmp.lt.s32.totalorder %v6688_v12, 0  ;;  %v6791_v52 = vsub.s32 %v6468_v20, %v1344_v21  ;;  %5144 = vmatpush3.bf16.msra.mxu1 %v6044_v7  ;;  %1971 = vst.msk [vmem:[#allocation2 + $0x48] sm:$0xff] %vm9052_vm8, %v1934_v19  ;;  %v2696_v57 = vpack.c.bf16 %v2673_v34, %v2672_v59  ;;  %vm1663_vm13 = vcmp.ge.s32.totalorder %v6733_v55, 1 }
 0x178   : > { %vm6800_vm10 = vmand %vm6745_vm2, %vm1754_vm11  ;;  %vm1693_vm7 = vcmp.le.s32.totalorder %v6733_v55, 16  ;;  %v1365_v7 = vshrl.u32 %v6675_v14, 4  ;;  %5145 = vmatprep.subr.bf16.mxu1 %v5544_v9  ;;  %v1118_v40 = vmax.f32 %v1088_v11, 0.0  ;;  %v1052_v2 = vadd.f32 %v957_v41, %v6031_v3  ;;  %v5073_v21 = vpop.f32.mrf.mxu0  ;;  %v5547_v3 = vld [vmem:[%s8933_s3 + $0x50] sm:$0xff]  }
 0x179   : > { %vm1757_vm2 = vcmp.ge.s32.totalorder %v6262_v26, %v6149_v56  ;;  %vm6820_vm8 = vmand %vm1545_vm1, %vm1515_vm3  ;;  %v1606_v14 = vadd.s32 24, %v6688_v12  ;;  %vm9057_vm4 = vcmask 261120   ;;  %v1355_v49 = vmul.u32 24, %v1354_v4  ;;  %v2039_v4 = vld [vmem:[#allocation2 + $0x38] sm:$0xff] }
 0x17a   : > { %5203 = vmatprep.mubr.msk.bf16.mxu0 %vm9057_vm4, %v2696_v57  ;;  %vm6830_vm11 = vmand %vm1546_vm0, %vm1516_vm15  ;;  %v6835_v28 = vmul.u32.u64.low 2863311531, %v6773_v35  ;;  %v6836_v27 = vmul.u32.u64.high 2863311531, %v6773_v35, %v6835_v28  ;;  %v6839_v15 = vadd.s32 160, %v6046_v36  ;;  %v1935_v16 = vsel %vm6762_vm6, %v1118_v40, 0.0  ;;  %v2040_v5 = vld [vmem:[#allocation2 + $0x40] sm:$0xff]  ;;  %v960_v61 = vpop.f32.mrf.mxu0 }
 0x17b   : > { %v1089_v46 = vadd.f32 %v6285_v22, %v1052_v2  ;;  %vm6849_vm3 = vmand %vm6800_vm10, %vm1817_vm5  ;;  %vm1517_vm1 = vcmp.ne.s32.totalorder %v6791_v52, 0  ;;  %vm1547_vm15 = vcmp.lt.s32.totalorder %v6791_v52, 0  ;;  %5146 = vmatpush3.bf16.msra.mxu1 %v5544_v9  ;;  %1972 = vst.msk [vmem:[#allocation2 + $0x50] sm:$0xff] %vm9057_vm4, %v1935_v16  ;;  %v2061_v19 = vpack.c.bf16 %v2040_v5, %v2039_v4  ;;  %v2674_v2 = vld [vmem:[#allocation2 + $0x3f] sm:$0xff] }
 0x17c   : > { %vm9062_vm6 = vcmp.ge.s32.totalorder %v6612_v50, 1  ;;  %vm1694_vm5 = vcmp.le.s32.totalorder %v6754_v6, 16  ;;  %v6868_v11 = vsel %vm6820_vm8, %v1605_v53, %v6615_v32  ;;  %v1366_v9 = vmul.u32 24, %v1365_v7  ;;  %5171 = vmatprep.subr.bf16.mxu1 %v5545_v62  ;;  %v5074_v53 = vpop.f32.mrf.mxu0  ;;  %vm9067_vm10 = vmmov %vm9057_vm4 }
 0x17d   : > { %vm6860_vm0 = vmand %vm9062_vm6, %vm1692_vm14  ;;  %v1119_v59 = vmax.f32 %v1089_v46, 0.0  ;;  %v1053_v34 = vadd.f32 %v960_v61, %v6033_v10  ;;  %v6882_v41 = vsel %vm6830_vm11, %v1606_v14, %v6688_v12  ;;  %v1607_v32 = vadd.s32 24, %v6791_v52  ;;  %5123 = vmatprep.mubr.msk.bf16.mxu1 %vm9067_vm10, %v2061_v19 }
 0x17e   : > { %vm6875_vm14 = vmand %vm1663_vm13, %vm1693_vm7  ;;  %vm1820_vm8 = vcmp.lt.s32.totalorder %v6262_v26, %v6151_v0  ;;  %v6897_v55 = vsub.s32 %v6579_v1, %v1355_v49  ;;  %v1376_v12 = vshrl.u32 %v6770_v33, 4  ;;  %vm9070_vm7 = vcmp.ge.s32.totalorder %v6178_v39, %v6149_v56  ;;  %v2675_v33 = vld [vmem:[#allocation2 + $0x47] sm:$0xff]  ;;  %v965_v31 = vpop.f32.mrf.mxu0 }
 0x17f   : > { %vm6892_vm13 = vmand %vm1547_vm15, %vm1517_vm1  ;;  %v6901_v57 = vmul.u32.u64.low 2863311531, %v6839_v15  ;;  %v6902_v48 = vmul.u32.u64.high 2863311531, %v6839_v15, %v6901_v57  ;;  %v1936_v7 = vsel %vm6783_vm9, %v1119_v59, 0.0  ;;  %v1090_v62 = vadd.f32 %v6285_v22, %v1053_v34  ;;  %v2041_v47 = vld [vmem:[#allocation2 + $0x48] sm:$0xff] }
 0x180   : > { %vm6912_vm11 = vmand %vm6860_vm0, %vm9070_vm7  ;;  %vm1665_vm1 = vcmp.ge.s32.totalorder %v6868_v11, 1  ;;  %vm1695_vm15 = vcmp.le.s32.totalorder %v6868_v11, 16  ;;  %1973 = vst.msk [vmem:[#allocation2 + $0x58] sm:$0xff] %vm9057_vm4, %v1936_v7  ;;  %v2697_v13 = vpack.c.bf16 %v2675_v33, %v2674_v2  ;;  %vm1666_vm0 = vcmp.ge.s32.totalorder %v6882_v41, 1 }
 0x181   : > { %vm6926_vm6 = vmand %vm6875_vm14, %vm1756_vm12  ;;  %vm1696_vm10 = vcmp.le.s32.totalorder %v6882_v41, 16  ;;  %v6935_v21 = vsub.s32 %v6618_v24, %v1366_v9  ;;  %v1120_v49 = vmax.f32 %v1090_v62, 0.0  ;;  %v1054_v28 = vadd.f32 %v965_v31, %v6035_v17 }
 0x182   : > { %vm9075_vm12 = vcmp.ge.s32.totalorder %v6754_v6, 1  ;;  %v6952_v46 = vsel %vm6892_vm13, %v1607_v32, %v6791_v52  ;;  %v6955_v4 = vadd.s32 168, %v6046_v36  ;;  %vm9078_vm4 = vcmp.lt.s32.totalorder %v6178_v39, %v6151_v0  ;;  %v5077_v6 = vpop.f32.mrf.mxu0  ;;  %v2042_v9 = vld [vmem:[#allocation2 + $0x50] sm:$0xff] }
 0x183   : > { %vm6945_vm14 = vmand %vm9075_vm12, %vm1694_vm5  ;;  %vm9081_vm5 = vcmask 261120   ;;  %vm1821_vm12 = vcmp.lt.s32.totalorder %v6300_v42, %v6151_v0  ;;  %vm1518_vm13 = vcmp.ne.s32.totalorder %v6897_v55, 0  ;;  %vm1548_vm9 = vcmp.lt.s32.totalorder %v6897_v55, 0 }
 0x184   : > { %vm6962_vm7 = vmand %vm6912_vm11, %vm9078_vm4  ;;  %5204 = vmatmul.mubr.msk.bf16.vlgmr.msra.gmra.mxu0 %vm9081_vm5, %v2697_v13  ;;  %v1377_v52 = vmul.u32 24, %v1376_v12  ;;  %v1387_v5 = vshrl.u32 %v6836_v27, 4  ;;  %v1937_v39 = vsel %vm6849_vm3, %v1120_v49, 0.0  ;;  %v1091_v61 = vadd.f32 %v6285_v22, %v1054_v28  ;;  %v968_v25 = vpop.f32.mrf.mxu0  ;;  %v2676_v13 = vld [vmem:[#allocation2 + $0x4f] sm:$0xff] }
 0x185   : > { %vm9082_vm11 = vcmp.lt.s32.totalorder %v6254_v63, %v6151_v0  ;;  %v1608_v59 = vadd.s32 24, %v6897_v55  ;;  %v6986_v27 = vadd.s32 176, %v6046_v36  ;;  %5256 = vmatpush3.bf16.msra.mxu0 %v6210_v18  ;;  %vm9085_vm3 = vmmov %vm9081_vm5  ;;  %v2062_v34 = vpack.c.bf16 %v2042_v9, %v2041_v47  ;;  %v7005_v18 = vld [vmem:[%s8933_s3 + $0x78] sm:$0xff]  }
 0x186   : > { %vm6980_vm4 = vmand %vm6926_vm6, %vm9082_vm11  ;;  %1974 = vst.msk [vmem:[#allocation2 + $0x60] sm:$0xff] %vm9085_vm3, %v1937_v39  ;;  %vm1519_vm5 = vcmp.ne.s32.totalorder %v6935_v21, 0  ;;  %vm1549_vm11 = vcmp.lt.s32.totalorder %v6935_v21, 0  ;;  %v1609_v50 = vadd.s32 24, %v6935_v21  ;;  %5257 = vmatprep.subr.bf16.mxu0 %v5547_v3  ;;  %v1121_v32 = vmax.f32 %v1091_v61, 0.0  ;;  %v5078_v7 = vpop.f32.mrf.mxu0 }
 0x187   : > { %vm6995_vm6 = vmand %vm6945_vm14, %vm1757_vm2  ;;  %v1055_v53 = vadd.f32 %v968_v25, %v6037_v23  ;;  %v7017_v12 = vmul.u32.u64.low 2863311531, %v6955_v4  ;;  %v7018_v57 = vmul.u32.u64.high 2863311531, %v6955_v4, %v7017_v12  ;;  %v7030_v11 = vsub.s32 %v6703_v43, %v1377_v52  ;;  %v2677_v14 = vld [vmem:[#allocation2 + $0x57] sm:$0xff] }
 0x188   : > { %vm7012_vm2 = vmand %vm1665_vm1, %vm1695_vm15  ;;  %v1388_v62 = vmul.u32 24, %v1387_v5  ;;  %v1398_v40 = vshrl.u32 %v6902_v48, 4  ;;  %v7034_v2 = vadd.s32 184, %v6046_v36  ;;  %v1938_v33 = vsel %vm6962_vm7, %v1121_v32, 0.0  ;;  %v973_v16 = vpop.f32.mrf.mxu0  ;;  %v2043_v25 = vld [vmem:[#allocation2 + $0x58] sm:$0xff] }
 0x189   : > { %vm9090_vm14 = vmmov %vm9085_vm3  ;;  %v1092_v31 = vadd.f32 %v6285_v22, %v1055_v53  ;;  %v7048_v48 = vmul.u32.u64.low 2863311531, %v6986_v27  ;;  %v7049_v28 = vmul.u32.u64.high 2863311531, %v6986_v27, %v7048_v48  ;;  %5258 = vmatpush3.bf16.msra.mxu0 %v5547_v3  ;;  %v2698_v17 = vpack.c.bf16 %v2677_v14, %v2676_v13 }
 0x18a   : > { %5124 = vmatmul.mubr.msk.bf16.gmra.mxu1 %vm9090_vm14, %v2062_v34  ;;  %vm7025_vm3 = vmand %vm1548_vm9, %vm1518_vm13  ;;  %vm1822_vm9 = vcmp.lt.s32.totalorder %v6371_v54, %v6151_v0  ;;  %vm1667_vm7 = vcmp.ge.s32.totalorder %v6952_v46, 1  ;;  %5311 = vmatprep.subr.bf16.mxu0 %v7005_v18  ;;  %v1056_v6 = vadd.f32 %v973_v16, %v6039_v30  ;;  %v5081_v39 = vpop.f32.mrf.mxu0  ;;  %v7091_v26 = vsub.s32 %v6773_v35, %v1388_v62 }
 0x18b   : > { %vm7043_vm1 = vmand %vm1666_vm0, %vm1696_vm10  ;;  %vm1760_vm0 = vcmp.ge.s32.totalorder %v6468_v20, %v6149_v56  ;;  %v1122_v3 = vmax.f32 %v1092_v31, 0.0  ;;  %v1638_v5 = vsel %vm7025_vm3, %v1608_v59, %v6897_v55  ;;  %v1399_v61 = vmul.u32 24, %v1398_v40 }
 0x18c   : > { %vm9095_vm15 = vmmov %vm9090_vm14  ;;  %vm1697_vm14 = vcmp.le.s32.totalorder %v6952_v46, 16  ;;  %v7094_v47 = vmul.u32.u64.low 2863311531, %v7034_v2  ;;  %v7095_v9 = vmul.u32.u64.high 2863311531, %v7034_v2, %v7094_v47  ;;  %v1093_v59 = vadd.f32 %v6285_v22, %v1056_v6  ;;  %v976_v32 = vpop.f32.mrf.mxu0 }
 0x18d   : > { %1975 = vst.msk [vmem:[#allocation2 + $0x68] sm:$0xff] %vm9095_vm15, %v1938_v33  ;;  %vm7061_vm10 = vmand %vm1549_vm11, %vm1519_vm5  ;;  %vm9101_vm11 = vcmp.ge.s32.totalorder %v6300_v42, %v6149_v56  ;;  %v1939_v55 = vsel %vm6980_vm4, %v1122_v3, 0.0  ;;  %v2044_v34 = vld [vmem:[#allocation2 + $0x60] sm:$0xff]  ;;  %vm1520_vm4 = vcmp.ne.s32.totalorder %v7030_v11, 0  ;;  %v1057_v12 = vadd.f32 %v976_v32, %v6048_v37 }
 0x18e   : > { %vm7072_vm13 = vmand %vm6995_vm6, %vm1820_vm8  ;;  %vm9104_vm8 = vcmp.ge.s32.totalorder %v6371_v54, %v6149_v56  ;;  %v1639_v19 = vsel %vm7061_vm10, %v1609_v50, %v6935_v21  ;;  %v2063_v53 = vpack.c.bf16 %v2044_v34, %v2043_v25  ;;  %vm1550_vm10 = vcmp.lt.s32.totalorder %v7030_v11, 0  ;;  %v5082_v23 = vpop.f32.mrf.mxu0  ;;  %v7161_v54 = vld [vmem:[#allocation2 + $0x5f] sm:$0xff] }
 0x18f   : > { %vm9100_vm5 = vmmov %vm9095_vm15  ;;  %v7128_v21 = vadd.s32 192, %v6046_v36  ;;  %v1123_v50 = vmax.f32 %v1093_v59, 0.0  ;;  %v1409_v7 = vshrl.u32 %v7018_v57, 4  ;;  %v1610_v42 = vadd.s32 24, %v7030_v11 }
 0x190   : > { %5207 = vmatprep.mubr.msk.bf16.mxu0 %vm9100_vm5, %v2698_v17  ;;  %vm7086_vm15 = vmand %vm7012_vm2, %vm9101_vm11  ;;  %vm1823_vm2 = vcmp.lt.s32.totalorder %v6468_v20, %v6151_v0  ;;  %v7156_v62 = vsub.s32 %v6839_v15, %v1399_v61  ;;  %v1094_v40 = vadd.f32 %v6285_v22, %v1057_v12  ;;  %v1420_v13 = vshrl.u32 %v7049_v28, 4  ;;  %v981_v14 = vpop.f32.mrf.mxu0 }
 0x191   : > { %vm7105_vm6 = vmand %vm7043_vm1, %vm9104_vm8  ;;  %v1940_v57 = vsel %vm7072_vm13, %v1123_v50, 0.0  ;;  %vm1551_vm13 = vcmp.lt.s32.totalorder %v7091_v26, 0  ;;  %vm1699_vm8 = vcmp.le.s32.totalorder %v1639_v19, 16  ;;  %v1058_v41 = vadd.f32 %v981_v14, %v6055_v45 }
 0x192   : > { %vm9107_vm3 = vmmov %vm9100_vm5  ;;  %vm1668_vm5 = vcmp.ge.s32.totalorder %v1638_v5, 1  ;;  %v7190_v16 = vmul.u32.u64.low 2863311531, %v7128_v21  ;;  %v7191_v17 = vmul.u32.u64.high 2863311531, %v7128_v21, %v7190_v16  ;;  %v1124_v28 = vmax.f32 %v1094_v40, 0.0  ;;  %v5085_v39 = vpop.f32.mrf.mxu0 }
 0x193   : > { %1976 = vst.msk [vmem:[#allocation2 + $0x70] sm:$0xff] %vm9107_vm3, %v1939_v55  ;;  %vm7120_vm1 = vmand %vm1667_vm7, %vm1697_vm14  ;;  %vm1698_vm14 = vcmp.le.s32.totalorder %v1638_v5, 16  ;;  %5127 = vmatprep.mubr.msk.bf16.mxu1 %vm9107_vm3, %v2063_v53  ;;  %v1611_v6 = vadd.s32 24, %v7091_v26  ;;  %v1410_v52 = vmul.u32 24, %v1409_v7  ;;  %v1431_v45 = vshrl.u32 %v7095_v9, 4 }
 0x194   : > { %vm7136_vm7 = vmand %vm7086_vm15, %vm1821_vm12  ;;  %vm1669_vm12 = vcmp.ge.s32.totalorder %v1639_v19, 1  ;;  %vm1521_vm15 = vcmp.ne.s32.totalorder %v7091_v26, 0  ;;  %v7163_v33 = vld [vmem:[#allocation2 + $0x67] sm:$0xff]  ;;  %1977 = vst.msk [vmem:[#allocation2 + $0x78] sm:$0xff] %vm9107_vm3, %v1940_v57  ;;  %v7214_v5 = vadd.s32 200, %v6046_v36  ;;  %v1095_v47 = vadd.f32 %v6285_v22, %v1058_v41  ;;  %v984_v63 = vpop.f32.mrf.mxu0 }
 0x195   : > { %vm7149_vm11 = vmand %vm7105_vm6, %vm1822_vm9  ;;  %vm1824_vm6 = vcmp.lt.s32.totalorder %v6579_v1, %v6151_v0  ;;  %v2699_v49 = vpack.c.bf16 %v7163_v33, %v7161_v54  ;;  %v1941_v61 = vsel %vm7136_vm7, %v1124_v28, 0.0  ;;  %v2045_v55 = vld [vmem:[#allocation2 + $0x68] sm:$0xff]  ;;  %v1421_v34 = vmul.u32 24, %v1420_v13 }
 0x196   : > { %vm7170_vm9 = vmand %vm7120_vm1, %vm1760_vm0  ;;  %vm1763_vm7 = vcmp.ge.s32.totalorder %v6703_v43, %v6149_v56  ;;  %v1612_v10 = vadd.s32 24, %v7156_v62  ;;  %v1125_v12 = vmax.f32 %v1095_v47, 0.0  ;;  %v1059_v46 = vadd.f32 %v984_v63, %v6060_v51 }
 0x197   : > { %vm7185_vm0 = vmand %vm1550_vm10, %vm1520_vm4  ;;  %v7253_v7 = vsub.s32 %v6955_v4, %v1410_v52  ;;  %v1432_v23 = vmul.u32 24, %v1431_v45  ;;  %v7270_v40 = vadd.s32 208, %v6046_v36  ;;  %v1442_v52 = vshrl.u32 %v7191_v17, 4 }
 0x198   : > { %vm7196_vm1 = vmand %vm1668_vm5, %vm1698_vm14  ;;  %vm1552_vm5 = vcmp.lt.s32.totalorder %v7156_v62, 0  ;;  %vm1825_vm14 = vcmp.lt.s32.totalorder %v6618_v24, %v6151_v0  ;;  %v1640_v53 = vsel %vm7185_vm0, %v1610_v42, %v7030_v11  ;;  %v1942_v20 = vsel %vm7149_vm11, %v1125_v12, 0.0 }
 0x199   : > { %vm9120_vm4 = vmmov %vm9107_vm3  ;;  %vm1522_vm3 = vcmp.ne.s32.totalorder %v7156_v62, 0  ;;  %v7266_v42 = vmul.u32.u64.low 2863311531, %v7214_v5  ;;  %v7267_v57 = vmul.u32.u64.high 2863311531, %v7214_v5, %v7266_v42  ;;  %v1096_v31 = vadd.f32 %v6285_v22, %v1059_v46 }
 0x19a   : > { %5208 = vmatmul.mubr.msk.bf16.gmra.mxu0 %vm9120_vm4, %v2699_v49  ;;  %vm7206_vm10 = vmand %vm1551_vm13, %vm1521_vm15  ;;  %v2046_v59 = vld [vmem:[#allocation2 + $0x70] sm:$0xff]  ;;  %v7287_v49 = vsub.s32 %v6986_v27, %v1421_v34  ;;  %vm9135_vm11 = vcmp.ge.s32.totalorder %v6618_v24, %v6149_v56  ;;  %v1613_v34 = vadd.s32 24, %v7253_v7  ;;  %v7360_v63 = vadd.s32 216, %v6046_v36 }
 0x19b   : > { %v7219_v25 = vld [vmem:[#allocation2 + $0x6f] sm:$0xff]  ;;  %vm9123_vm15 = vmmov %vm9120_vm4  ;;  %v2064_v9 = vpack.c.bf16 %v2046_v59, %v2045_v55  ;;  %v7242_v19 = vsel %vm7206_vm10, %v1611_v6, %v7091_v26  ;;  %v5086_v26 = vpop.f32.mrf.mxu0  ;;  %v7284_v14 = vld [vmem:[#allocation2 + $0x77] sm:$0xff]  ;;  %v1126_v41 = vmax.f32 %v1096_v31, 0.0  ;;  %v1443_v46 = vmul.u32 24, %v1442_v52 }
 0x19c   : > { %1978 = vst.msk [vmem:[#allocation2 + $0x80] sm:$0xff] %vm9123_vm15, %v1941_v61  ;;  %vm7226_vm13 = vmand %vm1669_vm12, %vm1699_vm8  ;;  %v2024_v50 = vpack.c.bf16 %v7219_v25, %v7163_v33  ;;  %v2700_v48 = vpack.c.bf16 %v7284_v14, %v7219_v25  ;;  %vm1764_vm15 = vcmp.ge.s32.totalorder %v6773_v35, %v6149_v56  ;;  %v2047_v47 = vld [vmem:[#allocation2 + $0x78] sm:$0xff]  ;;  %v1453_v11 = vshrl.u32 %v7267_v57, 4 }
 0x19d   : > { %vm7248_vm8 = vmand %vm1552_vm5, %vm1522_vm3  ;;  %v989_v37 = vpop.f32.mrf.mxu0  ;;  %vm1700_vm3 = vcmp.le.s32.totalorder %v1640_v53, 16  ;;  %vm1671_vm5 = vcmp.ge.s32.totalorder %v7242_v19, 1 }
 0x19e   : > { %vm7260_vm12 = vmand %vm7170_vm9, %vm1823_vm2  ;;  %vm9131_vm2 = vcmp.ge.s32.totalorder %v6579_v1, %v6149_v56  ;;  %v7307_v28 = vsel %vm7248_vm8, %v1612_v10, %v7156_v62  ;;  %v1060_v3 = vadd.f32 %v989_v37, %v6067_v60  ;;  %vm9140_vm8 = vcmask 261120  }
 0x19f   : > { %vm9130_vm0 = vmmov %vm9120_vm4  ;;  %vm1670_vm4 = vcmp.ge.s32.totalorder %v1640_v53, 1  ;;  %v5089_v62 = vpop.f32.mrf.mxu0  ;;  %5211 = vmatprep.mubr.msk.bf16.mxu0 %vm9140_vm8, %v2700_v48  ;;  %v7327_v60 = vsub.s32 %v7034_v2, %v1432_v23  ;;  %v7331_v39 = vmul.u32.u64.low 2863311531, %v7270_v40  ;;  %v7332_v1 = vmul.u32.u64.high 2863311531, %v7270_v40, %v7331_v39  ;;  %v9192_v53 = vld [vmem:[#allocation13_spill] sm:$0xff] }
 0x1a0   : > { %5128 = vmatmul.mubr.msk.bf16.gmra.mxu1 %vm9130_vm0, %v2064_v9  ;;  %vm7280_vm9 = vmand %vm7196_vm1, %vm9131_vm2  ;;  %vm1553_vm2 = vcmp.lt.s32.totalorder %v7253_v7, 0  ;;  %v1943_v30 = vsel %vm7260_vm12, %v1126_v41, 0.0  ;;  %v1097_v45 = vadd.f32 %v6285_v22, %v1060_v3  ;;  %vm1524_vm8 = vcmp.ne.s32.totalorder %v7287_v49, 0 }
 0x1a1   : > { %vm9134_vm10 = vmmov %vm9130_vm0  ;;  %vm1523_vm0 = vcmp.ne.s32.totalorder %v7253_v7, 0  ;;  %vm1554_vm12 = vcmp.lt.s32.totalorder %v7287_v49, 0  ;;  %v992_v55 = vpop.f32.mrf.mxu0  ;;  %v1614_v10 = vadd.s32 24, %v7287_v49  ;;  %v1615_v57 = vadd.s32 24, %v7327_v60 }
 0x1a2   : > { %1979 = vst.msk [vmem:[#allocation2 + $0x88] sm:$0xff] %vm9134_vm10, %v1942_v20  ;;  %vm7297_vm1 = vmand %vm7226_vm13, %vm9135_vm11  ;;  %vm9143_vm11 = vcmask 261120   ;;  %v1127_v9 = vmax.f32 %v1097_v45, 0.0  ;;  %v1061_v32 = vadd.f32 %v992_v55, %v6075_v8  ;;  %v1454_v52 = vmul.u32 24, %v1453_v11 }
 0x1a3   : > { %vm7319_vm10 = vmand %vm7280_vm9, %vm1824_vm6  ;;  %v2048_v17 = vld [vmem:[#allocation2 + $0x80] sm:$0xff]  ;;  %1980 = vst.msk [vmem:[#allocation2 + $0x90] sm:$0xff] %vm9143_vm11, %v1943_v30  ;;  %v5090_v12 = vpop.f32.mrf.mxu0  ;;  %v7420_v48 = vmul.u32.u64.low 2863311531, %v7360_v63  ;;  %v7421_v16 = vmul.u32.u64.high 2863311531, %v7360_v63, %v7420_v48  ;;  %v1464_v39 = vshrl.u32 %v7332_v1, 4 }
 0x1a4   : > { %vm7342_vm6 = vmand %vm7297_vm1, %vm1825_vm14  ;;  %v2065_v59 = vpack.c.bf16 %v2048_v17, %v2047_v47  ;;  %vm1701_vm14 = vcmp.le.s32.totalorder %v7242_v19, 16  ;;  %vm1672_vm1 = vcmp.ge.s32.totalorder %v7307_v28, 1  ;;  %v1944_v51 = vsel %vm7319_vm10, %v1127_v9, 0.0  ;;  %v7399_v42 = vld [vmem:[#allocation2 + $0x7f] sm:$0xff] }
 0x1a5   : > { %vm7353_vm13 = vmand %vm1670_vm4, %vm1700_vm3  ;;  %v1098_v26 = vadd.f32 %v6285_v22, %v1061_v32  ;;  %v997_v22 = vpop.f32.mrf.mxu0  ;;  %v7519_v8 = vsub.s32 %v7214_v5, %v1454_v52  ;;  %v9181_v19 = vld [vmem:[#allocation12_spill] sm:$0xff] }
 0x1a6   : > { %vm7370_vm4 = vmand %vm1553_vm2, %vm1523_vm0  ;;  %vm1555_vm0 = vcmp.lt.s32.totalorder %v7327_v60, 0  ;;  %v1062_v3 = vadd.f32 %v997_v22, %v6093_v29 }
 0x1a7   : > { %vm9148_vm3 = vmmov %vm9143_vm11  ;;  %vm1525_vm11 = vcmp.ne.s32.totalorder %v7327_v60, 0  ;;  %v1643_v37 = vsel %vm7370_vm4, %v1613_v34, %v7253_v7  ;;  %v1128_v41 = vmax.f32 %v1098_v26, 0.0  ;;  %v7438_v7 = vadd.s32 224, %v6046_v36  ;;  %v5093_v62 = vpop.f32.mrf.mxu0 }
 0x1a8   : > { %5131 = vmatprep.mubr.msk.bf16.mxu1 %vm9148_vm3, %v2065_v59  ;;  %vm7380_vm9 = vmand %vm1554_vm12, %vm1524_vm8  ;;  %vm1702_vm8 = vcmp.le.s32.totalorder %v7307_v28, 16  ;;  %vm1766_vm12 = vcmp.ge.s32.totalorder %v6955_v4, %v6149_v56  ;;  %v7460_v28 = vld [vmem:[%s8932_s2] ss:$0 sm:$0xff]  ;;  %vm9164_vm4 = vcmp.lt.s32.totalorder %v6703_v43, %v6151_v0  ;;  %v7489_v34 = vadd.s32 232, %v6046_v36  ;;  %v9167_v43 = vld [vmem:[#allocation11_spill] sm:$0xff] }
 0x1a9   : > { %vm7395_vm2 = vmand %vm7353_vm13, %vm1763_vm7  ;;  %v7401_v20 = vld [vmem:[#allocation2 + $0x87] sm:$0xff]  ;;  %v7427_v6 = vsel %vm7380_vm9, %v1614_v10, %v7287_v49  ;;  %v7452_v49 = vsub.s32 %v7128_v21, %v1443_v46  ;;  %v1945_v30 = vsel %vm7342_vm6, %v1128_v41, 0.0  ;;  %v1099_v45 = vadd.f32 %v7460_v28, %v1062_v3  ;;  %v1000_v55 = vpop.f32.mrf.mxu0 }
 0x1aa   : > { %vm9153_vm10 = vmmov %vm9148_vm3  ;;  %v2701_v31 = vpack.c.bf16 %v7401_v20, %v7399_v42  ;;  %v2049_v1 = vld [vmem:[#allocation2 + $0x88] sm:$0xff]  ;;  %v2050_v17 = vld [vmem:[#allocation2 + $0x90] sm:$0xff]  ;;  %vm1703_vm6 = vcmp.le.s32.totalorder %v1643_v37, 16  ;;  %v1063_v32 = vadd.f32 %v1000_v55, %v9167_v43  ;;  %v1465_v46 = vmul.u32 24, %v1464_v39 }
 0x1ab   : > { %1981 = vst.msk [vmem:[#allocation2 + $0x98] sm:$0xff] %vm9153_vm10, %v1944_v51  ;;  %vm7412_vm7 = vmand %vm1671_vm5, %vm1701_vm14  ;;  %v7482_v59 = vpack.c.bf16 %v2050_v17, %v2049_v1  ;;  %v1129_v9 = vmax.f32 %v1099_v45, 0.0  ;;  %v7502_v10 = vmul.u32.u64.low 2863311531, %v7438_v7  ;;  %v7503_v12 = vmul.u32.u64.high 2863311531, %v7438_v7, %v7502_v10  ;;  %v7524_v51 = vld [vmem:[#allocation2 + $0x8f] sm:$0xff] }
 0x1ac   : > { %vm7433_vm5 = vmand %vm1555_vm0, %vm1525_vm11  ;;  %vm9168_vm0 = vcmp.ge.s32.totalorder %v6839_v15, %v6149_v56  ;;  %v1100_v11 = vadd.f32 %v7460_v28, %v1063_v32  ;;  %v7550_v48 = vmul.u32.u64.low 2863311531, %v7489_v34  ;;  %v7551_v41 = vmul.u32.u64.high 2863311531, %v7489_v34, %v7550_v48 }
 0x1ad   : > { %vm9158_vm13 = vmmov %vm9148_vm3  ;;  %v1645_v24 = vsel %vm7433_vm5, %v1615_v57, %v7327_v60  ;;  %v5094_v60 = vpop.f32.mrf.mxu0  ;;  %vm1526_vm5 = vcmp.ne.s32.totalorder %v7452_v49, 0  ;;  %v1616_v57 = vadd.s32 24, %v7452_v49  ;;  %v7575_v52 = vsub.s32 %v7270_v40, %v1465_v46 }
 0x1ae   : > { %5212 = vmatmul.mubr.msk.bf16.gmra.mxu0 %vm9158_vm13, %v2701_v31  ;;  %vm7445_vm9 = vmand %vm1672_vm1, %vm1702_vm8  ;;  %vm1673_vm1 = vcmp.ge.s32.totalorder %v1643_v37, 1  ;;  %vm9171_vm8 = vcmp.lt.s32.totalorder %v6773_v35, %v6151_v0  ;;  %vm1556_vm13 = vcmp.lt.s32.totalorder %v7452_v49, 0  ;;  %v1475_v37 = vshrl.u32 %v7421_v16, 4 }
 0x1af   : > { %vm7468_vm14 = vmand %vm7412_vm7, %vm1764_vm15  ;;  %vm1674_vm15 = vcmp.ge.s32.totalorder %v7427_v6, 1  ;;  %v1005_v22 = vpop.f32.mrf.mxu0  ;;  %v1130_v3 = vmax.f32 %v1100_v11, 0.0  ;;  %v1486_v36 = vshrl.u32 %v7503_v12, 4  ;;  %v2026_v33 = vpack.c.bf16 %v7524_v51, %v7401_v20 }
 0x1b0   : > { %vm9163_vm11 = vmmov %vm9148_vm3  ;;  %v1064_v62 = vadd.f32 %v1005_v22, %v9181_v19  ;;  %v1476_v43 = vmul.u32 24, %v1475_v37  ;;  %v1497_v37 = vshrl.u32 %v7551_v41, 4 }
 0x1b1   : > { %1982 = vst.msk [vmem:[#allocation2 + $0xa0] sm:$0xff] %vm9163_vm11, %v1945_v30  ;;  %vm7478_vm3 = vmand %vm7395_vm2, %vm9164_vm4  ;;  %vm9178_vm4 = vcmp.lt.s32.totalorder %v6839_v15, %v6151_v0  ;;  %v5097_v29 = vpop.f32.mrf.mxu0 }
 0x1b2   : > { %vm7497_vm2 = vmand %vm7445_vm9, %vm9168_vm0  ;;  %v1946_v35 = vsel %vm7478_vm3, %v1129_v9, 0.0  ;;  %v7526_v26 = vld [vmem:[#allocation2 + $0x97] sm:$0xff]  ;;  %v1101_v30 = vadd.f32 %v7460_v28, %v1064_v62  ;;  %v1617_v9 = vadd.s32 24, %v7519_v8  ;;  %v1498_v55 = vmul.u32 24, %v1497_v37 }
 0x1b3   : > { %vm7510_vm10 = vmand %vm7468_vm14, %vm9171_vm8  ;;  %vm1704_vm14 = vcmp.le.s32.totalorder %v7427_v6, 16  ;;  %v2702_v13 = vpack.c.bf16 %v7526_v26, %v7524_v51  ;;  %v7582_v45 = vld [vmem:[#allocation2 + $0x98] sm:$0xff]  ;;  %v1008_v17 = vpop.f32.mrf.mxu0 }
 0x1b4   : > { %vm9174_vm7 = vmmov %vm9163_vm11  ;;  %v1947_v39 = vsel %vm7510_vm10, %v1130_v3, 0.0  ;;  %v1131_v32 = vmax.f32 %v1101_v30, 0.0  ;;  %v1065_v10 = vadd.f32 %v1008_v17, %v9192_v53  ;;  %v9203_v3 = vld [vmem:[#allocation14_spill] sm:$0xff] }
 0x1b5   : > { %5132 = vmatmul.mubr.msk.bf16.gmra.mxu1 %vm9174_vm7, %v7482_v59  ;;  %vm7530_vm9 = vmand %vm1673_vm1, %vm1703_vm6  ;;  %vm1675_vm1 = vcmp.ge.s32.totalorder %v1645_v24, 1  ;;  %vm1705_vm6 = vcmp.le.s32.totalorder %v1645_v24, 16 }
 0x1b6   : > { %vm9177_vm11 = vmmov %vm9174_vm7  ;;  %v1102_v46 = vadd.f32 %v7460_v28, %v1065_v10 }
 0x1b7   : > { %1983 = vst.msk [vmem:[#allocation2 + $0xa8] sm:$0xff] %vm9177_vm11, %v1946_v35  ;;  %vm7542_vm3 = vmand %vm7497_vm2, %vm9178_vm4  ;;  %vm1557_vm11 = vcmp.lt.s32.totalorder %v7519_v8, 0 }
 0x1b8   : > { %vm7558_vm0 = vmand %vm1556_vm13, %vm1526_vm5  ;;  %vm1829_vm5 = vcmp.lt.s32.totalorder %v6955_v4, %v6151_v0  ;;  %v2052_v47 = vld [vmem:[#allocation2 + $0xa0] sm:$0xff]  ;;  %vm1767_vm13 = vcmp.ge.s32.totalorder %v6986_v27, %v6149_v56  ;;  %v1948_v12 = vsel %vm7542_vm3, %v1131_v32, 0.0  ;;  %v1132_v48 = vmax.f32 %v1102_v46, 0.0 }
 0x1b9   : > { %vm9184_vm2 = vmmov %vm9174_vm7  ;;  %vm1527_vm7 = vcmp.ne.s32.totalorder %v7519_v8, 0  ;;  %v7596_v61 = vpack.c.bf16 %v2052_v47, %v7582_v45  ;;  %v1646_v6 = vsel %vm7558_vm0, %v1616_v57, %v7452_v49  ;;  %v5098_v49 = vpop.f32.mrf.mxu0  ;;  %vm1831_vm0 = vcmp.lt.s32.totalorder %v7034_v2, %v6151_v0  ;;  %v7648_v11 = vld [vmem:[#allocation2 + $0x9f] sm:$0xff] }
 0x1ba   : > { %5215 = vmatprep.mubr.msk.bf16.mxu0 %vm9184_vm2, %v2702_v13  ;;  %vm7568_vm8 = vmand %vm7530_vm9, %vm1766_vm12  ;;  %v7668_v13 = vsub.s32 %v7360_v63, %v1476_v43  ;;  %v2027_v25 = vpack.c.bf16 %v7648_v11, %v7526_v26 }
 0x1bb   : > { %vm7588_vm12 = vmand %vm1674_vm15, %vm1704_vm14  ;;  %vm1768_vm15 = vcmp.ge.s32.totalorder %v7034_v2, %v6149_v56  ;;  %v1013_v57 = vpop.f32.mrf.mxu0 }
 0x1bc   : > { %vm9189_vm10 = vmmov %vm9184_vm2  ;;  %v1066_v19 = vadd.f32 %v1013_v57, %v9203_v3  ;;  %v1619_v57 = vadd.s32 24, %v7668_v13  ;;  %v9223_v3 = vld [vmem:[#allocation16_spill] sm:$0xff] }
 0x1bd   : > { %1984 = vst.msk [vmem:[#allocation2 + $0xb0] sm:$0xff] %vm9189_vm10, %v1947_v39  ;;  %vm7600_vm9 = vmand %vm1675_vm1, %vm1705_vm6  ;;  %vm1830_vm6 = vcmp.lt.s32.totalorder %v6986_v27, %v6151_v0  ;;  %v5101_v15 = vpop.f32.mrf.mxu0  ;;  %v1618_v27 = vadd.s32 24, %v7575_v52 }
 0x1be   : > { %vm7615_vm14 = vmand %vm1557_vm11, %vm1527_vm7  ;;  %v7650_v23 = vld [vmem:[#allocation2 + $0xa7] sm:$0xff]  ;;  %vm1676_vm11 = vcmp.ge.s32.totalorder %v1646_v6, 1  ;;  %v1103_v16 = vadd.f32 %v7460_v28, %v1066_v19 }
 0x1bf   : > { %vm9195_vm4 = vmmov %vm9184_vm2  ;;  %vm1528_vm2 = vcmp.ne.s32.totalorder %v7575_v52, 0  ;;  %v2703_v22 = vpack.c.bf16 %v7650_v23, %v7648_v11  ;;  %v1647_v31 = vsel %vm7615_vm14, %v1617_v9, %v7519_v8  ;;  %v1487_v8 = vmul.u32 24, %v1486_v36  ;;  %v7704_v30 = vld [vmem:[#allocation2 + $0xa8] sm:$0xff]  ;;  %v1016_v1 = vpop.f32.mrf.mxu0  ;;  %v9214_v9 = vld [vmem:[#allocation15_spill] sm:$0xff] }
 0x1c0   : > { %5135 = vmatprep.mubr.msk.bf16.mxu1 %vm9195_vm4, %v7596_v61  ;;  %vm7627_vm1 = vmand %vm7588_vm12, %vm1767_vm13  ;;  %vm1706_vm12 = vcmp.le.s32.totalorder %v1646_v6, 16  ;;  %v1133_v6 = vmax.f32 %v1103_v16, 0.0  ;;  %v1067_v43 = vadd.f32 %v1016_v1, %v9214_v9 }
 0x1c1   : > { %vm7644_vm7 = vmand %vm7568_vm8, %vm1829_vm5  ;;  %vm1558_vm5 = vcmp.lt.s32.totalorder %v7575_v52, 0  ;;  %v1488_v53 = vsub.s32 %v7438_v7, %v1487_v8  ;;  %v5102_v10 = vpop.f32.mrf.mxu0 }
 0x1c2   : > { %vm9200_vm13 = vmmov %vm9195_vm4  ;;  %v1949_v29 = vsel %vm7644_vm7, %v1132_v48, 0.0  ;;  %vm1529_vm7 = vcmp.ne.s32.totalorder %v7668_v13, 0  ;;  %v1104_v49 = vadd.f32 %v7460_v28, %v1067_v43 }
 0x1c3   : > { %1985 = vst.msk [vmem:[#allocation2 + $0xb8] sm:$0xff] %vm9200_vm13, %v1948_v12  ;;  %vm7660_vm3 = vmand %vm7600_vm9, %vm1768_vm15  ;;  %vm1769_vm15 = vcmp.ge.s32.totalorder %v7128_v21, %v6149_v56  ;;  %v1620_v1 = vadd.s32 24, %v1488_v53 }
 0x1c4   : > { %vm7677_vm8 = vmand %vm7627_vm1, %vm1830_vm6  ;;  %v7706_v47 = vld [vmem:[#allocation2 + $0xb0] sm:$0xff]  ;;  %vm1707_vm1 = vcmp.le.s32.totalorder %v1647_v31, 16  ;;  %v1134_v48 = vmax.f32 %v1104_v49, 0.0 }
 0x1c5   : > { %vm9206_vm10 = vmmov %vm9195_vm4  ;;  %vm1677_vm4 = vcmp.ge.s32.totalorder %v1647_v31, 1  ;;  %v7711_v17 = vpack.c.bf16 %v7706_v47, %v7704_v30  ;;  %v1950_v36 = vsel %vm7677_vm8, %v1133_v6, 0.0  ;;  %v7746_v60 = vld [vmem:[#allocation2 + $0xaf] sm:$0xff]  ;;  %vm1832_vm8 = vcmp.lt.s32.totalorder %v7128_v21, %v6151_v0  ;;  %v9232_v6 = vld [vmem:[#allocation17_spill] sm:$0xff] }
 0x1c6   : > { %5216 = vmatmul.mubr.msk.bf16.gmra.mxu0 %vm9206_vm10, %v2703_v22  ;;  %vm7685_vm9 = vmand %vm1676_vm11, %vm1706_vm12  ;;  %v1021_v22 = vpop.f32.mrf.mxu0  ;;  %v1995_v21 = vld [vmem:[#allocation2 + $0x17] sm:$0xff]  ;;  %v2028_v20 = vpack.c.bf16 %v7746_v60, %v7650_v23  ;;  %v8062_v26 = vld [vmem:[#allocation2 + $0xa9] sm:$0xff] }
 0x1c7   : > { %vm7700_vm14 = vmand %vm7660_vm3, %vm1831_vm0  ;;  %vm1770_vm3 = vcmp.ge.s32.totalorder %v7214_v5, %v6149_v56  ;;  %v1068_v19 = vadd.f32 %v1021_v22, %v9223_v3  ;;  %v2431_v23 = vld [vmem:[#allocation2 + $0x21] sm:$0xff] }
 0x1c8   : > { %vm9211_vm6 = vmmov %vm9206_vm10  ;;  %v5105_v62 = vpop.f32.mrf.mxu0  ;;  %v1951_v15 = vsel %vm7700_vm14, %v1134_v48, 0.0 }
 0x1c9   : > { %1986 = vst.msk [vmem:[#allocation2 + $0xc0] sm:$0xff] %vm9211_vm6, %v1949_v29  ;;  %vm7717_vm0 = vmand %vm1558_vm5, %vm1528_vm2  ;;  %vm1559_vm2 = vcmp.lt.s32.totalorder %v7668_v13, 0  ;;  %v1105_v41 = vadd.f32 %v7460_v28, %v1068_v19  ;;  %v9240_v19 = vld [vmem:[#allocation18_spill] sm:$0xff] }
 0x1ca   : > { %vm7728_vm11 = vmand %vm7685_vm9, %vm1769_vm15  ;;  %v7748_v12 = vld [vmem:[#allocation2 + $0xb7] sm:$0xff]  ;;  %v1648_v35 = vsel %vm7717_vm0, %v1618_v27, %v7575_v52  ;;  %v1499_v52 = vsub.s32 %v7489_v34, %v1498_v55  ;;  %vm1530_vm9 = vcmp.ne.s32.totalorder %v1488_v53, 0  ;;  %vm1560_vm15 = vcmp.lt.s32.totalorder %v1488_v53, 0  ;;  %v1024_v39 = vpop.f32.mrf.mxu0 }
 0x1cb   : > { %vm9217_vm12 = vmmov %vm9211_vm6  ;;  %v7750_v46 = vld [vmem:[#allocation2 + $0xb8] sm:$0xff]  ;;  %v2704_v4 = vpack.c.bf16 %v7748_v12, %v7746_v60  ;;  %vm1678_vm0 = vcmp.ge.s32.totalorder %v1648_v35, 1  ;;  %v1135_v55 = vmax.f32 %v1105_v41, 0.0  ;;  %v1069_v9 = vadd.f32 %v1024_v39, %v9232_v6 }
 0x1cc   : > { %5136 = vmatmul.mubr.msk.bf16.gmra.mxu1 %vm9217_vm12, %v7711_v17  ;;  %vm7737_vm13 = vmand %vm1677_vm4, %vm1707_vm1  ;;  %v2946_v37 = vpack.c.bf16 %v7750_v46, %v7706_v47  ;;  %v5106_v43 = vpop.f32.mrf.mxu0 }
 0x1cd   : > { %vm9220_vm5 = vmmov %vm9211_vm6  ;;  %vm1833_vm6 = vcmp.lt.s32.totalorder %v7214_v5, %v6151_v0  ;;  %v1621_v5 = vadd.s32 24, %v1499_v52  ;;  %v1106_v24 = vadd.f32 %v7460_v28, %v1069_v9  ;;  %v9250_v43 = vld [vmem:[#allocation9_spill] sm:$0xff] }
 0x1ce   : > { %1987 = vst.msk [vmem:[#allocation2 + $0xc8] sm:$0xff] %vm9220_vm5, %v1950_v36  ;;  %vm7765_vm10 = vmand %vm1559_vm2, %vm1529_vm7  ;;  %vm1708_vm7 = vcmp.le.s32.totalorder %v1648_v35, 16  ;;  %v1029_v22 = vpop.f32.mrf.mxu0  ;;  %v784_v32 = vadd.f32 %v6420_v58, %v9250_v43 }
 0x1cf   : > { %vm9224_vm4 = vmmov %vm9220_vm5  ;;  %v1649_v16 = vsel %vm7765_vm10, %v1619_v57, %v7668_v13  ;;  %vm1771_vm10 = vcmp.ge.s32.totalorder %v7270_v40, %v6149_v56  ;;  %v1136_v3 = vmax.f32 %v1106_v24, 0.0  ;;  %v1070_v62 = vadd.f32 %v1029_v22, %v9240_v19 }
 0x1d0   : > { %5219 = vmatprep.mubr.msk.bf16.mxu0 %vm9224_vm4, %v2704_v4  ;;  %vm7779_vm1 = vmand %vm7737_vm13, %vm1770_vm3  ;;  %v7797_v29 = vld [vmem:[#allocation2 + $0xc0] sm:$0xff]  ;;  %vm1531_vm13 = vcmp.ne.s32.totalorder %v1499_v52, 0  ;;  %vm1561_vm3 = vcmp.lt.s32.totalorder %v1499_v52, 0 }
 0x1d1   : > { %vm7793_vm2 = vmand %vm7728_vm11, %vm1832_vm8  ;;  %v7805_v2 = vpack.c.bf16 %v7797_v29, %v7750_v46  ;;  %v7836_v36 = vld [vmem:[#allocation2 + $0xbf] sm:$0xff]  ;;  %v1107_v27 = vadd.f32 %v7460_v28, %v1070_v62 }
 0x1d2   : > { %vm9229_vm12 = vmmov %vm9224_vm4  ;;  %v1952_v10 = vsel %vm7793_vm2, %v1135_v55, 0.0  ;;  %v2000_v62 = vld [vmem:[#allocation2 + $0x3f] sm:$0xff]  ;;  %v8060_v51 = vpack.c.bf16 %v7836_v36, %v7748_v12 }
 0x1d3   : > { %1988 = vst.msk [vmem:[#allocation2 + $0xd0] sm:$0xff] %vm9229_vm12, %v1951_v15  ;;  %vm7809_vm14 = vmand %vm1560_vm15, %vm1530_vm9  ;;  %vm1679_vm9 = vcmp.ge.s32.totalorder %v1649_v16, 1  ;;  %vm1709_vm15 = vcmp.le.s32.totalorder %v1649_v16, 16  ;;  %vm1772_vm12 = vcmp.ge.s32.totalorder %v7360_v63, %v6149_v56  ;;  %v1996_v15 = vld [vmem:[#allocation2 + $0x1f] sm:$0xff]  ;;  %v1137_v55 = vmax.f32 %v1107_v27, 0.0 }
 0x1d4   : > { %vm7819_vm11 = vmand %vm7779_vm1, %vm1833_vm6  ;;  %v1650_v57 = vsel %vm7809_vm14, %v1620_v1, %v1488_v53  ;;  %1989 = vst.msk [vmem:[#allocation2 + $0xd8] sm:$0xff] %vm9224_vm4, %v1952_v10  ;;  %v5109_v53 = vpop.f32.mrf.mxu0  ;;  %v8065_v11 = vld [vmem:[#allocation2 + $0xb9] sm:$0xff] }
 0x1d5   : > { %vm9235_vm5 = vmmov %vm9224_vm4  ;;  %v7838_v49 = vld [vmem:[#allocation2 + $0xc7] sm:$0xff]  ;;  %vm1680_vm14 = vcmp.ge.s32.totalorder %v1650_v57, 1  ;;  %v1953_v41 = vsel %vm7819_vm11, %v1136_v3, 0.0  ;;  %v1998_v3 = vld [vmem:[#allocation2 + $0x2f] sm:$0xff] }
 0x1d6   : > { %5139 = vmatprep.mubr.msk.bf16.mxu1 %vm9235_vm5, %v7805_v2  ;;  %vm7827_vm8 = vmand %vm1678_vm0, %vm1708_vm7  ;;  %v7840_v35 = vld [vmem:[#allocation2 + $0xc8] sm:$0xff]  ;;  %v2705_v4 = vpack.c.bf16 %v7838_v49, %v7836_v36  ;;  %vm1834_vm0 = vcmp.lt.s32.totalorder %v7270_v40, %v6151_v0  ;;  %v1032_v16 = vpop.f32.mrf.mxu0  ;;  %v2430_v36 = vld [vmem:[#allocation2 + $0x19] sm:$0xff] }
 0x1d7   : > { %vm7849_vm1 = vmand %vm1561_vm3, %vm1531_vm13  ;;  %v2947_v48 = vpack.c.bf16 %v7840_v35, %v7797_v29  ;;  %vm1710_vm13 = vcmp.le.s32.totalorder %v1650_v57, 16  ;;  %v1071_v6 = vadd.f32 %v1032_v16, %v6373_v44  ;;  %v9256_v53 = vld [vmem:[#allocation10_spill] sm:$0xff]  ;;  %v7958_v44 = vld [vmem:[#allocation2 + $0x39] sm:$0xff] }
 0x1d8   : > { %vm1801_vm6 = vmand %vm7827_vm8, %vm1771_vm10  ;;  %v1651_v40 = vsel %vm7849_vm1, %v1621_v5, %v1499_v52  ;;  %vm1835_vm8 = vcmp.lt.s32.totalorder %v7360_v63, %v6151_v0  ;;  %v2019_v52 = vpack.c.bf16 %v1996_v15, %v1995_v21  ;;  %v5110_v13 = vpop.f32.mrf.mxu0  ;;  %v787_v8 = vadd.f32 %v6484_v38, %v9256_v53  ;;  %v1999_v21 = vld [vmem:[#allocation2 + $0x37] sm:$0xff] }
 0x1d9   : > { %vm9241_vm7 = vmmov %vm9224_vm4  ;;  %v1108_v10 = vadd.f32 %v7460_v28, %v1071_v6  ;;  %v2021_v13 = vpack.c.bf16 %v2000_v62, %v1999_v21  ;;  %v2001_v62 = vld [vmem:[#allocation2 + $0x47] sm:$0xff]  ;;  %v8008_v21 = vld [vmem:[#allocation2 + $0x51] sm:$0xff] }
 0x1da   : > { %5220 = vmatmul.mubr.msk.bf16.gmra.mxu0 %vm9241_vm7, %v2705_v4  ;;  %vm7865_vm2 = vmand %vm1679_vm9, %vm1709_vm15  ;;  %v7874_v1 = vld [vmem:[#allocation2 + $0xd0] sm:$0xff]  ;;  %vm1773_vm15 = vcmp.ge.s32.totalorder %v7438_v7, %v6149_v56  ;;  %v1037_v57 = vpop.f32.mrf.mxu0 }
 0x1db   : > { %vm9244_vm3 = vmmov %vm9224_vm4  ;;  %v7881_v39 = vpack.c.bf16 %v7874_v1, %v7840_v35  ;;  %vm1681_vm4 = vcmp.ge.s32.totalorder %v1651_v40, 1  ;;  %v7908_v24 = vld [vmem:[#allocation2 + $0xcf] sm:$0xff]  ;;  %v7910_v22 = vld [vmem:[#allocation2 + $0xd7] sm:$0xff]  ;;  %v1138_v4 = vmax.f32 %v1108_v10, 0.0  ;;  %v1072_v31 = vadd.f32 %v1037_v57, %v784_v32 }
 0x1dc   : > { %1990 = vst.msk [vmem:[#allocation2 + $0xe0] sm:$0xff] %vm9244_vm3, %v1953_v41  ;;  %vm1864_vm5 = vmand %vm1801_vm6, %vm1834_vm0  ;;  %vm1711_vm6 = vcmp.le.s32.totalorder %v1651_v40, 16  ;;  %v2706_v58 = vpack.c.bf16 %v7910_v22, %v7908_v24  ;;  %v5113_v63 = vpop.f32.mrf.mxu0  ;;  %v8075_v12 = vpack.c.bf16 %v7908_v24, %v7838_v49  ;;  %v5552_v24 = vld [vmem:[%s8933_s3 + $0x40] sm:$0xff]  }
 0x1dd   : > { %vm7889_vm11 = vmand %vm7865_vm2, %vm1772_vm12  ;;  %v1954_v5 = vsel %vm1864_vm5, %v1137_v55, 0.0  ;;  %vm1836_vm12 = vcmp.lt.s32.totalorder %v7438_v7, %v6151_v0  ;;  %v1109_v41 = vadd.f32 %v7460_v28, %v1072_v31  ;;  %v1997_v7 = vld [vmem:[#allocation2 + $0x27] sm:$0xff]  ;;  %v2002_v63 = vld [vmem:[#allocation2 + $0x4f] sm:$0xff] }
 0x1de   : > { %vm9247_vm10 = vmmov %vm9244_vm3  ;;  %v1040_v40 = vpop.f32.mrf.mxu0  ;;  %v2020_v16 = vpack.c.bf16 %v1998_v3, %v1997_v7  ;;  %v5548_v55 = vld [vmem:[%s8933_s3 + $0x20] sm:$0xff]   ;;  %v7990_v53 = vpack.c.bf16 %v2002_v63, %v2001_v62  ;;  %v3172_v63 = vld [vmem:[#allocation2 + $0xb1] sm:$0xff]  ;;  %v2454_v62 = vpack.c.bf16 %v2431_v23, %v2430_v36 }
 0x1df   : > { %5140 = vmatmul.mubr.msk.bf16.gmra.mxu1 %vm9247_vm10, %v7881_v39  ;;  %vm7898_vm9 = vmand %vm1680_vm14, %vm1710_vm13  ;;  %v1139_v38 = vmax.f32 %v1109_v41, 0.0  ;;  %v1073_v9 = vadd.f32 %v1040_v40, %v787_v8  ;;  %vm1837_vm10 = vcmp.lt.s32.totalorder %v7489_v34, %v6151_v0  ;;  %v7992_v8 = vld [vmem:[#allocation2 + $0x57] sm:$0xff]  ;;  %v7997_v41 = vld [vmem:[#allocation2 + $0x49] sm:$0xff] }
 0x1e0   : > { %vm9251_vm1 = vmmov %vm9244_vm3  ;;  %vm1774_vm3 = vcmp.ge.s32.totalorder %v7489_v34, %v6149_v56  ;;  %v5114_v43 = vpop.f32.mrf.mxu0  ;;  %v5560_v56 = vld [vmem:[%s8933_s3 + $0x28] sm:$0xff]   ;;  %v7976_v34 = vld [vmem:[#allocation2 + $0x31] sm:$0xff] }
 0x1e1   : > { %5147 = vmatprep.mubr.msk.bf16.mxu1 %vm9251_vm1, %v2019_v52  ;;  %vm9252_vm0 = vmmov %vm9251_vm1  ;;  %v3180_v3 = vpack.c.bf16 %v7958_v44, %v7976_v34  ;;  %v8001_v7 = vld [vmem:[#allocation2 + $0x59] sm:$0xff]  ;;  %v8004_v40 = vld [vmem:[#allocation2 + $0x41] sm:$0xff] }
 0x1e2   : > { %1991 = vst.msk [vmem:[#allocation2 + $0xe8] sm:$0xff] %vm9252_vm0, %v1954_v5  ;;  %vm1865_vm7 = vmand %vm7889_vm11, %vm1835_vm8  ;;  %v1110_v5 = vadd.f32 %v7460_v28, %v1073_v9  ;;  %v8020_v9 = vld [vmem:[#allocation2 + $0x69] sm:$0xff]  ;;  %v8026_v52 = vld [vmem:[#allocation2 + $0x79] sm:$0xff] }
 0x1e3   : > { %vm1803_vm2 = vmand %vm7898_vm9, %vm1773_vm15  ;;  %v1955_v15 = vsel %vm1865_vm7, %v1138_v4, 0.0  ;;  %v7938_v27 = vld [vmem:[#allocation2 + $0xdf] sm:$0xff]  ;;  %v8033_v43 = vld [vmem:[#allocation2 + $0x71] sm:$0xff] }
 0x1e4   : > { %vm9253_vm14 = vmmov %vm9252_vm0  ;;  %v3431_v6 = vpack.c.bf16 %v7938_v27, %v7910_v22  ;;  %v7967_v57 = vld [vmem:[#allocation2 + $0xd9] sm:$0xff]  ;;  %v1140_v31 = vmax.f32 %v1110_v5, 0.0  ;;  %v3644_v36 = vld [vmem:[#allocation2 + $0x68] sm:$0xff] }
 0x1e5   : > { %5223 = vmatprep.mubr.msk.bf16.mxu0 %vm9253_vm14, %v2706_v58  ;;  %vm7929_vm13 = vmand %vm1681_vm4, %vm1711_vm6  ;;  %v7981_v58 = vld [vmem:[%s8933_s3 + $0x48] sm:$0xff]  }
 0x1e6   : > { %vm9257_vm5 = vmmov %vm9252_vm0  ;;  %v3402_v35 = vld [vmem:[#allocation2 + $0x67] sm:$0xff] }
 0x1e7   : > { %1992 = vst.msk [vmem:[#allocation2 + $0xf0] sm:$0xff] %vm9257_vm5, %v1955_v15  ;;  %vm1866_vm11 = vmand %vm1803_vm2, %vm1836_vm12  ;;  %v2023_v15 = vpack.c.bf16 %v7161_v54, %v7992_v8  ;;  %v5551_v54 = vld [vmem:[%s8933_s3 + $0x70] sm:$0xff]  }
 0x1e8   : > { %vm7951_vm8 = vmand %vm7929_vm13, %vm1774_vm3  ;;  %v1956_v32 = vsel %vm1866_vm11, %v1139_v38, 0.0  ;;  %v2025_v38 = vpack.c.bf16 %v7399_v42, %v7284_v14  ;;  %v3184_v14 = vpack.c.bf16 %v8026_v52, %v8033_v43  ;;  %v8046_v42 = vld [vmem:[#allocation2 + $0x99] sm:$0xff] }
 0x1e9   : > { %vm9260_vm9 = vmmov %vm9252_vm0  ;;  %v7965_v10 = vld [vmem:[#allocation2 + $0xe7] sm:$0xff] }
 0x1ea   : > { %5148 = vmatmul.mubr.msk.bf16.vlgmr.msra.gmra.mxu1 %vm9260_vm9, %v2020_v16  ;;  %vm9261_vm15 = vmmov %vm9252_vm0  ;;  %v7969_v0 = vld [vmem:[#allocation2 + $0xe1] sm:$0xff]  ;;  %v2707_v28 = vpack.c.bf16 %v7965_v10, %v7938_v27  ;;  %v3181_v16 = vpack.c.bf16 %v7997_v41, %v8004_v40 }
 0x1eb   : > { %5172 = vmatpush3.bf16.msra.mxu1 %v5560_v56  ;;  %5151 = vmatprep.mubr.msk.bf16.mxu1 %vm9261_vm15, %v2021_v13  ;;  %vm9262_vm4 = vmmov %vm9252_vm0  ;;  %v8029_v13 = vld [vmem:[#allocation2 + $0x61] sm:$0xff]  ;;  %v8050_v56 = vld [vmem:[#allocation2 + $0x91] sm:$0xff] }
 0x1ec   : > { %1993 = vst.msk [vmem:[#allocation2 + $0xf8] sm:$0xff] %vm9262_vm4, %v1956_v32  ;;  %vm1867_vm1 = vmand %vm7951_vm8, %vm1837_vm10  ;;  %5173 = vmatprep.subr.bf16.mxu1 %v5548_v55  ;;  %v3166_v32 = vld [vmem:[#allocation2 + $0x81] sm:$0xff] }
 0x1ed   : > { %vm9263_vm6 = vmmov %vm9252_vm0  ;;  %v1957_v19 = vsel %vm1867_vm1, %v1140_v31, 0.0  ;;  %v3170_v31 = vld [vmem:[#allocation2 + $0xa1] sm:$0xff] }
 0x1ee   : > { %5224 = vmatmul.mubr.msk.bf16.gmra.mxu0 %vm9263_vm6, %v2707_v28  ;;  %vm9264_vm7 = vmmov %vm9252_vm0  ;;  %v3186_v28 = vpack.c.bf16 %v8046_v42, %v8050_v56 }
 0x1ef   : > { %5259 = vmatprep.mubr.msk.bf16.mxu0 %vm9252_vm0, %v3180_v3  ;;  %5174 = vmatpush3.bf16.msra.mxu1 %v5548_v55  ;;  %1994 = vst.msk [vmem:[#allocation2 + $0x100] sm:$0xff] %vm9264_vm7, %v1957_v19  ;;  %vm9265_vm2 = vmmov %vm9252_vm0  ;;  %v3182_v55 = vpack.c.bf16 %v8001_v7, %v8008_v21  ;;  %v3187_v3 = vpack.c.bf16 %v8062_v26, %v3170_v31 }
 0x1f0   : > { %5227 = vmatprep.subr.bf16.mxu1 %v7981_v58  ;;  %vm9266_vm12 = vmmov %vm9252_vm0  ;;  %v3188_v19 = vpack.c.bf16 %v8065_v11, %v3172_v63 }
 0x1f1   : > { %vm9267_vm14 = vmmov %vm9252_vm0 }
 0x1f2   : > { %5152 = vmatmul.mubr.msk.bf16.gmra.mxu1 %vm9265_vm2, %v7990_v53  ;;  %vm9268_vm13 = vmmov %vm9252_vm0 }
 0x1f3   : > { %5155 = vmatprep.mubr.msk.bf16.mxu1 %vm9266_vm12, %v2023_v15  ;;  %vm9269_vm3 = vmmov %vm9252_vm0  ;;  %v3175_v15 = vld [vmem:[#allocation2 + $0xc9] sm:$0xff] }
 0x1f4   : > { %vm9270_vm5 = vmmov %vm9252_vm0 }
 0x1f5   : > { %vm9271_vm11 = vmmov %vm9252_vm0 }
 0x1f6   : > { %5260 = vmatmul.mubr.msk.bf16.vlgmr.msra.gmra.mxu0 %vm9267_vm14, %v3181_v16  ;;  %vm9272_vm8 = vmmov %vm9252_vm0  ;;  %v3174_v16 = vld [vmem:[#allocation2 + $0xc1] sm:$0xff] }
 0x1f7   : > { %5263 = vmatprep.mubr.msk.bf16.mxu0 %vm9268_vm13, %v3182_v55  ;;  %5312 = vmatpush3.bf16.msra.mxu0 %v7005_v18  ;;  %v3183_v18 = vpack.c.bf16 %v8020_v9, %v8029_v13  ;;  %vm9273_vm10 = vmmov %vm9252_vm0  ;;  %v3176_v55 = vld [vmem:[#allocation2 + $0xd1] sm:$0xff] }
 0x1f8   : > { %5313 = vmatprep.subr.bf16.mxu0 %v5551_v54  ;;  %vm9274_vm9 = vmmov %vm9252_vm0 }
 0x1f9   : > { %vm9275_vm15 = vmmov %vm9252_vm0 }
 0x1fa   : > { %5156 = vmatmul.mubr.msk.bf16.gmra.mxu1 %vm9269_vm3, %v2024_v50  ;;  %v8043_v50 = vld [vmem:[#allocation2 + $0x89] sm:$0xff]  ;;  %vm9276_vm4 = vmmov %vm9252_vm0 }
 0x1fb   : > { %5159 = vmatprep.mubr.msk.bf16.mxu1 %vm9270_vm5, %v2025_v38  ;;  %5314 = vmatpush3.bf16.msra.mxu0 %v5551_v54  ;;  %v3185_v5 = vpack.c.bf16 %v8043_v50, %v3166_v32  ;;  %vm9277_vm1 = vmmov %vm9252_vm0  ;;  %v3189_v54 = vpack.c.bf16 %v3175_v15, %v3174_v16  ;;  %v3190_v38 = vpack.c.bf16 %v7967_v57, %v3176_v55 }
 0x1fc   : > { %vm9278_vm6 = vmmov %vm9252_vm0 }
 0x1fd   : > { %vm9279_vm7 = vmmov %vm9252_vm0 }
 0x1fe   : > { %5264 = vmatmul.mubr.msk.bf16.gmra.mxu0 %vm9271_vm11, %v3183_v18  ;;  %vm9280_vm2 = vmmov %vm9252_vm0  ;;  %v2432_v18 = vld [vmem:[#allocation2 + $0x29] sm:$0xff] }
 0x1ff   : > { %5267 = vmatprep.mubr.msk.bf16.mxu0 %vm9272_vm8, %v3184_v14  ;;  %vm9281_vm12 = vmmov %vm9252_vm0  ;;  %v2455_v49 = vpack.c.bf16 %v7976_v34, %v2432_v18  ;;  %v2456_v14 = vpack.c.bf16 %v8004_v40, %v7958_v44  ;;  %v8110_v40 = vpack.c.bf16 %v8029_v13, %v8001_v7  ;;  %v8123_v7 = vpack.c.bf16 %v8033_v43, %v8020_v9  ;;  %v3647_v13 = vld [vmem:[#allocation2 + $0x80] sm:$0xff] }
 0x200   : > { %vm9282_vm14 = vmmov %vm9252_vm0  ;;  %v8137_v9 = vpack.c.bf16 %v8050_v56, %v8043_v50  ;;  %v8154_v43 = vpack.c.bf16 %v3174_v16, %v8065_v11  ;;  %v2915_v50 = vld [vmem:[#allocation2 + $0x38] sm:$0xff]  ;;  %v3661_v56 = vld [vmem:[#allocation2 + $0xf0] sm:$0xff] }
 0x201   : > { %vm9283_vm13 = vmmov %vm9252_vm0 }
 0x202   : > { %5160 = vmatmul.mubr.msk.bf16.gmra.mxu1 %vm9273_vm10, %v2026_v33  ;;  %v8089_v33 = vld [vmem:[#allocation2 + $0xe9] sm:$0xff]  ;;  %vm9284_vm3 = vmmov %vm9252_vm0 }
 0x203   : > { %5163 = vmatprep.mubr.msk.bf16.mxu1 %vm9274_vm9, %v2027_v25  ;;  %v8092_v25 = vld [vmem:[#allocation2 + $0x50] sm:$0xff]  ;;  %vm9285_vm5 = vmmov %vm9252_vm0  ;;  %v3191_v34 = vpack.c.bf16 %v8089_v33, %v7969_v0 }
 0x204   : > { %vm9286_vm11 = vmmov %vm9252_vm0 }
 0x205   : > { %vm9287_vm8 = vmmov %vm9252_vm0 }
 0x206   : > { %5268 = vmatmul.mubr.msk.bf16.gmra.mxu0 %vm9275_vm15, %v3185_v5  ;;  %v3640_v5 = vld [vmem:[#allocation2 + $0x48] sm:$0xff]  ;;  %vm9288_vm10 = vmmov %vm9252_vm0 }
 0x207   : > { %5271 = vmatprep.mubr.msk.bf16.mxu0 %vm9276_vm4, %v3186_v28  ;;  %v5553_v28 = vld [vmem:[%s8933_s3 + $0x68] sm:$0xff]   ;;  %v3664_v44 = vpack.c.bf16 %v8092_v25, %v3640_v5  ;;  %vm9289_vm9 = vmmov %vm9252_vm0 }
 0x208   : > { %vm9290_vm15 = vmmov %vm9252_vm0 }
 0x209   : > { %vm9291_vm4 = vmmov %vm9252_vm0 }
 0x20a   : > { %5164 = vmatmul.mubr.msk.bf16.gmra.mxu1 %vm9277_vm1, %v2028_v20  ;;  %v8112_v20 = vld [vmem:[#allocation2 + $0x60] sm:$0xff]  ;;  %vm9292_vm1 = vmmov %vm9252_vm0 }
 0x20b   : > { %5167 = vmatprep.mubr.msk.bf16.mxu1 %vm9278_vm6, %v8060_v51  ;;  %vm9293_vm6 = vmmov %vm9252_vm0 }
 0x20e   : > { %5272 = vmatmul.mubr.msk.bf16.gmra.mxu0 %vm9252_vm0, %v3187_v3  ;;  %v3645_v3 = vld [vmem:[#allocation2 + $0x70] sm:$0xff] }
 0x20f   : > { %5275 = vmatprep.mubr.msk.bf16.mxu0 %vm9279_vm7, %v3188_v19  ;;  %v3642_v19 = vld [vmem:[#allocation2 + $0x58] sm:$0xff]  ;;  %vm9294_vm7 = vmmov %vm9252_vm0 }
 0x210   : > { %v3665_v23 = vpack.c.bf16 %v8112_v20, %v3642_v19  ;;  %v2940_v16 = vpack.c.bf16 %v3642_v19, %v8092_v25  ;;  %v2925_v25 = vld [vmem:[#allocation2 + $0x88] sm:$0xff]  ;;  %v2928_v19 = vld [vmem:[#allocation2 + $0xa0] sm:$0xff] }
 0x212   : > { %5168 = vmatmul.mubr.msk.bf16.gmra.mxu1 %vm9280_vm2, %v8075_v12  ;;  %vm9295_vm2 = vmmov %vm9252_vm0 }
 0x213   : > { %5175 = vmatprep.mubr.msk.bf16.mxu1 %vm9281_vm12, %v2454_v62  ;;  %v3646_v62 = vld [vmem:[#allocation2 + $0x78] sm:$0xff]  ;;  %vm9296_vm12 = vmmov %vm9252_vm0 }
 0x216   : > { %5276 = vmatmul.mubr.msk.bf16.gmra.mxu0 %vm9282_vm14, %v3189_v54  ;;  %v3667_v54 = vpack.c.bf16 %v3647_v13, %v3646_v62  ;;  %vm9297_vm14 = vmmov %vm9252_vm0 }
 0x217   : > { %5279 = vmatprep.mubr.msk.bf16.mxu0 %vm9283_vm13, %v3190_v38  ;;  %vm9298_vm13 = vmmov %vm9252_vm0  ;;  %v3662_v38 = vld [vmem:[#allocation2 + $0xf8] sm:$0xff] }
 0x21a   : > { %5176 = vmatmul.mubr.msk.bf16.vlgmr.msra.gmra.mxu1 %vm9284_vm3, %v2455_v49  ;;  %vm9299_vm3 = vmmov %vm9252_vm0  ;;  %v5555_v49 = vld [vmem:[%s8933_s3 + $0x88] sm:$0xff]  }
 0x21b   : > { %5228 = vmatpush3.bf16.msra.mxu1 %v7981_v58  ;;  %5179 = vmatprep.mubr.msk.bf16.mxu1 %vm9285_vm5, %v2456_v14  ;;  %v8106_v58 = vpack.c.bf16 %v8008_v21, %v7997_v41  ;;  %v3666_v41 = vpack.c.bf16 %v3645_v3, %v3644_v36  ;;  %v8126_v21 = vpack.c.bf16 %v3166_v32, %v8026_v52  ;;  %vm9300_vm5 = vmmov %vm9252_vm0  ;;  %v3659_v32 = vld [vmem:[#allocation2 + $0xe0] sm:$0xff] }
 0x21c   : > { %5229 = vmatprep.subr.bf16.mxu1 %v5552_v24  ;;  %v8140_v52 = vpack.c.bf16 %v3170_v31, %v8046_v42  ;;  %v3660_v31 = vld [vmem:[#allocation2 + $0xe8] sm:$0xff]  ;;  %v2942_v14 = vpack.c.bf16 %v3646_v62, %v3645_v3 }
 0x21d   : > { %v2949_v47 = vpack.c.bf16 %v3660_v31, %v3659_v32 }
 0x21e   : > { %5280 = vmatmul.mubr.msk.bf16.gmra.mxu0 %vm9286_vm11, %v3191_v34  ;;  %vm9301_vm11 = vmmov %vm9252_vm0  ;;  %v2943_v34 = vpack.c.bf16 %v2925_v25, %v3647_v13  ;;  %v3403_v13 = vld [vmem:[#allocation2 + $0x6f] sm:$0xff] }
 0x21f   : > { %5315 = vmatprep.mubr.msk.bf16.mxu0 %vm9287_vm8, %v3664_v44  ;;  %5230 = vmatpush3.bf16.msra.mxu1 %v5552_v24  ;;  %vm9302_vm8 = vmmov %vm9252_vm0  ;;  %v2941_v24 = vpack.c.bf16 %v3644_v36, %v8112_v20  ;;  %v2945_v20 = vpack.c.bf16 %v7704_v30, %v2928_v19 }
 0x220   : > { %5283 = vmatprep.subr.bf16.mxu1 %v5553_v28 }
 0x222   : > { %5180 = vmatmul.mubr.msk.bf16.gmra.mxu1 %vm9288_vm10, %v8106_v58  ;;  %vm9303_vm10 = vmmov %vm9252_vm0 }
 0x223   : > { %5183 = vmatprep.mubr.msk.bf16.mxu1 %vm9289_vm9, %v8110_v40  ;;  %vm9304_vm9 = vmmov %vm9252_vm0 }
 0x226   : > { %5316 = vmatmul.mubr.msk.bf16.vlgmr.msra.gmra.mxu0 %vm9290_vm15, %v3665_v23  ;;  %vm9305_vm15 = vmmov %vm9252_vm0 }
 0x227   : > { %5319 = vmatprep.mubr.msk.bf16.mxu0 %vm9291_vm4, %v3666_v41  ;;  %vm9306_vm4 = vmmov %vm9252_vm0 }
 0x22a   : > { %5184 = vmatmul.mubr.msk.bf16.gmra.mxu1 %vm9292_vm1, %v8123_v7  ;;  %vm9307_vm1 = vmmov %vm9252_vm0 }
 0x22b   : > { %5187 = vmatprep.mubr.msk.bf16.mxu1 %vm9293_vm6, %v8126_v21  ;;  %vm9308_vm6 = vmmov %vm9252_vm0 }
 0x22e   : > { %5320 = vmatmul.mubr.msk.bf16.gmra.mxu0 %vm9252_vm0, %v3667_v54  ;;  %v3424_v54 = vpack.c.bf16 %v3403_v13, %v3402_v35 }
 0x22f   : > { %5323 = vmatprep.mubr.msk.bf16.mxu0 %vm9294_vm7, %v7482_v59  ;;  %v8151_v59 = vpack.c.bf16 %v3172_v63, %v8062_v26  ;;  %v3658_v26 = vld [vmem:[#allocation2 + $0xd8] sm:$0xff]  ;;  %v3674_v63 = vpack.c.bf16 %v3661_v56, %v3660_v31  ;;  %vm9309_vm7 = vmmov %vm9252_vm0  ;;  %v3406_v56 = vld [vmem:[#allocation2 + $0x87] sm:$0xff] }
 0x230   : > { %v3673_v11 = vpack.c.bf16 %v3659_v32, %v3658_v26  ;;  %v2948_v36 = vpack.c.bf16 %v3658_v26, %v7874_v1 }
 0x232   : > { %5188 = vmatmul.mubr.msk.bf16.gmra.mxu1 %vm9295_vm2, %v8137_v9  ;;  %vm9310_vm2 = vmmov %vm9252_vm0 }
 0x233   : > { %5191 = vmatprep.mubr.msk.bf16.mxu1 %vm9296_vm12, %v8140_v52  ;;  %vm9311_vm12 = vmmov %vm9252_vm0 }
 0x236   : > { %5324 = vmatmul.mubr.msk.bf16.gmra.mxu0 %vm9297_vm14, %v7596_v61  ;;  %v8164_v61 = vpack.c.bf16 %v3176_v55, %v3175_v15  ;;  %v5554_v15 = vld [vmem:[%s8933_s3 + $0x60] sm:$0xff]   ;;  %vm9312_vm14 = vmmov %vm9252_vm0  ;;  %v8187_v44 = vpop.f32.mrf.mxu1 }
 0x237   : > { %5327 = vmatprep.mubr.msk.bf16.mxu0 %vm9298_vm13, %v7711_v17  ;;  %v2914_v17 = vld [vmem:[#allocation2 + $0x30] sm:$0xff]  ;;  %v3663_v55 = vld [vmem:[#allocation2 + $0x100] sm:$0xff]  ;;  %vm9313_vm13 = vmmov %vm9252_vm0 }
 0x238   : > { %v2938_v42 = vpack.c.bf16 %v2915_v50, %v2914_v17  ;;  %v3675_v18 = vpack.c.bf16 %v3663_v55, %v3662_v38  ;;  %v8189_v23 = vpop.f32.mrf.mxu1  ;;  %v3405_v50 = vld [vmem:[#allocation2 + $0x7f] sm:$0xff]  ;;  %v3407_v17 = vld [vmem:[#allocation2 + $0x8f] sm:$0xff]  ;;  %v3410_v55 = vld [vmem:[#allocation2 + $0xa7] sm:$0xff] }
 0x239   : > { %v3426_v26 = vpack.c.bf16 %v3407_v17, %v3406_v56  ;;  %v3428_v38 = vpack.c.bf16 %v7746_v60, %v3410_v55 }
 0x23a   : > { %5192 = vmatmul.mubr.msk.bf16.gmra.mxu1 %vm9299_vm3, %v8151_v59  ;;  %vm9314_vm3 = vmmov %vm9252_vm0  ;;  %v8197_v3 = vpop.f32.mrf.mxu1 }
 0x23b   : > { %5195 = vmatprep.mubr.msk.bf16.mxu1 %vm9300_vm5, %v8154_v43  ;;  %vm9315_vm5 = vmmov %vm9252_vm0 }
 0x23e   : > { %5328 = vmatmul.mubr.msk.bf16.gmra.mxu0 %vm9301_vm11, %v7805_v2  ;;  %v2916_v2 = vld [vmem:[#allocation2 + $0x40] sm:$0xff]  ;;  %vm9316_vm11 = vmmov %vm9252_vm0 }
 0x23f   : > { %5331 = vmatprep.mubr.msk.bf16.mxu0 %vm9302_vm8, %v7881_v39  ;;  %v2939_v39 = vpack.c.bf16 %v3640_v5, %v2916_v2  ;;  %v2926_v5 = vld [vmem:[#allocation2 + $0x90] sm:$0xff]  ;;  %vm9317_vm8 = vmmov %vm9252_vm0 }
 0x242   : > { %5196 = vmatmul.mubr.msk.bf16.gmra.mxu1 %vm9303_vm10, %v8164_v61  ;;  %vm9318_vm10 = vmmov %vm9252_vm0 }
 0x243   : > { %5231 = vmatprep.mubr.msk.bf16.mxu1 %vm9304_vm9, %v2938_v42  ;;  %vm9319_vm9 = vmmov %vm9252_vm0  ;;  %v3404_v42 = vld [vmem:[#allocation2 + $0x77] sm:$0xff] }
 0x246   : > { %5332 = vmatmul.mubr.msk.bf16.gmra.mxu0 %vm9305_vm15, %v3673_v11  ;;  %vm9320_vm15 = vmmov %vm9252_vm0  ;;  %v8232_v11 = vpop.f32.mrf.mxu0 }
 0x247   : > { %5335 = vmatprep.mubr.msk.bf16.mxu0 %vm9306_vm4, %v3674_v63  ;;  %vm9321_vm4 = vmmov %vm9252_vm0  ;;  %v3409_v63 = vld [vmem:[#allocation2 + $0x9f] sm:$0xff] }
 0x24a   : > { %5232 = vmatmul.mubr.msk.bf16.vlgmr.msra.gmra.mxu1 %vm9307_vm1, %v2939_v39  ;;  %vm9322_vm1 = vmmov %vm9252_vm0  ;;  %v3408_v39 = vld [vmem:[#allocation2 + $0x97] sm:$0xff] }
 0x24b   : > { %5284 = vmatpush3.bf16.msra.mxu1 %v5553_v28  ;;  %5235 = vmatprep.mubr.msk.bf16.mxu1 %vm9308_vm6, %v2940_v16  ;;  %v2944_v28 = vpack.c.bf16 %v7582_v45, %v2926_v5  ;;  %v8199_v45 = vpop.f32.mrf.mxu1  ;;  %v3427_v16 = vpack.c.bf16 %v3409_v63, %v3408_v39  ;;  %vm9323_vm6 = vmmov %vm9252_vm0 }
 0x24c   : > { %5285 = vmatprep.subr.bf16.mxu1 %v5554_v15 }
 0x24d   : > { %v8202_v41 = vpop.f32.mrf.mxu1 }
 0x24e   : > { %5336 = vmatmul.mubr.msk.bf16.gmra.mxu0 %vm9252_vm0, %v3675_v18 }
 0x24f   : > { %5286 = vmatpush3.bf16.msra.mxu1 %v5554_v15  ;;  %v8209_v30 = vpop.f32.mrf.mxu1  ;;  %v8238_v15 = vpop.f32.mrf.mxu0 }
 0x250   : > { %5339 = vmatprep.subr.bf16.mxu1 %v5555_v49 }
 0x251   : > { %v8211_v46 = vpop.f32.mrf.mxu1 }
 0x252   : > { %5236 = vmatmul.mubr.msk.bf16.gmra.mxu1 %vm9309_vm7, %v2941_v24  ;;  %vm9324_vm7 = vmmov %vm9252_vm0 }
 0x253   : > { %5239 = vmatprep.mubr.msk.bf16.mxu1 %vm9310_vm2, %v2942_v14  ;;  %v8216_v1 = vpop.f32.mrf.mxu1  ;;  %vm9325_vm2 = vmmov %vm9252_vm0 }
 0x25a   : > { %5240 = vmatmul.mubr.msk.bf16.gmra.mxu1 %vm9311_vm12, %v2943_v34  ;;  %vm9326_vm12 = vmmov %vm9252_vm0 }
 0x25b   : > { %5243 = vmatprep.mubr.msk.bf16.mxu1 %vm9312_vm14, %v2944_v28  ;;  %v3419_v28 = vld [vmem:[#allocation2 + $0xef] sm:$0xff]  ;;  %vm9327_vm14 = vmmov %vm9252_vm0 }
 0x260   : > { %v8218_v62 = vpop.f32.mrf.mxu1 }
 0x262   : > { %5244 = vmatmul.mubr.msk.bf16.gmra.mxu1 %vm9313_vm13, %v2945_v20  ;;  %v3432_v20 = vpack.c.bf16 %v3419_v28, %v7965_v10  ;;  %vm9328_vm13 = vmmov %vm9252_vm0 }
 0x263   : > { %5247 = vmatprep.mubr.msk.bf16.mxu1 %vm9314_vm3, %v2946_v37  ;;  %v3401_v37 = vld [vmem:[#allocation2 + $0x5f] sm:$0xff]  ;;  %vm9329_vm3 = vmmov %vm9252_vm0 }
 0x264   : > { %v3423_v29 = vpack.c.bf16 %v3401_v37, %v7992_v8  ;;  %v3425_v8 = vpack.c.bf16 %v3405_v50, %v3404_v42  ;;  %v3420_v37 = vld [vmem:[#allocation2 + $0xf7] sm:$0xff] }
 0x26a   : > { %5248 = vmatmul.mubr.msk.bf16.gmra.mxu1 %vm9315_vm5, %v2947_v48  ;;  %v5556_v48 = vld [vmem:[%s8933_s3 + $0x80] sm:$0xff]   ;;  %vm9330_vm5 = vmmov %vm9252_vm0 }
 0x26b   : > { %5251 = vmatprep.mubr.msk.bf16.mxu1 %vm9316_vm11, %v2948_v36  ;;  %vm9331_vm11 = vmmov %vm9252_vm0 }
 0x272   : > { %5252 = vmatmul.mubr.msk.bf16.gmra.mxu1 %vm9317_vm8, %v2949_v47  ;;  %vm9332_vm8 = vmmov %vm9252_vm0 }
 0x273   : > { %5287 = vmatprep.mubr.msk.bf16.mxu1 %vm9318_vm10, %v7990_v53  ;;  %v8226_v53 = vpop.f32.mrf.mxu1  ;;  %vm9333_vm10 = vmmov %vm9252_vm0 }
 0x275   : > { %v8228_v32 = vpop.f32.mrf.mxu1 }
 0x277   : > { %v8234_v31 = vpop.f32.mrf.mxu1 }
 0x279   : > { %v8236_v2 = vpop.f32.mrf.mxu1 }
 0x27a   : > { %5288 = vmatmul.mubr.msk.bf16.vlgmr.msra.gmra.mxu1 %vm9319_vm9, %v3423_v29  ;;  %vm9335_vm9 = vmmov %vm9252_vm0 }
 0x27b   : > { %5340 = vmatpush3.bf16.msra.mxu1 %v5555_v49  ;;  %5291 = vmatprep.mubr.msk.bf16.mxu1 %vm9320_vm15, %v3424_v54  ;;  %v8241_v18 = vpop.f32.mrf.mxu1  ;;  %v8245_v49 = vpop.f32.mrf.mxu0  ;;  %vm9336_vm15 = vmmov %vm9252_vm0 }
 0x27c   : > { %5341 = vmatprep.subr.bf16.mxu1 %v5556_v48 }
 0x27d   : > { %v8247_v24 = vpop.f32.mrf.mxu1  ;;  %v8249_v14 = vpop.f32.mrf.mxu0 }
 0x27f   : > { %5342 = vmatpush3.bf16.msra.mxu1 %v5556_v48  ;;  %v8251_v25 = vpop.f32.mrf.mxu0  ;;  %v8253_v34 = vpop.f32.mrf.mxu1 }
 0x281   : > { %v8261_v5 = vpop.f32.mrf.mxu0 }
 0x282   : > { %5292 = vmatmul.mubr.msk.bf16.gmra.mxu1 %vm9321_vm4, %v3425_v8  ;;  %vm9339_vm4 = vmmov %vm9252_vm0 }
 0x283   : > { %5295 = vmatprep.mubr.msk.bf16.mxu1 %vm9322_vm1, %v3426_v26  ;;  %v8266_v36 = vpop.f32.mrf.mxu0  ;;  %vm9340_vm1 = vmmov %vm9252_vm0 }
 0x285   : > { %v8275_v47 = vpop.f32.mrf.mxu0 }
 0x287   : > { %v8277_v13 = vpop.f32.mrf.mxu0 }
 0x289   : > { %v8286_v22 = vpop.f32.mrf.mxu0 }
 0x28a   : > { %5296 = vmatmul.mubr.msk.bf16.gmra.mxu1 %vm9323_vm6, %v3427_v16  ;;  %vm9344_vm6 = vmmov %vm9252_vm0 }
 0x28b   : > { %5299 = vmatprep.mubr.msk.bf16.mxu1 %vm9252_vm0, %v3428_v38  ;;  %v8292_v48 = vpop.f32.mrf.mxu0 }
 0x28c   : > { %v8259_v60 = vpop.f32.mrf.mxu1 }
 0x28d   : > { %v8302_v17 = vpop.f32.mrf.mxu0 }
 0x28e   : > { %v8263_v19 = vpop.f32.mrf.mxu1 }
 0x28f   : > { %v8306_v42 = vpop.f32.mrf.mxu0 }
 0x291   : > { %v8312_v26 = vpop.f32.mrf.mxu0 }
 0x292   : > { %5300 = vmatmul.mubr.msk.bf16.gmra.mxu1 %vm9324_vm7, %v8060_v51  ;;  %v8273_v51 = vpop.f32.mrf.mxu1  ;;  %vm9346_vm7 = vmmov %vm9252_vm0 }
 0x293   : > { %5303 = vmatprep.mubr.msk.bf16.mxu1 %vm9325_vm2, %v8075_v12  ;;  %v3421_v12 = vld [vmem:[#allocation2 + $0xff] sm:$0xff]  ;;  %vm9382_vm2 = vmmov %vm9252_vm0 }
 0x294   : > { %v8279_v29 = vpop.f32.mrf.mxu1  ;;  %v3433_v10 = vpack.c.bf16 %v3421_v12, %v3420_v37 }
 0x29a   : > { %5304 = vmatmul.mubr.msk.bf16.gmra.mxu1 %vm9326_vm12, %v3431_v6  ;;  %vm9383_vm12 = vmmov %vm9252_vm0 }
 0x29b   : > { %5307 = vmatprep.mubr.msk.bf16.mxu1 %vm9327_vm14, %v3432_v20  ;;  %vm9387_vm14 = vmmov %vm9252_vm0 }
 0x29f   : > { %v8281_v35 = vpop.f32.mrf.mxu1 }
 0x2a1   : > { %v8288_v27 = vpop.f32.mrf.mxu1 }
 0x2a2   : > { %5308 = vmatmul.mubr.msk.bf16.gmra.mxu1 %vm9328_vm13, %v3433_v10  ;;  %vm9391_vm13 = vmmov %vm9252_vm0 }
 0x2a3   : > { %5343 = vmatprep.mubr.msk.bf16.mxu1 %vm9329_vm3, %v8106_v58  ;;  %v8290_v6 = vpop.f32.mrf.mxu1  ;;  %vm9401_vm3 = vmmov %vm9252_vm0 }
 0x2a5   : > { %v8294_v54 = vpop.f32.mrf.mxu1 }
 0x2aa   : > { %v8296_v50 = vpop.f32.mrf.mxu1  ;;  %5344 = vmatmul.mubr.msk.bf16.vlgmr.msra.gmra.mxu1 %vm9330_vm5, %v8110_v40  ;;  %vm9405_vm5 = vmmov %vm9252_vm0 }
 0x2ab   : > { %5347 = vmatprep.mubr.msk.bf16.mxu1 %vm9331_vm11, %v8123_v7  ;;  %v8322_v7 = vpop.f32.mrf.mxu0  ;;  %vm9415_vm11 = vmmov %vm9252_vm0 }
 0x2ac   : > { %v8304_v58 = vpop.f32.mrf.mxu1 }
 0x2ad   : > { %v8328_v55 = vpop.f32.mrf.mxu0 }
 0x2ae   : > { %v8308_v8 = vpop.f32.mrf.mxu1  ;;  %9334 = vst [vmem:[#allocation11_spill] sm:$0xff] %v8328_v55  ;;  %v3903_v55 = vld [vmem:[#allocation2 + $0xf1] sm:$0xff] }
 0x2b0   : > { %v8310_v56 = vpop.f32.mrf.mxu1 }
 0x2b2   : > { %v8314_v63 = vpop.f32.mrf.mxu1  ;;  %5348 = vmatmul.mubr.msk.bf16.gmra.mxu1 %vm9332_vm8, %v8126_v21  ;;  %v8336_v21 = vpop.f32.mrf.mxu0  ;;  %vm9416_vm8 = vmmov %vm9252_vm0 }
 0x2b3   : > { %5351 = vmatprep.mubr.msk.bf16.mxu1 %vm9333_vm10, %v8137_v9  ;;  %9337 = vst [vmem:[#allocation12_spill] sm:$0xff] %v8336_v21  ;;  %vm9417_vm10 = vmmov %vm9252_vm0 }
 0x2b4   : > { %v8320_v40 = vpop.f32.mrf.mxu1  ;;  %v8342_v20 = vpop.f32.mrf.mxu0 }
 0x2b5   : > { %9338 = vst [vmem:[#allocation13_spill] sm:$0xff] %v8342_v20 }
 0x2b6   : > { %v8324_v39 = vpop.f32.mrf.mxu1 }
 0x2b8   : > { %v8326_v16 = vpop.f32.mrf.mxu1 }
 0x2ba   : > { %v8330_v38 = vpop.f32.mrf.mxu1  ;;  %5352 = vmatmul.mubr.msk.bf16.gmra.mxu1 %vm9335_vm9, %v8140_v52  ;;  %vm9418_vm9 = vmmov %vm9252_vm0 }
 0x2bb   : > { %5355 = vmatprep.mubr.msk.bf16.mxu1 %vm9336_vm15, %v8151_v59  ;;  %v8354_v59 = vpop.f32.mrf.mxu0  ;;  %vm9419_vm15 = vmmov %vm9252_vm0 }
 0x2bc   : > { %v8338_v9 = vpop.f32.mrf.mxu1  ;;  %9341 = vst [vmem:[#allocation14_spill] sm:$0xff] %v8354_v59 }
 0x2be   : > { %v8340_v28 = vpop.f32.mrf.mxu1 }
 0x2c0   : > { %v2370_v12 = vpop.f32.mrf.mxu1 }
 0x2c1   : > { %v8345_v37 = vadd.f32 %v2370_v12, %v8234_v31  ;;  %v8362_v12 = vpop.f32.mrf.mxu0 }
 0x2c2   : > { %v5161_v10 = vpop.f32.mrf.mxu1  ;;  %5356 = vmatmul.mubr.msk.bf16.gmra.mxu1 %vm9339_vm4, %v8154_v43  ;;  %vm9420_vm4 = vmmov %vm9252_vm0 }
 0x2c3   : > { %v8350_v52 = vadd.f32 %v5161_v10, %v8236_v2  ;;  %5359 = vmatprep.mubr.msk.bf16.mxu1 %vm9340_vm1, %v8164_v61  ;;  %v3916_v10 = vpack.c.bf16 %v3903_v55, %v8089_v33  ;;  %v5557_v61 = vld [vmem:[%s8935_s5 + $0x8] sm:$0xff]   ;;  %v8371_v59 = vpop.f32.mrf.mxu0  ;;  %v3904_v55 = vld [vmem:[#allocation2 + $0xf9] sm:$0xff] }
 0x2c4   : > { %v2383_v4 = vpop.f32.mrf.mxu1  ;;  %9342 = vst [vmem:[#allocation15_spill] sm:$0xff] %v8371_v59  ;;  %5367 = vmatprep.subr.bf16.mxu0 %v5557_v61 }
 0x2c5   : > { %v8357_v21 = vadd.f32 %v2383_v4, %v8241_v18  ;;  %v9343_v18 = vpack.c.bf16 %v7969_v0, %v7967_v57  ;;  %5368 = vmatpush3.bf16.msra.mxu0 %v5557_v61 }
 0x2c6   : > { %v5162_v20 = vpop.f32.mrf.mxu1 }
 0x2c7   : > { %v8360_v31 = vadd.f32 %v5162_v20, %v8247_v24  ;;  %v3905_v20 = vld [vmem:[#allocation2 + $0x101] sm:$0xff] }
 0x2c8   : > { %v2386_v43 = vpop.f32.mrf.mxu1 }
 0x2c9   : > { %v8365_v2 = vadd.f32 %v2386_v43, %v8253_v34  ;;  %v8384_v43 = vpop.f32.mrf.mxu0 }
 0x2ca   : > { %v5165_v4 = vpop.f32.mrf.mxu1  ;;  %5360 = vmatmul.mubr.msk.bf16.gmra.mxu1 %vm9344_vm6, %v9343_v18  ;;  %9345 = vst [vmem:[#allocation16_spill] sm:$0xff] %v8384_v43  ;;  %v3917_v18 = vpack.c.bf16 %v3905_v20, %v3904_v55  ;;  %v2344_v55 = vadd.f32 %v8296_v50, %v8187_v44 }
 0x2cb   : > { %v8378_v24 = vadd.f32 %v5165_v4, %v8259_v60  ;;  %5363 = vmatprep.mubr.msk.bf16.mxu1 %vm9252_vm0, %v3916_v10  ;;  %v8392_v10 = vpop.f32.mrf.mxu0 }
 0x2cc   : > { %v2399_v34 = vpop.f32.mrf.mxu1 }
 0x2cd   : > { %v8382_v33 = vadd.f32 %v2399_v34, %v8263_v19  ;;  %v8401_v43 = vpop.f32.mrf.mxu0 }
 0x2ce   : > { %v5166_v59 = vpop.f32.mrf.mxu1 }
 0x2cf   : > { %v8387_v57 = vadd.f32 %v5166_v59, %v8273_v51 }
 0x2d0   : > { %v2402_v0 = vpop.f32.mrf.mxu1 }
 0x2d1   : > { %v8390_v60 = vadd.f32 %v2402_v0, %v8279_v29  ;;  %v8411_v0 = vpop.f32.mrf.mxu0 }
 0x2d2   : > { %v5169_v4 = vpop.f32.mrf.mxu1  ;;  %5364 = vmatmul.mubr.msk.bf16.gmra.mxu1 %vm9346_vm7, %v3917_v18 }
 0x2d3   : > { %v8396_v19 = vadd.f32 %v5169_v4, %v8281_v35 }
 0x2d4   : > { %v2415_v61 = vpop.f32.mrf.mxu1 }
 0x2d5   : > { %v8399_v34 = vadd.f32 %v2415_v61, %v8288_v27  ;;  %v2336_v27 = vadd.f32 %v8304_v58, %v8189_v23  ;;  %v2360_v23 = vadd.f32 %v8314_v63, %v8202_v41  ;;  %v2363_v41 = vadd.f32 %v8324_v39, %v8211_v46 }
 0x2d6   : > { %v5170_v51 = vpop.f32.mrf.mxu1  ;;  %v2368_v46 = vadd.f32 %v8338_v9, %v8226_v53 }
 0x2d7   : > { %v8404_v59 = vadd.f32 %v5170_v51, %v8290_v6  ;;  %v2347_v6 = vadd.f32 %v8308_v8, %v8197_v3  ;;  %v8421_v51 = vpop.f32.mrf.mxu0  ;;  %v5558_v3 = vld [vmem:[%s8935_s5] sm:$0xff]  }
 0x2d8   : > { %v2418_v29 = vpop.f32.mrf.mxu1  ;;  %5369 = vmatprep.subr.bf16.mxu0 %v5558_v3 }
 0x2d9   : > { %v8409_v20 = vadd.f32 %v2418_v29, %v8294_v54  ;;  %v2339_v54 = vadd.f32 %v8310_v56, %v8199_v45  ;;  %v8434_v8 = vpop.f32.mrf.mxu0  ;;  %5370 = vmatpush3.bf16.msra.mxu0 %v5558_v3 }
 0x2da   : > { %v5177_v35 = vpop.f32.mrf.mxu1 }
 0x2db   : > { %v8415_v18 = vadd.f32 %v5177_v35, %v2344_v55  ;;  %v2352_v35 = vadd.f32 %v8320_v40, %v8209_v30  ;;  %v8444_v63 = vpop.f32.mrf.mxu0  ;;  %v2376_v30 = vadd.f32 %v8330_v38, %v8218_v62 }
 0x2dc   : > { %v2553_v4 = vpop.f32.mrf.mxu1 }
 0x2dd   : > { %v8419_v61 = vadd.f32 %v2553_v4, %v2336_v27 }
 0x2de   : > { %v5178_v44 = vpop.f32.mrf.mxu1 }
 0x2df   : > { %v8425_v50 = vadd.f32 %v5178_v44, %v2347_v6  ;;  %v2355_v6 = vadd.f32 %v8326_v16, %v8216_v1  ;;  %v2379_v1 = vadd.f32 %v8340_v28, %v8228_v32 }
 0x2e0   : > { %v2556_v29 = vpop.f32.mrf.mxu1 }
 0x2e1   : > { %v8429_v58 = vadd.f32 %v2556_v29, %v2339_v54  ;;  %v8454_v29 = vpop.f32.mrf.mxu0 }
 0x2e2   : > { %v5181_v55 = vpop.f32.mrf.mxu1 }
 0x2e3   : > { %v8438_v27 = vadd.f32 %v5181_v55, %v2360_v23  ;;  %v8464_v55 = vpop.f32.mrf.mxu0 }
 0x2e4   : > { %v2569_v45 = vpop.f32.mrf.mxu1 }
 0x2e5   : > { %v8442_v56 = vadd.f32 %v2569_v45, %v2352_v35 }
 0x2e6   : > { %v5182_v4 = vpop.f32.mrf.mxu1 }
 0x2e7   : > { %v8448_v44 = vadd.f32 %v5182_v4, %v2363_v41  ;;  %v8471_v41 = vpop.f32.mrf.mxu0 }
 0x2e8   : > { %v2572_v54 = vpop.f32.mrf.mxu1 }
 0x2e9   : > { %v8452_v40 = vadd.f32 %v2572_v54, %v2355_v6  ;;  %v8479_v28 = vpop.f32.mrf.mxu0 }
 0x2ea   : > { %v5185_v23 = vpop.f32.mrf.mxu1 }
 0x2eb   : > { %v8458_v39 = vadd.f32 %v5185_v23, %v2376_v30  ;;  %v8487_v23 = vpop.f32.mrf.mxu0 }
 0x2ec   : > { %v2585_v3 = vpop.f32.mrf.mxu1 }
 0x2ed   : > { %v8462_v16 = vadd.f32 %v2585_v3, %v2368_v46 }
 0x2ee   : > { %v5186_v35 = vpop.f32.mrf.mxu1 }
 0x2ef   : > { %v8466_v62 = vadd.f32 %v5186_v35, %v2379_v1  ;;  %v8495_v1 = vpop.f32.mrf.mxu0 }
 0x2f0   : > { %v2588_v38 = vpop.f32.mrf.mxu1 }
 0x2f1   : > { %v8469_v45 = vadd.f32 %v2588_v38, %v8345_v37 }
 0x2f2   : > { %v5189_v53 = vpop.f32.mrf.mxu1 }
 0x2f3   : > { %v8474_v9 = vadd.f32 %v5189_v53, %v8350_v52  ;;  %v8503_v53 = vpop.f32.mrf.mxu0 }
 0x2f4   : > { %v2601_v4 = vpop.f32.mrf.mxu1 }
 0x2f5   : > { %v8477_v32 = vadd.f32 %v2601_v4, %v8357_v21 }
 0x2f6   : > { %v5190_v6 = vpop.f32.mrf.mxu1 }
 0x2f7   : > { %v8482_v54 = vadd.f32 %v5190_v6, %v8360_v31 }
 0x2f8   : > { %v2604_v30 = vpop.f32.mrf.mxu1 }
 0x2f9   : > { %v8485_v37 = vadd.f32 %v2604_v30, %v8365_v2  ;;  %v8511_v30 = vpop.f32.mrf.mxu0 }
 0x2fa   : > { %v5193_v46 = vpop.f32.mrf.mxu1  ;;  %9347 = vst [vmem:[#allocation17_spill] sm:$0xff] %v8511_v30 }
 0x2fb   : > { %v8490_v52 = vadd.f32 %v5193_v46, %v8378_v24 }
 0x2fc   : > { %v2617_v3 = vpop.f32.mrf.mxu1 }
 0x2fd   : > { %v8493_v21 = vadd.f32 %v2617_v3, %v8382_v33 }
 0x2fe   : > { %v5194_v35 = vpop.f32.mrf.mxu1 }
 0x2ff   : > { %v8498_v31 = vadd.f32 %v5194_v35, %v8387_v57  ;;  %v2892_v35 = vadd.f32 %v8232_v11, %v8415_v18  ;;  %v2891_v11 = vadd.f32 %v8249_v14, %v8429_v58  ;;  %v2897_v14 = vadd.f32 %v8266_v36, %v8448_v44 }
 0x300   : > { %v2620_v38 = vpop.f32.mrf.mxu1  ;;  %v2898_v36 = vadd.f32 %v8286_v22, %v8462_v16  ;;  %v2904_v22 = vadd.f32 %v8306_v42, %v8474_v9  ;;  %v9353_v42 = vld [vmem:[#allocation11_spill] sm:$0xff] }
 0x301   : > { %v8501_v2 = vadd.f32 %v2620_v38, %v8390_v60  ;;  %v8521_v38 = vpop.f32.mrf.mxu0  ;;  %v2903_v9 = vadd.f32 %v9353_v42, %v8485_v37 }
 0x302   : > { %v5197_v4 = vpop.f32.mrf.mxu1 }
 0x303   : > { %v8506_v24 = vadd.f32 %v5197_v4, %v8396_v19 }
 0x304   : > { %v2633_v6 = vpop.f32.mrf.mxu1 }
 0x305   : > { %v8509_v33 = vadd.f32 %v2633_v6, %v8399_v34  ;;  %v2890_v34 = vadd.f32 %v8238_v15, %v8419_v61  ;;  %v2896_v15 = vadd.f32 %v8251_v25, %v8438_v27  ;;  %v2895_v25 = vadd.f32 %v8275_v47, %v8452_v40 }
 0x306   : > { %v5198_v46 = vpop.f32.mrf.mxu1  ;;  %v2901_v47 = vadd.f32 %v8292_v48, %v8466_v62  ;;  %v2902_v48 = vadd.f32 %v8312_v26, %v8477_v32 }
 0x307   : > { %v8514_v57 = vadd.f32 %v5198_v46, %v8404_v59  ;;  %v2893_v59 = vadd.f32 %v8245_v49, %v8425_v50  ;;  %v8531_v46 = vpop.f32.mrf.mxu0  ;;  %v2894_v49 = vadd.f32 %v8261_v5, %v8442_v56  ;;  %v2900_v5 = vadd.f32 %v8277_v13, %v8458_v39 }
 0x308   : > { %v2636_v3 = vpop.f32.mrf.mxu1  ;;  %v2899_v13 = vadd.f32 %v8302_v17, %v8469_v45  ;;  %v2905_v17 = vadd.f32 %v8322_v7, %v8482_v54  ;;  %v9358_v7 = vld [vmem:[#allocation13_spill] sm:$0xff] }
 0x309   : > { %v8517_v60 = vadd.f32 %v2636_v3, %v8409_v20  ;;  %v8541_v61 = vpop.f32.mrf.mxu0  ;;  %v2906_v54 = vadd.f32 %v9358_v7, %v8493_v21 }
 0x30a   : > { %v5233_v19 = vpop.f32.mrf.mxu1 }
 0x30b   : > { %v8523_v4 = vadd.f32 %v5233_v19, %v2892_v35  ;;  %v8551_v58 = vpop.f32.mrf.mxu0 }
 0x30c   : > { %v3037_v6 = vpop.f32.mrf.mxu1  ;;  %9348 = vst [vmem:[#allocation18_spill] sm:$0xff] %v8551_v58 }
 0x30d   : > { %v8527_v30 = vadd.f32 %v3037_v6, %v2890_v34  ;;  %v8561_v56 = vpop.f32.mrf.mxu0 }
 0x30e   : > { %v5234_v20 = vpop.f32.mrf.mxu1  ;;  %9349 = vst [vmem:[#allocation9_spill] sm:$0xff] %v8561_v56 }
 0x30f   : > { %v8533_v3 = vadd.f32 %v5234_v20, %v2893_v59  ;;  %v8571_v40 = vpop.f32.mrf.mxu0 }
 0x310   : > { %v3040_v18 = vpop.f32.mrf.mxu1  ;;  %9350 = vst [vmem:[#allocation10_spill] sm:$0xff] %v8571_v40 }
 0x311   : > { %v8537_v35 = vadd.f32 %v3040_v18, %v2891_v11  ;;  %v8581_v16 = vpop.f32.mrf.mxu0 }
 0x312   : > { %v5237_v19 = vpop.f32.mrf.mxu1  ;;  %9351 = vst [vmem:[#allocation19_spill] sm:$0xff] %v8581_v16 }
 0x313   : > { %v8543_v34 = vadd.f32 %v5237_v19, %v2896_v15  ;;  %v8591_v45 = vpop.f32.mrf.mxu0 }
 0x314   : > { %v3053_v50 = vpop.f32.mrf.mxu1  ;;  %9352 = vst [vmem:[#allocation20_spill] sm:$0xff] %v8591_v45 }
 0x315   : > { %v8547_v6 = vadd.f32 %v3053_v50, %v2894_v49  ;;  %v8601_v32 = vpop.f32.mrf.mxu0 }
 0x316   : > { %v5238_v59 = vpop.f32.mrf.mxu1 }
 0x317   : > { %v8553_v20 = vadd.f32 %v5238_v59, %v2897_v14 }
 0x318   : > { %v3056_v27 = vpop.f32.mrf.mxu1 }
 0x319   : > { %v8557_v11 = vadd.f32 %v3056_v27, %v2895_v25 }
 0x31a   : > { %v5241_v18 = vpop.f32.mrf.mxu1 }
 0x31b   : > { %v8563_v15 = vadd.f32 %v5241_v18, %v2900_v5 }
 0x31c   : > { %v3069_v44 = vpop.f32.mrf.mxu1 }
 0x31d   : > { %v8567_v19 = vadd.f32 %v3069_v44, %v2898_v36 }
 0x31e   : > { %v5242_v49 = vpop.f32.mrf.mxu1 }
 0x31f   : > { %v8573_v50 = vadd.f32 %v5242_v49, %v2901_v47  ;;  %v9355_v47 = vld [vmem:[#allocation12_spill] sm:$0xff] }
 0x320   : > { %v3072_v39 = vpop.f32.mrf.mxu1  ;;  %v2908_v26 = vadd.f32 %v9355_v47, %v8490_v52  ;;  %9356 = vst [vmem:[#allocation12_spill] sm:$0xff] %v8601_v32  ;;  %v2907_v52 = vadd.f32 %v8362_v12, %v8501_v2  ;;  %v2913_v12 = vadd.f32 %v8392_v10, %v8514_v57 }
 0x321   : > { %v8577_v14 = vadd.f32 %v3072_v39, %v2899_v13 }
 0x322   : > { %v5245_v59 = vpop.f32.mrf.mxu1 }
 0x323   : > { %v8583_v25 = vadd.f32 %v5245_v59, %v2904_v22  ;;  %v9360_v59 = vld [vmem:[#allocation14_spill] sm:$0xff] }
 0x324   : > { %v3085_v62 = vpop.f32.mrf.mxu1  ;;  %v2909_v37 = vadd.f32 %v9360_v59, %v8498_v31  ;;  %v9367_v31 = vld [vmem:[#allocation16_spill] sm:$0xff] }
 0x325   : > { %v8587_v27 = vadd.f32 %v3085_v62, %v2902_v48  ;;  %v8611_v48 = vpop.f32.mrf.mxu0 }
 0x326   : > { %v5246_v5 = vpop.f32.mrf.mxu1  ;;  %9361 = vst [vmem:[#allocation14_spill] sm:$0xff] %v8611_v48 }
 0x327   : > { %v8593_v18 = vadd.f32 %v5246_v5, %v2905_v17 }
 0x328   : > { %v3088_v36 = vpop.f32.mrf.mxu1 }
 0x329   : > { %v8597_v44 = vadd.f32 %v3088_v36, %v2903_v9  ;;  %v9364_v9 = vld [vmem:[#allocation15_spill] sm:$0xff]  ;;  %v8621_v36 = vpop.f32.mrf.mxu0 }
 0x32a   : > { %v5249_v49 = vpop.f32.mrf.mxu1  ;;  %v2912_v21 = vadd.f32 %v9364_v9, %v8506_v24  ;;  %9365 = vst [vmem:[#allocation15_spill] sm:$0xff] %v8621_v36  ;;  %v2911_v24 = vadd.f32 %v8401_v43, %v8517_v60 }
 0x32b   : > { %9354 = vst [vmem:[#allocation11_spill] sm:$0xff] %v8597_v44  ;;  %v8603_v13 = vadd.f32 %v5249_v49, %v2908_v26  ;;  %v2910_v49 = vadd.f32 %v9367_v31, %v8509_v33  ;;  %v8631_v2 = vpop.f32.mrf.mxu0 }
 0x32c   : > { %v3101_v39 = vpop.f32.mrf.mxu1  ;;  %9369 = vst [vmem:[#allocation25_spill] sm:$0xff] %v8631_v2 }
 0x32d   : > { %9357 = vst [vmem:[#allocation21_spill] sm:$0xff] %v8603_v13  ;;  %v8607_v22 = vadd.f32 %v3101_v39, %v2906_v54  ;;  %v3376_v13 = vadd.f32 %v8411_v0, %v8523_v4  ;;  %v3375_v0 = vadd.f32 %v8444_v63, %v8537_v35 }
 0x32e   : > { %v5250_v62 = vpop.f32.mrf.mxu1 }
 0x32f   : > { %9359 = vst [vmem:[#allocation13_spill] sm:$0xff] %v8607_v22  ;;  %v8613_v17 = vadd.f32 %v5250_v62, %v2909_v37 }
 0x330   : > { %v3104_v5 = vpop.f32.mrf.mxu1 }
 0x331   : > { %9362 = vst [vmem:[#allocation22_spill] sm:$0xff] %v8613_v17  ;;  %v8617_v42 = vadd.f32 %v3104_v5, %v2907_v52  ;;  %v5317_v52 = vpop.f32.mrf.mxu0 }
 0x332   : > { %v5253_v47 = vpop.f32.mrf.mxu1 }
 0x333   : > { %9363 = vst [vmem:[#allocation23_spill] sm:$0xff] %v8617_v42  ;;  %v8623_v26 = vadd.f32 %v5253_v47, %v2912_v21  ;;  %v3763_v9 = vpop.f32.mrf.mxu0 }
 0x334   : > { %v3117_v7 = vpop.f32.mrf.mxu1 }
 0x335   : > { %9366 = vst [vmem:[#allocation24_spill] sm:$0xff] %v8623_v26  ;;  %v8627_v54 = vadd.f32 %v3117_v7, %v2910_v49  ;;  %v5318_v31 = vpop.f32.mrf.mxu0 }
 0x336   : > { %v5254_v39 = vpop.f32.mrf.mxu1 }
 0x337   : > { %9368 = vst [vmem:[#allocation16_spill] sm:$0xff] %v8627_v54  ;;  %v8633_v59 = vadd.f32 %v5254_v39, %v2913_v12  ;;  %v3766_v57 = vpop.f32.mrf.mxu0 }
 0x338   : > { %v3120_v37 = vpop.f32.mrf.mxu1 }
 0x339   : > { %9370 = vst [vmem:[#allocation26_spill] sm:$0xff] %v8633_v59  ;;  %v8637_v62 = vadd.f32 %v3120_v37, %v2911_v24  ;;  %v5321_v12 = vpop.f32.mrf.mxu0 }
 0x33a   : > { %v5289_v5 = vpop.f32.mrf.mxu1 }
 0x33b   : > { %9371 = vst [vmem:[#allocation27_spill] sm:$0xff] %v8637_v62  ;;  %v3779_v43 = vpop.f32.mrf.mxu0  ;;  %v3618_v58 = vadd.f32 %v5289_v5, %v3376_v13 }
 0x33c   : > { %v3521_v33 = vpop.f32.mrf.mxu1 }
 0x33d   : > { %v8647_v37 = vpop.f32.mrf.mxu0  ;;  %v3860_v4 = vadd.f32 %v5317_v52, %v3618_v58 }
 0x33e   : > { %v5290_v21 = vpop.f32.mrf.mxu1 }
 0x33f   : > { %v8653_v48 = vpop.f32.mrf.mxu0 }
 0x340   : > { %v3524_v47 = vpop.f32.mrf.mxu1 }
 0x341   : > { %v8659_v26 = vpop.f32.mrf.mxu0  ;;  %v3617_v5 = vadd.f32 %v3524_v47, %v3375_v0 }
 0x342   : > { %v5293_v49 = vpop.f32.mrf.mxu1 }
 0x343   : > { %v8665_v16 = vpop.f32.mrf.mxu0 }
 0x344   : > { %v3537_v10 = vpop.f32.mrf.mxu1 }
 0x345   : > { %v8671_v22 = vpop.f32.mrf.mxu0 }
 0x346   : > { %v5294_v7 = vpop.f32.mrf.mxu1 }
 0x348   : > { %v3540_v2 = vpop.f32.mrf.mxu1 }
 0x34a   : > { %v8639_v39 = vpop.f32.mrf.mxu1 }
 0x34c   : > { %v8641_v36 = vpop.f32.mrf.mxu1 }
 0x34e   : > { %v8643_v60 = vpop.f32.mrf.mxu1 }
 0x350   : > { %v8645_v24 = vpop.f32.mrf.mxu1 }
 0x352   : > { %v8649_v62 = vpop.f32.mrf.mxu1 }
 0x354   : > { %v8651_v59 = vpop.f32.mrf.mxu1 }
 0x356   : > { %v8655_v54 = vpop.f32.mrf.mxu1 }
 0x357   : > { %9372 = vst [vmem:[#allocation28_spill] sm:$0xff] %v8655_v54 }
 0x358   : > { %v8657_v32 = vpop.f32.mrf.mxu1 }
 0x359   : > { %9373 = vst [vmem:[#allocation29_spill] sm:$0xff] %v8657_v32 }
 0x35a   : > { %v8661_v45 = vpop.f32.mrf.mxu1 }
 0x35b   : > { %9374 = vst [vmem:[#allocation30_spill] sm:$0xff] %v8661_v45  ;;  %v3374_v45 = vadd.f32 %v8421_v51, %v8527_v30  ;;  %v3380_v51 = vadd.f32 %v8454_v29, %v8543_v34  ;;  %v3381_v29 = vadd.f32 %v8471_v41, %v8553_v20  ;;  %v3384_v41 = vadd.f32 %v8487_v23, %v8563_v15 }
 0x35c   : > { %v8663_v42 = vpop.f32.mrf.mxu1 }
 0x35d   : > { %9375 = vst [vmem:[#allocation31_spill] sm:$0xff] %v8663_v42  ;;  %v8681_v42 = vpop.f32.mrf.mxu0  ;;  %v3622_v63 = vadd.f32 %v5293_v49, %v3380_v51 }
 0x35e   : > { %v8667_v17 = vpop.f32.mrf.mxu1 }
 0x35f   : > { %9376 = vst [vmem:[#allocation32_spill] sm:$0xff] %v8667_v17  ;;  %v3616_v17 = vadd.f32 %v3521_v33, %v3374_v45  ;;  %v3378_v45 = vadd.f32 %v8464_v55, %v8547_v6  ;;  %v3859_v55 = vadd.f32 %v3766_v57, %v3617_v5  ;;  %v3623_v6 = vadd.f32 %v5294_v7, %v3381_v29 }
 0x360   : > { %v8669_v40 = vpop.f32.mrf.mxu1 }
 0x361   : > { %9377 = vst [vmem:[#allocation33_spill] sm:$0xff] %v8669_v40  ;;  %v3377_v40 = vadd.f32 %v8434_v8, %v8533_v3  ;;  %v8700_v8 = vld [vmem:[%s8934_s4] ss:$0 sm:$0xff]  ;;  %v3620_v52 = vadd.f32 %v3537_v10, %v3378_v45 }
 0x362   : > { %v8673_v56 = vpop.f32.mrf.mxu1 }
 0x363   : > { %9378 = vst [vmem:[#allocation34_spill] sm:$0xff] %v8673_v56  ;;  %v3619_v56 = vadd.f32 %v5290_v21, %v3377_v40  ;;  %v3862_v0 = vadd.f32 %v3779_v43, %v3620_v52  ;;  %v3385_v43 = vadd.f32 %v8503_v53, %v8573_v50 }
 0x364   : > { %v8677_v32 = vpop.f32.mrf.mxu1 }
 0x365   : > { %9379 = vst [vmem:[#allocation35_spill] sm:$0xff] %v8677_v32  ;;  %v8691_v32 = vpop.f32.mrf.mxu0  ;;  %v3861_v58 = vadd.f32 %v5318_v31, %v3619_v56  ;;  %v3864_v31 = vadd.f32 %v5321_v12, %v3622_v63  ;;  %v3865_v12 = vadd.f32 %v8647_v37, %v3623_v6  ;;  %v9381_v37 = vld [vmem:[#allocation17_spill] sm:$0xff] }
 0x366   : > { %v8683_v44 = vpop.f32.mrf.mxu1 }
 0x367   : > { %9380 = vst [vmem:[#allocation36_spill] sm:$0xff] %v8683_v44  ;;  %v3858_v44 = vadd.f32 %v3763_v9, %v3616_v17  ;;  %v8702_v40 = vpop.f32.mrf.mxu0  ;;  %v3379_v9 = vadd.f32 %v8479_v28, %v8557_v11  ;;  %v3626_v11 = vadd.f32 %v8639_v39, %v3384_v41 }
 0x368   : > { %v8687_v54 = vpop.f32.mrf.mxu1 }
 0x369   : > { %v8711_v49 = vpop.f32.mrf.mxu0  ;;  %v3621_v10 = vadd.f32 %v3540_v2, %v3379_v9  ;;  %v3868_v53 = vadd.f32 %v8659_v26, %v3626_v11  ;;  %v3386_v26 = vadd.f32 %v8531_v46, %v8587_v27  ;;  %v9384_v27 = vld [vmem:[#allocation28_spill] sm:$0xff] }
 0x36a   : > { %v5345_v13 = vpop.f32.mrf.mxu1 }
 0x36b   : > { %v4102_v30 = vadd.f32 %v5345_v13, %v3860_v4  ;;  %v3382_v13 = vadd.f32 %v8495_v1, %v8567_v19  ;;  %v8720_v23 = vpop.f32.mrf.mxu0  ;;  %v3863_v1 = vadd.f32 %v8653_v48, %v3621_v10  ;;  %v3627_v19 = vadd.f32 %v8643_v60, %v3385_v43 }
 0x36c   : > { %v4005_v3 = vpop.f32.mrf.mxu1  ;;  %v3388_v48 = vadd.f32 %v8521_v38, %v8583_v25  ;;  %v3389_v10 = vadd.f32 %v8541_v61, %v8593_v18 }
 0x36d   : > { %v4100_v35 = vadd.f32 %v4005_v3, %v3858_v44  ;;  %v4133_v17 = vadd.f32 %v8700_v8, %v4102_v30  ;;  %v3624_v15 = vadd.f32 %v8641_v36, %v3382_v13  ;;  %v8734_v50 = vpop.f32.mrf.mxu0 }
 0x36e   : > { %v5346_v34 = vpop.f32.mrf.mxu1 }
 0x36f   : > { %v4103_v33 = vadd.f32 %v5346_v34, %v3861_v58  ;;  %v4131_v47 = vadd.f32 %v8700_v8, %v4100_v35  ;;  %v4157_v57 = vmax.f32 %v4133_v17, 0.0  ;;  %v3383_v58 = vadd.f32 %v9381_v37, %v8577_v14 }
 0x370   : > { %v4008_v21 = vpop.f32.mrf.mxu1  ;;  %v3866_v14 = vadd.f32 %v8665_v16, %v3624_v15  ;;  %v3628_v16 = vadd.f32 %v8651_v59, %v3386_v26  ;;  %v9398_v26 = vld [vmem:[#allocation32_spill] sm:$0xff] }
 0x371   : > { %v4134_v56 = vadd.f32 %v8700_v8, %v4103_v33  ;;  %v4101_v44 = vadd.f32 %v4008_v21, %v3859_v55  ;;  %v4155_v51 = vmax.f32 %v4131_v47, 0.0  ;;  %v3625_v17 = vadd.f32 %v8645_v24, %v3383_v58 }
 0x372   : > { %v5349_v20 = vpop.f32.mrf.mxu1  ;;  %v3630_v21 = vadd.f32 %v8649_v62, %v3388_v48  ;;  %v3869_v24 = vadd.f32 %v8671_v22, %v3627_v19  ;;  %v9385_v22 = vld [vmem:[#allocation11_spill] sm:$0xff]  ;;  %v9396_v48 = vld [vmem:[#allocation22_spill] sm:$0xff] }
 0x373   : > { %v4158_v7 = vmax.f32 %v4134_v56, 0.0  ;;  %v4132_v4 = vadd.f32 %v8700_v8, %v4101_v44  ;;  %v4106_v28 = vadd.f32 %v5349_v20, %v3864_v31  ;;  %v3827_v31 = vpop.f32.mrf.mxu0  ;;  %v3867_v46 = vadd.f32 %v8681_v42, %v3625_v17  ;;  %v9390_v42 = vld [vmem:[#allocation9_spill] sm:$0xff]  ;;  %v9395_v17 = vld [vmem:[#allocation31_spill] sm:$0xff] }
 0x374   : > { %v4021_v5 = vpop.f32.mrf.mxu1  ;;  %v3872_v61 = vadd.f32 %v8691_v32, %v3630_v21  ;;  %v9394_v32 = vld [vmem:[#allocation10_spill] sm:$0xff] }
 0x375   : > { %v4180_v2 = vpack.c.bf16 %v4158_v7, %v4157_v57  ;;  %v4156_v30 = vmax.f32 %v4132_v4, 0.0  ;;  %v4104_v45 = vadd.f32 %v4021_v5, %v3862_v0  ;;  %v4137_v39 = vadd.f32 %v8700_v8, %v4106_v28  ;;  %v9386_v7 = vld [vmem:[#allocation18_spill] sm:$0xff]  ;;  %v5334_v18 = vpop.f32.mrf.mxu0  ;;  %v9388_v5 = vld [vmem:[#allocation29_spill] sm:$0xff] }
 0x376   : > { %v5350_v3 = vpop.f32.mrf.mxu1  ;;  %v3631_v57 = vadd.f32 %v9384_v27, %v3389_v10  ;;  %v3387_v4 = vadd.f32 %v9386_v7, %v9385_v22 }
 0x377   : > { %v4179_v63 = vpack.c.bf16 %v4156_v30, %v4155_v51  ;;  %v4107_v35 = vadd.f32 %v5350_v3, %v3865_v12  ;;  %v4135_v29 = vadd.f32 %v8700_v8, %v4104_v45  ;;  %v4161_v33 = vmax.f32 %v4137_v39, 0.0  ;;  %v9389_v51 = vld [vmem:[#allocation21_spill] sm:$0xff]  ;;  %v9392_v39 = vld [vmem:[#allocation30_spill] sm:$0xff] }
 0x378   : > { %v4024_v52 = vpop.f32.mrf.mxu1  ;;  %v3629_v12 = vadd.f32 %v9388_v5, %v3387_v4  ;;  %v3870_v45 = vadd.f32 %v8702_v40, %v3628_v16  ;;  %v3873_v58 = vadd.f32 %v8711_v49, %v3631_v57  ;;  %v9399_v49 = vld [vmem:[#allocation23_spill] sm:$0xff] }
 0x379   : > { %v4138_v36 = vadd.f32 %v8700_v8, %v4107_v35  ;;  %v4105_v34 = vadd.f32 %v4024_v52, %v3863_v1  ;;  %5371 = vmatprep.mubr.msk.bf16.mxu0 %vm9382_vm2, %v4179_v63  ;;  %v4159_v56 = vmax.f32 %v4135_v29, 0.0  ;;  %v9393_v1 = vld [vmem:[#allocation13_spill] sm:$0xff] }
 0x37a   : > { %v5353_v60 = vpop.f32.mrf.mxu1  ;;  %5372 = vmatmul.mubr.msk.bf16.vlgmr.msra.gmra.mxu0 %vm9383_vm12, %v4180_v2  ;;  %v3392_v2 = vadd.f32 %v9390_v42, %v9389_v51  ;;  %v3390_v19 = vadd.f32 %v9394_v32, %v9393_v1  ;;  %v3871_v21 = vadd.f32 %v8720_v23, %v3629_v12  ;;  %v9404_v23 = vld [vmem:[#allocation12_spill] sm:$0xff] }
 0x37b   : > { %v4162_v55 = vmax.f32 %v4138_v36, 0.0  ;;  %v4136_v6 = vadd.f32 %v8700_v8, %v4105_v34  ;;  %v4110_v9 = vadd.f32 %v5353_v60, %v3868_v53  ;;  %v3830_v53 = vpop.f32.mrf.mxu0  ;;  %v9397_v60 = vld [vmem:[#allocation19_spill] sm:$0xff] }
 0x37c   : > { %v4037_v47 = vpop.f32.mrf.mxu1  ;;  %v3634_v35 = vadd.f32 %v9392_v39, %v3392_v2  ;;  %v3632_v40 = vadd.f32 %v9395_v17, %v3390_v19 }
 0x37d   : > { %v4182_v38 = vpack.c.bf16 %v4162_v55, %v4161_v33  ;;  %v4160_v25 = vmax.f32 %v4136_v6, 0.0  ;;  %v4108_v44 = vadd.f32 %v4037_v47, %v3866_v14  ;;  %v4141_v62 = vadd.f32 %v8700_v8, %v4110_v9 }
 0x37e   : > { %v5354_v41 = vpop.f32.mrf.mxu1  ;;  %v3393_v14 = vadd.f32 %v9397_v60, %v9396_v48  ;;  %v3876_v10 = vadd.f32 %v8734_v50, %v3634_v35  ;;  %v3874_v57 = vadd.f32 %v3827_v31, %v3632_v40  ;;  %v9410_v31 = vld [vmem:[#allocation26_spill] sm:$0xff] }
 0x37f   : > { %v4181_v20 = vpack.c.bf16 %v4160_v25, %v4159_v56  ;;  %v4111_v0 = vadd.f32 %v5354_v41, %v3869_v24  ;;  %v4139_v11 = vadd.f32 %v8700_v8, %v4108_v44  ;;  %v4165_v15 = vmax.f32 %v4141_v62, 0.0  ;;  %v9400_v24 = vld [vmem:[#allocation20_spill] sm:$0xff]  ;;  %v5337_v41 = vpop.f32.mrf.mxu0 }
 0x380   : > { %v4040_v28 = vpop.f32.mrf.mxu1  ;;  %v3635_v47 = vadd.f32 %v9398_v26, %v3393_v14  ;;  %v3391_v56 = vadd.f32 %v9400_v24, %v9399_v49 }
 0x381   : > { %v4142_v59 = vadd.f32 %v8700_v8, %v4111_v0  ;;  %v4109_v13 = vadd.f32 %v4040_v28, %v3867_v46  ;;  %5375 = vmatprep.mubr.msk.bf16.mxu0 %vm9387_vm14, %v4181_v20  ;;  %v4163_v52 = vmax.f32 %v4139_v11, 0.0  ;;  %v9402_v20 = vld [vmem:[#allocation33_spill] sm:$0xff]  ;;  %v9403_v0 = vld [vmem:[#allocation24_spill] sm:$0xff]  ;;  %v9406_v11 = vld [vmem:[#allocation34_spill] sm:$0xff] }
 0x382   : > { %v5357_v30 = vpop.f32.mrf.mxu1  ;;  %5376 = vmatmul.mubr.msk.bf16.gmra.mxu0 %vm9391_vm13, %v4182_v38  ;;  %v3633_v62 = vadd.f32 %v9402_v20, %v3391_v56  ;;  %v3396_v46 = vadd.f32 %v9404_v23, %v9403_v0  ;;  %v3877_v12 = vadd.f32 %v5334_v18, %v3635_v47  ;;  %v9414_v18 = vld [vmem:[#allocation25_spill] sm:$0xff] }
 0x383   : > { %v4166_v43 = vmax.f32 %v4142_v59, 0.0  ;;  %v4140_v3 = vadd.f32 %v8700_v8, %v4109_v13  ;;  %v4114_v63 = vadd.f32 %v5357_v30, %v3872_v61  ;;  %v9407_v13 = vld [vmem:[#allocation16_spill] sm:$0xff]  ;;  %v9408_v61 = vld [vmem:[#allocation14_spill] sm:$0xff] }
 0x384   : > { %v4053_v37 = vpop.f32.mrf.mxu1  ;;  %v3638_v59 = vadd.f32 %v9406_v11, %v3396_v46  ;;  %v3394_v50 = vadd.f32 %v9408_v61, %v9407_v13  ;;  %v3875_v19 = vadd.f32 %v3830_v53, %v3633_v62  ;;  %v8815_v11 = vld [vmem:[%s8936_s6] ss:$0 sm:$0xff] }
 0x385   : > { %v4184_v29 = vpack.c.bf16 %v4166_v43, %v4165_v15  ;;  %v4164_v36 = vmax.f32 %v4140_v3, 0.0  ;;  %v4112_v34 = vadd.f32 %v4053_v37, %v3870_v45  ;;  %v4145_v6 = vadd.f32 %v8700_v8, %v4114_v63  ;;  %v3843_v45 = vpop.f32.mrf.mxu0  ;;  %v9409_v15 = vld [vmem:[#allocation35_spill] sm:$0xff]  ;;  %v9412_v37 = vld [vmem:[#allocation36_spill] sm:$0xff] }
 0x386   : > { %v5358_v33 = vpop.f32.mrf.mxu1  ;;  %v3636_v43 = vadd.f32 %v9409_v15, %v3394_v50  ;;  %v9411_v3 = vld [vmem:[#allocation15_spill] sm:$0xff]  ;;  %v3880_v48 = vadd.f32 %v5337_v41, %v3638_v59 }
 0x387   : > { %v4183_v55 = vpack.c.bf16 %v4164_v36, %v4163_v52  ;;  %v4115_v9 = vadd.f32 %v5358_v33, %v3873_v58  ;;  %v4143_v25 = vadd.f32 %v8700_v8, %v4112_v34  ;;  %v4169_v22 = vmax.f32 %v4145_v6, 0.0  ;;  %v9413_v52 = vld [vmem:[#allocation27_spill] sm:$0xff]  ;;  %v5338_v60 = vpop.f32.mrf.mxu0 }
 0x388   : > { %v4056_v38 = vpop.f32.mrf.mxu1  ;;  %v3397_v63 = vadd.f32 %v9411_v3, %v9410_v31  ;;  %v3878_v53 = vadd.f32 %v3843_v45, %v3636_v43 }
 0x389   : > { %v4146_v44 = vadd.f32 %v8700_v8, %v4115_v9  ;;  %v4113_v16 = vadd.f32 %v4056_v38, %v3871_v21  ;;  %5379 = vmatprep.mubr.msk.bf16.mxu0 %vm9401_vm3, %v4183_v55  ;;  %v4167_v51 = vmax.f32 %v4143_v25, 0.0  ;;  %v3846_v25 = vpop.f32.mrf.mxu0 }
 0x38a   : > { %v5361_v27 = vpop.f32.mrf.mxu1  ;;  %5380 = vmatmul.mubr.msk.bf16.gmra.mxu0 %vm9405_vm5, %v4184_v29  ;;  %v3639_v58 = vadd.f32 %v9412_v37, %v3397_v63  ;;  %v3395_v29 = vadd.f32 %v9414_v18, %v9413_v52 }
 0x38b   : > { %v4170_v7 = vmax.f32 %v4146_v44, 0.0  ;;  %v4144_v4 = vadd.f32 %v8700_v8, %v4113_v16  ;;  %v4118_v28 = vadd.f32 %v5361_v27, %v3876_v10 }
 0x38c   : > { %v4069_v5 = vpop.f32.mrf.mxu1  ;;  %v3637_v14 = vadd.f32 %v8687_v54, %v3395_v29  ;;  %v3881_v47 = vadd.f32 %v5338_v60, %v3639_v58 }
 0x38d   : > { %v4186_v42 = vpack.c.bf16 %v4170_v7, %v4169_v22  ;;  %v4168_v2 = vmax.f32 %v4144_v4, 0.0  ;;  %v4116_v30 = vadd.f32 %v4069_v5, %v3874_v57  ;;  %v4149_v1 = vadd.f32 %v8700_v8, %v4118_v28 }
 0x38e   : > { %v5362_v39 = vpop.f32.mrf.mxu1  ;;  %v3879_v41 = vadd.f32 %v3846_v25, %v3637_v14 }
 0x38f   : > { %v4185_v35 = vpack.c.bf16 %v4168_v2, %v4167_v51  ;;  %v4119_v32 = vadd.f32 %v5362_v39, %v3877_v12  ;;  %v4147_v34 = vadd.f32 %v8700_v8, %v4116_v30  ;;  %v4173_v55 = vmax.f32 %v4149_v1, 0.0 }
 0x390   : > { %v4072_v36 = vpop.f32.mrf.mxu1 }
 0x391   : > { %v4150_v17 = vadd.f32 %v8700_v8, %v4119_v32  ;;  %v4117_v40 = vadd.f32 %v4072_v36, %v3875_v19  ;;  %5383 = vmatprep.mubr.msk.bf16.mxu0 %vm9415_vm11, %v4185_v35  ;;  %v4171_v49 = vmax.f32 %v4147_v34, 0.0 }
 0x392   : > { %v5365_v33 = vpop.f32.mrf.mxu1  ;;  %5384 = vmatmul.mubr.msk.bf16.gmra.mxu0 %vm9416_vm8, %v4186_v42 }
 0x393   : > { %v4174_v6 = vmax.f32 %v4150_v17, 0.0  ;;  %v4148_v9 = vadd.f32 %v8700_v8, %v4117_v40  ;;  %v4122_v21 = vadd.f32 %v5365_v33, %v3880_v48 }
 0x394   : > { %v4085_v26 = vpop.f32.mrf.mxu1 }
 0x395   : > { %v4188_v24 = vpack.c.bf16 %v4174_v6, %v4173_v55  ;;  %v4172_v56 = vmax.f32 %v4148_v9, 0.0  ;;  %v4120_v38 = vadd.f32 %v4085_v26, %v3878_v53  ;;  %v4153_v54 = vadd.f32 %v8700_v8, %v4122_v21 }
 0x396   : > { %v5366_v44 = vpop.f32.mrf.mxu1 }
 0x397   : > { %v4187_v16 = vpack.c.bf16 %v4172_v56, %v4171_v49  ;;  %v4123_v10 = vadd.f32 %v5366_v44, %v3881_v47  ;;  %v4151_v62 = vadd.f32 %v8700_v8, %v4120_v38  ;;  %v4177_v46 = vmax.f32 %v4153_v54, 0.0 }
 0x398   : > { %v4088_v20 = vpop.f32.mrf.mxu1 }
 0x399   : > { %v4154_v0 = vadd.f32 %v8700_v8, %v4123_v10  ;;  %v4121_v23 = vadd.f32 %v4088_v20, %v3879_v41  ;;  %5387 = vmatprep.mubr.msk.bf16.mxu0 %vm9417_vm10, %v4187_v16  ;;  %v4175_v22 = vmax.f32 %v4151_v62, 0.0 }
 0x39a   : > { %5388 = vmatmul.mubr.msk.bf16.gmra.mxu0 %vm9418_vm9, %v4188_v24 }
 0x39b   : > { %v4178_v27 = vmax.f32 %v4154_v0, 0.0  ;;  %v4152_v57 = vadd.f32 %v8700_v8, %v4121_v23 }
 0x39d   : > { %v4190_v7 = vpack.c.bf16 %v4178_v27, %v4177_v46  ;;  %v4176_v4 = vmax.f32 %v4152_v57, 0.0 }
 0x39f   : > { %v4189_v28 = vpack.c.bf16 %v4176_v4, %v4175_v22 }
 0x3a1   : > { %5391 = vmatprep.mubr.msk.bf16.mxu0 %vm9419_vm15, %v4189_v28 }
 0x3a2   : > { %5392 = vmatmul.mubr.msk.bf16.gmra.mxu0 %vm9420_vm4, %v4190_v7 }
 0x43a   : > { %v5373_v59 = vpop.f32.mrf.mxu0 }
 0x43b   : > { %v4293_v13 = vadd.f32 %v5373_v59, %v8815_v11 }
 0x43c   : > { %v4284_v8 = vpop.f32.mrf.mxu0 }
 0x43d   : > { %4381 = vst [vmem:[%s8818_s10 + $0x10] sm:$0xff] %v4293_v13  ;;  %v4285_v61 = vadd.f32 %v8815_v11, %v4284_v8 }
 0x43e   : > { %v5374_v50 = vpop.f32.mrf.mxu0 }
 0x43f   : > { %4379 = vst [vmem:[%s8818_s10] sm:$0xff] %v4285_v61  ;;  %v4296_v5 = vadd.f32 %v5374_v50, %v8815_v11 }
 0x440   : > { %v4287_v12 = vpop.f32.mrf.mxu0 }
 0x441   : > { %4382 = vst [vmem:[%s8818_s10 + $0x18] sm:$0xff] %v4296_v5  ;;  %v4288_v51 = vadd.f32 %v8815_v11, %v4287_v12 }
 0x442   : > { %v5377_v42 = vpop.f32.mrf.mxu0 }
 0x443   : > { %4380 = vst [vmem:[%s8818_s10 + $0x8] sm:$0xff] %v4288_v51  ;;  %v4309_v2 = vadd.f32 %v5377_v42, %v8815_v11 }
 0x444   : > { %v4300_v30 = vpop.f32.mrf.mxu0 }
 0x445   : > { %4385 = vst [vmem:[%s8818_s10 + $0x30] sm:$0xff] %v4309_v2  ;;  %v4301_v45 = vadd.f32 %v8815_v11, %v4300_v30 }
 0x446   : > { %v5378_v15 = vpop.f32.mrf.mxu0 }
 0x447   : > { %4383 = vst [vmem:[%s8818_s10 + $0x20] sm:$0xff] %v4301_v45  ;;  %v4312_v43 = vadd.f32 %v5378_v15, %v8815_v11 }
 0x448   : > { %v4303_v31 = vpop.f32.mrf.mxu0 }
 0x449   : > { %4386 = vst [vmem:[%s8818_s10 + $0x38] sm:$0xff] %v4312_v43  ;;  %v4304_v3 = vadd.f32 %v8815_v11, %v4303_v31 }
 0x44a   : > { %v5381_v63 = vpop.f32.mrf.mxu0 }
 0x44b   : > { %4384 = vst [vmem:[%s8818_s10 + $0x28] sm:$0xff] %v4304_v3  ;;  %v4325_v39 = vadd.f32 %v5381_v63, %v8815_v11 }
 0x44c   : > { %v4316_v35 = vpop.f32.mrf.mxu0 }
 0x44d   : > { %4389 = vst [vmem:[%s8818_s10 + $0x50] sm:$0xff] %v4325_v39  ;;  %v4317_v1 = vadd.f32 %v8815_v11, %v4316_v35 }
 0x44e   : > { %v5382_v32 = vpop.f32.mrf.mxu0 }
 0x44f   : > { %4387 = vst [vmem:[%s8818_s10 + $0x40] sm:$0xff] %v4317_v1  ;;  %v4328_v19 = vadd.f32 %v5382_v32, %v8815_v11 }
 0x450   : > { %v4319_v37 = vpop.f32.mrf.mxu0 }
 0x451   : > { %4390 = vst [vmem:[%s8818_s10 + $0x58] sm:$0xff] %v4328_v19  ;;  %v4320_v58 = vadd.f32 %v8815_v11, %v4319_v37 }
 0x452   : > { %v5385_v52 = vpop.f32.mrf.mxu0 }
 0x453   : > { %4388 = vst [vmem:[%s8818_s10 + $0x48] sm:$0xff] %v4320_v58  ;;  %v4341_v18 = vadd.f32 %v5385_v52, %v8815_v11 }
 0x454   : > { %v4332_v29 = vpop.f32.mrf.mxu0 }
 0x455   : > { %4393 = vst [vmem:[%s8818_s10 + $0x70] sm:$0xff] %v4341_v18  ;;  %v4333_v36 = vadd.f32 %v8815_v11, %v4332_v29 }
 0x456   : > { %v5386_v34 = vpop.f32.mrf.mxu0 }
 0x457   : > { %4391 = vst [vmem:[%s8818_s10 + $0x60] sm:$0xff] %v4333_v36  ;;  %v4344_v17 = vadd.f32 %v5386_v34, %v8815_v11 }
 0x458   : > { %v4335_v40 = vpop.f32.mrf.mxu0 }
 0x459   : > { %4394 = vst [vmem:[%s8818_s10 + $0x78] sm:$0xff] %v4344_v17  ;;  %v4336_v48 = vadd.f32 %v8815_v11, %v4335_v40 }
 0x45a   : > { %v5389_v60 = vpop.f32.mrf.mxu0 }
 0x45b   : > { %4392 = vst [vmem:[%s8818_s10 + $0x68] sm:$0xff] %v4336_v48  ;;  %v4357_v14 = vadd.f32 %v5389_v60, %v8815_v11 }
 0x45c   : > { %v4348_v33 = vpop.f32.mrf.mxu0 }
 0x45d   : > { %4397 = vst [vmem:[%s8818_s10 + $0x90] sm:$0xff] %v4357_v14  ;;  %v4349_v53 = vadd.f32 %v8815_v11, %v4348_v33 }
 0x45e   : > { %v5390_v55 = vpop.f32.mrf.mxu0 }
 0x45f   : > { %4395 = vst [vmem:[%s8818_s10 + $0x80] sm:$0xff] %v4349_v53  ;;  %v4360_v6 = vadd.f32 %v5390_v55, %v8815_v11 }
 0x460   : > { %v4351_v9 = vpop.f32.mrf.mxu0 }
 0x461   : > { %4398 = vst [vmem:[%s8818_s10 + $0x98] sm:$0xff] %v4360_v6  ;;  %v4352_v21 = vadd.f32 %v8815_v11, %v4351_v9 }
 0x462   : > { %v5393_v26 = vpop.f32.mrf.mxu0 }
 0x463   : > { %4396 = vst [vmem:[%s8818_s10 + $0x88] sm:$0xff] %v4352_v21  ;;  %v4373_v47 = vadd.f32 %v5393_v26, %v8815_v11 }
 0x464   : > { %v4364_v49 = vpop.f32.mrf.mxu0 }
 0x465   : > { %4401 = vst [vmem:[%s8818_s10 + $0xb0] sm:$0xff] %v4373_v47  ;;  %v4365_v24 = vadd.f32 %v8815_v11, %v4364_v49 }
 0x466   : > { %v5394_v56 = vpop.f32.mrf.mxu0 }
 0x467   : > { %4399 = vst [vmem:[%s8818_s10 + $0xa0] sm:$0xff] %v4365_v24  ;;  %v4376_v38 = vadd.f32 %v5394_v56, %v8815_v11 }
 0x468   : > { %v4367_v25 = vpop.f32.mrf.mxu0 }
 0x469   : > { %4402 = vst [vmem:[%s8818_s10 + $0xb8] sm:$0xff] %v4376_v38  ;;  %v4368_v44 = vadd.f32 %v8815_v11, %v4367_v25 }
 0x46b   : > { %4400 = vst [vmem:[%s8818_s10 + $0xa8] sm:$0xff] %v4368_v44 }
 0x46c   : > { %5574 = shalt.err (!%p5571_p7)
}
 0x46d   : > { %s5575_s12 = scalar_lea.hbm %s8870_s20, 3072  ;;  %s5579_s16 = scalar_lea.hbm %s8937_s7, 12288 }
 0x46e   : > { %p5576_p9 = scmp.ne.s32.totalorder %s8870_s20, %s5575_s12  ;;  %p5580_p12 = scmp.lt.s32.totalorder %s8870_s20, %s8937_s7 }
 0x46f   : > { %p5581_p13 = scmp.lt.s32.totalorder %s5579_s16, %s5575_s12 }
 0x470   : > { %p5577_p10 = pnand %p5576_p9, %p5751_p3 }
 0x471   : > { %p5582_p0 = por %p5581_p13, %p5580_p12 }
 0x472   : > { %p5578_p11 = pneg %p5577_p10 }
 0x474   : > { %p5583_p1 = pnand %p5582_p0, %p5578_p11 }
 0x476   : > { %5586 = shalt.err (!%p5583_p1)
}
 0x477   : > { %s5658_s17 = smov 128   ;;  %s5659_s18 = smov 8  }
 0x478   : > { %5461 = dma.vmem_to_hbm [thread:$0]  (%p5751_p3), %s8872_s28, 3072, %s8870_s20, %s8879_s21, %s5658_s17, %s5658_s17, %s5659_s18  }
 0x479 PF: > { %p5467_p2 = scmp.ge.s32.totalorder %s5653_s8, 2  ;;  %s4434_s11 = sand.u32 1, %s5625_s24  }
 0x47a   : > { %s4435_s22 = scalar_lea.sflag [#allocation4], %s4434_s11 }
 0x47b   : > { %p5464_p4 = pnand %p5467_p2, %p5760_p8 }
 0x47d   : > { %p5465_p5 = pneg %p5464_p4 }
 0x47f   : > { %5620 = dma.done.wait (%p5465_p5), %s4435_s22, 3072  }
 0x480   : > { %5622 = vsyncadd (%p5465_p5), %s4435_s22, 4294964224  ;;  %s20_s8 = sadd.s32 1, %s5653_s8   ;;  %s9421_s28 = sld [smem:[#allocation6_spill]] }
 0x481   : > { %p17_p6 = scmp.ge.s32.totalorder %s20_s8, 6   ;;  %s9422_s14 = sld [smem:[#allocation7_spill]] }
 0x482   : > { %s9423_s30 = sld [smem:[#allocation8_spill]]  ;;  %s9424_s24 = smov %s5629_s25 }
 0x483   : > { %s9425_s25 = smov %s5633_s26  ;;  %s9426_s26 = smov %s5769_s19 }
 0x484   : > { %s9427_s27 = smov %s5645_s29  ;;  %19 = sbr.rel (!%p17_p6) target bundleno = 5 (0x5), region = 93 }
 0x487   : > { %s9428_s29 = smov %s9422_s14 }
 0x489   :  { %4440 = vsyncpa [#allocation4], 1 }
 0x48a   :  { %4442 = vsyncpa [#allocation4 + $0x1], 1 }

// kernel: tpu_custom_call.1
= control target key start
LH: loop header
LB: loop body
LE: loop exit
PB: predicated region body
PF: predicated region fallthrough
CT: control target
= control target key end

     0   :  { %12 = vsyncpa [#allocation4], 0  ;;  %s8930_s0 = inlined_call_operand.vmem [shape: f32[2,2,288,12], index: 0, kind: input, shape index: {}]   ;;  %s8931_s1 = inlined_call_operand.vmem [shape: bf16[3,12,32], index: 1, kind: input, shape index: {}]   ;;  %s8932_s2 = inlined_call_operand.vmem [shape: f32[1,32], index: 2, kind: input, shape index: {}]   ;;  %s8933_s3 = inlined_call_operand.vmem [shape: bf16[9,32,32], index: 3, kind: input, shape index: {}]   ;;  %s8934_s4 = inlined_call_operand.vmem [shape: f32[1,32], index: 4, kind: input, shape index: {}]   ;;  %s8935_s5 = inlined_call_operand.vmem [shape: bf16[32,128], index: 5, kind: input, shape index: {}]   ;;  %s8936_s6 = inlined_call_operand.vmem [shape: f32[1,128], index: 6, kind: input, shape index: {}]   ;;  %s8937_s7 = inlined_call_operand.hbm [shape: f32[2,384,128], index: 7, kind: output, shape index: {}]  }
   0x1   :  { %14 = vsyncpa [#allocation4 + $0x1], 0  ;;  %s5700_s24 = smov 0   ;;  %s5702_s25 = smov 0  }
   0x2   :  { %s5704_s26 = smov 0   ;;  %s5706_s27 = smov 0  }
   0x3   :  { %s5708_s28 = smov 0   ;;  %s5710_s29 = smov 0  }
   0x4   :  { %s5712_s30 = smov 0   ;;  %s5714_s8 = smov 0  }
   0x5 LB: > { %8942 = sst [smem:[#allocation6_spill]] %s5649_s30  ;;  %s4504_s9 = sadd.s32 4294967295, %s5653_s8   ;;  %s5653_s8 = sphi %s5714_s8, %s20_s8   ;;  %s5649_s30 = sphi %s5712_s30, %s9423_s30   ;;  %s5645_s29 = sphi %s5710_s29, %s9428_s29   ;;  %s5641_s28 = sphi %s5708_s28, %s9421_s28   ;;  %s5637_s27 = sphi %s5706_s27, %s9427_s27   ;;  %s5633_s26 = sphi %s5704_s26, %s9426_s26   ;;  %s5629_s25 = sphi %s5702_s25, %s9425_s25   ;;  %s5625_s24 = sphi %s5700_s24, %s9424_s24  }
   0x6   : > { %s4505_s10 = sadd.s32 4294967294, %s5653_s8   ;;  %s29_s11 = sadd.s32 1, %s5645_s29 }
   0x7   : > { %p30_p0 = scmp.ge.s32.totalorder %s29_s11, 2  ;;  %s32_s12 = sadd.s32 1, %s5649_s30 }
   0x8   : > { %p205_p1 = scmp.ne.s32.totalorder %s5633_s26, %s5629_s25  ;;  %p206_p2 = scmp.eq.s32.totalorder %s4504_s9, 3 }
   0x9   : > { %s9430_s11 = smov (%p30_p0, %s29_s11), 0  ;;  %s9432_s12 = smov (!%p30_p0, %s32_s12), %s5649_s30 }
   0xa   : > { %8943 = sst [smem:[#allocation7_spill]] %s9430_s11  ;;  %s191_s13 = ssub.s32 %s5645_s29, %s9430_s11 }
   0xb   : > { %p5751_p3 = por %p206_p2, %p205_p1  ;;  %p34_p4 = scmp.ge.s32.totalorder %s9432_s12, 2 }
   0xc   : > { %p211_p5 = scmp.ne.s32.totalorder %s5629_s25, %s5625_s24  ;;  %p212_p6 = scmp.eq.s32.totalorder %s4505_s10, 3 }
   0xd   : > { %p4508_p7 = scmp.ge.s32.totalorder %s5653_s8, 1  ;;  %s9434_s12 = smov (%p34_p4, %s9432_s12), 0 }
   0xe   : > { %8945 = sst [smem:[#allocation8_spill]] %s9434_s12  ;;  %p5760_p8 = por %p212_p6, %p211_p5 }
   0xf   : > { %p260_p9 = scmp.lt.s32.totalorder %s5653_s8, 5  ;;  %s190_s16 = ssub.s32 %s5649_s30, %s9434_s12 }
  0x10   : > { %s195_s17 = sadd.s32 1, %s5633_s26  ;;  %s192_s18 = sor.u32 %s191_s13, %s190_s16 }
  0x11   : > { %p261_p10 = pnand %p4508_p7, %p260_p9  ;;  %p193_p11 = scmp.eq.s32.totalorder %s192_s18, 0 }
  0x13   : > { %s5769_s19 = scalar_select %p193_p11, %s5633_s26, %s195_s17  }
  0x14   : > { %264 = sbr.rel (%p261_p10) target bundleno = 1145 (0x479), region = 48 }
  0x19   : > { %vm427_vm0 = vcmask 1045504   ;;  %v5655_v0 = vmov 0.0   ;;  %v5536_v1 = vld [vmem:[%s8931_s1 + $0x8] sm:$0x3f]   ;;  %p296_p12 = scmp.lt.s32.totalorder %s5641_s28, 1  ;;  %p298_p13 = scmp.lt.s32.totalorder %s5637_s27, 1 }
  0x1a   : > { %4929 = vmatprep.subr.bf16.mxu0 %v5655_v0  ;;  %5395 = vmatprep.subr.bf16.mxu1 %v5655_v0  ;;  %vm5656_vm1 = vmmov 0   ;;  %v429_v2 = vsel %vm427_vm0, %v5536_v1, 0  ;;  %v5537_v3 = vld [vmem:[%s8931_s1 + $0x10] sm:$0x3f]   ;;  %v5538_v4 = vld [vmem:[%s8931_s1] sm:$0x3f]  }
  0x1b   : > { %4931 = vmatprep.mubr.msk.bf16.mxu0 %vm5656_vm1, %v5655_v0  ;;  %4987 = vmatprep.mubr.msk.bf16.mxu1 %vm5656_vm1, %v5655_v0  ;;  %s297_s22 = scalar_select %p296_p12, %s5641_s28, 1  ;;  %vm381_vm2 = vcmask 97280   ;;  %v889_v10 = vsel %vm427_vm0, %v5537_v3, 0  ;;  %v635_v12 = vsel %vm427_vm0, %v5538_v4, 0  ;;  %vm8941_vm3 = vcmask 261120  }
  0x1c   : > { %4930 = vmatpush3.bf16.msra.mxu0 %v429_v2  ;;  %5396 = vmatpush3.bf16.msra.mxu1 %v429_v2  ;;  %s299_s23 = scalar_select %p298_p13, %s5637_s27, 1  ;;  %1961 = vst.msk [vmem:[#allocation2 + $0x10] sm:$0xff] %vm8941_vm3, %v5655_v0  ;;  %1962 = vst.msk [vmem:[#allocation2 + $0x108] sm:$0xff] %vm8941_vm3, %v5655_v0 }
  0x1d   : > { %5053 = vmatprep.subr.bf16.mxu0 %v5655_v0  ;;  %s5399_s9 = smul.u32 72, %s297_s22  ;;  %4991 = vmatprep.subr.bf16.mxu1 %v5655_v0  ;;  %s4510_s18 = sshll.u32 %s5637_s27, 3 }
  0x1e   : > { %s5398_s10 = smul.u32 36, %s299_s23 }
  0x1f   : > { %s4411_s13 = smul.u32 24, %s5637_s27 }
  0x20   : > { %s302_s20 = sadd.s32 %s5399_s9, %s5398_s10  ;;  %s5460_s16 = smul.u32 48, %s5641_s28 }
  0x21   : > { %s4509_s21 = sshll.u32 %s302_s20, 3  ;;  %s6114_s20 = ssub.s32 1, %s4510_s18 }
  0x22   : > { %s5796_s30 = scalar_lea.vmem %s8930_s0, %s4509_s21  ;;  %s6116_s21 = ssub.s32 17, %s4510_s18 }
  0x23   : > { %v311_v5 = vld [vmem:[%s5796_s30 + $0x18] sm:$0xff]  ;;  %v312_v6 = vld [vmem:[%s5796_s30 + $0x20] sm:$0xff]  ;;  %v313_v13 = vld [vmem:[%s5796_s30 + $0x28] sm:$0xff]  ;;  %s1743_s11 = smul.u32 24, %s6114_s20 }
  0x24   : > { %v5801_v7 = vld [vmem:[%s5796_s30 + $0xf8] sm:$0xff]  ;;  %v358_v8 = vpack.c.bf16 %v312_v6, %v311_v5  ;;  %v5804_v9 = vld [vmem:[%s5796_s30 + $0x100] sm:$0xff]  ;;  %v314_v14 = vld [vmem:[%s5796_s30 + $0x30] sm:$0xff]  ;;  %v340_v27 = vpack.c.bf16 %v313_v13, %v312_v6  ;;  %s1806_s12 = smul.u32 24, %s6116_s21 }
  0x25   : > { %v372_v11 = vpack.c.bf16 %v5804_v9, %v5801_v7  ;;  %v308_v15 = vld [vmem:[%s5796_s30] sm:$0xff]  ;;  %v309_v16 = vld [vmem:[%s5796_s30 + $0x8] sm:$0xff]  ;;  %v359_v17 = vpack.c.bf16 %v314_v14, %v313_v13  ;;  %v315_v19 = vld [vmem:[%s5796_s30 + $0x38] sm:$0xff] }
  0x26   : > { %4932 = vmatmul.mubr.msk.bf16.vlgmr.msra.gmra.mxu0 %vm381_vm2, %v358_v8  ;;  %v338_v18 = vpack.c.bf16 %v309_v16, %v308_v15  ;;  %v316_v20 = vld [vmem:[%s5796_s30 + $0x40] sm:$0xff]  ;;  %v310_v21 = vld [vmem:[%s5796_s30 + $0x10] sm:$0xff]  ;;  %v317_v24 = vld [vmem:[%s5796_s30 + $0x48] sm:$0xff]  ;;  %v5845_v31 = vpack.c.bf16 %v315_v19, %v314_v14 }
  0x27   : > { %4988 = vmatmul.mubr.msk.bf16.vlgmr.msra.gmra.mxu1 %vm381_vm2, %v372_v11  ;;  %5054 = vmatpush3.bf16.msra.mxu0 %v889_v10  ;;  %v360_v22 = vpack.c.bf16 %v316_v20, %v315_v19  ;;  %v339_v23 = vpack.c.bf16 %v311_v5, %v310_v21  ;;  %v318_v25 = vld [vmem:[%s5796_s30 + $0x50] sm:$0xff]  ;;  %v319_v28 = vld [vmem:[%s5796_s30 + $0x58] sm:$0xff]  ;;  %v320_v29 = vld [vmem:[%s5796_s30 + $0x60] sm:$0xff]  ;;  %v5856_v35 = vpack.c.bf16 %v317_v24, %v316_v20 }
  0x28   : > { %4992 = vmatpush3.bf16.msra.mxu1 %v635_v12  ;;  %4935 = vmatprep.mubr.msk.bf16.mxu0 %vm5656_vm1, %v5655_v0  ;;  %v361_v26 = vpack.c.bf16 %v318_v25, %v317_v24  ;;  %v362_v30 = vpack.c.bf16 %v320_v29, %v319_v28  ;;  %v321_v32 = vld [vmem:[%s5796_s30 + $0x68] sm:$0xff]  ;;  %v322_v33 = vld [vmem:[%s5796_s30 + $0x70] sm:$0xff]  ;;  %v323_v36 = vld [vmem:[%s5796_s30 + $0x78] sm:$0xff]  ;;  %v5867_v39 = vpack.c.bf16 %v319_v28, %v318_v25 }
  0x29   : > { %4993 = vmatprep.mubr.msk.bf16.mxu1 %vm5656_vm1, %v5655_v0  ;;  %v363_v34 = vpack.c.bf16 %v322_v33, %v321_v32  ;;  %v324_v37 = vld [vmem:[%s5796_s30 + $0x80] sm:$0xff]  ;;  %v325_v40 = vld [vmem:[%s5796_s30 + $0x88] sm:$0xff]  ;;  %v326_v41 = vld [vmem:[%s5796_s30 + $0x90] sm:$0xff]  ;;  %v5878_v43 = vpack.c.bf16 %v321_v32, %v320_v29  ;;  %v345_v47 = vpack.c.bf16 %v323_v36, %v322_v33 }
  0x2a   : > { %v364_v38 = vpack.c.bf16 %v324_v37, %v323_v36  ;;  %v365_v42 = vpack.c.bf16 %v326_v41, %v325_v40  ;;  %v327_v44 = vld [vmem:[%s5796_s30 + $0x98] sm:$0xff]  ;;  %v328_v45 = vld [vmem:[%s5796_s30 + $0xa0] sm:$0xff]  ;;  %v329_v48 = vld [vmem:[%s5796_s30 + $0xa8] sm:$0xff]  ;;  %v346_v51 = vpack.c.bf16 %v325_v40, %v324_v37 }
  0x2b   : > { %v366_v46 = vpack.c.bf16 %v328_v45, %v327_v44  ;;  %v330_v49 = vld [vmem:[%s5796_s30 + $0xb0] sm:$0xff]  ;;  %v331_v52 = vld [vmem:[%s5796_s30 + $0xb8] sm:$0xff]  ;;  %v332_v53 = vld [vmem:[%s5796_s30 + $0xc0] sm:$0xff]  ;;  %v347_v55 = vpack.c.bf16 %v327_v44, %v326_v41  ;;  %v348_v59 = vpack.c.bf16 %v329_v48, %v328_v45 }
  0x2c   : > { %v367_v50 = vpack.c.bf16 %v330_v49, %v329_v48  ;;  %v368_v54 = vpack.c.bf16 %v332_v53, %v331_v52  ;;  %v333_v56 = vld [vmem:[%s5796_s30 + $0xc8] sm:$0xff]  ;;  %v334_v57 = vld [vmem:[%s5796_s30 + $0xd0] sm:$0xff]  ;;  %v335_v60 = vld [vmem:[%s5796_s30 + $0xd8] sm:$0xff]  ;;  %v349_v63 = vpack.c.bf16 %v331_v52, %v330_v49 }
  0x2d   : > { %v369_v58 = vpack.c.bf16 %v334_v57, %v333_v56  ;;  %v336_v61 = vld [vmem:[%s5796_s30 + $0xe0] sm:$0xff]  ;;  %v337_v1 = vld [vmem:[%s5796_s30 + $0xe8] sm:$0xff]  ;;  %v5927_v2 = vld [vmem:[%s5796_s30 + $0xf0] sm:$0xff]  ;;  %v350_v4 = vpack.c.bf16 %v333_v56, %v332_v53  ;;  %v351_v5 = vpack.c.bf16 %v335_v60, %v334_v57 }
  0x2e   : > { %4936 = vmatmul.mubr.msk.bf16.gmra.mxu0 %vm381_vm2, %v359_v17  ;;  %v370_v62 = vpack.c.bf16 %v336_v61, %v335_v60  ;;  %v371_v3 = vpack.c.bf16 %v5927_v2, %v337_v1  ;;  %v352_v6 = vpack.c.bf16 %v337_v1, %v336_v61  ;;  %v5539_v8 = vld [vmem:[%s8933_s3 + $0x18] sm:$0xff]   ;;  %v5540_v11 = vld [vmem:[%s8933_s3 + $0x10] sm:$0xff]   ;;  %v832_v25 = vpack.c.bf16 %v5801_v7, %v5927_v2  ;;  %v817_v32 = vld [vmem:[%s5796_s30 + $0x108] sm:$0xff] }
  0x2f   : > { %4994 = vmatmul.mubr.msk.bf16.vlgmr.msra.gmra.mxu1 %vm381_vm2, %v338_v18  ;;  %4939 = vmatprep.mubr.msk.bf16.mxu0 %vm5656_vm1, %v5655_v0  ;;  %v5541_v33 = vld [vmem:[%s8933_s3 + $0x38] sm:$0xff]   ;;  %v833_v37 = vpack.c.bf16 %v817_v32, %v5804_v9  ;;  %v818_v45 = vld [vmem:[%s5796_s30 + $0x110] sm:$0xff] }
  0x30   : > { %4997 = vmatprep.mubr.msk.bf16.mxu1 %vm5656_vm1, %v5655_v0  ;;  %5115 = vmatprep.subr.bf16.mxu1 %v5539_v8  ;;  %v819_v9 = vld [vmem:[%s5796_s30 + $0x118] sm:$0xff]  ;;  %s4416_s30 = sadd.s32 %s5460_s16, %s4411_s13 }
  0x31   : > { %5116 = vmatpush3.bf16.msra.mxu1 %v5539_v8  ;;  %5199 = vmatprep.subr.bf16.mxu0 %v5541_v33  ;;  %s4738_s27 = sshll.u32 %s4416_s30, 7 }
  0x32   : > { %5117 = vmatprep.subr.bf16.mxu1 %v5540_v11  ;;  %s8870_s20 = scalar_lea.hbm %s8937_s7, %s4738_s27 }
  0x35   : > { %5118 = vmatpush3.bf16.msra.mxu1 %v5540_v11 }
  0x36   : > { %4940 = vmatmul.mubr.msk.bf16.gmra.mxu0 %vm381_vm2, %v360_v22 }
  0x37   : > { %4998 = vmatmul.mubr.msk.bf16.gmra.mxu1 %vm381_vm2, %v339_v23  ;;  %4943 = vmatprep.mubr.msk.bf16.mxu0 %vm5656_vm1, %v5655_v0 }
  0x38   : > { %5001 = vmatprep.mubr.msk.bf16.mxu1 %vm5656_vm1, %v5655_v0 }
  0x3e   : > { %4944 = vmatmul.mubr.msk.bf16.gmra.mxu0 %vm381_vm2, %v361_v26 }
  0x3f   : > { %5002 = vmatmul.mubr.msk.bf16.gmra.mxu1 %vm381_vm2, %v340_v27  ;;  %4947 = vmatprep.mubr.msk.bf16.mxu0 %vm5656_vm1, %v5655_v0 }
  0x40   : > { %5005 = vmatprep.mubr.msk.bf16.mxu1 %vm5656_vm1, %v5655_v0 }
  0x46   : > { %4948 = vmatmul.mubr.msk.bf16.gmra.mxu0 %vm381_vm2, %v362_v30 }
  0x47   : > { %5006 = vmatmul.mubr.msk.bf16.gmra.mxu1 %vm381_vm2, %v5845_v31  ;;  %4951 = vmatprep.mubr.msk.bf16.mxu0 %vm5656_vm1, %v5655_v0 }
  0x48   : > { %5009 = vmatprep.mubr.msk.bf16.mxu1 %vm5656_vm1, %v5655_v0 }
  0x4e   : > { %4952 = vmatmul.mubr.msk.bf16.gmra.mxu0 %vm381_vm2, %v363_v34 }
  0x4f   : > { %5010 = vmatmul.mubr.msk.bf16.gmra.mxu1 %vm381_vm2, %v5856_v35  ;;  %4955 = vmatprep.mubr.msk.bf16.mxu0 %vm5656_vm1, %v5655_v0 }
  0x50   : > { %5013 = vmatprep.mubr.msk.bf16.mxu1 %vm5656_vm1, %v5655_v0 }
  0x56   : > { %4956 = vmatmul.mubr.msk.bf16.gmra.mxu0 %vm381_vm2, %v364_v38 }
  0x57   : > { %5014 = vmatmul.mubr.msk.bf16.gmra.mxu1 %vm381_vm2, %v5867_v39  ;;  %4959 = vmatprep.mubr.msk.bf16.mxu0 %vm5656_vm1, %v5655_v0 }
  0x58   : > { %5017 = vmatprep.mubr.msk.bf16.mxu1 %vm5656_vm1, %v5655_v0 }
  0x5e   : > { %4960 = vmatmul.mubr.msk.bf16.gmra.mxu0 %vm381_vm2, %v365_v42 }
  0x5f   : > { %5018 = vmatmul.mubr.msk.bf16.gmra.mxu1 %vm381_vm2, %v5878_v43  ;;  %4963 = vmatprep.mubr.msk.bf16.mxu0 %vm5656_vm1, %v5655_v0 }
  0x60   : > { %5021 = vmatprep.mubr.msk.bf16.mxu1 %vm5656_vm1, %v5655_v0 }
  0x66   : > { %4964 = vmatmul.mubr.msk.bf16.gmra.mxu0 %vm381_vm2, %v366_v46 }
  0x67   : > { %5022 = vmatmul.mubr.msk.bf16.gmra.mxu1 %vm381_vm2, %v345_v47  ;;  %4967 = vmatprep.mubr.msk.bf16.mxu0 %vm5656_vm1, %v5655_v0 }
  0x68   : > { %5025 = vmatprep.mubr.msk.bf16.mxu1 %vm5656_vm1, %v5655_v0 }
  0x6e   : > { %4968 = vmatmul.mubr.msk.bf16.gmra.mxu0 %vm381_vm2, %v367_v50  ;;  %v834_v50 = vpack.c.bf16 %v819_v9, %v818_v45 }
  0x6f   : > { %5026 = vmatmul.mubr.msk.bf16.gmra.mxu1 %vm381_vm2, %v346_v51  ;;  %4971 = vmatprep.mubr.msk.bf16.mxu0 %vm5656_vm1, %v5655_v0 }
  0x70   : > { %5029 = vmatprep.mubr.msk.bf16.mxu1 %vm5656_vm1, %v5655_v0 }
  0x76   : > { %4972 = vmatmul.mubr.msk.bf16.gmra.mxu0 %vm381_vm2, %v368_v54 }
  0x77   : > { %5030 = vmatmul.mubr.msk.bf16.gmra.mxu1 %vm381_vm2, %v347_v55  ;;  %4975 = vmatprep.mubr.msk.bf16.mxu0 %vm5656_vm1, %v5655_v0 }
  0x78   : > { %5033 = vmatprep.mubr.msk.bf16.mxu1 %vm5656_vm1, %v5655_v0 }
  0x7e   : > { %4976 = vmatmul.mubr.msk.bf16.gmra.mxu0 %vm381_vm2, %v369_v58 }
  0x7f   : > { %5034 = vmatmul.mubr.msk.bf16.gmra.mxu1 %vm381_vm2, %v348_v59  ;;  %4979 = vmatprep.mubr.msk.bf16.mxu0 %vm5656_vm1, %v5655_v0 }
  0x80   : > { %5037 = vmatprep.mubr.msk.bf16.mxu1 %vm5656_vm1, %v5655_v0 }
  0x86   : > { %4980 = vmatmul.mubr.msk.bf16.gmra.mxu0 %vm381_vm2, %v370_v62 }
  0x87   : > { %5038 = vmatmul.mubr.msk.bf16.gmra.mxu1 %vm381_vm2, %v349_v63  ;;  %4983 = vmatprep.mubr.msk.bf16.mxu0 %vm5656_vm1, %v5655_v0 }
  0x88   : > { %5041 = vmatprep.mubr.msk.bf16.mxu1 %vm5656_vm1, %v5655_v0 }
  0x8e   : > { %4984 = vmatmul.mubr.msk.bf16.gmra.mxu0 %vm381_vm2, %v371_v3 }
  0x8f   : > { %5042 = vmatmul.mubr.msk.bf16.gmra.mxu1 %vm381_vm2, %v350_v4  ;;  %5055 = vmatprep.mubr.msk.bf16.mxu0 %vm5656_vm1, %v5655_v0 }
  0x90   : > { %5045 = vmatprep.mubr.msk.bf16.mxu1 %vm5656_vm1, %v5655_v0 }
  0x96   : > { %5056 = vmatmul.mubr.msk.bf16.vlgmr.msra.gmra.mxu0 %vm381_vm2, %v5845_v31 }
  0x97   : > { %5046 = vmatmul.mubr.msk.bf16.gmra.mxu1 %vm381_vm2, %v351_v5  ;;  %5059 = vmatprep.mubr.msk.bf16.mxu0 %vm5656_vm1, %v5655_v0 }
  0x98   : > { %5049 = vmatprep.mubr.msk.bf16.mxu1 %vm5656_vm1, %v5655_v0  ;;  %5200 = vmatpush3.bf16.msra.mxu0 %v5541_v33 }
  0x9e   : > { %5060 = vmatmul.mubr.msk.bf16.gmra.mxu0 %vm381_vm2, %v5856_v35 }
  0x9f   : > { %5050 = vmatmul.mubr.msk.bf16.gmra.mxu1 %vm381_vm2, %v352_v6  ;;  %5063 = vmatprep.mubr.msk.bf16.mxu0 %vm5656_vm1, %v5655_v0 }
  0xa6   : > { %5064 = vmatmul.mubr.msk.bf16.gmra.mxu0 %vm381_vm2, %v5867_v39  ;;  %v5542_v39 = vld [vmem:[%s8933_s3 + $0x30] sm:$0xff]  }
  0xa7   : > { %5067 = vmatprep.mubr.msk.bf16.mxu0 %vm5656_vm1, %v5655_v0  ;;  %5201 = vmatprep.subr.bf16.mxu0 %v5542_v39 }
  0xa8   : > { %5202 = vmatpush3.bf16.msra.mxu0 %v5542_v39 }
  0xae   : > { %5068 = vmatmul.mubr.msk.bf16.gmra.mxu0 %vm381_vm2, %v5878_v43 }
  0xaf   : > { %5071 = vmatprep.mubr.msk.bf16.mxu0 %vm5656_vm1, %v5655_v0 }
  0xb6   : > { %5072 = vmatmul.mubr.msk.bf16.gmra.mxu0 %vm381_vm2, %v345_v47 }
  0xb7   : > { %5075 = vmatprep.mubr.msk.bf16.mxu0 %vm5656_vm1, %v5655_v0 }
  0xbe   : > { %5076 = vmatmul.mubr.msk.bf16.gmra.mxu0 %vm381_vm2, %v346_v51 }
  0xbf   : > { %5079 = vmatprep.mubr.msk.bf16.mxu0 %vm5656_vm1, %v5655_v0 }
  0xc6   : > { %5080 = vmatmul.mubr.msk.bf16.gmra.mxu0 %vm381_vm2, %v347_v55 }
  0xc7   : > { %5083 = vmatprep.mubr.msk.bf16.mxu0 %vm5656_vm1, %v5655_v0 }
  0xce   : > { %5084 = vmatmul.mubr.msk.bf16.gmra.mxu0 %vm381_vm2, %v348_v59 }
  0xcf   : > { %5087 = vmatprep.mubr.msk.bf16.mxu0 %vm5656_vm1, %v5655_v0 }
  0xd6   : > { %5088 = vmatmul.mubr.msk.bf16.gmra.mxu0 %vm381_vm2, %v349_v63 }
  0xd7   : > { %5091 = vmatprep.mubr.msk.bf16.mxu0 %vm5656_vm1, %v5655_v0 }
  0xde   : > { %5092 = vmatmul.mubr.msk.bf16.gmra.mxu0 %vm381_vm2, %v350_v4 }
  0xdf   : > { %5095 = vmatprep.mubr.msk.bf16.mxu0 %vm5656_vm1, %v5655_v0 }
  0xe6   : > { %v465_v10 = vpop.f32.mrf.mxu0  ;;  %5096 = vmatmul.mubr.msk.bf16.gmra.mxu0 %vm381_vm2, %v351_v5 }
  0xe7   : > { %v5987_v12 = vpop.f32.mrf.mxu1  ;;  %5099 = vmatprep.mubr.msk.bf16.mxu0 %vm5656_vm1, %v5655_v0 }
  0xe8   : > { %8947 = vst [vmem:[#allocation9_spill] sm:$0xff] %v5987_v12  ;;  %v4933_v13 = vpop.f32.mrf.mxu0 }
  0xe9   : > { %v4989_v14 = vpop.f32.mrf.mxu1 }
  0xea   : > { %v468_v15 = vpop.f32.mrf.mxu0 }
  0xeb   : > { %v5991_v16 = vpop.f32.mrf.mxu1 }
  0xec   : > { %8948 = vst [vmem:[#allocation10_spill] sm:$0xff] %v5991_v16  ;;  %v4934_v17 = vpop.f32.mrf.mxu0 }
  0xed   : > { %v4990_v18 = vpop.f32.mrf.mxu1 }
  0xee   : > { %v473_v19 = vpop.f32.mrf.mxu0  ;;  %5100 = vmatmul.mubr.msk.bf16.gmra.mxu0 %vm381_vm2, %v352_v6 }
  0xef   : > { %v671_v20 = vpop.f32.mrf.mxu1  ;;  %5103 = vmatprep.mubr.msk.bf16.mxu0 %vm5656_vm1, %v5655_v0 }
  0xf0   : > { %v5996_v21 = vadd.f32 %v671_v20, %v465_v10  ;;  %v4937_v22 = vpop.f32.mrf.mxu0 }
  0xf1   : > { %v4995_v23 = vpop.f32.mrf.mxu1 }
  0xf2   : > { %v476_v24 = vpop.f32.mrf.mxu0 }
  0xf3   : > { %v674_v26 = vpop.f32.mrf.mxu1 }
  0xf4   : > { %v6000_v27 = vadd.f32 %v674_v26, %v468_v15  ;;  %v4938_v28 = vpop.f32.mrf.mxu0 }
  0xf5   : > { %v4996_v29 = vpop.f32.mrf.mxu1 }
  0xf6   : > { %v481_v30 = vpop.f32.mrf.mxu0  ;;  %5104 = vmatmul.mubr.msk.bf16.gmra.mxu0 %vm381_vm2, %v832_v25  ;;  %v1141_v29 = vlaneseq }
  0xf7   : > { %v679_v31 = vpop.f32.mrf.mxu1  ;;  %5107 = vmatprep.mubr.msk.bf16.mxu0 %vm5656_vm1, %v5655_v0 }
  0xf8   : > { %v6009_v34 = vadd.f32 %v679_v31, %v473_v19  ;;  %v4941_v7 = vpop.f32.mrf.mxu0 }
  0xf9   : > { %v4999_v35 = vpop.f32.mrf.mxu1  ;;  %v6044_v7 = vld [vmem:[%s8933_s3 + $0x8] sm:$0xff]  }
  0xfa   : > { %v484_v36 = vpop.f32.mrf.mxu0  ;;  %5143 = vmatprep.subr.bf16.mxu1 %v6044_v7 }
  0xfb   : > { %v682_v38 = vpop.f32.mrf.mxu1 }
  0xfc   : > { %v6015_v40 = vadd.f32 %v682_v38, %v476_v24  ;;  %v4942_v41 = vpop.f32.mrf.mxu0 }
  0xfd   : > { %v5000_v42 = vpop.f32.mrf.mxu1 }
  0xfe   : > { %v489_v43 = vpop.f32.mrf.mxu0  ;;  %5108 = vmatmul.mubr.msk.bf16.gmra.mxu0 %vm381_vm2, %v833_v37 }
  0xff   : > { %v687_v44 = vpop.f32.mrf.mxu1  ;;  %5111 = vmatprep.mubr.msk.bf16.mxu0 %vm5656_vm1, %v5655_v0 }
 0x100   : > { %v6022_v46 = vadd.f32 %v687_v44, %v481_v30  ;;  %v4945_v47 = vpop.f32.mrf.mxu0 }
 0x101   : > { %v5003_v48 = vpop.f32.mrf.mxu1 }
 0x102   : > { %v492_v49 = vpop.f32.mrf.mxu0 }
 0x103   : > { %v690_v51 = vpop.f32.mrf.mxu1 }
 0x104   : > { %v6024_v52 = vadd.f32 %v690_v51, %v484_v36  ;;  %v4946_v53 = vpop.f32.mrf.mxu0  ;;  %v6046_v36 = vshrl.u32 %v1141_v29, 7 }
 0x105   : > { %v5004_v54 = vpop.f32.mrf.mxu1 }
 0x106   : > { %v497_v55 = vpop.f32.mrf.mxu0  ;;  %5112 = vmatmul.mubr.msk.bf16.gmra.mxu0 %vm381_vm2, %v834_v50 }
 0x107   : > { %v695_v56 = vpop.f32.mrf.mxu1 }
 0x108   : > { %v6027_v57 = vadd.f32 %v695_v56, %v489_v43  ;;  %v4949_v0 = vpop.f32.mrf.mxu0  ;;  %v6052_v43 = vmul.u32.u64.low 2863311531, %v6046_v36  ;;  %v6053_v44 = vmul.u32.u64.high 2863311531, %v6046_v36, %v6052_v43 }
 0x109   : > { %v5007_v58 = vpop.f32.mrf.mxu1 }
 0x10a   : > { %v500_v59 = vpop.f32.mrf.mxu0 }
 0x10b   : > { %v698_v60 = vpop.f32.mrf.mxu1 }
 0x10c   : > { %v6029_v61 = vadd.f32 %v698_v60, %v492_v49  ;;  %v4950_v62 = vpop.f32.mrf.mxu0  ;;  %v6058_v49 = vadd.s32 8, %v6046_v36 }
 0x10d   : > { %v5008_v63 = vpop.f32.mrf.mxu1 }
 0x10e   : > { %v505_v1 = vpop.f32.mrf.mxu0  ;;  %v6063_v56 = vmul.u32.u64.low 2863311531, %v6058_v49  ;;  %v6064_v0 = vmul.u32.u64.high 2863311531, %v6058_v49, %v6063_v56 }
 0x10f   : > { %v703_v2 = vpop.f32.mrf.mxu1 }
 0x110   : > { %v6031_v3 = vadd.f32 %v703_v2, %v497_v55  ;;  %v4953_v4 = vpop.f32.mrf.mxu0 }
 0x111   : > { %v5011_v5 = vpop.f32.mrf.mxu1  ;;  %v6073_v4 = vadd.s32 24, %v6046_v36 }
 0x112   : > { %v508_v6 = vpop.f32.mrf.mxu0 }
 0x113   : > { %v706_v8 = vpop.f32.mrf.mxu1 }
 0x114   : > { %v6033_v10 = vadd.f32 %v706_v8, %v500_v59  ;;  %v4954_v11 = vpop.f32.mrf.mxu0  ;;  %v1178_v59 = vshrl.u32 %v6053_v44, 4 }
 0x115   : > { %v5012_v13 = vpop.f32.mrf.mxu1 }
 0x116   : > { %v513_v14 = vpop.f32.mrf.mxu0 }
 0x117   : > { %v711_v15 = vpop.f32.mrf.mxu1 }
 0x118   : > { %v6035_v17 = vadd.f32 %v711_v15, %v505_v1  ;;  %v4957_v18 = vpop.f32.mrf.mxu0  ;;  %v6070_v1 = vadd.s32 16, %v6046_v36 }
 0x119   : > { %v5015_v19 = vpop.f32.mrf.mxu1 }
 0x11a   : > { %v516_v20 = vpop.f32.mrf.mxu0  ;;  %v1189_v19 = vshrl.u32 %v6064_v0, 4 }
 0x11b   : > { %v714_v22 = vpop.f32.mrf.mxu1 }
 0x11c   : > { %v6037_v23 = vadd.f32 %v714_v22, %v508_v6  ;;  %v4958_v24 = vpop.f32.mrf.mxu0  ;;  %v1179_v6 = vmul.u32 24, %v1178_v59 }
 0x11d   : > { %v5016_v25 = vpop.f32.mrf.mxu1  ;;  %v6087_v24 = vadd.s32 32, %v6046_v36 }
 0x11e   : > { %v521_v26 = vpop.f32.mrf.mxu0 }
 0x11f   : > { %v719_v28 = vpop.f32.mrf.mxu1 }
 0x120   : > { %v6039_v30 = vadd.f32 %v719_v28, %v513_v14  ;;  %v4961_v31 = vpop.f32.mrf.mxu0  ;;  %v6078_v14 = vmul.u32.u64.low 2863311531, %v6070_v1  ;;  %v6079_v15 = vmul.u32.u64.high 2863311531, %v6070_v1, %v6078_v14  ;;  %v6091_v28 = vadd.s32 40, %v6046_v36 }
 0x121   : > { %v5019_v32 = vpop.f32.mrf.mxu1 }
 0x122   : > { %v524_v33 = vpop.f32.mrf.mxu0 }
 0x123   : > { %v722_v35 = vpop.f32.mrf.mxu1 }
 0x124   : > { %v6048_v37 = vadd.f32 %v722_v35, %v516_v20  ;;  %v4962_v38 = vpop.f32.mrf.mxu0  ;;  %v6083_v20 = vmul.u32.u64.low 2863311531, %v6073_v4  ;;  %v6084_v22 = vmul.u32.u64.high 2863311531, %v6073_v4, %v6083_v20  ;;  %v1190_v35 = vmul.u32 24, %v1189_v19 }
 0x125   : > { %v5020_v39 = vpop.f32.mrf.mxu1  ;;  %v6126_v19 = vadd.s32 56, %v6046_v36 }
 0x126   : > { %v529_v41 = vpop.f32.mrf.mxu0  ;;  %v6096_v38 = vmul.u32.u64.low 2863311531, %v6087_v24  ;;  %v6097_v39 = vmul.u32.u64.high 2863311531, %v6087_v24, %v6096_v38  ;;  %v1211_v56 = vshrl.u32 %v6084_v22, 4 }
 0x127   : > { %v727_v42 = vpop.f32.mrf.mxu1 }
 0x128   : > { %v6055_v45 = vadd.f32 %v727_v42, %v521_v26  ;;  %v4965_v9 = vpop.f32.mrf.mxu0  ;;  %v1180_v26 = vsub.s32 %v6046_v36, %v1179_v6  ;;  %v6100_v42 = vmul.u32.u64.low 2863311531, %v6091_v28  ;;  %v6101_v43 = vmul.u32.u64.high 2863311531, %v6091_v28, %v6100_v42 }
 0x129   : > { %v5023_v47 = vpop.f32.mrf.mxu1  ;;  %v1222_v14 = vshrl.u32 %v6097_v39, 4 }
 0x12a   : > { %v532_v48 = vpop.f32.mrf.mxu0  ;;  %vm1502_vm4 = vcmp.ne.s32.totalorder %v1180_v26, 0  ;;  %vm1532_vm5 = vcmp.lt.s32.totalorder %v1180_v26, 0 }
 0x12b   : > { %v730_v50 = vpop.f32.mrf.mxu1  ;;  %vm1562_vm6 = vmand %vm1532_vm5, %vm1502_vm4  ;;  %v1223_v39 = vmul.u32 24, %v1222_v14 }
 0x12c   : > { %v6060_v51 = vadd.f32 %v730_v50, %v524_v33  ;;  %v4966_v53 = vpop.f32.mrf.mxu0  ;;  %v1200_v50 = vshrl.u32 %v6079_v15, 4 }
 0x12d   : > { %v5024_v54 = vpop.f32.mrf.mxu1  ;;  %v6108_v53 = vadd.s32 48, %v6046_v36 }
 0x12e   : > { %v537_v55 = vpop.f32.mrf.mxu0 }
 0x12f   : > { %v735_v58 = vpop.f32.mrf.mxu1 }
 0x130   : > { %v6067_v60 = vadd.f32 %v735_v58, %v529_v41  ;;  %v4969_v62 = vpop.f32.mrf.mxu0 }
 0x131   : > { %v5027_v63 = vpop.f32.mrf.mxu1 }
 0x132   : > { %v540_v2 = vpop.f32.mrf.mxu0 }
 0x133   : > { %v738_v5 = vpop.f32.mrf.mxu1 }
 0x134   : > { %v6075_v8 = vadd.f32 %v738_v5, %v532_v48  ;;  %v4970_v11 = vpop.f32.mrf.mxu0  ;;  %v1592_v48 = vadd.s32 24, %v1180_v26  ;;  %v6119_v5 = vmul.u32.u64.low 2863311531, %v6108_v53  ;;  %v6120_v6 = vmul.u32.u64.high 2863311531, %v6108_v53, %v6119_v5 }
 0x135   : > { %v5028_v13 = vpop.f32.mrf.mxu1 }
 0x136   : > { %v545_v18 = vpop.f32.mrf.mxu0  ;;  %v1622_v63 = vsel %vm1562_vm6, %v1592_v48, %v1180_v26  ;;  %v1212_v13 = vmul.u32 24, %v1211_v56  ;;  %v6149_v56 = vstv %s1743_s11  ;;  %v1244_v5 = vshrl.u32 %v6120_v6, 4 }
 0x137   : > { %v743_v25 = vpop.f32.mrf.mxu1  ;;  %vm1652_vm9 = vcmp.ge.s32.totalorder %v1622_v63, 1  ;;  %vm1682_vm11 = vcmp.le.s32.totalorder %v1622_v63, 16  ;;  %vm1745_vm2 = vcmp.ge.s32.totalorder %v6046_v36, %v6149_v56  ;;  %v6254_v63 = vadd.s32 88, %v6046_v36 }
 0x138   : > { %v6093_v29 = vadd.f32 %v743_v25, %v537_v55  ;;  %v4973_v31 = vpop.f32.mrf.mxu0  ;;  %v1191_v55 = vsub.s32 %v6058_v49, %v1190_v35  ;;  %v1213_v38 = vsub.s32 %v6073_v4, %v1212_v13  ;;  %vm6182_vm1 = vmand %vm1652_vm9, %vm1682_vm11 }
 0x139   : > { %v5031_v32 = vpop.f32.mrf.mxu1 }
 0x13a   : > { %v548_v33 = vpop.f32.mrf.mxu0  ;;  %vm1503_vm7 = vcmp.ne.s32.totalorder %v1191_v55, 0  ;;  %vm1533_vm8 = vcmp.lt.s32.totalorder %v1191_v55, 0  ;;  %v1593_v25 = vadd.s32 24, %v1191_v55  ;;  %vm1505_vm14 = vcmp.ne.s32.totalorder %v1213_v38, 0 }
 0x13b   : > { %v746_v41 = vpop.f32.mrf.mxu1  ;;  %vm6131_vm10 = vmand %vm1533_vm8, %vm1503_vm7  ;;  %vm1535_vm15 = vcmp.lt.s32.totalorder %v1213_v38, 0  ;;  %vm1746_vm7 = vcmp.ge.s32.totalorder %v6058_v49, %v6149_v56 }
 0x13c   : > { %v6103_v44 = vadd.f32 %v746_v41, %v540_v2  ;;  %v4974_v9 = vpop.f32.mrf.mxu0  ;;  %v1201_v2 = vmul.u32 24, %v1200_v50  ;;  %v6138_v41 = vadd.s32 64, %v6046_v36  ;;  %vm6198_vm8 = vmand %vm1535_vm15, %vm1505_vm14  ;;  %vm1747_vm14 = vcmp.ge.s32.totalorder %v6070_v1, %v6149_v56 }
 0x13d   : > { %v5032_v47 = vpop.f32.mrf.mxu1 }
 0x13e   : > { %8949 = vst [vmem:[#allocation11_spill] sm:$0xff] %v6103_v44  ;;  %v553_v54 = vpop.f32.mrf.mxu0  ;;  %v1202_v32 = vsub.s32 %v6070_v1, %v1201_v2  ;;  %v6145_v47 = vadd.s32 72, %v6046_v36 }
 0x13f   : > { %v751_v0 = vpop.f32.mrf.mxu1 }
 0x140   : > { %v6112_v58 = vadd.f32 %v751_v0, %v545_v18  ;;  %v4977_v59 = vpop.f32.mrf.mxu0  ;;  %v1233_v18 = vshrl.u32 %v6101_v43, 4  ;;  %v6141_v43 = vmul.u32.u64.low 2863311531, %v6126_v19  ;;  %v6142_v9 = vmul.u32.u64.high 2863311531, %v6126_v19, %v6141_v43 }
 0x141   : > { %v5035_v62 = vpop.f32.mrf.mxu1  ;;  %v6151_v0 = vstv %s1806_s12  ;;  %v6155_v59 = vsel %vm6131_vm10, %v1593_v25, %v1191_v55  ;;  %vm1504_vm12 = vcmp.ne.s32.totalorder %v1202_v32, 0  ;;  %vm1534_vm13 = vcmp.lt.s32.totalorder %v1202_v32, 0  ;;  %s293_s12 = sand.u32 1, %s5629_s25  }
 0x142   : > { %8950 = vst [vmem:[#allocation12_spill] sm:$0xff] %v6112_v58  ;;  %v556_v11 = vpop.f32.mrf.mxu0  ;;  %v1234_v42 = vmul.u32 24, %v1233_v18  ;;  %v1594_v2 = vadd.s32 24, %v1202_v32  ;;  %vm6173_vm0 = vmand %vm1534_vm13, %vm1504_vm12  ;;  %vm1808_vm4 = vcmp.lt.s32.totalorder %v6046_v36, %v6151_v0  ;;  %v1245_v43 = vmul.u32 24, %v1244_v5  ;;  %s5397_s22 = smul.u32 192, %s293_s12  ;;  %s8879_s21 = scalar_lea.sflag [#allocation4], %s293_s12 }
 0x143   : > { %v754_v15 = vpop.f32.mrf.mxu1  ;;  %vm1653_vm5 = vcmp.ge.s32.totalorder %v6155_v59, 1  ;;  %vm1683_vm6 = vcmp.le.s32.totalorder %v6155_v59, 16  ;;  %vm6219_vm13 = vmand %vm6182_vm1, %vm1745_vm2  ;;  %vm1809_vm15 = vcmp.lt.s32.totalorder %v6058_v49, %v6151_v0 }
 0x144   : > { %v6128_v20 = vadd.f32 %v754_v15, %v548_v33  ;;  %v4978_v22 = vpop.f32.mrf.mxu0  ;;  %v6162_v14 = vmul.u32.u64.low 2863311531, %v6138_v41  ;;  %v6163_v15 = vmul.u32.u64.high 2863311531, %v6138_v41, %v6162_v14  ;;  %v1235_v55 = vsub.s32 %v6091_v28, %v1234_v42  ;;  %vm6269_vm3 = vmand %vm6219_vm13, %vm1808_vm4  ;;  %s8818_s10 = scalar_lea.vmem [#allocation3], %s5397_s22  ;;  %s5657_s22 = smov [#allocation3]  }
 0x145   : > { %v5036_v26 = vpop.f32.mrf.mxu1  ;;  %v6167_v22 = vmul.u32.u64.low 2863311531, %v6145_v47  ;;  %v6168_v25 = vmul.u32.u64.high 2863311531, %v6145_v47, %v6167_v22  ;;  %v1624_v5 = vsel %vm6173_vm0, %v1594_v2, %v1202_v32  ;;  %v1255_v14 = vshrl.u32 %v6142_v9, 4  ;;  %vm6291_vm4 = vmand %vm1653_vm5, %vm1683_vm6  ;;  %s4419_s28 = sshll.u32 %s8818_s10, 4  ;;  %s5565_s23 = sshll.u32 %s5657_s22, 4  ;;  %s8872_s28 = int_to_ptr.vmem [resolvable:$true] %s4419_s28  ;;  %s5566_s23 = int_to_ptr.vmem [resolvable:$false] %s5565_s23 }
 0x146   : > { %8951 = vst [vmem:[#allocation13_spill] sm:$0xff] %v6128_v20  ;;  %v561_v35 = vpop.f32.mrf.mxu0  ;;  %vm1507_vm11 = vcmp.ne.s32.totalorder %v1235_v55, 0  ;;  %vm1537_vm12 = vcmp.lt.s32.totalorder %v1235_v55, 0  ;;  %vm1654_vm1 = vcmp.ge.s32.totalorder %v1624_v5, 1  ;;  %vm1811_vm5 = vcmp.lt.s32.totalorder %v6073_v4, %v6151_v0  ;;  %s5561_s11 = scalar_lea.vmem %s8872_s28, 3072  ;;  %s5567_s9 = scalar_lea.vmem %s5566_s23, 6144 }
 0x147   : > { %v759_v33 = vpop.f32.mrf.mxu1  ;;  %v1277_v16 = vshrl.u32 %v6168_v25, 4  ;;  %p5562_p0 = scmp.ne.s32.totalorder %s8872_s28, %s5561_s11  ;;  %p5568_p4 = scmp.lt.s32.totalorder %s8872_s28, %s5566_s23 }
 0x148   : > { %v6147_v48 = vadd.f32 %v759_v33, %v553_v54  ;;  %v4981_v50 = vpop.f32.mrf.mxu0  ;;  %v6159_v54 = vsub.s32 %v6087_v24, %v1223_v39  ;;  %v6178_v39 = vadd.s32 80, %v6046_v36  ;;  %p5569_p5 = scmp.lt.s32.totalorder %s5567_s9, %s5561_s11 }
 0x149   : > { %v5039_v62 = vpop.f32.mrf.mxu1  ;;  %p5563_p1 = pnand %p5562_p0, %p5751_p3 }
 0x14a   : > { %8954 = vst [vmem:[#allocation14_spill] sm:$0xff] %v6147_v48  ;;  %v564_v13 = vpop.f32.mrf.mxu0  ;;  %vm1506_vm9 = vcmp.ne.s32.totalorder %v6159_v54, 0  ;;  %vm1536_vm10 = vcmp.lt.s32.totalorder %v6159_v54, 0  ;;  %v6226_v32 = vmul.u32.u64.low 2863311531, %v6178_v39  ;;  %v6227_v9 = vmul.u32.u64.high 2863311531, %v6178_v39, %v6226_v32  ;;  %p5570_p6 = por %p5569_p5, %p5568_p4 }
 0x14b   : > { %v762_v18 = vpop.f32.mrf.mxu1  ;;  %vm6237_vm0 = vmand %vm1536_vm10, %vm1506_vm9  ;;  %v1596_v42 = vadd.s32 24, %v6159_v54  ;;  %vm1684_vm9 = vcmp.le.s32.totalorder %v1624_v5, 16  ;;  %p5564_p2 = pneg %p5563_p1 }
 0x14c   : > { %v6170_v26 = vadd.f32 %v762_v18, %v556_v11  ;;  %v4982_v6 = vpop.f32.mrf.mxu0  ;;  %v1595_v11 = vadd.s32 24, %v1213_v38  ;;  %v6210_v18 = vld [vmem:[%s8933_s3 + $0x58] sm:$0xff]   ;;  %vm6305_vm13 = vmand %vm1654_vm1, %vm1684_vm9  ;;  %v1288_v5 = vshrl.u32 %v6227_v9, 4 }
 0x14d   : > { %v5040_v33 = vpop.f32.mrf.mxu1  ;;  %5255 = vmatprep.subr.bf16.mxu0 %v6210_v18  ;;  %vm6347_vm9 = vmand %vm6305_vm13, %vm1747_vm14  ;;  %p5571_p7 = pnand %p5570_p6, %p5564_p2 }
 0x14e   : > { %8955 = vst [vmem:[#allocation15_spill] sm:$0xff] %v6170_v26  ;;  %v6190_v50 = vpop.f32.mrf.mxu0  ;;  %v6262_v26 = vadd.s32 96, %v6046_v36 }
 0x14f   : > { %v767_v62 = vpop.f32.mrf.mxu1 }
 0x150   : > { %v6212_v22 = vadd.f32 %v767_v62, %v561_v35  ;;  %v4985_v6 = vpop.f32.mrf.mxu0  ;;  %v1625_v35 = vsel %vm6198_vm8, %v1595_v11, %v1213_v38  ;;  %v1597_v62 = vadd.s32 24, %v1235_v55  ;;  %vm6248_vm8 = vmand %vm1537_vm12, %vm1507_vm11  ;;  %v1266_v11 = vshrl.u32 %v6163_v15, 4 }
 0x151   : > { %v5043_v2 = vpop.f32.mrf.mxu1  ;;  %v1246_v6 = vsub.s32 %v6108_v53, %v1245_v43  ;;  %v1256_v43 = vmul.u32 24, %v1255_v14  ;;  %vm1655_vm11 = vcmp.ge.s32.totalorder %v1625_v35, 1  ;;  %vm1685_vm12 = vcmp.le.s32.totalorder %v1625_v35, 16 }
 0x152   : > { %8962 = vst [vmem:[#allocation16_spill] sm:$0xff] %v6212_v22  ;;  %v572_v32 = vpop.f32.mrf.mxu0  ;;  %v6280_v25 = vsel %vm6248_vm8, %v1597_v62, %v1235_v55  ;;  %v6296_v55 = vmul.u32.u64.low 2863311531, %v6254_v63  ;;  %v6297_v33 = vmul.u32.u64.high 2863311531, %v6254_v63, %v6296_v55  ;;  %vm1749_vm8 = vcmp.ge.s32.totalorder %v6087_v24, %v6149_v56 }
 0x153   : > { %v770_v2 = vpop.f32.mrf.mxu1  ;;  %vm1508_vm10 = vcmp.ne.s32.totalorder %v1246_v6, 0  ;;  %vm1538_vm2 = vcmp.lt.s32.totalorder %v1246_v6, 0  ;;  %v1598_v59 = vadd.s32 24, %v1246_v6 }
 0x154   : > { %v6259_v12 = vadd.f32 %v770_v2, %v564_v13  ;;  %v4986_v22 = vpop.f32.mrf.mxu0  ;;  %v6276_v13 = vsel %vm6237_vm0, %v1596_v42, %v6159_v54  ;;  %v1267_v54 = vmul.u32 24, %v1266_v11  ;;  %v6300_v42 = vadd.s32 104, %v6046_v36  ;;  %vm6319_vm6 = vmand %vm1538_vm2, %vm1508_vm10 }
 0x155   : > { %v5044_v15 = vpop.f32.mrf.mxu1  ;;  %v6285_v22 = vld [vmem:[%s8932_s2] ss:$0 sm:$0xff]  ;;  %v6312_v11 = vsub.s32 %v6126_v19, %v1256_v43  ;;  %vm6334_vm0 = vmand %vm6291_vm4, %vm1746_vm7  ;;  %vm1656_vm1 = vcmp.ge.s32.totalorder %v6276_v13, 1  ;;  %vm1686_vm2 = vcmp.le.s32.totalorder %v6276_v13, 16  ;;  %vm1657_vm7 = vcmp.ge.s32.totalorder %v6280_v25, 1 }
 0x156   : > { %8969 = vst [vmem:[#allocation17_spill] sm:$0xff] %v6259_v12  ;;  %v925_v14 = vpop.f32.mrf.mxu0  ;;  %v1278_v15 = vmul.u32 24, %v1277_v16  ;;  %v6356_v9 = vmul.u32.u64.low 2863311531, %v6300_v42  ;;  %v6357_v31 = vmul.u32.u64.high 2863311531, %v6300_v42, %v6356_v9  ;;  %vm6362_vm10 = vmand %vm1655_vm11, %vm1685_vm12  ;;  %vm8987_vm12 = vcmp.lt.s32.totalorder %v6070_v1, %v6151_v0 }
 0x157   : > { %v775_v62 = vpop.f32.mrf.mxu1  ;;  %v1044_v38 = vadd.f32 %v925_v14, %v5996_v21  ;;  %v6325_v14 = vmul.u32.u64.low 2863311531, %v6262_v26  ;;  %v6326_v20 = vmul.u32.u64.high 2863311531, %v6262_v26, %v6325_v14  ;;  %vm6380_vm14 = vmand %vm6334_vm0, %vm1809_vm15  ;;  %vm1509_vm11 = vcmp.ne.s32.totalorder %v6312_v11, 0 }
 0x158   : > { %v6315_v55 = vadd.f32 %v775_v62, %v6190_v50  ;;  %v5057_v12 = vpop.f32.mrf.mxu0  ;;  %v6353_v50 = vsub.s32 %v6138_v41, %v1267_v54  ;;  %v6371_v54 = vadd.s32 112, %v6046_v36  ;;  %vm6396_vm15 = vmand %vm6347_vm9, %vm8987_vm12  ;;  %vm1539_vm13 = vcmp.lt.s32.totalorder %v6312_v11, 0 }
 0x159   : > { %v1081_v43 = vadd.f32 %v6285_v22, %v1044_v38  ;;  %v5047_v58 = vpop.f32.mrf.mxu1  ;;  %v1599_v48 = vadd.s32 24, %v6312_v11  ;;  %v1299_v12 = vshrl.u32 %v6297_v33, 4  ;;  %vm6443_vm9 = vmand %vm1539_vm13, %vm1509_vm11  ;;  %v1310_v2 = vshrl.u32 %v6326_v20, 4 }
 0x15a   : > { %8976 = vst [vmem:[#allocation18_spill] sm:$0xff] %v6315_v55  ;;  %v928_v16 = vpop.f32.mrf.mxu0  ;;  %v6368_v55 = vsel %vm6319_vm6, %v1598_v59, %v1246_v6  ;;  %v6386_v6 = vsub.s32 %v6145_v47, %v1278_v15  ;;  %v1289_v59 = vmul.u32 24, %v1288_v5  ;;  %vm8991_vm6 = vcmp.ge.s32.totalorder %v6073_v4, %v6149_v56 }
 0x15b   : > { %v1111_v62 = vmax.f32 %v1081_v43, 0.0  ;;  %v778_v38 = vpop.f32.mrf.mxu1  ;;  %v1045_v14 = vadd.f32 %v928_v16, %v6000_v27  ;;  %vm6410_vm0 = vmand %vm6362_vm10, %vm8991_vm6  ;;  %vm1510_vm12 = vcmp.ne.s32.totalorder %v6353_v50, 0  ;;  %vm1540_vm4 = vcmp.lt.s32.totalorder %v6353_v50, 0 }
 0x15c   : > { %v6373_v44 = vadd.f32 %v778_v38, %v572_v32  ;;  %v5058_v35 = vpop.f32.mrf.mxu0  ;;  %v1600_v5 = vadd.s32 24, %v6353_v50  ;;  %vm6427_vm10 = vmand %vm1656_vm1, %vm1686_vm2  ;;  %vm1511_vm1 = vcmp.ne.s32.totalorder %v6386_v6, 0  ;;  %vm1541_vm2 = vcmp.lt.s32.totalorder %v6386_v6, 0 }
 0x15d   : > { %v1928_v32 = vsel %vm6269_vm3, %v1111_v62, 0.0  ;;  %v1082_v21 = vadd.f32 %v6285_v22, %v1045_v14  ;;  %v5048_v43 = vpop.f32.mrf.mxu1  ;;  %vm8990_vm3 = vcmask 261120   ;;  %v6450_v13 = vsub.s32 %v6178_v39, %v1289_v59  ;;  %vm6463_vm6 = vmand %vm1540_vm4, %vm1510_vm12 }
 0x15e   : > { %1965 = vst.msk [vmem:[#allocation2 + $0x18] sm:$0xff] %vm8990_vm3, %v1928_v32  ;;  %v933_v15 = vpop.f32.mrf.mxu0  ;;  %vm1812_vm3 = vcmp.lt.s32.totalorder %v6087_v24, %v6151_v0  ;;  %v6434_v38 = vmul.u32.u64.low 2863311531, %v6371_v54  ;;  %v6435_v14 = vmul.u32.u64.high 2863311531, %v6371_v54, %v6434_v38  ;;  %vm1687_vm11 = vcmp.le.s32.totalorder %v6280_v25, 16  ;;  %vm6476_vm13 = vmand %vm6410_vm0, %vm1811_vm5 }
 0x15f   : > { %v1112_v16 = vmax.f32 %v1082_v21, 0.0  ;;  %v6420_v58 = vpop.f32.mrf.mxu1  ;;  %v1046_v9 = vadd.f32 %v933_v15, %v6009_v34  ;;  %v6468_v20 = vadd.s32 120, %v6046_v36  ;;  %vm1658_vm4 = vcmp.ge.s32.totalorder %v6368_v55, 1  ;;  %vm6496_vm5 = vmand %vm1541_vm2, %vm1511_vm1 }
 0x160   : > { %v5061_v33 = vpop.f32.mrf.mxu0  ;;  %vm1688_vm12 = vcmp.le.s32.totalorder %v6368_v55, 16  ;;  %v1601_v15 = vadd.s32 24, %v6386_v6  ;;  %v6490_v4 = vsel %vm6443_vm9, %v1599_v48, %v6312_v11  ;;  %vm6505_vm0 = vmand %vm6427_vm10, %vm1749_vm8  ;;  %v6512_v11 = vsel %vm6463_vm6, %v1600_v5, %v6353_v50 }
 0x161   : > { %v1929_v35 = vsel %vm6380_vm14, %v1112_v16, 0.0  ;;  %v1083_v32 = vadd.f32 %v6285_v22, %v1046_v9  ;;  %v5051_v21 = vpop.f32.mrf.mxu1  ;;  %vm9000_vm14 = vcmask 261120   ;;  %v1321_v16 = vshrl.u32 %v6357_v31, 4  ;;  %vm6523_vm8 = vmand %vm1657_vm7, %vm1687_vm11 }
 0x162   : > { %1966 = vst.msk [vmem:[#allocation2 + $0x20] sm:$0xff] %vm9000_vm14, %v1929_v35  ;;  %v936_v27 = vpop.f32.mrf.mxu0  ;;  %v1300_v35 = vmul.u32 24, %v1299_v12  ;;  %vm1512_vm9 = vcmp.ne.s32.totalorder %v6450_v13, 0  ;;  %vm1542_vm1 = vcmp.lt.s32.totalorder %v6450_v13, 0  ;;  %v1311_v48 = vmul.u32 24, %v1310_v2  ;;  %vm9009_vm10 = vmmov %vm9000_vm14 }
 0x163   : > { %v1113_v9 = vmax.f32 %v1083_v32, 0.0  ;;  %v6484_v38 = vpop.f32.mrf.mxu1  ;;  %v1047_v33 = vadd.f32 %v936_v27, %v6015_v40  ;;  %v6528_v50 = vmul.u32.u64.low 2863311531, %v6468_v20  ;;  %v6529_v5 = vmul.u32.u64.high 2863311531, %v6468_v20, %v6528_v50  ;;  %vm6556_vm11 = vmand %vm1542_vm1, %vm1512_vm9 }
 0x164   : > { %v5062_v31 = vpop.f32.mrf.mxu0  ;;  %vm1659_vm7 = vcmp.ge.s32.totalorder %v6490_v4, 1  ;;  %vm1752_vm6 = vcmp.ge.s32.totalorder %v6126_v19, %v6149_v56  ;;  %v6546_v25 = vsel %vm6496_vm5, %v1601_v15, %v6386_v6  ;;  %v1602_v21 = vadd.s32 24, %v6450_v13  ;;  %vm6603_vm2 = vmand %vm6505_vm0, %vm1812_vm3 }
 0x165   : > { %v1930_v12 = vsel %vm6396_vm15, %v1113_v9, 0.0  ;;  %v1084_v34 = vadd.f32 %v6285_v22, %v1047_v33  ;;  %v5052_v32 = vpop.f32.mrf.mxu1  ;;  %vm6536_vm15 = vmand %vm1658_vm4, %vm1688_vm12  ;;  %v1322_v59 = vmul.u32 24, %v1321_v16  ;;  %v6561_v6 = vsub.s32 %v6254_v63, %v1300_v35  ;;  %v2035_v31 = vld [vmem:[#allocation2 + $0x18] sm:$0xff] }
 0x166   : > { %1967 = vst.msk [vmem:[#allocation2 + $0x28] sm:$0xff] %vm9009_vm10, %v1930_v12  ;;  %v941_v2 = vpop.f32.mrf.mxu0  ;;  %v1332_v15 = vshrl.u32 %v6435_v14, 4  ;;  %vm9014_vm14 = vcmp.ge.s32.totalorder %v6091_v28, %v6149_v56  ;;  %vm1689_vm12 = vcmp.le.s32.totalorder %v6490_v4, 16  ;;  %vm1660_vm5 = vcmp.ge.s32.totalorder %v6512_v11, 1 }
 0x167   : > { %v1114_v27 = vmax.f32 %v1084_v34, 0.0  ;;  %v1048_v55 = vadd.f32 %v941_v2, %v6022_v46  ;;  %vm6569_vm4 = vmand %vm6523_vm8, %vm9014_vm14  ;;  %v6576_v33 = vsub.s32 %v6262_v26, %v1311_v48  ;;  %v6579_v1 = vadd.s32 128, %v6046_v36 }
 0x168   : > { %v5065_v16 = vpop.f32.mrf.mxu0  ;;  %vm9017_vm9 = vcmp.ge.s32.totalorder %v6108_v53, %v6149_v56  ;;  %vm1690_vm10 = vcmp.le.s32.totalorder %v6512_v11, 16  ;;  %vm9020_vm14 = vcmask 261120   ;;  %v6612_v50 = vsel %vm6556_vm11, %v1602_v21, %v6450_v13 }
 0x169   : > { %v1931_v14 = vsel %vm6476_vm13, %v1114_v27, 0.0  ;;  %v1085_v35 = vadd.f32 %v6285_v22, %v1048_v55  ;;  %v2036_v12 = vld [vmem:[#allocation2 + $0x20] sm:$0xff]  ;;  %vm6589_vm1 = vmand %vm6536_vm15, %vm9017_vm9  ;;  %vm1661_vm13 = vcmp.ge.s32.totalorder %v6546_v25, 1  ;;  %v6615_v32 = vsub.s32 %v6300_v42, %v1322_v59 }
 0x16a   : > { %1968 = vst.msk [vmem:[#allocation2 + $0x30] sm:$0xff] %vm9020_vm14, %v1931_v14  ;;  %v944_v48 = vpop.f32.mrf.mxu0  ;;  %v2059_v62 = vpack.c.bf16 %v2036_v12, %v2035_v31  ;;  %v6618_v24 = vadd.s32 136, %v6046_v36  ;;  %vm9023_vm3 = vcmp.lt.s32.totalorder %v6091_v28, %v6151_v0  ;;  %vm1754_vm11 = vcmp.ge.s32.totalorder %v6145_v47, %v6149_v56 }
 0x16b   : > { %v1115_v40 = vmax.f32 %v1085_v35, 0.0  ;;  %v1049_v2 = vadd.f32 %v944_v48, %v6024_v52  ;;  %vm6626_vm0 = vmand %vm6569_vm4, %vm9023_vm3  ;;  %vm1513_vm9 = vcmp.ne.s32.totalorder %v6561_v6, 0  ;;  %v1333_v13 = vmul.u32 24, %v1332_v15 }
 0x16c   : > { %v5066_v21 = vpop.f32.mrf.mxu0  ;;  %5119 = vmatprep.mubr.msk.bf16.mxu1 %vm9020_vm14, %v2059_v62  ;;  %vm9026_vm15 = vcmp.lt.s32.totalorder %v6108_v53, %v6151_v0  ;;  %vm1543_vm4 = vcmp.lt.s32.totalorder %v6561_v6, 0  ;;  %vm1514_vm3 = vcmp.ne.s32.totalorder %v6576_v33, 0  ;;  %v1343_v9 = vshrl.u32 %v6529_v5, 4 }
 0x16d   : > { %vm6639_vm8 = vmand %vm6589_vm1, %vm9026_vm15  ;;  %v6646_v28 = vmul.u32.u64.low 2863311531, %v6579_v1  ;;  %v6647_v59 = vmul.u32.u64.high 2863311531, %v6579_v1, %v6646_v28  ;;  %v1932_v27 = vsel %vm6603_vm2, %v1115_v40, 0.0  ;;  %v1086_v55 = vadd.f32 %v6285_v22, %v1049_v2  ;;  %v2037_v2 = vld [vmem:[#allocation2 + $0x28] sm:$0xff] }
 0x16e   : > { %vm6656_vm1 = vmand %vm1659_vm7, %vm1689_vm12  ;;  %vm1544_vm15 = vcmp.lt.s32.totalorder %v6576_v33, 0  ;;  %1969 = vst.msk [vmem:[#allocation2 + $0x38] sm:$0xff] %vm9020_vm14, %v1932_v27  ;;  %v949_v15 = vpop.f32.mrf.mxu0  ;;  %vm1691_vm7 = vcmp.le.s32.totalorder %v6546_v25, 16  ;;  %v1603_v4 = vadd.s32 24, %v6561_v6  ;;  %v1604_v31 = vadd.s32 24, %v6576_v33 }
 0x16f   : > { %vm6667_vm2 = vmand %vm1660_vm5, %vm1690_vm10  ;;  %v6674_v46 = vmul.u32.u64.low 2863311531, %v6618_v24  ;;  %v6675_v14 = vmul.u32.u64.high 2863311531, %v6618_v24, %v6674_v46  ;;  %v1116_v5 = vmax.f32 %v1086_v55, 0.0  ;;  %v1050_v35 = vadd.f32 %v949_v15, %v6027_v57 }
 0x170   : > { %vm6682_vm12 = vmand %vm1543_vm4, %vm1513_vm9  ;;  %v6688_v12 = vsub.s32 %v6371_v54, %v1333_v13  ;;  %v5069_v34 = vpop.f32.mrf.mxu0  ;;  %vm1817_vm5 = vcmp.lt.s32.totalorder %v6145_v47, %v6151_v0  ;;  %vm1692_vm14 = vcmp.le.s32.totalorder %v6612_v50, 16  ;;  %v6703_v43 = vadd.s32 144, %v6046_v36 }
 0x171   : > { %vm6698_vm9 = vmand %vm1544_vm15, %vm1514_vm3  ;;  %v1933_v48 = vsel %vm6626_vm0, %v1116_v5, 0.0  ;;  %v1087_v62 = vadd.f32 %v6285_v22, %v1050_v35  ;;  %v2038_v13 = vld [vmem:[#allocation2 + $0x30] sm:$0xff]  ;;  %vm1515_vm3 = vcmp.ne.s32.totalorder %v6615_v32, 0  ;;  %v1344_v21 = vmul.u32 24, %v1343_v9  ;;  %v5544_v9 = vld [vmem:[%s8933_s3] sm:$0xff]  }
 0x172   : > { %vm6713_vm4 = vmand %vm6656_vm1, %vm1752_vm6  ;;  %vm9039_vm15 = vcmask 261120   ;;  %v952_v49 = vpop.f32.mrf.mxu0  ;;  %v2060_v28 = vpack.c.bf16 %v2038_v13, %v2037_v2  ;;  %vm9040_vm0 = vcmp.ge.s32.totalorder %v6138_v41, %v6149_v56  ;;  %v6733_v55 = vsel %vm6682_vm12, %v1603_v4, %v6561_v6 }
 0x173   : > { %1970 = vst.msk [vmem:[#allocation2 + $0x40] sm:$0xff] %vm9039_vm15, %v1933_v48  ;;  %vm6724_vm10 = vmand %vm6667_vm2, %vm9040_vm0  ;;  %vm1545_vm1 = vcmp.lt.s32.totalorder %v6615_v32, 0  ;;  %v1605_v53 = vadd.s32 24, %v6615_v32  ;;  %v1117_v15 = vmax.f32 %v1087_v62, 0.0  ;;  %v1051_v16 = vadd.f32 %v952_v49, %v6029_v61  ;;  %v5545_v62 = vld [vmem:[%s8933_s3 + $0x28] sm:$0xff]  }
 0x174   : > { %vm6745_vm2 = vmand %vm1661_vm13, %vm1691_vm7  ;;  %vm1756_vm12 = vcmp.ge.s32.totalorder %v6254_v63, %v6149_v56  ;;  %v6754_v6 = vsel %vm6698_vm9, %v1604_v31, %v6576_v33  ;;  %vm1516_vm15 = vcmp.ne.s32.totalorder %v6688_v12, 0  ;;  %vm9045_vm0 = vcmp.lt.s32.totalorder %v6126_v19, %v6151_v0  ;;  %v5070_v25 = vpop.f32.mrf.mxu0 }
 0x175   : > { %vm6762_vm6 = vmand %vm6713_vm4, %vm9045_vm0  ;;  %vm9048_vm13 = vcmask 261120   ;;  %v1354_v4 = vshrl.u32 %v6647_v59, 4  ;;  %v6769_v5 = vmul.u32.u64.low 2863311531, %v6703_v43  ;;  %v6770_v33 = vmul.u32.u64.high 2863311531, %v6703_v43, %v6769_v5  ;;  %v2672_v59 = vld [vmem:[#allocation2 + $0x2f] sm:$0xff]  ;;  %v2673_v34 = vld [vmem:[#allocation2 + $0x37] sm:$0xff] }
 0x176   : > { %5120 = vmatmul.mubr.msk.bf16.vlgmr.msra.gmra.mxu1 %vm9048_vm13, %v2060_v28  ;;  %v6773_v35 = vadd.s32 152, %v6046_v36  ;;  %v1934_v19 = vsel %vm6639_vm8, %v1117_v15, 0.0  ;;  %v1088_v11 = vadd.f32 %v6285_v22, %v1051_v16  ;;  %vm9049_vm7 = vcmp.lt.s32.totalorder %v6138_v41, %v6151_v0  ;;  %vm9052_vm8 = vmmov %vm9048_vm13  ;;  %v957_v41 = vpop.f32.mrf.mxu0 }
 0x177   : > { %vm6783_vm9 = vmand %vm6724_vm10, %vm9049_vm7  ;;  %vm1546_vm0 = vcmp.lt.s32.totalorder %v6688_v12, 0  ;;  %v6791_v52 = vsub.s32 %v6468_v20, %v1344_v21  ;;  %5144 = vmatpush3.bf16.msra.mxu1 %v6044_v7  ;;  %1971 = vst.msk [vmem:[#allocation2 + $0x48] sm:$0xff] %vm9052_vm8, %v1934_v19  ;;  %v2696_v57 = vpack.c.bf16 %v2673_v34, %v2672_v59  ;;  %vm1663_vm13 = vcmp.ge.s32.totalorder %v6733_v55, 1 }
 0x178   : > { %vm6800_vm10 = vmand %vm6745_vm2, %vm1754_vm11  ;;  %vm1693_vm7 = vcmp.le.s32.totalorder %v6733_v55, 16  ;;  %v1365_v7 = vshrl.u32 %v6675_v14, 4  ;;  %5145 = vmatprep.subr.bf16.mxu1 %v5544_v9  ;;  %v1118_v40 = vmax.f32 %v1088_v11, 0.0  ;;  %v1052_v2 = vadd.f32 %v957_v41, %v6031_v3  ;;  %v5073_v21 = vpop.f32.mrf.mxu0  ;;  %v5547_v3 = vld [vmem:[%s8933_s3 + $0x50] sm:$0xff]  }
 0x179   : > { %vm1757_vm2 = vcmp.ge.s32.totalorder %v6262_v26, %v6149_v56  ;;  %vm6820_vm8 = vmand %vm1545_vm1, %vm1515_vm3  ;;  %v1606_v14 = vadd.s32 24, %v6688_v12  ;;  %vm9057_vm4 = vcmask 261120   ;;  %v1355_v49 = vmul.u32 24, %v1354_v4  ;;  %v2039_v4 = vld [vmem:[#allocation2 + $0x38] sm:$0xff] }
 0x17a   : > { %5203 = vmatprep.mubr.msk.bf16.mxu0 %vm9057_vm4, %v2696_v57  ;;  %vm6830_vm11 = vmand %vm1546_vm0, %vm1516_vm15  ;;  %v6835_v28 = vmul.u32.u64.low 2863311531, %v6773_v35  ;;  %v6836_v27 = vmul.u32.u64.high 2863311531, %v6773_v35, %v6835_v28  ;;  %v6839_v15 = vadd.s32 160, %v6046_v36  ;;  %v1935_v16 = vsel %vm6762_vm6, %v1118_v40, 0.0  ;;  %v2040_v5 = vld [vmem:[#allocation2 + $0x40] sm:$0xff]  ;;  %v960_v61 = vpop.f32.mrf.mxu0 }
 0x17b   : > { %v1089_v46 = vadd.f32 %v6285_v22, %v1052_v2  ;;  %vm6849_vm3 = vmand %vm6800_vm10, %vm1817_vm5  ;;  %vm1517_vm1 = vcmp.ne.s32.totalorder %v6791_v52, 0  ;;  %vm1547_vm15 = vcmp.lt.s32.totalorder %v6791_v52, 0  ;;  %5146 = vmatpush3.bf16.msra.mxu1 %v5544_v9  ;;  %1972 = vst.msk [vmem:[#allocation2 + $0x50] sm:$0xff] %vm9057_vm4, %v1935_v16  ;;  %v2061_v19 = vpack.c.bf16 %v2040_v5, %v2039_v4  ;;  %v2674_v2 = vld [vmem:[#allocation2 + $0x3f] sm:$0xff] }
 0x17c   : > { %vm9062_vm6 = vcmp.ge.s32.totalorder %v6612_v50, 1  ;;  %vm1694_vm5 = vcmp.le.s32.totalorder %v6754_v6, 16  ;;  %v6868_v11 = vsel %vm6820_vm8, %v1605_v53, %v6615_v32  ;;  %v1366_v9 = vmul.u32 24, %v1365_v7  ;;  %5171 = vmatprep.subr.bf16.mxu1 %v5545_v62  ;;  %v5074_v53 = vpop.f32.mrf.mxu0  ;;  %vm9067_vm10 = vmmov %vm9057_vm4 }
 0x17d   : > { %vm6860_vm0 = vmand %vm9062_vm6, %vm1692_vm14  ;;  %v1119_v59 = vmax.f32 %v1089_v46, 0.0  ;;  %v1053_v34 = vadd.f32 %v960_v61, %v6033_v10  ;;  %v6882_v41 = vsel %vm6830_vm11, %v1606_v14, %v6688_v12  ;;  %v1607_v32 = vadd.s32 24, %v6791_v52  ;;  %5123 = vmatprep.mubr.msk.bf16.mxu1 %vm9067_vm10, %v2061_v19 }
 0x17e   : > { %vm6875_vm14 = vmand %vm1663_vm13, %vm1693_vm7  ;;  %vm1820_vm8 = vcmp.lt.s32.totalorder %v6262_v26, %v6151_v0  ;;  %v6897_v55 = vsub.s32 %v6579_v1, %v1355_v49  ;;  %v1376_v12 = vshrl.u32 %v6770_v33, 4  ;;  %vm9070_vm7 = vcmp.ge.s32.totalorder %v6178_v39, %v6149_v56  ;;  %v2675_v33 = vld [vmem:[#allocation2 + $0x47] sm:$0xff]  ;;  %v965_v31 = vpop.f32.mrf.mxu0 }
 0x17f   : > { %vm6892_vm13 = vmand %vm1547_vm15, %vm1517_vm1  ;;  %v6901_v57 = vmul.u32.u64.low 2863311531, %v6839_v15  ;;  %v6902_v48 = vmul.u32.u64.high 2863311531, %v6839_v15, %v6901_v57  ;;  %v1936_v7 = vsel %vm6783_vm9, %v1119_v59, 0.0  ;;  %v1090_v62 = vadd.f32 %v6285_v22, %v1053_v34  ;;  %v2041_v47 = vld [vmem:[#allocation2 + $0x48] sm:$0xff] }
 0x180   : > { %vm6912_vm11 = vmand %vm6860_vm0, %vm9070_vm7  ;;  %vm1665_vm1 = vcmp.ge.s32.totalorder %v6868_v11, 1  ;;  %vm1695_vm15 = vcmp.le.s32.totalorder %v6868_v11, 16  ;;  %1973 = vst.msk [vmem:[#allocation2 + $0x58] sm:$0xff] %vm9057_vm4, %v1936_v7  ;;  %v2697_v13 = vpack.c.bf16 %v2675_v33, %v2674_v2  ;;  %vm1666_vm0 = vcmp.ge.s32.totalorder %v6882_v41, 1 }
 0x181   : > { %vm6926_vm6 = vmand %vm6875_vm14, %vm1756_vm12  ;;  %vm1696_vm10 = vcmp.le.s32.totalorder %v6882_v41, 16  ;;  %v6935_v21 = vsub.s32 %v6618_v24, %v1366_v9  ;;  %v1120_v49 = vmax.f32 %v1090_v62, 0.0  ;;  %v1054_v28 = vadd.f32 %v965_v31, %v6035_v17 }
 0x182   : > { %vm9075_vm12 = vcmp.ge.s32.totalorder %v6754_v6, 1  ;;  %v6952_v46 = vsel %vm6892_vm13, %v1607_v32, %v6791_v52  ;;  %v6955_v4 = vadd.s32 168, %v6046_v36  ;;  %vm9078_vm4 = vcmp.lt.s32.totalorder %v6178_v39, %v6151_v0  ;;  %v5077_v6 = vpop.f32.mrf.mxu0  ;;  %v2042_v9 = vld [vmem:[#allocation2 + $0x50] sm:$0xff] }
 0x183   : > { %vm6945_vm14 = vmand %vm9075_vm12, %vm1694_vm5  ;;  %vm9081_vm5 = vcmask 261120   ;;  %vm1821_vm12 = vcmp.lt.s32.totalorder %v6300_v42, %v6151_v0  ;;  %vm1518_vm13 = vcmp.ne.s32.totalorder %v6897_v55, 0  ;;  %vm1548_vm9 = vcmp.lt.s32.totalorder %v6897_v55, 0 }
 0x184   : > { %vm6962_vm7 = vmand %vm6912_vm11, %vm9078_vm4  ;;  %5204 = vmatmul.mubr.msk.bf16.vlgmr.msra.gmra.mxu0 %vm9081_vm5, %v2697_v13  ;;  %v1377_v52 = vmul.u32 24, %v1376_v12  ;;  %v1387_v5 = vshrl.u32 %v6836_v27, 4  ;;  %v1937_v39 = vsel %vm6849_vm3, %v1120_v49, 0.0  ;;  %v1091_v61 = vadd.f32 %v6285_v22, %v1054_v28  ;;  %v968_v25 = vpop.f32.mrf.mxu0  ;;  %v2676_v13 = vld [vmem:[#allocation2 + $0x4f] sm:$0xff] }
 0x185   : > { %vm9082_vm11 = vcmp.lt.s32.totalorder %v6254_v63, %v6151_v0  ;;  %v1608_v59 = vadd.s32 24, %v6897_v55  ;;  %v6986_v27 = vadd.s32 176, %v6046_v36  ;;  %5256 = vmatpush3.bf16.msra.mxu0 %v6210_v18  ;;  %vm9085_vm3 = vmmov %vm9081_vm5  ;;  %v2062_v34 = vpack.c.bf16 %v2042_v9, %v2041_v47  ;;  %v7005_v18 = vld [vmem:[%s8933_s3 + $0x78] sm:$0xff]  }
 0x186   : > { %vm6980_vm4 = vmand %vm6926_vm6, %vm9082_vm11  ;;  %1974 = vst.msk [vmem:[#allocation2 + $0x60] sm:$0xff] %vm9085_vm3, %v1937_v39  ;;  %vm1519_vm5 = vcmp.ne.s32.totalorder %v6935_v21, 0  ;;  %vm1549_vm11 = vcmp.lt.s32.totalorder %v6935_v21, 0  ;;  %v1609_v50 = vadd.s32 24, %v6935_v21  ;;  %5257 = vmatprep.subr.bf16.mxu0 %v5547_v3  ;;  %v1121_v32 = vmax.f32 %v1091_v61, 0.0  ;;  %v5078_v7 = vpop.f32.mrf.mxu0 }
 0x187   : > { %vm6995_vm6 = vmand %vm6945_vm14, %vm1757_vm2  ;;  %v1055_v53 = vadd.f32 %v968_v25, %v6037_v23  ;;  %v7017_v12 = vmul.u32.u64.low 2863311531, %v6955_v4  ;;  %v7018_v57 = vmul.u32.u64.high 2863311531, %v6955_v4, %v7017_v12  ;;  %v7030_v11 = vsub.s32 %v6703_v43, %v1377_v52  ;;  %v2677_v14 = vld [vmem:[#allocation2 + $0x57] sm:$0xff] }
 0x188   : > { %vm7012_vm2 = vmand %vm1665_vm1, %vm1695_vm15  ;;  %v1388_v62 = vmul.u32 24, %v1387_v5  ;;  %v1398_v40 = vshrl.u32 %v6902_v48, 4  ;;  %v7034_v2 = vadd.s32 184, %v6046_v36  ;;  %v1938_v33 = vsel %vm6962_vm7, %v1121_v32, 0.0  ;;  %v973_v16 = vpop.f32.mrf.mxu0  ;;  %v2043_v25 = vld [vmem:[#allocation2 + $0x58] sm:$0xff] }
 0x189   : > { %vm9090_vm14 = vmmov %vm9085_vm3  ;;  %v1092_v31 = vadd.f32 %v6285_v22, %v1055_v53  ;;  %v7048_v48 = vmul.u32.u64.low 2863311531, %v6986_v27  ;;  %v7049_v28 = vmul.u32.u64.high 2863311531, %v6986_v27, %v7048_v48  ;;  %5258 = vmatpush3.bf16.msra.mxu0 %v5547_v3  ;;  %v2698_v17 = vpack.c.bf16 %v2677_v14, %v2676_v13 }
 0x18a   : > { %5124 = vmatmul.mubr.msk.bf16.gmra.mxu1 %vm9090_vm14, %v2062_v34  ;;  %vm7025_vm3 = vmand %vm1548_vm9, %vm1518_vm13  ;;  %vm1822_vm9 = vcmp.lt.s32.totalorder %v6371_v54, %v6151_v0  ;;  %vm1667_vm7 = vcmp.ge.s32.totalorder %v6952_v46, 1  ;;  %5311 = vmatprep.subr.bf16.mxu0 %v7005_v18  ;;  %v1056_v6 = vadd.f32 %v973_v16, %v6039_v30  ;;  %v5081_v39 = vpop.f32.mrf.mxu0  ;;  %v7091_v26 = vsub.s32 %v6773_v35, %v1388_v62 }
 0x18b   : > { %vm7043_vm1 = vmand %vm1666_vm0, %vm1696_vm10  ;;  %vm1760_vm0 = vcmp.ge.s32.totalorder %v6468_v20, %v6149_v56  ;;  %v1122_v3 = vmax.f32 %v1092_v31, 0.0  ;;  %v1638_v5 = vsel %vm7025_vm3, %v1608_v59, %v6897_v55  ;;  %v1399_v61 = vmul.u32 24, %v1398_v40 }
 0x18c   : > { %vm9095_vm15 = vmmov %vm9090_vm14  ;;  %vm1697_vm14 = vcmp.le.s32.totalorder %v6952_v46, 16  ;;  %v7094_v47 = vmul.u32.u64.low 2863311531, %v7034_v2  ;;  %v7095_v9 = vmul.u32.u64.high 2863311531, %v7034_v2, %v7094_v47  ;;  %v1093_v59 = vadd.f32 %v6285_v22, %v1056_v6  ;;  %v976_v32 = vpop.f32.mrf.mxu0 }
 0x18d   : > { %1975 = vst.msk [vmem:[#allocation2 + $0x68] sm:$0xff] %vm9095_vm15, %v1938_v33  ;;  %vm7061_vm10 = vmand %vm1549_vm11, %vm1519_vm5  ;;  %vm9101_vm11 = vcmp.ge.s32.totalorder %v6300_v42, %v6149_v56  ;;  %v1939_v55 = vsel %vm6980_vm4, %v1122_v3, 0.0  ;;  %v2044_v34 = vld [vmem:[#allocation2 + $0x60] sm:$0xff]  ;;  %vm1520_vm4 = vcmp.ne.s32.totalorder %v7030_v11, 0  ;;  %v1057_v12 = vadd.f32 %v976_v32, %v6048_v37 }
 0x18e   : > { %vm7072_vm13 = vmand %vm6995_vm6, %vm1820_vm8  ;;  %vm9104_vm8 = vcmp.ge.s32.totalorder %v6371_v54, %v6149_v56  ;;  %v1639_v19 = vsel %vm7061_vm10, %v1609_v50, %v6935_v21  ;;  %v2063_v53 = vpack.c.bf16 %v2044_v34, %v2043_v25  ;;  %vm1550_vm10 = vcmp.lt.s32.totalorder %v7030_v11, 0  ;;  %v5082_v23 = vpop.f32.mrf.mxu0  ;;  %v7161_v54 = vld [vmem:[#allocation2 + $0x5f] sm:$0xff] }
 0x18f   : > { %vm9100_vm5 = vmmov %vm9095_vm15  ;;  %v7128_v21 = vadd.s32 192, %v6046_v36  ;;  %v1123_v50 = vmax.f32 %v1093_v59, 0.0  ;;  %v1409_v7 = vshrl.u32 %v7018_v57, 4  ;;  %v1610_v42 = vadd.s32 24, %v7030_v11 }
 0x190   : > { %5207 = vmatprep.mubr.msk.bf16.mxu0 %vm9100_vm5, %v2698_v17  ;;  %vm7086_vm15 = vmand %vm7012_vm2, %vm9101_vm11  ;;  %vm1823_vm2 = vcmp.lt.s32.totalorder %v6468_v20, %v6151_v0  ;;  %v7156_v62 = vsub.s32 %v6839_v15, %v1399_v61  ;;  %v1094_v40 = vadd.f32 %v6285_v22, %v1057_v12  ;;  %v1420_v13 = vshrl.u32 %v7049_v28, 4  ;;  %v981_v14 = vpop.f32.mrf.mxu0 }
 0x191   : > { %vm7105_vm6 = vmand %vm7043_vm1, %vm9104_vm8  ;;  %v1940_v57 = vsel %vm7072_vm13, %v1123_v50, 0.0  ;;  %vm1551_vm13 = vcmp.lt.s32.totalorder %v7091_v26, 0  ;;  %vm1699_vm8 = vcmp.le.s32.totalorder %v1639_v19, 16  ;;  %v1058_v41 = vadd.f32 %v981_v14, %v6055_v45 }
 0x192   : > { %vm9107_vm3 = vmmov %vm9100_vm5  ;;  %vm1668_vm5 = vcmp.ge.s32.totalorder %v1638_v5, 1  ;;  %v7190_v16 = vmul.u32.u64.low 2863311531, %v7128_v21  ;;  %v7191_v17 = vmul.u32.u64.high 2863311531, %v7128_v21, %v7190_v16  ;;  %v1124_v28 = vmax.f32 %v1094_v40, 0.0  ;;  %v5085_v39 = vpop.f32.mrf.mxu0 }
 0x193   : > { %1976 = vst.msk [vmem:[#allocation2 + $0x70] sm:$0xff] %vm9107_vm3, %v1939_v55  ;;  %vm7120_vm1 = vmand %vm1667_vm7, %vm1697_vm14  ;;  %vm1698_vm14 = vcmp.le.s32.totalorder %v1638_v5, 16  ;;  %5127 = vmatprep.mubr.msk.bf16.mxu1 %vm9107_vm3, %v2063_v53  ;;  %v1611_v6 = vadd.s32 24, %v7091_v26  ;;  %v1410_v52 = vmul.u32 24, %v1409_v7  ;;  %v1431_v45 = vshrl.u32 %v7095_v9, 4 }
 0x194   : > { %vm7136_vm7 = vmand %vm7086_vm15, %vm1821_vm12  ;;  %vm1669_vm12 = vcmp.ge.s32.totalorder %v1639_v19, 1  ;;  %vm1521_vm15 = vcmp.ne.s32.totalorder %v7091_v26, 0  ;;  %v7163_v33 = vld [vmem:[#allocation2 + $0x67] sm:$0xff]  ;;  %1977 = vst.msk [vmem:[#allocation2 + $0x78] sm:$0xff] %vm9107_vm3, %v1940_v57  ;;  %v7214_v5 = vadd.s32 200, %v6046_v36  ;;  %v1095_v47 = vadd.f32 %v6285_v22, %v1058_v41  ;;  %v984_v63 = vpop.f32.mrf.mxu0 }
 0x195   : > { %vm7149_vm11 = vmand %vm7105_vm6, %vm1822_vm9  ;;  %vm1824_vm6 = vcmp.lt.s32.totalorder %v6579_v1, %v6151_v0  ;;  %v2699_v49 = vpack.c.bf16 %v7163_v33, %v7161_v54  ;;  %v1941_v61 = vsel %vm7136_vm7, %v1124_v28, 0.0  ;;  %v2045_v55 = vld [vmem:[#allocation2 + $0x68] sm:$0xff]  ;;  %v1421_v34 = vmul.u32 24, %v1420_v13 }
 0x196   : > { %vm7170_vm9 = vmand %vm7120_vm1, %vm1760_vm0  ;;  %vm1763_vm7 = vcmp.ge.s32.totalorder %v6703_v43, %v6149_v56  ;;  %v1612_v10 = vadd.s32 24, %v7156_v62  ;;  %v1125_v12 = vmax.f32 %v1095_v47, 0.0  ;;  %v1059_v46 = vadd.f32 %v984_v63, %v6060_v51 }
 0x197   : > { %vm7185_vm0 = vmand %vm1550_vm10, %vm1520_vm4  ;;  %v7253_v7 = vsub.s32 %v6955_v4, %v1410_v52  ;;  %v1432_v23 = vmul.u32 24, %v1431_v45  ;;  %v7270_v40 = vadd.s32 208, %v6046_v36  ;;  %v1442_v52 = vshrl.u32 %v7191_v17, 4 }
 0x198   : > { %vm7196_vm1 = vmand %vm1668_vm5, %vm1698_vm14  ;;  %vm1552_vm5 = vcmp.lt.s32.totalorder %v7156_v62, 0  ;;  %vm1825_vm14 = vcmp.lt.s32.totalorder %v6618_v24, %v6151_v0  ;;  %v1640_v53 = vsel %vm7185_vm0, %v1610_v42, %v7030_v11  ;;  %v1942_v20 = vsel %vm7149_vm11, %v1125_v12, 0.0 }
 0x199   : > { %vm9120_vm4 = vmmov %vm9107_vm3  ;;  %vm1522_vm3 = vcmp.ne.s32.totalorder %v7156_v62, 0  ;;  %v7266_v42 = vmul.u32.u64.low 2863311531, %v7214_v5  ;;  %v7267_v57 = vmul.u32.u64.high 2863311531, %v7214_v5, %v7266_v42  ;;  %v1096_v31 = vadd.f32 %v6285_v22, %v1059_v46 }
 0x19a   : > { %5208 = vmatmul.mubr.msk.bf16.gmra.mxu0 %vm9120_vm4, %v2699_v49  ;;  %vm7206_vm10 = vmand %vm1551_vm13, %vm1521_vm15  ;;  %v2046_v59 = vld [vmem:[#allocation2 + $0x70] sm:$0xff]  ;;  %v7287_v49 = vsub.s32 %v6986_v27, %v1421_v34  ;;  %vm9135_vm11 = vcmp.ge.s32.totalorder %v6618_v24, %v6149_v56  ;;  %v1613_v34 = vadd.s32 24, %v7253_v7  ;;  %v7360_v63 = vadd.s32 216, %v6046_v36 }
 0x19b   : > { %v7219_v25 = vld [vmem:[#allocation2 + $0x6f] sm:$0xff]  ;;  %vm9123_vm15 = vmmov %vm9120_vm4  ;;  %v2064_v9 = vpack.c.bf16 %v2046_v59, %v2045_v55  ;;  %v7242_v19 = vsel %vm7206_vm10, %v1611_v6, %v7091_v26  ;;  %v5086_v26 = vpop.f32.mrf.mxu0  ;;  %v7284_v14 = vld [vmem:[#allocation2 + $0x77] sm:$0xff]  ;;  %v1126_v41 = vmax.f32 %v1096_v31, 0.0  ;;  %v1443_v46 = vmul.u32 24, %v1442_v52 }
 0x19c   : > { %1978 = vst.msk [vmem:[#allocation2 + $0x80] sm:$0xff] %vm9123_vm15, %v1941_v61  ;;  %vm7226_vm13 = vmand %vm1669_vm12, %vm1699_vm8  ;;  %v2024_v50 = vpack.c.bf16 %v7219_v25, %v7163_v33  ;;  %v2700_v48 = vpack.c.bf16 %v7284_v14, %v7219_v25  ;;  %vm1764_vm15 = vcmp.ge.s32.totalorder %v6773_v35, %v6149_v56  ;;  %v2047_v47 = vld [vmem:[#allocation2 + $0x78] sm:$0xff]  ;;  %v1453_v11 = vshrl.u32 %v7267_v57, 4 }
 0x19d   : > { %vm7248_vm8 = vmand %vm1552_vm5, %vm1522_vm3  ;;  %v989_v37 = vpop.f32.mrf.mxu0  ;;  %vm1700_vm3 = vcmp.le.s32.totalorder %v1640_v53, 16  ;;  %vm1671_vm5 = vcmp.ge.s32.totalorder %v7242_v19, 1 }
 0x19e   : > { %vm7260_vm12 = vmand %vm7170_vm9, %vm1823_vm2  ;;  %vm9131_vm2 = vcmp.ge.s32.totalorder %v6579_v1, %v6149_v56  ;;  %v7307_v28 = vsel %vm7248_vm8, %v1612_v10, %v7156_v62  ;;  %v1060_v3 = vadd.f32 %v989_v37, %v6067_v60  ;;  %vm9140_vm8 = vcmask 261120  }
 0x19f   : > { %vm9130_vm0 = vmmov %vm9120_vm4  ;;  %vm1670_vm4 = vcmp.ge.s32.totalorder %v1640_v53, 1  ;;  %v5089_v62 = vpop.f32.mrf.mxu0  ;;  %5211 = vmatprep.mubr.msk.bf16.mxu0 %vm9140_vm8, %v2700_v48  ;;  %v7327_v60 = vsub.s32 %v7034_v2, %v1432_v23  ;;  %v7331_v39 = vmul.u32.u64.low 2863311531, %v7270_v40  ;;  %v7332_v1 = vmul.u32.u64.high 2863311531, %v7270_v40, %v7331_v39  ;;  %v9192_v53 = vld [vmem:[#allocation13_spill] sm:$0xff] }
 0x1a0   : > { %5128 = vmatmul.mubr.msk.bf16.gmra.mxu1 %vm9130_vm0, %v2064_v9  ;;  %vm7280_vm9 = vmand %vm7196_vm1, %vm9131_vm2  ;;  %vm1553_vm2 = vcmp.lt.s32.totalorder %v7253_v7, 0  ;;  %v1943_v30 = vsel %vm7260_vm12, %v1126_v41, 0.0  ;;  %v1097_v45 = vadd.f32 %v6285_v22, %v1060_v3  ;;  %vm1524_vm8 = vcmp.ne.s32.totalorder %v7287_v49, 0 }
 0x1a1   : > { %vm9134_vm10 = vmmov %vm9130_vm0  ;;  %vm1523_vm0 = vcmp.ne.s32.totalorder %v7253_v7, 0  ;;  %vm1554_vm12 = vcmp.lt.s32.totalorder %v7287_v49, 0  ;;  %v992_v55 = vpop.f32.mrf.mxu0  ;;  %v1614_v10 = vadd.s32 24, %v7287_v49  ;;  %v1615_v57 = vadd.s32 24, %v7327_v60 }
 0x1a2   : > { %1979 = vst.msk [vmem:[#allocation2 + $0x88] sm:$0xff] %vm9134_vm10, %v1942_v20  ;;  %vm7297_vm1 = vmand %vm7226_vm13, %vm9135_vm11  ;;  %vm9143_vm11 = vcmask 261120   ;;  %v1127_v9 = vmax.f32 %v1097_v45, 0.0  ;;  %v1061_v32 = vadd.f32 %v992_v55, %v6075_v8  ;;  %v1454_v52 = vmul.u32 24, %v1453_v11 }
 0x1a3   : > { %vm7319_vm10 = vmand %vm7280_vm9, %vm1824_vm6  ;;  %v2048_v17 = vld [vmem:[#allocation2 + $0x80] sm:$0xff]  ;;  %1980 = vst.msk [vmem:[#allocation2 + $0x90] sm:$0xff] %vm9143_vm11, %v1943_v30  ;;  %v5090_v12 = vpop.f32.mrf.mxu0  ;;  %v7420_v48 = vmul.u32.u64.low 2863311531, %v7360_v63  ;;  %v7421_v16 = vmul.u32.u64.high 2863311531, %v7360_v63, %v7420_v48  ;;  %v1464_v39 = vshrl.u32 %v7332_v1, 4 }
 0x1a4   : > { %vm7342_vm6 = vmand %vm7297_vm1, %vm1825_vm14  ;;  %v2065_v59 = vpack.c.bf16 %v2048_v17, %v2047_v47  ;;  %vm1701_vm14 = vcmp.le.s32.totalorder %v7242_v19, 16  ;;  %vm1672_vm1 = vcmp.ge.s32.totalorder %v7307_v28, 1  ;;  %v1944_v51 = vsel %vm7319_vm10, %v1127_v9, 0.0  ;;  %v7399_v42 = vld [vmem:[#allocation2 + $0x7f] sm:$0xff] }
 0x1a5   : > { %vm7353_vm13 = vmand %vm1670_vm4, %vm1700_vm3  ;;  %v1098_v26 = vadd.f32 %v6285_v22, %v1061_v32  ;;  %v997_v22 = vpop.f32.mrf.mxu0  ;;  %v7519_v8 = vsub.s32 %v7214_v5, %v1454_v52  ;;  %v9181_v19 = vld [vmem:[#allocation12_spill] sm:$0xff] }
 0x1a6   : > { %vm7370_vm4 = vmand %vm1553_vm2, %vm1523_vm0  ;;  %vm1555_vm0 = vcmp.lt.s32.totalorder %v7327_v60, 0  ;;  %v1062_v3 = vadd.f32 %v997_v22, %v6093_v29 }
 0x1a7   : > { %vm9148_vm3 = vmmov %vm9143_vm11  ;;  %vm1525_vm11 = vcmp.ne.s32.totalorder %v7327_v60, 0  ;;  %v1643_v37 = vsel %vm7370_vm4, %v1613_v34, %v7253_v7  ;;  %v1128_v41 = vmax.f32 %v1098_v26, 0.0  ;;  %v7438_v7 = vadd.s32 224, %v6046_v36  ;;  %v5093_v62 = vpop.f32.mrf.mxu0 }
 0x1a8   : > { %5131 = vmatprep.mubr.msk.bf16.mxu1 %vm9148_vm3, %v2065_v59  ;;  %vm7380_vm9 = vmand %vm1554_vm12, %vm1524_vm8  ;;  %vm1702_vm8 = vcmp.le.s32.totalorder %v7307_v28, 16  ;;  %vm1766_vm12 = vcmp.ge.s32.totalorder %v6955_v4, %v6149_v56  ;;  %v7460_v28 = vld [vmem:[%s8932_s2] ss:$0 sm:$0xff]  ;;  %vm9164_vm4 = vcmp.lt.s32.totalorder %v6703_v43, %v6151_v0  ;;  %v7489_v34 = vadd.s32 232, %v6046_v36  ;;  %v9167_v43 = vld [vmem:[#allocation11_spill] sm:$0xff] }
 0x1a9   : > { %vm7395_vm2 = vmand %vm7353_vm13, %vm1763_vm7  ;;  %v7401_v20 = vld [vmem:[#allocation2 + $0x87] sm:$0xff]  ;;  %v7427_v6 = vsel %vm7380_vm9, %v1614_v10, %v7287_v49  ;;  %v7452_v49 = vsub.s32 %v7128_v21, %v1443_v46  ;;  %v1945_v30 = vsel %vm7342_vm6, %v1128_v41, 0.0  ;;  %v1099_v45 = vadd.f32 %v7460_v28, %v1062_v3  ;;  %v1000_v55 = vpop.f32.mrf.mxu0 }
 0x1aa   : > { %vm9153_vm10 = vmmov %vm9148_vm3  ;;  %v2701_v31 = vpack.c.bf16 %v7401_v20, %v7399_v42  ;;  %v2049_v1 = vld [vmem:[#allocation2 + $0x88] sm:$0xff]  ;;  %v2050_v17 = vld [vmem:[#allocation2 + $0x90] sm:$0xff]  ;;  %vm1703_vm6 = vcmp.le.s32.totalorder %v1643_v37, 16  ;;  %v1063_v32 = vadd.f32 %v1000_v55, %v9167_v43  ;;  %v1465_v46 = vmul.u32 24, %v1464_v39 }
 0x1ab   : > { %1981 = vst.msk [vmem:[#allocation2 + $0x98] sm:$0xff] %vm9153_vm10, %v1944_v51  ;;  %vm7412_vm7 = vmand %vm1671_vm5, %vm1701_vm14  ;;  %v7482_v59 = vpack.c.bf16 %v2050_v17, %v2049_v1  ;;  %v1129_v9 = vmax.f32 %v1099_v45, 0.0  ;;  %v7502_v10 = vmul.u32.u64.low 2863311531, %v7438_v7  ;;  %v7503_v12 = vmul.u32.u64.high 2863311531, %v7438_v7, %v7502_v10  ;;  %v7524_v51 = vld [vmem:[#allocation2 + $0x8f] sm:$0xff] }
 0x1ac   : > { %vm7433_vm5 = vmand %vm1555_vm0, %vm1525_vm11  ;;  %vm9168_vm0 = vcmp.ge.s32.totalorder %v6839_v15, %v6149_v56  ;;  %v1100_v11 = vadd.f32 %v7460_v28, %v1063_v32  ;;  %v7550_v48 = vmul.u32.u64.low 2863311531, %v7489_v34  ;;  %v7551_v41 = vmul.u32.u64.high 2863311531, %v7489_v34, %v7550_v48 }
 0x1ad   : > { %vm9158_vm13 = vmmov %vm9148_vm3  ;;  %v1645_v24 = vsel %vm7433_vm5, %v1615_v57, %v7327_v60  ;;  %v5094_v60 = vpop.f32.mrf.mxu0  ;;  %vm1526_vm5 = vcmp.ne.s32.totalorder %v7452_v49, 0  ;;  %v1616_v57 = vadd.s32 24, %v7452_v49  ;;  %v7575_v52 = vsub.s32 %v7270_v40, %v1465_v46 }
 0x1ae   : > { %5212 = vmatmul.mubr.msk.bf16.gmra.mxu0 %vm9158_vm13, %v2701_v31  ;;  %vm7445_vm9 = vmand %vm1672_vm1, %vm1702_vm8  ;;  %vm1673_vm1 = vcmp.ge.s32.totalorder %v1643_v37, 1  ;;  %vm9171_vm8 = vcmp.lt.s32.totalorder %v6773_v35, %v6151_v0  ;;  %vm1556_vm13 = vcmp.lt.s32.totalorder %v7452_v49, 0  ;;  %v1475_v37 = vshrl.u32 %v7421_v16, 4 }
 0x1af   : > { %vm7468_vm14 = vmand %vm7412_vm7, %vm1764_vm15  ;;  %vm1674_vm15 = vcmp.ge.s32.totalorder %v7427_v6, 1  ;;  %v1005_v22 = vpop.f32.mrf.mxu0  ;;  %v1130_v3 = vmax.f32 %v1100_v11, 0.0  ;;  %v1486_v36 = vshrl.u32 %v7503_v12, 4  ;;  %v2026_v33 = vpack.c.bf16 %v7524_v51, %v7401_v20 }
 0x1b0   : > { %vm9163_vm11 = vmmov %vm9148_vm3  ;;  %v1064_v62 = vadd.f32 %v1005_v22, %v9181_v19  ;;  %v1476_v43 = vmul.u32 24, %v1475_v37  ;;  %v1497_v37 = vshrl.u32 %v7551_v41, 4 }
 0x1b1   : > { %1982 = vst.msk [vmem:[#allocation2 + $0xa0] sm:$0xff] %vm9163_vm11, %v1945_v30  ;;  %vm7478_vm3 = vmand %vm7395_vm2, %vm9164_vm4  ;;  %vm9178_vm4 = vcmp.lt.s32.totalorder %v6839_v15, %v6151_v0  ;;  %v5097_v29 = vpop.f32.mrf.mxu0 }
 0x1b2   : > { %vm7497_vm2 = vmand %vm7445_vm9, %vm9168_vm0  ;;  %v1946_v35 = vsel %vm7478_vm3, %v1129_v9, 0.0  ;;  %v7526_v26 = vld [vmem:[#allocation2 + $0x97] sm:$0xff]  ;;  %v1101_v30 = vadd.f32 %v7460_v28, %v1064_v62  ;;  %v1617_v9 = vadd.s32 24, %v7519_v8  ;;  %v1498_v55 = vmul.u32 24, %v1497_v37 }
 0x1b3   : > { %vm7510_vm10 = vmand %vm7468_vm14, %vm9171_vm8  ;;  %vm1704_vm14 = vcmp.le.s32.totalorder %v7427_v6, 16  ;;  %v2702_v13 = vpack.c.bf16 %v7526_v26, %v7524_v51  ;;  %v7582_v45 = vld [vmem:[#allocation2 + $0x98] sm:$0xff]  ;;  %v1008_v17 = vpop.f32.mrf.mxu0 }
 0x1b4   : > { %vm9174_vm7 = vmmov %vm9163_vm11  ;;  %v1947_v39 = vsel %vm7510_vm10, %v1130_v3, 0.0  ;;  %v1131_v32 = vmax.f32 %v1101_v30, 0.0  ;;  %v1065_v10 = vadd.f32 %v1008_v17, %v9192_v53  ;;  %v9203_v3 = vld [vmem:[#allocation14_spill] sm:$0xff] }
 0x1b5   : > { %5132 = vmatmul.mubr.msk.bf16.gmra.mxu1 %vm9174_vm7, %v7482_v59  ;;  %vm7530_vm9 = vmand %vm1673_vm1, %vm1703_vm6  ;;  %vm1675_vm1 = vcmp.ge.s32.totalorder %v1645_v24, 1  ;;  %vm1705_vm6 = vcmp.le.s32.totalorder %v1645_v24, 16 }
 0x1b6   : > { %vm9177_vm11 = vmmov %vm9174_vm7  ;;  %v1102_v46 = vadd.f32 %v7460_v28, %v1065_v10 }
 0x1b7   : > { %1983 = vst.msk [vmem:[#allocation2 + $0xa8] sm:$0xff] %vm9177_vm11, %v1946_v35  ;;  %vm7542_vm3 = vmand %vm7497_vm2, %vm9178_vm4  ;;  %vm1557_vm11 = vcmp.lt.s32.totalorder %v7519_v8, 0 }
 0x1b8   : > { %vm7558_vm0 = vmand %vm1556_vm13, %vm1526_vm5  ;;  %vm1829_vm5 = vcmp.lt.s32.totalorder %v6955_v4, %v6151_v0  ;;  %v2052_v47 = vld [vmem:[#allocation2 + $0xa0] sm:$0xff]  ;;  %vm1767_vm13 = vcmp.ge.s32.totalorder %v6986_v27, %v6149_v56  ;;  %v1948_v12 = vsel %vm7542_vm3, %v1131_v32, 0.0  ;;  %v1132_v48 = vmax.f32 %v1102_v46, 0.0 }
 0x1b9   : > { %vm9184_vm2 = vmmov %vm9174_vm7  ;;  %vm1527_vm7 = vcmp.ne.s32.totalorder %v7519_v8, 0  ;;  %v7596_v61 = vpack.c.bf16 %v2052_v47, %v7582_v45  ;;  %v1646_v6 = vsel %vm7558_vm0, %v1616_v57, %v7452_v49  ;;  %v5098_v49 = vpop.f32.mrf.mxu0  ;;  %vm1831_vm0 = vcmp.lt.s32.totalorder %v7034_v2, %v6151_v0  ;;  %v7648_v11 = vld [vmem:[#allocation2 + $0x9f] sm:$0xff] }
 0x1ba   : > { %5215 = vmatprep.mubr.msk.bf16.mxu0 %vm9184_vm2, %v2702_v13  ;;  %vm7568_vm8 = vmand %vm7530_vm9, %vm1766_vm12  ;;  %v7668_v13 = vsub.s32 %v7360_v63, %v1476_v43  ;;  %v2027_v25 = vpack.c.bf16 %v7648_v11, %v7526_v26 }
 0x1bb   : > { %vm7588_vm12 = vmand %vm1674_vm15, %vm1704_vm14  ;;  %vm1768_vm15 = vcmp.ge.s32.totalorder %v7034_v2, %v6149_v56  ;;  %v1013_v57 = vpop.f32.mrf.mxu0 }
 0x1bc   : > { %vm9189_vm10 = vmmov %vm9184_vm2  ;;  %v1066_v19 = vadd.f32 %v1013_v57, %v9203_v3  ;;  %v1619_v57 = vadd.s32 24, %v7668_v13  ;;  %v9223_v3 = vld [vmem:[#allocation16_spill] sm:$0xff] }
 0x1bd   : > { %1984 = vst.msk [vmem:[#allocation2 + $0xb0] sm:$0xff] %vm9189_vm10, %v1947_v39  ;;  %vm7600_vm9 = vmand %vm1675_vm1, %vm1705_vm6  ;;  %vm1830_vm6 = vcmp.lt.s32.totalorder %v6986_v27, %v6151_v0  ;;  %v5101_v15 = vpop.f32.mrf.mxu0  ;;  %v1618_v27 = vadd.s32 24, %v7575_v52 }
 0x1be   : > { %vm7615_vm14 = vmand %vm1557_vm11, %vm1527_vm7  ;;  %v7650_v23 = vld [vmem:[#allocation2 + $0xa7] sm:$0xff]  ;;  %vm1676_vm11 = vcmp.ge.s32.totalorder %v1646_v6, 1  ;;  %v1103_v16 = vadd.f32 %v7460_v28, %v1066_v19 }
 0x1bf   : > { %vm9195_vm4 = vmmov %vm9184_vm2  ;;  %vm1528_vm2 = vcmp.ne.s32.totalorder %v7575_v52, 0  ;;  %v2703_v22 = vpack.c.bf16 %v7650_v23, %v7648_v11  ;;  %v1647_v31 = vsel %vm7615_vm14, %v1617_v9, %v7519_v8  ;;  %v1487_v8 = vmul.u32 24, %v1486_v36  ;;  %v7704_v30 = vld [vmem:[#allocation2 + $0xa8] sm:$0xff]  ;;  %v1016_v1 = vpop.f32.mrf.mxu0  ;;  %v9214_v9 = vld [vmem:[#allocation15_spill] sm:$0xff] }
 0x1c0   : > { %5135 = vmatprep.mubr.msk.bf16.mxu1 %vm9195_vm4, %v7596_v61  ;;  %vm7627_vm1 = vmand %vm7588_vm12, %vm1767_vm13  ;;  %vm1706_vm12 = vcmp.le.s32.totalorder %v1646_v6, 16  ;;  %v1133_v6 = vmax.f32 %v1103_v16, 0.0  ;;  %v1067_v43 = vadd.f32 %v1016_v1, %v9214_v9 }
 0x1c1   : > { %vm7644_vm7 = vmand %vm7568_vm8, %vm1829_vm5  ;;  %vm1558_vm5 = vcmp.lt.s32.totalorder %v7575_v52, 0  ;;  %v1488_v53 = vsub.s32 %v7438_v7, %v1487_v8  ;;  %v5102_v10 = vpop.f32.mrf.mxu0 }
 0x1c2   : > { %vm9200_vm13 = vmmov %vm9195_vm4  ;;  %v1949_v29 = vsel %vm7644_vm7, %v1132_v48, 0.0  ;;  %vm1529_vm7 = vcmp.ne.s32.totalorder %v7668_v13, 0  ;;  %v1104_v49 = vadd.f32 %v7460_v28, %v1067_v43 }
 0x1c3   : > { %1985 = vst.msk [vmem:[#allocation2 + $0xb8] sm:$0xff] %vm9200_vm13, %v1948_v12  ;;  %vm7660_vm3 = vmand %vm7600_vm9, %vm1768_vm15  ;;  %vm1769_vm15 = vcmp.ge.s32.totalorder %v7128_v21, %v6149_v56  ;;  %v1620_v1 = vadd.s32 24, %v1488_v53 }
 0x1c4   : > { %vm7677_vm8 = vmand %vm7627_vm1, %vm1830_vm6  ;;  %v7706_v47 = vld [vmem:[#allocation2 + $0xb0] sm:$0xff]  ;;  %vm1707_vm1 = vcmp.le.s32.totalorder %v1647_v31, 16  ;;  %v1134_v48 = vmax.f32 %v1104_v49, 0.0 }
 0x1c5   : > { %vm9206_vm10 = vmmov %vm9195_vm4  ;;  %vm1677_vm4 = vcmp.ge.s32.totalorder %v1647_v31, 1  ;;  %v7711_v17 = vpack.c.bf16 %v7706_v47, %v7704_v30  ;;  %v1950_v36 = vsel %vm7677_vm8, %v1133_v6, 0.0  ;;  %v7746_v60 = vld [vmem:[#allocation2 + $0xaf] sm:$0xff]  ;;  %vm1832_vm8 = vcmp.lt.s32.totalorder %v7128_v21, %v6151_v0  ;;  %v9232_v6 = vld [vmem:[#allocation17_spill] sm:$0xff] }
 0x1c6   : > { %5216 = vmatmul.mubr.msk.bf16.gmra.mxu0 %vm9206_vm10, %v2703_v22  ;;  %vm7685_vm9 = vmand %vm1676_vm11, %vm1706_vm12  ;;  %v1021_v22 = vpop.f32.mrf.mxu0  ;;  %v1995_v21 = vld [vmem:[#allocation2 + $0x17] sm:$0xff]  ;;  %v2028_v20 = vpack.c.bf16 %v7746_v60, %v7650_v23  ;;  %v8062_v26 = vld [vmem:[#allocation2 + $0xa9] sm:$0xff] }
 0x1c7   : > { %vm7700_vm14 = vmand %vm7660_vm3, %vm1831_vm0  ;;  %vm1770_vm3 = vcmp.ge.s32.totalorder %v7214_v5, %v6149_v56  ;;  %v1068_v19 = vadd.f32 %v1021_v22, %v9223_v3  ;;  %v2431_v23 = vld [vmem:[#allocation2 + $0x21] sm:$0xff] }
 0x1c8   : > { %vm9211_vm6 = vmmov %vm9206_vm10  ;;  %v5105_v62 = vpop.f32.mrf.mxu0  ;;  %v1951_v15 = vsel %vm7700_vm14, %v1134_v48, 0.0 }
 0x1c9   : > { %1986 = vst.msk [vmem:[#allocation2 + $0xc0] sm:$0xff] %vm9211_vm6, %v1949_v29  ;;  %vm7717_vm0 = vmand %vm1558_vm5, %vm1528_vm2  ;;  %vm1559_vm2 = vcmp.lt.s32.totalorder %v7668_v13, 0  ;;  %v1105_v41 = vadd.f32 %v7460_v28, %v1068_v19  ;;  %v9240_v19 = vld [vmem:[#allocation18_spill] sm:$0xff] }
 0x1ca   : > { %vm7728_vm11 = vmand %vm7685_vm9, %vm1769_vm15  ;;  %v7748_v12 = vld [vmem:[#allocation2 + $0xb7] sm:$0xff]  ;;  %v1648_v35 = vsel %vm7717_vm0, %v1618_v27, %v7575_v52  ;;  %v1499_v52 = vsub.s32 %v7489_v34, %v1498_v55  ;;  %vm1530_vm9 = vcmp.ne.s32.totalorder %v1488_v53, 0  ;;  %vm1560_vm15 = vcmp.lt.s32.totalorder %v1488_v53, 0  ;;  %v1024_v39 = vpop.f32.mrf.mxu0 }
 0x1cb   : > { %vm9217_vm12 = vmmov %vm9211_vm6  ;;  %v7750_v46 = vld [vmem:[#allocation2 + $0xb8] sm:$0xff]  ;;  %v2704_v4 = vpack.c.bf16 %v7748_v12, %v7746_v60  ;;  %vm1678_vm0 = vcmp.ge.s32.totalorder %v1648_v35, 1  ;;  %v1135_v55 = vmax.f32 %v1105_v41, 0.0  ;;  %v1069_v9 = vadd.f32 %v1024_v39, %v9232_v6 }
 0x1cc   : > { %5136 = vmatmul.mubr.msk.bf16.gmra.mxu1 %vm9217_vm12, %v7711_v17  ;;  %vm7737_vm13 = vmand %vm1677_vm4, %vm1707_vm1  ;;  %v2946_v37 = vpack.c.bf16 %v7750_v46, %v7706_v47  ;;  %v5106_v43 = vpop.f32.mrf.mxu0 }
 0x1cd   : > { %vm9220_vm5 = vmmov %vm9211_vm6  ;;  %vm1833_vm6 = vcmp.lt.s32.totalorder %v7214_v5, %v6151_v0  ;;  %v1621_v5 = vadd.s32 24, %v1499_v52  ;;  %v1106_v24 = vadd.f32 %v7460_v28, %v1069_v9  ;;  %v9250_v43 = vld [vmem:[#allocation9_spill] sm:$0xff] }
 0x1ce   : > { %1987 = vst.msk [vmem:[#allocation2 + $0xc8] sm:$0xff] %vm9220_vm5, %v1950_v36  ;;  %vm7765_vm10 = vmand %vm1559_vm2, %vm1529_vm7  ;;  %vm1708_vm7 = vcmp.le.s32.totalorder %v1648_v35, 16  ;;  %v1029_v22 = vpop.f32.mrf.mxu0  ;;  %v784_v32 = vadd.f32 %v6420_v58, %v9250_v43 }
 0x1cf   : > { %vm9224_vm4 = vmmov %vm9220_vm5  ;;  %v1649_v16 = vsel %vm7765_vm10, %v1619_v57, %v7668_v13  ;;  %vm1771_vm10 = vcmp.ge.s32.totalorder %v7270_v40, %v6149_v56  ;;  %v1136_v3 = vmax.f32 %v1106_v24, 0.0  ;;  %v1070_v62 = vadd.f32 %v1029_v22, %v9240_v19 }
 0x1d0   : > { %5219 = vmatprep.mubr.msk.bf16.mxu0 %vm9224_vm4, %v2704_v4  ;;  %vm7779_vm1 = vmand %vm7737_vm13, %vm1770_vm3  ;;  %v7797_v29 = vld [vmem:[#allocation2 + $0xc0] sm:$0xff]  ;;  %vm1531_vm13 = vcmp.ne.s32.totalorder %v1499_v52, 0  ;;  %vm1561_vm3 = vcmp.lt.s32.totalorder %v1499_v52, 0 }
 0x1d1   : > { %vm7793_vm2 = vmand %vm7728_vm11, %vm1832_vm8  ;;  %v7805_v2 = vpack.c.bf16 %v7797_v29, %v7750_v46  ;;  %v7836_v36 = vld [vmem:[#allocation2 + $0xbf] sm:$0xff]  ;;  %v1107_v27 = vadd.f32 %v7460_v28, %v1070_v62 }
 0x1d2   : > { %vm9229_vm12 = vmmov %vm9224_vm4  ;;  %v1952_v10 = vsel %vm7793_vm2, %v1135_v55, 0.0  ;;  %v2000_v62 = vld [vmem:[#allocation2 + $0x3f] sm:$0xff]  ;;  %v8060_v51 = vpack.c.bf16 %v7836_v36, %v7748_v12 }
 0x1d3   : > { %1988 = vst.msk [vmem:[#allocation2 + $0xd0] sm:$0xff] %vm9229_vm12, %v1951_v15  ;;  %vm7809_vm14 = vmand %vm1560_vm15, %vm1530_vm9  ;;  %vm1679_vm9 = vcmp.ge.s32.totalorder %v1649_v16, 1  ;;  %vm1709_vm15 = vcmp.le.s32.totalorder %v1649_v16, 16  ;;  %vm1772_vm12 = vcmp.ge.s32.totalorder %v7360_v63, %v6149_v56  ;;  %v1996_v15 = vld [vmem:[#allocation2 + $0x1f] sm:$0xff]  ;;  %v1137_v55 = vmax.f32 %v1107_v27, 0.0 }
 0x1d4   : > { %vm7819_vm11 = vmand %vm7779_vm1, %vm1833_vm6  ;;  %v1650_v57 = vsel %vm7809_vm14, %v1620_v1, %v1488_v53  ;;  %1989 = vst.msk [vmem:[#allocation2 + $0xd8] sm:$0xff] %vm9224_vm4, %v1952_v10  ;;  %v5109_v53 = vpop.f32.mrf.mxu0  ;;  %v8065_v11 = vld [vmem:[#allocation2 + $0xb9] sm:$0xff] }
 0x1d5   : > { %vm9235_vm5 = vmmov %vm9224_vm4  ;;  %v7838_v49 = vld [vmem:[#allocation2 + $0xc7] sm:$0xff]  ;;  %vm1680_vm14 = vcmp.ge.s32.totalorder %v1650_v57, 1  ;;  %v1953_v41 = vsel %vm7819_vm11, %v1136_v3, 0.0  ;;  %v1998_v3 = vld [vmem:[#allocation2 + $0x2f] sm:$0xff] }
 0x1d6   : > { %5139 = vmatprep.mubr.msk.bf16.mxu1 %vm9235_vm5, %v7805_v2  ;;  %vm7827_vm8 = vmand %vm1678_vm0, %vm1708_vm7  ;;  %v7840_v35 = vld [vmem:[#allocation2 + $0xc8] sm:$0xff]  ;;  %v2705_v4 = vpack.c.bf16 %v7838_v49, %v7836_v36  ;;  %vm1834_vm0 = vcmp.lt.s32.totalorder %v7270_v40, %v6151_v0  ;;  %v1032_v16 = vpop.f32.mrf.mxu0  ;;  %v2430_v36 = vld [vmem:[#allocation2 + $0x19] sm:$0xff] }
 0x1d7   : > { %vm7849_vm1 = vmand %vm1561_vm3, %vm1531_vm13  ;;  %v2947_v48 = vpack.c.bf16 %v7840_v35, %v7797_v29  ;;  %vm1710_vm13 = vcmp.le.s32.totalorder %v1650_v57, 16  ;;  %v1071_v6 = vadd.f32 %v1032_v16, %v6373_v44  ;;  %v9256_v53 = vld [vmem:[#allocation10_spill] sm:$0xff]  ;;  %v7958_v44 = vld [vmem:[#allocation2 + $0x39] sm:$0xff] }
 0x1d8   : > { %vm1801_vm6 = vmand %vm7827_vm8, %vm1771_vm10  ;;  %v1651_v40 = vsel %vm7849_vm1, %v1621_v5, %v1499_v52  ;;  %vm1835_vm8 = vcmp.lt.s32.totalorder %v7360_v63, %v6151_v0  ;;  %v2019_v52 = vpack.c.bf16 %v1996_v15, %v1995_v21  ;;  %v5110_v13 = vpop.f32.mrf.mxu0  ;;  %v787_v8 = vadd.f32 %v6484_v38, %v9256_v53  ;;  %v1999_v21 = vld [vmem:[#allocation2 + $0x37] sm:$0xff] }
 0x1d9   : > { %vm9241_vm7 = vmmov %vm9224_vm4  ;;  %v1108_v10 = vadd.f32 %v7460_v28, %v1071_v6  ;;  %v2021_v13 = vpack.c.bf16 %v2000_v62, %v1999_v21  ;;  %v2001_v62 = vld [vmem:[#allocation2 + $0x47] sm:$0xff]  ;;  %v8008_v21 = vld [vmem:[#allocation2 + $0x51] sm:$0xff] }
 0x1da   : > { %5220 = vmatmul.mubr.msk.bf16.gmra.mxu0 %vm9241_vm7, %v2705_v4  ;;  %vm7865_vm2 = vmand %vm1679_vm9, %vm1709_vm15  ;;  %v7874_v1 = vld [vmem:[#allocation2 + $0xd0] sm:$0xff]  ;;  %vm1773_vm15 = vcmp.ge.s32.totalorder %v7438_v7, %v6149_v56  ;;  %v1037_v57 = vpop.f32.mrf.mxu0 }
 0x1db   : > { %vm9244_vm3 = vmmov %vm9224_vm4  ;;  %v7881_v39 = vpack.c.bf16 %v7874_v1, %v7840_v35  ;;  %vm1681_vm4 = vcmp.ge.s32.totalorder %v1651_v40, 1  ;;  %v7908_v24 = vld [vmem:[#allocation2 + $0xcf] sm:$0xff]  ;;  %v7910_v22 = vld [vmem:[#allocation2 + $0xd7] sm:$0xff]  ;;  %v1138_v4 = vmax.f32 %v1108_v10, 0.0  ;;  %v1072_v31 = vadd.f32 %v1037_v57, %v784_v32 }
 0x1dc   : > { %1990 = vst.msk [vmem:[#allocation2 + $0xe0] sm:$0xff] %vm9244_vm3, %v1953_v41  ;;  %vm1864_vm5 = vmand %vm1801_vm6, %vm1834_vm0  ;;  %vm1711_vm6 = vcmp.le.s32.totalorder %v1651_v40, 16  ;;  %v2706_v58 = vpack.c.bf16 %v7910_v22, %v7908_v24  ;;  %v5113_v63 = vpop.f32.mrf.mxu0  ;;  %v8075_v12 = vpack.c.bf16 %v7908_v24, %v7838_v49  ;;  %v5552_v24 = vld [vmem:[%s8933_s3 + $0x40] sm:$0xff]  }
 0x1dd   : > { %vm7889_vm11 = vmand %vm7865_vm2, %vm1772_vm12  ;;  %v1954_v5 = vsel %vm1864_vm5, %v1137_v55, 0.0  ;;  %vm1836_vm12 = vcmp.lt.s32.totalorder %v7438_v7, %v6151_v0  ;;  %v1109_v41 = vadd.f32 %v7460_v28, %v1072_v31  ;;  %v1997_v7 = vld [vmem:[#allocation2 + $0x27] sm:$0xff]  ;;  %v2002_v63 = vld [vmem:[#allocation2 + $0x4f] sm:$0xff] }
 0x1de   : > { %vm9247_vm10 = vmmov %vm9244_vm3  ;;  %v1040_v40 = vpop.f32.mrf.mxu0  ;;  %v2020_v16 = vpack.c.bf16 %v1998_v3, %v1997_v7  ;;  %v5548_v55 = vld [vmem:[%s8933_s3 + $0x20] sm:$0xff]   ;;  %v7990_v53 = vpack.c.bf16 %v2002_v63, %v2001_v62  ;;  %v3172_v63 = vld [vmem:[#allocation2 + $0xb1] sm:$0xff]  ;;  %v2454_v62 = vpack.c.bf16 %v2431_v23, %v2430_v36 }
 0x1df   : > { %5140 = vmatmul.mubr.msk.bf16.gmra.mxu1 %vm9247_vm10, %v7881_v39  ;;  %vm7898_vm9 = vmand %vm1680_vm14, %vm1710_vm13  ;;  %v1139_v38 = vmax.f32 %v1109_v41, 0.0  ;;  %v1073_v9 = vadd.f32 %v1040_v40, %v787_v8  ;;  %vm1837_vm10 = vcmp.lt.s32.totalorder %v7489_v34, %v6151_v0  ;;  %v7992_v8 = vld [vmem:[#allocation2 + $0x57] sm:$0xff]  ;;  %v7997_v41 = vld [vmem:[#allocation2 + $0x49] sm:$0xff] }
 0x1e0   : > { %vm9251_vm1 = vmmov %vm9244_vm3  ;;  %vm1774_vm3 = vcmp.ge.s32.totalorder %v7489_v34, %v6149_v56  ;;  %v5114_v43 = vpop.f32.mrf.mxu0  ;;  %v5560_v56 = vld [vmem:[%s8933_s3 + $0x28] sm:$0xff]   ;;  %v7976_v34 = vld [vmem:[#allocation2 + $0x31] sm:$0xff] }
 0x1e1   : > { %5147 = vmatprep.mubr.msk.bf16.mxu1 %vm9251_vm1, %v2019_v52  ;;  %vm9252_vm0 = vmmov %vm9251_vm1  ;;  %v3180_v3 = vpack.c.bf16 %v7958_v44, %v7976_v34  ;;  %v8001_v7 = vld [vmem:[#allocation2 + $0x59] sm:$0xff]  ;;  %v8004_v40 = vld [vmem:[#allocation2 + $0x41] sm:$0xff] }
 0x1e2   : > { %1991 = vst.msk [vmem:[#allocation2 + $0xe8] sm:$0xff] %vm9252_vm0, %v1954_v5  ;;  %vm1865_vm7 = vmand %vm7889_vm11, %vm1835_vm8  ;;  %v1110_v5 = vadd.f32 %v7460_v28, %v1073_v9  ;;  %v8020_v9 = vld [vmem:[#allocation2 + $0x69] sm:$0xff]  ;;  %v8026_v52 = vld [vmem:[#allocation2 + $0x79] sm:$0xff] }
 0x1e3   : > { %vm1803_vm2 = vmand %vm7898_vm9, %vm1773_vm15  ;;  %v1955_v15 = vsel %vm1865_vm7, %v1138_v4, 0.0  ;;  %v7938_v27 = vld [vmem:[#allocation2 + $0xdf] sm:$0xff]  ;;  %v8033_v43 = vld [vmem:[#allocation2 + $0x71] sm:$0xff] }
 0x1e4   : > { %vm9253_vm14 = vmmov %vm9252_vm0  ;;  %v3431_v6 = vpack.c.bf16 %v7938_v27, %v7910_v22  ;;  %v7967_v57 = vld [vmem:[#allocation2 + $0xd9] sm:$0xff]  ;;  %v1140_v31 = vmax.f32 %v1110_v5, 0.0  ;;  %v3644_v36 = vld [vmem:[#allocation2 + $0x68] sm:$0xff] }
 0x1e5   : > { %5223 = vmatprep.mubr.msk.bf16.mxu0 %vm9253_vm14, %v2706_v58  ;;  %vm7929_vm13 = vmand %vm1681_vm4, %vm1711_vm6  ;;  %v7981_v58 = vld [vmem:[%s8933_s3 + $0x48] sm:$0xff]  }
 0x1e6   : > { %vm9257_vm5 = vmmov %vm9252_vm0  ;;  %v3402_v35 = vld [vmem:[#allocation2 + $0x67] sm:$0xff] }
 0x1e7   : > { %1992 = vst.msk [vmem:[#allocation2 + $0xf0] sm:$0xff] %vm9257_vm5, %v1955_v15  ;;  %vm1866_vm11 = vmand %vm1803_vm2, %vm1836_vm12  ;;  %v2023_v15 = vpack.c.bf16 %v7161_v54, %v7992_v8  ;;  %v5551_v54 = vld [vmem:[%s8933_s3 + $0x70] sm:$0xff]  }
 0x1e8   : > { %vm7951_vm8 = vmand %vm7929_vm13, %vm1774_vm3  ;;  %v1956_v32 = vsel %vm1866_vm11, %v1139_v38, 0.0  ;;  %v2025_v38 = vpack.c.bf16 %v7399_v42, %v7284_v14  ;;  %v3184_v14 = vpack.c.bf16 %v8026_v52, %v8033_v43  ;;  %v8046_v42 = vld [vmem:[#allocation2 + $0x99] sm:$0xff] }
 0x1e9   : > { %vm9260_vm9 = vmmov %vm9252_vm0  ;;  %v7965_v10 = vld [vmem:[#allocation2 + $0xe7] sm:$0xff] }
 0x1ea   : > { %5148 = vmatmul.mubr.msk.bf16.vlgmr.msra.gmra.mxu1 %vm9260_vm9, %v2020_v16  ;;  %vm9261_vm15 = vmmov %vm9252_vm0  ;;  %v7969_v0 = vld [vmem:[#allocation2 + $0xe1] sm:$0xff]  ;;  %v2707_v28 = vpack.c.bf16 %v7965_v10, %v7938_v27  ;;  %v3181_v16 = vpack.c.bf16 %v7997_v41, %v8004_v40 }
 0x1eb   : > { %5172 = vmatpush3.bf16.msra.mxu1 %v5560_v56  ;;  %5151 = vmatprep.mubr.msk.bf16.mxu1 %vm9261_vm15, %v2021_v13  ;;  %vm9262_vm4 = vmmov %vm9252_vm0  ;;  %v8029_v13 = vld [vmem:[#allocation2 + $0x61] sm:$0xff]  ;;  %v8050_v56 = vld [vmem:[#allocation2 + $0x91] sm:$0xff] }
 0x1ec   : > { %1993 = vst.msk [vmem:[#allocation2 + $0xf8] sm:$0xff] %vm9262_vm4, %v1956_v32  ;;  %vm1867_vm1 = vmand %vm7951_vm8, %vm1837_vm10  ;;  %5173 = vmatprep.subr.bf16.mxu1 %v5548_v55  ;;  %v3166_v32 = vld [vmem:[#allocation2 + $0x81] sm:$0xff] }
 0x1ed   : > { %vm9263_vm6 = vmmov %vm9252_vm0  ;;  %v1957_v19 = vsel %vm1867_vm1, %v1140_v31, 0.0  ;;  %v3170_v31 = vld [vmem:[#allocation2 + $0xa1] sm:$0xff] }
 0x1ee   : > { %5224 = vmatmul.mubr.msk.bf16.gmra.mxu0 %vm9263_vm6, %v2707_v28  ;;  %vm9264_vm7 = vmmov %vm9252_vm0  ;;  %v3186_v28 = vpack.c.bf16 %v8046_v42, %v8050_v56 }
 0x1ef   : > { %5259 = vmatprep.mubr.msk.bf16.mxu0 %vm9252_vm0, %v3180_v3  ;;  %5174 = vmatpush3.bf16.msra.mxu1 %v5548_v55  ;;  %1994 = vst.msk [vmem:[#allocation2 + $0x100] sm:$0xff] %vm9264_vm7, %v1957_v19  ;;  %vm9265_vm2 = vmmov %vm9252_vm0  ;;  %v3182_v55 = vpack.c.bf16 %v8001_v7, %v8008_v21  ;;  %v3187_v3 = vpack.c.bf16 %v8062_v26, %v3170_v31 }
 0x1f0   : > { %5227 = vmatprep.subr.bf16.mxu1 %v7981_v58  ;;  %vm9266_vm12 = vmmov %vm9252_vm0  ;;  %v3188_v19 = vpack.c.bf16 %v8065_v11, %v3172_v63 }
 0x1f1   : > { %vm9267_vm14 = vmmov %vm9252_vm0 }
 0x1f2   : > { %5152 = vmatmul.mubr.msk.bf16.gmra.mxu1 %vm9265_vm2, %v7990_v53  ;;  %vm9268_vm13 = vmmov %vm9252_vm0 }
 0x1f3   : > { %5155 = vmatprep.mubr.msk.bf16.mxu1 %vm9266_vm12, %v2023_v15  ;;  %vm9269_vm3 = vmmov %vm9252_vm0  ;;  %v3175_v15 = vld [vmem:[#allocation2 + $0xc9] sm:$0xff] }
 0x1f4   : > { %vm9270_vm5 = vmmov %vm9252_vm0 }
 0x1f5   : > { %vm9271_vm11 = vmmov %vm9252_vm0 }
 0x1f6   : > { %5260 = vmatmul.mubr.msk.bf16.vlgmr.msra.gmra.mxu0 %vm9267_vm14, %v3181_v16  ;;  %vm9272_vm8 = vmmov %vm9252_vm0  ;;  %v3174_v16 = vld [vmem:[#allocation2 + $0xc1] sm:$0xff] }
 0x1f7   : > { %5263 = vmatprep.mubr.msk.bf16.mxu0 %vm9268_vm13, %v3182_v55  ;;  %5312 = vmatpush3.bf16.msra.mxu0 %v7005_v18  ;;  %v3183_v18 = vpack.c.bf16 %v8020_v9, %v8029_v13  ;;  %vm9273_vm10 = vmmov %vm9252_vm0  ;;  %v3176_v55 = vld [vmem:[#allocation2 + $0xd1] sm:$0xff] }
 0x1f8   : > { %5313 = vmatprep.subr.bf16.mxu0 %v5551_v54  ;;  %vm9274_vm9 = vmmov %vm9252_vm0 }
 0x1f9   : > { %vm9275_vm15 = vmmov %vm9252_vm0 }
 0x1fa   : > { %5156 = vmatmul.mubr.msk.bf16.gmra.mxu1 %vm9269_vm3, %v2024_v50  ;;  %v8043_v50 = vld [vmem:[#allocation2 + $0x89] sm:$0xff]  ;;  %vm9276_vm4 = vmmov %vm9252_vm0 }
 0x1fb   : > { %5159 = vmatprep.mubr.msk.bf16.mxu1 %vm9270_vm5, %v2025_v38  ;;  %5314 = vmatpush3.bf16.msra.mxu0 %v5551_v54  ;;  %v3185_v5 = vpack.c.bf16 %v8043_v50, %v3166_v32  ;;  %vm9277_vm1 = vmmov %vm9252_vm0  ;;  %v3189_v54 = vpack.c.bf16 %v3175_v15, %v3174_v16  ;;  %v3190_v38 = vpack.c.bf16 %v7967_v57, %v3176_v55 }
 0x1fc   : > { %vm9278_vm6 = vmmov %vm9252_vm0 }
 0x1fd   : > { %vm9279_vm7 = vmmov %vm9252_vm0 }
 0x1fe   : > { %5264 = vmatmul.mubr.msk.bf16.gmra.mxu0 %vm9271_vm11, %v3183_v18  ;;  %vm9280_vm2 = vmmov %vm9252_vm0  ;;  %v2432_v18 = vld [vmem:[#allocation2 + $0x29] sm:$0xff] }
 0x1ff   : > { %5267 = vmatprep.mubr.msk.bf16.mxu0 %vm9272_vm8, %v3184_v14  ;;  %vm9281_vm12 = vmmov %vm9252_vm0  ;;  %v2455_v49 = vpack.c.bf16 %v7976_v34, %v2432_v18  ;;  %v2456_v14 = vpack.c.bf16 %v8004_v40, %v7958_v44  ;;  %v8110_v40 = vpack.c.bf16 %v8029_v13, %v8001_v7  ;;  %v8123_v7 = vpack.c.bf16 %v8033_v43, %v8020_v9  ;;  %v3647_v13 = vld [vmem:[#allocation2 + $0x80] sm:$0xff] }
 0x200   : > { %vm9282_vm14 = vmmov %vm9252_vm0  ;;  %v8137_v9 = vpack.c.bf16 %v8050_v56, %v8043_v50  ;;  %v8154_v43 = vpack.c.bf16 %v3174_v16, %v8065_v11  ;;  %v2915_v50 = vld [vmem:[#allocation2 + $0x38] sm:$0xff]  ;;  %v3661_v56 = vld [vmem:[#allocation2 + $0xf0] sm:$0xff] }
 0x201   : > { %vm9283_vm13 = vmmov %vm9252_vm0 }
 0x202   : > { %5160 = vmatmul.mubr.msk.bf16.gmra.mxu1 %vm9273_vm10, %v2026_v33  ;;  %v8089_v33 = vld [vmem:[#allocation2 + $0xe9] sm:$0xff]  ;;  %vm9284_vm3 = vmmov %vm9252_vm0 }
 0x203   : > { %5163 = vmatprep.mubr.msk.bf16.mxu1 %vm9274_vm9, %v2027_v25  ;;  %v8092_v25 = vld [vmem:[#allocation2 + $0x50] sm:$0xff]  ;;  %vm9285_vm5 = vmmov %vm9252_vm0  ;;  %v3191_v34 = vpack.c.bf16 %v8089_v33, %v7969_v0 }
 0x204   : > { %vm9286_vm11 = vmmov %vm9252_vm0 }
 0x205   : > { %vm9287_vm8 = vmmov %vm9252_vm0 }
 0x206   : > { %5268 = vmatmul.mubr.msk.bf16.gmra.mxu0 %vm9275_vm15, %v3185_v5  ;;  %v3640_v5 = vld [vmem:[#allocation2 + $0x48] sm:$0xff]  ;;  %vm9288_vm10 = vmmov %vm9252_vm0 }
 0x207   : > { %5271 = vmatprep.mubr.msk.bf16.mxu0 %vm9276_vm4, %v3186_v28  ;;  %v5553_v28 = vld [vmem:[%s8933_s3 + $0x68] sm:$0xff]   ;;  %v3664_v44 = vpack.c.bf16 %v8092_v25, %v3640_v5  ;;  %vm9289_vm9 = vmmov %vm9252_vm0 }
 0x208   : > { %vm9290_vm15 = vmmov %vm9252_vm0 }
 0x209   : > { %vm9291_vm4 = vmmov %vm9252_vm0 }
 0x20a   : > { %5164 = vmatmul.mubr.msk.bf16.gmra.mxu1 %vm9277_vm1, %v2028_v20  ;;  %v8112_v20 = vld [vmem:[#allocation2 + $0x60] sm:$0xff]  ;;  %vm9292_vm1 = vmmov %vm9252_vm0 }
 0x20b   : > { %5167 = vmatprep.mubr.msk.bf16.mxu1 %vm9278_vm6, %v8060_v51  ;;  %vm9293_vm6 = vmmov %vm9252_vm0 }
 0x20e   : > { %5272 = vmatmul.mubr.msk.bf16.gmra.mxu0 %vm9252_vm0, %v3187_v3  ;;  %v3645_v3 = vld [vmem:[#allocation2 + $0x70] sm:$0xff] }
 0x20f   : > { %5275 = vmatprep.mubr.msk.bf16.mxu0 %vm9279_vm7, %v3188_v19  ;;  %v3642_v19 = vld [vmem:[#allocation2 + $0x58] sm:$0xff]  ;;  %vm9294_vm7 = vmmov %vm9252_vm0 }
 0x210   : > { %v3665_v23 = vpack.c.bf16 %v8112_v20, %v3642_v19  ;;  %v2940_v16 = vpack.c.bf16 %v3642_v19, %v8092_v25  ;;  %v2925_v25 = vld [vmem:[#allocation2 + $0x88] sm:$0xff]  ;;  %v2928_v19 = vld [vmem:[#allocation2 + $0xa0] sm:$0xff] }
 0x212   : > { %5168 = vmatmul.mubr.msk.bf16.gmra.mxu1 %vm9280_vm2, %v8075_v12  ;;  %vm9295_vm2 = vmmov %vm9252_vm0 }
 0x213   : > { %5175 = vmatprep.mubr.msk.bf16.mxu1 %vm9281_vm12, %v2454_v62  ;;  %v3646_v62 = vld [vmem:[#allocation2 + $0x78] sm:$0xff]  ;;  %vm9296_vm12 = vmmov %vm9252_vm0 }
 0x216   : > { %5276 = vmatmul.mubr.msk.bf16.gmra.mxu0 %vm9282_vm14, %v3189_v54  ;;  %v3667_v54 = vpack.c.bf16 %v3647_v13, %v3646_v62  ;;  %vm9297_vm14 = vmmov %vm9252_vm0 }
 0x217   : > { %5279 = vmatprep.mubr.msk.bf16.mxu0 %vm9283_vm13, %v3190_v38  ;;  %vm9298_vm13 = vmmov %vm9252_vm0  ;;  %v3662_v38 = vld [vmem:[#allocation2 + $0xf8] sm:$0xff] }
 0x21a   : > { %5176 = vmatmul.mubr.msk.bf16.vlgmr.msra.gmra.mxu1 %vm9284_vm3, %v2455_v49  ;;  %vm9299_vm3 = vmmov %vm9252_vm0  ;;  %v5555_v49 = vld [vmem:[%s8933_s3 + $0x88] sm:$0xff]  }
 0x21b   : > { %5228 = vmatpush3.bf16.msra.mxu1 %v7981_v58  ;;  %5179 = vmatprep.mubr.msk.bf16.mxu1 %vm9285_vm5, %v2456_v14  ;;  %v8106_v58 = vpack.c.bf16 %v8008_v21, %v7997_v41  ;;  %v3666_v41 = vpack.c.bf16 %v3645_v3, %v3644_v36  ;;  %v8126_v21 = vpack.c.bf16 %v3166_v32, %v8026_v52  ;;  %vm9300_vm5 = vmmov %vm9252_vm0  ;;  %v3659_v32 = vld [vmem:[#allocation2 + $0xe0] sm:$0xff] }
 0x21c   : > { %5229 = vmatprep.subr.bf16.mxu1 %v5552_v24  ;;  %v8140_v52 = vpack.c.bf16 %v3170_v31, %v8046_v42  ;;  %v3660_v31 = vld [vmem:[#allocation2 + $0xe8] sm:$0xff]  ;;  %v2942_v14 = vpack.c.bf16 %v3646_v62, %v3645_v3 }
 0x21d   : > { %v2949_v47 = vpack.c.bf16 %v3660_v31, %v3659_v32 }
 0x21e   : > { %5280 = vmatmul.mubr.msk.bf16.gmra.mxu0 %vm9286_vm11, %v3191_v34  ;;  %vm9301_vm11 = vmmov %vm9252_vm0  ;;  %v2943_v34 = vpack.c.bf16 %v2925_v25, %v3647_v13  ;;  %v3403_v13 = vld [vmem:[#allocation2 + $0x6f] sm:$0xff] }
 0x21f   : > { %5315 = vmatprep.mubr.msk.bf16.mxu0 %vm9287_vm8, %v3664_v44  ;;  %5230 = vmatpush3.bf16.msra.mxu1 %v5552_v24  ;;  %vm9302_vm8 = vmmov %vm9252_vm0  ;;  %v2941_v24 = vpack.c.bf16 %v3644_v36, %v8112_v20  ;;  %v2945_v20 = vpack.c.bf16 %v7704_v30, %v2928_v19 }
 0x220   : > { %5283 = vmatprep.subr.bf16.mxu1 %v5553_v28 }
 0x222   : > { %5180 = vmatmul.mubr.msk.bf16.gmra.mxu1 %vm9288_vm10, %v8106_v58  ;;  %vm9303_vm10 = vmmov %vm9252_vm0 }
 0x223   : > { %5183 = vmatprep.mubr.msk.bf16.mxu1 %vm9289_vm9, %v8110_v40  ;;  %vm9304_vm9 = vmmov %vm9252_vm0 }
 0x226   : > { %5316 = vmatmul.mubr.msk.bf16.vlgmr.msra.gmra.mxu0 %vm9290_vm15, %v3665_v23  ;;  %vm9305_vm15 = vmmov %vm9252_vm0 }
 0x227   : > { %5319 = vmatprep.mubr.msk.bf16.mxu0 %vm9291_vm4, %v3666_v41  ;;  %vm9306_vm4 = vmmov %vm9252_vm0 }
 0x22a   : > { %5184 = vmatmul.mubr.msk.bf16.gmra.mxu1 %vm9292_vm1, %v8123_v7  ;;  %vm9307_vm1 = vmmov %vm9252_vm0 }
 0x22b   : > { %5187 = vmatprep.mubr.msk.bf16.mxu1 %vm9293_vm6, %v8126_v21  ;;  %vm9308_vm6 = vmmov %vm9252_vm0 }
 0x22e   : > { %5320 = vmatmul.mubr.msk.bf16.gmra.mxu0 %vm9252_vm0, %v3667_v54  ;;  %v3424_v54 = vpack.c.bf16 %v3403_v13, %v3402_v35 }
 0x22f   : > { %5323 = vmatprep.mubr.msk.bf16.mxu0 %vm9294_vm7, %v7482_v59  ;;  %v8151_v59 = vpack.c.bf16 %v3172_v63, %v8062_v26  ;;  %v3658_v26 = vld [vmem:[#allocation2 + $0xd8] sm:$0xff]  ;;  %v3674_v63 = vpack.c.bf16 %v3661_v56, %v3660_v31  ;;  %vm9309_vm7 = vmmov %vm9252_vm0  ;;  %v3406_v56 = vld [vmem:[#allocation2 + $0x87] sm:$0xff] }
 0x230   : > { %v3673_v11 = vpack.c.bf16 %v3659_v32, %v3658_v26  ;;  %v2948_v36 = vpack.c.bf16 %v3658_v26, %v7874_v1 }
 0x232   : > { %5188 = vmatmul.mubr.msk.bf16.gmra.mxu1 %vm9295_vm2, %v8137_v9  ;;  %vm9310_vm2 = vmmov %vm9252_vm0 }
 0x233   : > { %5191 = vmatprep.mubr.msk.bf16.mxu1 %vm9296_vm12, %v8140_v52  ;;  %vm9311_vm12 = vmmov %vm9252_vm0 }
 0x236   : > { %5324 = vmatmul.mubr.msk.bf16.gmra.mxu0 %vm9297_vm14, %v7596_v61  ;;  %v8164_v61 = vpack.c.bf16 %v3176_v55, %v3175_v15  ;;  %v5554_v15 = vld [vmem:[%s8933_s3 + $0x60] sm:$0xff]   ;;  %vm9312_vm14 = vmmov %vm9252_vm0  ;;  %v8187_v44 = vpop.f32.mrf.mxu1 }
 0x237   : > { %5327 = vmatprep.mubr.msk.bf16.mxu0 %vm9298_vm13, %v7711_v17  ;;  %v2914_v17 = vld [vmem:[#allocation2 + $0x30] sm:$0xff]  ;;  %v3663_v55 = vld [vmem:[#allocation2 + $0x100] sm:$0xff]  ;;  %vm9313_vm13 = vmmov %vm9252_vm0 }
 0x238   : > { %v2938_v42 = vpack.c.bf16 %v2915_v50, %v2914_v17  ;;  %v3675_v18 = vpack.c.bf16 %v3663_v55, %v3662_v38  ;;  %v8189_v23 = vpop.f32.mrf.mxu1  ;;  %v3405_v50 = vld [vmem:[#allocation2 + $0x7f] sm:$0xff]  ;;  %v3407_v17 = vld [vmem:[#allocation2 + $0x8f] sm:$0xff]  ;;  %v3410_v55 = vld [vmem:[#allocation2 + $0xa7] sm:$0xff] }
 0x239   : > { %v3426_v26 = vpack.c.bf16 %v3407_v17, %v3406_v56  ;;  %v3428_v38 = vpack.c.bf16 %v7746_v60, %v3410_v55 }
 0x23a   : > { %5192 = vmatmul.mubr.msk.bf16.gmra.mxu1 %vm9299_vm3, %v8151_v59  ;;  %vm9314_vm3 = vmmov %vm9252_vm0  ;;  %v8197_v3 = vpop.f32.mrf.mxu1 }
 0x23b   : > { %5195 = vmatprep.mubr.msk.bf16.mxu1 %vm9300_vm5, %v8154_v43  ;;  %vm9315_vm5 = vmmov %vm9252_vm0 }
 0x23e   : > { %5328 = vmatmul.mubr.msk.bf16.gmra.mxu0 %vm9301_vm11, %v7805_v2  ;;  %v2916_v2 = vld [vmem:[#allocation2 + $0x40] sm:$0xff]  ;;  %vm9316_vm11 = vmmov %vm9252_vm0 }
 0x23f   : > { %5331 = vmatprep.mubr.msk.bf16.mxu0 %vm9302_vm8, %v7881_v39  ;;  %v2939_v39 = vpack.c.bf16 %v3640_v5, %v2916_v2  ;;  %v2926_v5 = vld [vmem:[#allocation2 + $0x90] sm:$0xff]  ;;  %vm9317_vm8 = vmmov %vm9252_vm0 }
 0x242   : > { %5196 = vmatmul.mubr.msk.bf16.gmra.mxu1 %vm9303_vm10, %v8164_v61  ;;  %vm9318_vm10 = vmmov %vm9252_vm0 }
 0x243   : > { %5231 = vmatprep.mubr.msk.bf16.mxu1 %vm9304_vm9, %v2938_v42  ;;  %vm9319_vm9 = vmmov %vm9252_vm0  ;;  %v3404_v42 = vld [vmem:[#allocation2 + $0x77] sm:$0xff] }
 0x246   : > { %5332 = vmatmul.mubr.msk.bf16.gmra.mxu0 %vm9305_vm15, %v3673_v11  ;;  %vm9320_vm15 = vmmov %vm9252_vm0  ;;  %v8232_v11 = vpop.f32.mrf.mxu0 }
 0x247   : > { %5335 = vmatprep.mubr.msk.bf16.mxu0 %vm9306_vm4, %v3674_v63  ;;  %vm9321_vm4 = vmmov %vm9252_vm0  ;;  %v3409_v63 = vld [vmem:[#allocation2 + $0x9f] sm:$0xff] }
 0x24a   : > { %5232 = vmatmul.mubr.msk.bf16.vlgmr.msra.gmra.mxu1 %vm9307_vm1, %v2939_v39  ;;  %vm9322_vm1 = vmmov %vm9252_vm0  ;;  %v3408_v39 = vld [vmem:[#allocation2 + $0x97] sm:$0xff] }
 0x24b   : > { %5284 = vmatpush3.bf16.msra.mxu1 %v5553_v28  ;;  %5235 = vmatprep.mubr.msk.bf16.mxu1 %vm9308_vm6, %v2940_v16  ;;  %v2944_v28 = vpack.c.bf16 %v7582_v45, %v2926_v5  ;;  %v8199_v45 = vpop.f32.mrf.mxu1  ;;  %v3427_v16 = vpack.c.bf16 %v3409_v63, %v3408_v39  ;;  %vm9323_vm6 = vmmov %vm9252_vm0 }
 0x24c   : > { %5285 = vmatprep.subr.bf16.mxu1 %v5554_v15 }
 0x24d   : > { %v8202_v41 = vpop.f32.mrf.mxu1 }
 0x24e   : > { %5336 = vmatmul.mubr.msk.bf16.gmra.mxu0 %vm9252_vm0, %v3675_v18 }
 0x24f   : > { %5286 = vmatpush3.bf16.msra.mxu1 %v5554_v15  ;;  %v8209_v30 = vpop.f32.mrf.mxu1  ;;  %v8238_v15 = vpop.f32.mrf.mxu0 }
 0x250   : > { %5339 = vmatprep.subr.bf16.mxu1 %v5555_v49 }
 0x251   : > { %v8211_v46 = vpop.f32.mrf.mxu1 }
 0x252   : > { %5236 = vmatmul.mubr.msk.bf16.gmra.mxu1 %vm9309_vm7, %v2941_v24  ;;  %vm9324_vm7 = vmmov %vm9252_vm0 }
 0x253   : > { %5239 = vmatprep.mubr.msk.bf16.mxu1 %vm9310_vm2, %v2942_v14  ;;  %v8216_v1 = vpop.f32.mrf.mxu1  ;;  %vm9325_vm2 = vmmov %vm9252_vm0 }
 0x25a   : > { %5240 = vmatmul.mubr.msk.bf16.gmra.mxu1 %vm9311_vm12, %v2943_v34  ;;  %vm9326_vm12 = vmmov %vm9252_vm0 }
 0x25b   : > { %5243 = vmatprep.mubr.msk.bf16.mxu1 %vm9312_vm14, %v2944_v28  ;;  %v3419_v28 = vld [vmem:[#allocation2 + $0xef] sm:$0xff]  ;;  %vm9327_vm14 = vmmov %vm9252_vm0 }
 0x260   : > { %v8218_v62 = vpop.f32.mrf.mxu1 }
 0x262   : > { %5244 = vmatmul.mubr.msk.bf16.gmra.mxu1 %vm9313_vm13, %v2945_v20  ;;  %v3432_v20 = vpack.c.bf16 %v3419_v28, %v7965_v10  ;;  %vm9328_vm13 = vmmov %vm9252_vm0 }
 0x263   : > { %5247 = vmatprep.mubr.msk.bf16.mxu1 %vm9314_vm3, %v2946_v37  ;;  %v3401_v37 = vld [vmem:[#allocation2 + $0x5f] sm:$0xff]  ;;  %vm9329_vm3 = vmmov %vm9252_vm0 }
 0x264   : > { %v3423_v29 = vpack.c.bf16 %v3401_v37, %v7992_v8  ;;  %v3425_v8 = vpack.c.bf16 %v3405_v50, %v3404_v42  ;;  %v3420_v37 = vld [vmem:[#allocation2 + $0xf7] sm:$0xff] }
 0x26a   : > { %5248 = vmatmul.mubr.msk.bf16.gmra.mxu1 %vm9315_vm5, %v2947_v48  ;;  %v5556_v48 = vld [vmem:[%s8933_s3 + $0x80] sm:$0xff]   ;;  %vm9330_vm5 = vmmov %vm9252_vm0 }
 0x26b   : > { %5251 = vmatprep.mubr.msk.bf16.mxu1 %vm9316_vm11, %v2948_v36  ;;  %vm9331_vm11 = vmmov %vm9252_vm0 }
 0x272   : > { %5252 = vmatmul.mubr.msk.bf16.gmra.mxu1 %vm9317_vm8, %v2949_v47  ;;  %vm9332_vm8 = vmmov %vm9252_vm0 }
 0x273   : > { %5287 = vmatprep.mubr.msk.bf16.mxu1 %vm9318_vm10, %v7990_v53  ;;  %v8226_v53 = vpop.f32.mrf.mxu1  ;;  %vm9333_vm10 = vmmov %vm9252_vm0 }
 0x275   : > { %v8228_v32 = vpop.f32.mrf.mxu1 }
 0x277   : > { %v8234_v31 = vpop.f32.mrf.mxu1 }
 0x279   : > { %v8236_v2 = vpop.f32.mrf.mxu1 }
 0x27a   : > { %5288 = vmatmul.mubr.msk.bf16.vlgmr.msra.gmra.mxu1 %vm9319_vm9, %v3423_v29  ;;  %vm9335_vm9 = vmmov %vm9252_vm0 }
 0x27b   : > { %5340 = vmatpush3.bf16.msra.mxu1 %v5555_v49  ;;  %5291 = vmatprep.mubr.msk.bf16.mxu1 %vm9320_vm15, %v3424_v54  ;;  %v8241_v18 = vpop.f32.mrf.mxu1  ;;  %v8245_v49 = vpop.f32.mrf.mxu0  ;;  %vm9336_vm15 = vmmov %vm9252_vm0 }
 0x27c   : > { %5341 = vmatprep.subr.bf16.mxu1 %v5556_v48 }
 0x27d   : > { %v8247_v24 = vpop.f32.mrf.mxu1  ;;  %v8249_v14 = vpop.f32.mrf.mxu0 }
 0x27f   : > { %5342 = vmatpush3.bf16.msra.mxu1 %v5556_v48  ;;  %v8251_v25 = vpop.f32.mrf.mxu0  ;;  %v8253_v34 = vpop.f32.mrf.mxu1 }
 0x281   : > { %v8261_v5 = vpop.f32.mrf.mxu0 }
 0x282   : > { %5292 = vmatmul.mubr.msk.bf16.gmra.mxu1 %vm9321_vm4, %v3425_v8  ;;  %vm9339_vm4 = vmmov %vm9252_vm0 }
 0x283   : > { %5295 = vmatprep.mubr.msk.bf16.mxu1 %vm9322_vm1, %v3426_v26  ;;  %v8266_v36 = vpop.f32.mrf.mxu0  ;;  %vm9340_vm1 = vmmov %vm9252_vm0 }
 0x285   : > { %v8275_v47 = vpop.f32.mrf.mxu0 }
 0x287   : > { %v8277_v13 = vpop.f32.mrf.mxu0 }
 0x289   : > { %v8286_v22 = vpop.f32.mrf.mxu0 }
 0x28a   : > { %5296 = vmatmul.mubr.msk.bf16.gmra.mxu1 %vm9323_vm6, %v3427_v16  ;;  %vm9344_vm6 = vmmov %vm9252_vm0 }
 0x28b   : > { %5299 = vmatprep.mubr.msk.bf16.mxu1 %vm9252_vm0, %v3428_v38  ;;  %v8292_v48 = vpop.f32.mrf.mxu0 }
 0x28c   : > { %v8259_v60 = vpop.f32.mrf.mxu1 }
 0x28d   : > { %v8302_v17 = vpop.f32.mrf.mxu0 }
 0x28e   : > { %v8263_v19 = vpop.f32.mrf.mxu1 }
 0x28f   : > { %v8306_v42 = vpop.f32.mrf.mxu0 }
 0x291   : > { %v8312_v26 = vpop.f32.mrf.mxu0 }
 0x292   : > { %5300 = vmatmul.mubr.msk.bf16.gmra.mxu1 %vm9324_vm7, %v8060_v51  ;;  %v8273_v51 = vpop.f32.mrf.mxu1  ;;  %vm9346_vm7 = vmmov %vm9252_vm0 }
 0x293   : > { %5303 = vmatprep.mubr.msk.bf16.mxu1 %vm9325_vm2, %v8075_v12  ;;  %v3421_v12 = vld [vmem:[#allocation2 + $0xff] sm:$0xff]  ;;  %vm9382_vm2 = vmmov %vm9252_vm0 }
 0x294   : > { %v8279_v29 = vpop.f32.mrf.mxu1  ;;  %v3433_v10 = vpack.c.bf16 %v3421_v12, %v3420_v37 }
 0x29a   : > { %5304 = vmatmul.mubr.msk.bf16.gmra.mxu1 %vm9326_vm12, %v3431_v6  ;;  %vm9383_vm12 = vmmov %vm9252_vm0 }
 0x29b   : > { %5307 = vmatprep.mubr.msk.bf16.mxu1 %vm9327_vm14, %v3432_v20  ;;  %vm9387_vm14 = vmmov %vm9252_vm0 }
 0x29f   : > { %v8281_v35 = vpop.f32.mrf.mxu1 }
 0x2a1   : > { %v8288_v27 = vpop.f32.mrf.mxu1 }
 0x2a2   : > { %5308 = vmatmul.mubr.msk.bf16.gmra.mxu1 %vm9328_vm13, %v3433_v10  ;;  %vm9391_vm13 = vmmov %vm9252_vm0 }
 0x2a3   : > { %5343 = vmatprep.mubr.msk.bf16.mxu1 %vm9329_vm3, %v8106_v58  ;;  %v8290_v6 = vpop.f32.mrf.mxu1  ;;  %vm9401_vm3 = vmmov %vm9252_vm0 }
 0x2a5   : > { %v8294_v54 = vpop.f32.mrf.mxu1 }
 0x2aa   : > { %v8296_v50 = vpop.f32.mrf.mxu1  ;;  %5344 = vmatmul.mubr.msk.bf16.vlgmr.msra.gmra.mxu1 %vm9330_vm5, %v8110_v40  ;;  %vm9405_vm5 = vmmov %vm9252_vm0 }
 0x2ab   : > { %5347 = vmatprep.mubr.msk.bf16.mxu1 %vm9331_vm11, %v8123_v7  ;;  %v8322_v7 = vpop.f32.mrf.mxu0  ;;  %vm9415_vm11 = vmmov %vm9252_vm0 }
 0x2ac   : > { %v8304_v58 = vpop.f32.mrf.mxu1 }
 0x2ad   : > { %v8328_v55 = vpop.f32.mrf.mxu0 }
 0x2ae   : > { %v8308_v8 = vpop.f32.mrf.mxu1  ;;  %9334 = vst [vmem:[#allocation11_spill] sm:$0xff] %v8328_v55  ;;  %v3903_v55 = vld [vmem:[#allocation2 + $0xf1] sm:$0xff] }
 0x2b0   : > { %v8310_v56 = vpop.f32.mrf.mxu1 }
 0x2b2   : > { %v8314_v63 = vpop.f32.mrf.mxu1  ;;  %5348 = vmatmul.mubr.msk.bf16.gmra.mxu1 %vm9332_vm8, %v8126_v21  ;;  %v8336_v21 = vpop.f32.mrf.mxu0  ;;  %vm9416_vm8 = vmmov %vm9252_vm0 }
 0x2b3   : > { %5351 = vmatprep.mubr.msk.bf16.mxu1 %vm9333_vm10, %v8137_v9  ;;  %9337 = vst [vmem:[#allocation12_spill] sm:$0xff] %v8336_v21  ;;  %vm9417_vm10 = vmmov %vm9252_vm0 }
 0x2b4   : > { %v8320_v40 = vpop.f32.mrf.mxu1  ;;  %v8342_v20 = vpop.f32.mrf.mxu0 }
 0x2b5   : > { %9338 = vst [vmem:[#allocation13_spill] sm:$0xff] %v8342_v20 }
 0x2b6   : > { %v8324_v39 = vpop.f32.mrf.mxu1 }
 0x2b8   : > { %v8326_v16 = vpop.f32.mrf.mxu1 }
 0x2ba   : > { %v8330_v38 = vpop.f32.mrf.mxu1  ;;  %5352 = vmatmul.mubr.msk.bf16.gmra.mxu1 %vm9335_vm9, %v8140_v52  ;;  %vm9418_vm9 = vmmov %vm9252_vm0 }
 0x2bb   : > { %5355 = vmatprep.mubr.msk.bf16.mxu1 %vm9336_vm15, %v8151_v59  ;;  %v8354_v59 = vpop.f32.mrf.mxu0  ;;  %vm9419_vm15 = vmmov %vm9252_vm0 }
 0x2bc   : > { %v8338_v9 = vpop.f32.mrf.mxu1  ;;  %9341 = vst [vmem:[#allocation14_spill] sm:$0xff] %v8354_v59 }
 0x2be   : > { %v8340_v28 = vpop.f32.mrf.mxu1 }
 0x2c0   : > { %v2370_v12 = vpop.f32.mrf.mxu1 }
 0x2c1   : > { %v8345_v37 = vadd.f32 %v2370_v12, %v8234_v31  ;;  %v8362_v12 = vpop.f32.mrf.mxu0 }
 0x2c2   : > { %v5161_v10 = vpop.f32.mrf.mxu1  ;;  %5356 = vmatmul.mubr.msk.bf16.gmra.mxu1 %vm9339_vm4, %v8154_v43  ;;  %vm9420_vm4 = vmmov %vm9252_vm0 }
 0x2c3   : > { %v8350_v52 = vadd.f32 %v5161_v10, %v8236_v2  ;;  %5359 = vmatprep.mubr.msk.bf16.mxu1 %vm9340_vm1, %v8164_v61  ;;  %v3916_v10 = vpack.c.bf16 %v3903_v55, %v8089_v33  ;;  %v5557_v61 = vld [vmem:[%s8935_s5 + $0x8] sm:$0xff]   ;;  %v8371_v59 = vpop.f32.mrf.mxu0  ;;  %v3904_v55 = vld [vmem:[#allocation2 + $0xf9] sm:$0xff] }
 0x2c4   : > { %v2383_v4 = vpop.f32.mrf.mxu1  ;;  %9342 = vst [vmem:[#allocation15_spill] sm:$0xff] %v8371_v59  ;;  %5367 = vmatprep.subr.bf16.mxu0 %v5557_v61 }
 0x2c5   : > { %v8357_v21 = vadd.f32 %v2383_v4, %v8241_v18  ;;  %v9343_v18 = vpack.c.bf16 %v7969_v0, %v7967_v57  ;;  %5368 = vmatpush3.bf16.msra.mxu0 %v5557_v61 }
 0x2c6   : > { %v5162_v20 = vpop.f32.mrf.mxu1 }
 0x2c7   : > { %v8360_v31 = vadd.f32 %v5162_v20, %v8247_v24  ;;  %v3905_v20 = vld [vmem:[#allocation2 + $0x101] sm:$0xff] }
 0x2c8   : > { %v2386_v43 = vpop.f32.mrf.mxu1 }
 0x2c9   : > { %v8365_v2 = vadd.f32 %v2386_v43, %v8253_v34  ;;  %v8384_v43 = vpop.f32.mrf.mxu0 }
 0x2ca   : > { %v5165_v4 = vpop.f32.mrf.mxu1  ;;  %5360 = vmatmul.mubr.msk.bf16.gmra.mxu1 %vm9344_vm6, %v9343_v18  ;;  %9345 = vst [vmem:[#allocation16_spill] sm:$0xff] %v8384_v43  ;;  %v3917_v18 = vpack.c.bf16 %v3905_v20, %v3904_v55  ;;  %v2344_v55 = vadd.f32 %v8296_v50, %v8187_v44 }
 0x2cb   : > { %v8378_v24 = vadd.f32 %v5165_v4, %v8259_v60  ;;  %5363 = vmatprep.mubr.msk.bf16.mxu1 %vm9252_vm0, %v3916_v10  ;;  %v8392_v10 = vpop.f32.mrf.mxu0 }
 0x2cc   : > { %v2399_v34 = vpop.f32.mrf.mxu1 }
 0x2cd   : > { %v8382_v33 = vadd.f32 %v2399_v34, %v8263_v19  ;;  %v8401_v43 = vpop.f32.mrf.mxu0 }
 0x2ce   : > { %v5166_v59 = vpop.f32.mrf.mxu1 }
 0x2cf   : > { %v8387_v57 = vadd.f32 %v5166_v59, %v8273_v51 }
 0x2d0   : > { %v2402_v0 = vpop.f32.mrf.mxu1 }
 0x2d1   : > { %v8390_v60 = vadd.f32 %v2402_v0, %v8279_v29  ;;  %v8411_v0 = vpop.f32.mrf.mxu0 }
 0x2d2   : > { %v5169_v4 = vpop.f32.mrf.mxu1  ;;  %5364 = vmatmul.mubr.msk.bf16.gmra.mxu1 %vm9346_vm7, %v3917_v18 }
 0x2d3   : > { %v8396_v19 = vadd.f32 %v5169_v4, %v8281_v35 }
 0x2d4   : > { %v2415_v61 = vpop.f32.mrf.mxu1 }
 0x2d5   : > { %v8399_v34 = vadd.f32 %v2415_v61, %v8288_v27  ;;  %v2336_v27 = vadd.f32 %v8304_v58, %v8189_v23  ;;  %v2360_v23 = vadd.f32 %v8314_v63, %v8202_v41  ;;  %v2363_v41 = vadd.f32 %v8324_v39, %v8211_v46 }
 0x2d6   : > { %v5170_v51 = vpop.f32.mrf.mxu1  ;;  %v2368_v46 = vadd.f32 %v8338_v9, %v8226_v53 }
 0x2d7   : > { %v8404_v59 = vadd.f32 %v5170_v51, %v8290_v6  ;;  %v2347_v6 = vadd.f32 %v8308_v8, %v8197_v3  ;;  %v8421_v51 = vpop.f32.mrf.mxu0  ;;  %v5558_v3 = vld [vmem:[%s8935_s5] sm:$0xff]  }
 0x2d8   : > { %v2418_v29 = vpop.f32.mrf.mxu1  ;;  %5369 = vmatprep.subr.bf16.mxu0 %v5558_v3 }
 0x2d9   : > { %v8409_v20 = vadd.f32 %v2418_v29, %v8294_v54  ;;  %v2339_v54 = vadd.f32 %v8310_v56, %v8199_v45  ;;  %v8434_v8 = vpop.f32.mrf.mxu0  ;;  %5370 = vmatpush3.bf16.msra.mxu0 %v5558_v3 }
 0x2da   : > { %v5177_v35 = vpop.f32.mrf.mxu1 }
 0x2db   : > { %v8415_v18 = vadd.f32 %v5177_v35, %v2344_v55  ;;  %v2352_v35 = vadd.f32 %v8320_v40, %v8209_v30  ;;  %v8444_v63 = vpop.f32.mrf.mxu0  ;;  %v2376_v30 = vadd.f32 %v8330_v38, %v8218_v62 }
 0x2dc   : > { %v2553_v4 = vpop.f32.mrf.mxu1 }
 0x2dd   : > { %v8419_v61 = vadd.f32 %v2553_v4, %v2336_v27 }
 0x2de   : > { %v5178_v44 = vpop.f32.mrf.mxu1 }
 0x2df   : > { %v8425_v50 = vadd.f32 %v5178_v44, %v2347_v6  ;;  %v2355_v6 = vadd.f32 %v8326_v16, %v8216_v1  ;;  %v2379_v1 = vadd.f32 %v8340_v28, %v8228_v32 }
 0x2e0   : > { %v2556_v29 = vpop.f32.mrf.mxu1 }
 0x2e1   : > { %v8429_v58 = vadd.f32 %v2556_v29, %v2339_v54  ;;  %v8454_v29 = vpop.f32.mrf.mxu0 }
 0x2e2   : > { %v5181_v55 = vpop.f32.mrf.mxu1 }
 0x2e3   : > { %v8438_v27 = vadd.f32 %v5181_v55, %v2360_v23  ;;  %v8464_v55 = vpop.f32.mrf.mxu0 }
 0x2e4   : > { %v2569_v45 = vpop.f32.mrf.mxu1 }
 0x2e5   : > { %v8442_v56 = vadd.f32 %v2569_v45, %v2352_v35 }
 0x2e6   : > { %v5182_v4 = vpop.f32.mrf.mxu1 }
 0x2e7   : > { %v8448_v44 = vadd.f32 %v5182_v4, %v2363_v41  ;;  %v8471_v41 = vpop.f32.mrf.mxu0 }
 0x2e8   : > { %v2572_v54 = vpop.f32.mrf.mxu1 }
 0x2e9   : > { %v8452_v40 = vadd.f32 %v2572_v54, %v2355_v6  ;;  %v8479_v28 = vpop.f32.mrf.mxu0 }
 0x2ea   : > { %v5185_v23 = vpop.f32.mrf.mxu1 }
 0x2eb   : > { %v8458_v39 = vadd.f32 %v5185_v23, %v2376_v30  ;;  %v8487_v23 = vpop.f32.mrf.mxu0 }
 0x2ec   : > { %v2585_v3 = vpop.f32.mrf.mxu1 }
 0x2ed   : > { %v8462_v16 = vadd.f32 %v2585_v3, %v2368_v46 }
 0x2ee   : > { %v5186_v35 = vpop.f32.mrf.mxu1 }
 0x2ef   : > { %v8466_v62 = vadd.f32 %v5186_v35, %v2379_v1  ;;  %v8495_v1 = vpop.f32.mrf.mxu0 }
 0x2f0   : > { %v2588_v38 = vpop.f32.mrf.mxu1 }
 0x2f1   : > { %v8469_v45 = vadd.f32 %v2588_v38, %v8345_v37 }
 0x2f2   : > { %v5189_v53 = vpop.f32.mrf.mxu1 }
 0x2f3   : > { %v8474_v9 = vadd.f32 %v5189_v53, %v8350_v52  ;;  %v8503_v53 = vpop.f32.mrf.mxu0 }
 0x2f4   : > { %v2601_v4 = vpop.f32.mrf.mxu1 }
 0x2f5   : > { %v8477_v32 = vadd.f32 %v2601_v4, %v8357_v21 }
 0x2f6   : > { %v5190_v6 = vpop.f32.mrf.mxu1 }
 0x2f7   : > { %v8482_v54 = vadd.f32 %v5190_v6, %v8360_v31 }
 0x2f8   : > { %v2604_v30 = vpop.f32.mrf.mxu1 }
 0x2f9   : > { %v8485_v37 = vadd.f32 %v2604_v30, %v8365_v2  ;;  %v8511_v30 = vpop.f32.mrf.mxu0 }
 0x2fa   : > { %v5193_v46 = vpop.f32.mrf.mxu1  ;;  %9347 = vst [vmem:[#allocation17_spill] sm:$0xff] %v8511_v30 }
 0x2fb   : > { %v8490_v52 = vadd.f32 %v5193_v46, %v8378_v24 }
 0x2fc   : > { %v2617_v3 = vpop.f32.mrf.mxu1 }
 0x2fd   : > { %v8493_v21 = vadd.f32 %v2617_v3, %v8382_v33 }
 0x2fe   : > { %v5194_v35 = vpop.f32.mrf.mxu1 }
 0x2ff   : > { %v8498_v31 = vadd.f32 %v5194_v35, %v8387_v57  ;;  %v2892_v35 = vadd.f32 %v8232_v11, %v8415_v18  ;;  %v2891_v11 = vadd.f32 %v8249_v14, %v8429_v58  ;;  %v2897_v14 = vadd.f32 %v8266_v36, %v8448_v44 }
 0x300   : > { %v2620_v38 = vpop.f32.mrf.mxu1  ;;  %v2898_v36 = vadd.f32 %v8286_v22, %v8462_v16  ;;  %v2904_v22 = vadd.f32 %v8306_v42, %v8474_v9  ;;  %v9353_v42 = vld [vmem:[#allocation11_spill] sm:$0xff] }
 0x301   : > { %v8501_v2 = vadd.f32 %v2620_v38, %v8390_v60  ;;  %v8521_v38 = vpop.f32.mrf.mxu0  ;;  %v2903_v9 = vadd.f32 %v9353_v42, %v8485_v37 }
 0x302   : > { %v5197_v4 = vpop.f32.mrf.mxu1 }
 0x303   : > { %v8506_v24 = vadd.f32 %v5197_v4, %v8396_v19 }
 0x304   : > { %v2633_v6 = vpop.f32.mrf.mxu1 }
 0x305   : > { %v8509_v33 = vadd.f32 %v2633_v6, %v8399_v34  ;;  %v2890_v34 = vadd.f32 %v8238_v15, %v8419_v61  ;;  %v2896_v15 = vadd.f32 %v8251_v25, %v8438_v27  ;;  %v2895_v25 = vadd.f32 %v8275_v47, %v8452_v40 }
 0x306   : > { %v5198_v46 = vpop.f32.mrf.mxu1  ;;  %v2901_v47 = vadd.f32 %v8292_v48, %v8466_v62  ;;  %v2902_v48 = vadd.f32 %v8312_v26, %v8477_v32 }
 0x307   : > { %v8514_v57 = vadd.f32 %v5198_v46, %v8404_v59  ;;  %v2893_v59 = vadd.f32 %v8245_v49, %v8425_v50  ;;  %v8531_v46 = vpop.f32.mrf.mxu0  ;;  %v2894_v49 = vadd.f32 %v8261_v5, %v8442_v56  ;;  %v2900_v5 = vadd.f32 %v8277_v13, %v8458_v39 }
 0x308   : > { %v2636_v3 = vpop.f32.mrf.mxu1  ;;  %v2899_v13 = vadd.f32 %v8302_v17, %v8469_v45  ;;  %v2905_v17 = vadd.f32 %v8322_v7, %v8482_v54  ;;  %v9358_v7 = vld [vmem:[#allocation13_spill] sm:$0xff] }
 0x309   : > { %v8517_v60 = vadd.f32 %v2636_v3, %v8409_v20  ;;  %v8541_v61 = vpop.f32.mrf.mxu0  ;;  %v2906_v54 = vadd.f32 %v9358_v7, %v8493_v21 }
 0x30a   : > { %v5233_v19 = vpop.f32.mrf.mxu1 }
 0x30b   : > { %v8523_v4 = vadd.f32 %v5233_v19, %v2892_v35  ;;  %v8551_v58 = vpop.f32.mrf.mxu0 }
 0x30c   : > { %v3037_v6 = vpop.f32.mrf.mxu1  ;;  %9348 = vst [vmem:[#allocation18_spill] sm:$0xff] %v8551_v58 }
 0x30d   : > { %v8527_v30 = vadd.f32 %v3037_v6, %v2890_v34  ;;  %v8561_v56 = vpop.f32.mrf.mxu0 }
 0x30e   : > { %v5234_v20 = vpop.f32.mrf.mxu1  ;;  %9349 = vst [vmem:[#allocation9_spill] sm:$0xff] %v8561_v56 }
 0x30f   : > { %v8533_v3 = vadd.f32 %v5234_v20, %v2893_v59  ;;  %v8571_v40 = vpop.f32.mrf.mxu0 }
 0x310   : > { %v3040_v18 = vpop.f32.mrf.mxu1  ;;  %9350 = vst [vmem:[#allocation10_spill] sm:$0xff] %v8571_v40 }
 0x311   : > { %v8537_v35 = vadd.f32 %v3040_v18, %v2891_v11  ;;  %v8581_v16 = vpop.f32.mrf.mxu0 }
 0x312   : > { %v5237_v19 = vpop.f32.mrf.mxu1  ;;  %9351 = vst [vmem:[#allocation19_spill] sm:$0xff] %v8581_v16 }
 0x313   : > { %v8543_v34 = vadd.f32 %v5237_v19, %v2896_v15  ;;  %v8591_v45 = vpop.f32.mrf.mxu0 }
 0x314   : > { %v3053_v50 = vpop.f32.mrf.mxu1  ;;  %9352 = vst [vmem:[#allocation20_spill] sm:$0xff] %v8591_v45 }
 0x315   : > { %v8547_v6 = vadd.f32 %v3053_v50, %v2894_v49  ;;  %v8601_v32 = vpop.f32.mrf.mxu0 }
 0x316   : > { %v5238_v59 = vpop.f32.mrf.mxu1 }
 0x317   : > { %v8553_v20 = vadd.f32 %v5238_v59, %v2897_v14 }
 0x318   : > { %v3056_v27 = vpop.f32.mrf.mxu1 }
 0x319   : > { %v8557_v11 = vadd.f32 %v3056_v27, %v2895_v25 }
 0x31a   : > { %v5241_v18 = vpop.f32.mrf.mxu1 }
 0x31b   : > { %v8563_v15 = vadd.f32 %v5241_v18, %v2900_v5 }
 0x31c   : > { %v3069_v44 = vpop.f32.mrf.mxu1 }
 0x31d   : > { %v8567_v19 = vadd.f32 %v3069_v44, %v2898_v36 }
 0x31e   : > { %v5242_v49 = vpop.f32.mrf.mxu1 }
 0x31f   : > { %v8573_v50 = vadd.f32 %v5242_v49, %v2901_v47  ;;  %v9355_v47 = vld [vmem:[#allocation12_spill] sm:$0xff] }
 0x320   : > { %v3072_v39 = vpop.f32.mrf.mxu1  ;;  %v2908_v26 = vadd.f32 %v9355_v47, %v8490_v52  ;;  %9356 = vst [vmem:[#allocation12_spill] sm:$0xff] %v8601_v32  ;;  %v2907_v52 = vadd.f32 %v8362_v12, %v8501_v2  ;;  %v2913_v12 = vadd.f32 %v8392_v10, %v8514_v57 }
 0x321   : > { %v8577_v14 = vadd.f32 %v3072_v39, %v2899_v13 }
 0x322   : > { %v5245_v59 = vpop.f32.mrf.mxu1 }
 0x323   : > { %v8583_v25 = vadd.f32 %v5245_v59, %v2904_v22  ;;  %v9360_v59 = vld [vmem:[#allocation14_spill] sm:$0xff] }
 0x324   : > { %v3085_v62 = vpop.f32.mrf.mxu1  ;;  %v2909_v37 = vadd.f32 %v9360_v59, %v8498_v31  ;;  %v9367_v31 = vld [vmem:[#allocation16_spill] sm:$0xff] }
 0x325   : > { %v8587_v27 = vadd.f32 %v3085_v62, %v2902_v48  ;;  %v8611_v48 = vpop.f32.mrf.mxu0 }
 0x326   : > { %v5246_v5 = vpop.f32.mrf.mxu1  ;;  %9361 = vst [vmem:[#allocation14_spill] sm:$0xff] %v8611_v48 }
 0x327   : > { %v8593_v18 = vadd.f32 %v5246_v5, %v2905_v17 }
 0x328   : > { %v3088_v36 = vpop.f32.mrf.mxu1 }
 0x329   : > { %v8597_v44 = vadd.f32 %v3088_v36, %v2903_v9  ;;  %v9364_v9 = vld [vmem:[#allocation15_spill] sm:$0xff]  ;;  %v8621_v36 = vpop.f32.mrf.mxu0 }
 0x32a   : > { %v5249_v49 = vpop.f32.mrf.mxu1  ;;  %v2912_v21 = vadd.f32 %v9364_v9, %v8506_v24  ;;  %9365 = vst [vmem:[#allocation15_spill] sm:$0xff] %v8621_v36  ;;  %v2911_v24 = vadd.f32 %v8401_v43, %v8517_v60 }
 0x32b   : > { %9354 = vst [vmem:[#allocation11_spill] sm:$0xff] %v8597_v44  ;;  %v8603_v13 = vadd.f32 %v5249_v49, %v2908_v26  ;;  %v2910_v49 = vadd.f32 %v9367_v31, %v8509_v33  ;;  %v8631_v2 = vpop.f32.mrf.mxu0 }
 0x32c   : > { %v3101_v39 = vpop.f32.mrf.mxu1  ;;  %9369 = vst [vmem:[#allocation25_spill] sm:$0xff] %v8631_v2 }
 0x32d   : > { %9357 = vst [vmem:[#allocation21_spill] sm:$0xff] %v8603_v13  ;;  %v8607_v22 = vadd.f32 %v3101_v39, %v2906_v54  ;;  %v3376_v13 = vadd.f32 %v8411_v0, %v8523_v4  ;;  %v3375_v0 = vadd.f32 %v8444_v63, %v8537_v35 }
 0x32e   : > { %v5250_v62 = vpop.f32.mrf.mxu1 }
 0x32f   : > { %9359 = vst [vmem:[#allocation13_spill] sm:$0xff] %v8607_v22  ;;  %v8613_v17 = vadd.f32 %v5250_v62, %v2909_v37 }
 0x330   : > { %v3104_v5 = vpop.f32.mrf.mxu1 }
 0x331   : > { %9362 = vst [vmem:[#allocation22_spill] sm:$0xff] %v8613_v17  ;;  %v8617_v42 = vadd.f32 %v3104_v5, %v2907_v52  ;;  %v5317_v52 = vpop.f32.mrf.mxu0 }
 0x332   : > { %v5253_v47 = vpop.f32.mrf.mxu1 }
 0x333   : > { %9363 = vst [vmem:[#allocation23_spill] sm:$0xff] %v8617_v42  ;;  %v8623_v26 = vadd.f32 %v5253_v47, %v2912_v21  ;;  %v3763_v9 = vpop.f32.mrf.mxu0 }
 0x334   : > { %v3117_v7 = vpop.f32.mrf.mxu1 }
 0x335   : > { %9366 = vst [vmem:[#allocation24_spill] sm:$0xff] %v8623_v26  ;;  %v8627_v54 = vadd.f32 %v3117_v7, %v2910_v49  ;;  %v5318_v31 = vpop.f32.mrf.mxu0 }
 0x336   : > { %v5254_v39 = vpop.f32.mrf.mxu1 }
 0x337   : > { %9368 = vst [vmem:[#allocation16_spill] sm:$0xff] %v8627_v54  ;;  %v8633_v59 = vadd.f32 %v5254_v39, %v2913_v12  ;;  %v3766_v57 = vpop.f32.mrf.mxu0 }
 0x338   : > { %v3120_v37 = vpop.f32.mrf.mxu1 }
 0x339   : > { %9370 = vst [vmem:[#allocation26_spill] sm:$0xff] %v8633_v59  ;;  %v8637_v62 = vadd.f32 %v3120_v37, %v2911_v24  ;;  %v5321_v12 = vpop.f32.mrf.mxu0 }
 0x33a   : > { %v5289_v5 = vpop.f32.mrf.mxu1 }
 0x33b   : > { %9371 = vst [vmem:[#allocation27_spill] sm:$0xff] %v8637_v62  ;;  %v3779_v43 = vpop.f32.mrf.mxu0  ;;  %v3618_v58 = vadd.f32 %v5289_v5, %v3376_v13 }
 0x33c   : > { %v3521_v33 = vpop.f32.mrf.mxu1 }
 0x33d   : > { %v8647_v37 = vpop.f32.mrf.mxu0  ;;  %v3860_v4 = vadd.f32 %v5317_v52, %v3618_v58 }
 0x33e   : > { %v5290_v21 = vpop.f32.mrf.mxu1 }
 0x33f   : > { %v8653_v48 = vpop.f32.mrf.mxu0 }
 0x340   : > { %v3524_v47 = vpop.f32.mrf.mxu1 }
 0x341   : > { %v8659_v26 = vpop.f32.mrf.mxu0  ;;  %v3617_v5 = vadd.f32 %v3524_v47, %v3375_v0 }
 0x342   : > { %v5293_v49 = vpop.f32.mrf.mxu1 }
 0x343   : > { %v8665_v16 = vpop.f32.mrf.mxu0 }
 0x344   : > { %v3537_v10 = vpop.f32.mrf.mxu1 }
 0x345   : > { %v8671_v22 = vpop.f32.mrf.mxu0 }
 0x346   : > { %v5294_v7 = vpop.f32.mrf.mxu1 }
 0x348   : > { %v3540_v2 = vpop.f32.mrf.mxu1 }
 0x34a   : > { %v8639_v39 = vpop.f32.mrf.mxu1 }
 0x34c   : > { %v8641_v36 = vpop.f32.mrf.mxu1 }
 0x34e   : > { %v8643_v60 = vpop.f32.mrf.mxu1 }
 0x350   : > { %v8645_v24 = vpop.f32.mrf.mxu1 }
 0x352   : > { %v8649_v62 = vpop.f32.mrf.mxu1 }
 0x354   : > { %v8651_v59 = vpop.f32.mrf.mxu1 }
 0x356   : > { %v8655_v54 = vpop.f32.mrf.mxu1 }
 0x357   : > { %9372 = vst [vmem:[#allocation28_spill] sm:$0xff] %v8655_v54 }
 0x358   : > { %v8657_v32 = vpop.f32.mrf.mxu1 }
 0x359   : > { %9373 = vst [vmem:[#allocation29_spill] sm:$0xff] %v8657_v32 }
 0x35a   : > { %v8661_v45 = vpop.f32.mrf.mxu1 }
 0x35b   : > { %9374 = vst [vmem:[#allocation30_spill] sm:$0xff] %v8661_v45  ;;  %v3374_v45 = vadd.f32 %v8421_v51, %v8527_v30  ;;  %v3380_v51 = vadd.f32 %v8454_v29, %v8543_v34  ;;  %v3381_v29 = vadd.f32 %v8471_v41, %v8553_v20  ;;  %v3384_v41 = vadd.f32 %v8487_v23, %v8563_v15 }
 0x35c   : > { %v8663_v42 = vpop.f32.mrf.mxu1 }
 0x35d   : > { %9375 = vst [vmem:[#allocation31_spill] sm:$0xff] %v8663_v42  ;;  %v8681_v42 = vpop.f32.mrf.mxu0  ;;  %v3622_v63 = vadd.f32 %v5293_v49, %v3380_v51 }
 0x35e   : > { %v8667_v17 = vpop.f32.mrf.mxu1 }
 0x35f   : > { %9376 = vst [vmem:[#allocation32_spill] sm:$0xff] %v8667_v17  ;;  %v3616_v17 = vadd.f32 %v3521_v33, %v3374_v45  ;;  %v3378_v45 = vadd.f32 %v8464_v55, %v8547_v6  ;;  %v3859_v55 = vadd.f32 %v3766_v57, %v3617_v5  ;;  %v3623_v6 = vadd.f32 %v5294_v7, %v3381_v29 }
 0x360   : > { %v8669_v40 = vpop.f32.mrf.mxu1 }
 0x361   : > { %9377 = vst [vmem:[#allocation33_spill] sm:$0xff] %v8669_v40  ;;  %v3377_v40 = vadd.f32 %v8434_v8, %v8533_v3  ;;  %v8700_v8 = vld [vmem:[%s8934_s4] ss:$0 sm:$0xff]  ;;  %v3620_v52 = vadd.f32 %v3537_v10, %v3378_v45 }
 0x362   : > { %v8673_v56 = vpop.f32.mrf.mxu1 }
 0x363   : > { %9378 = vst [vmem:[#allocation34_spill] sm:$0xff] %v8673_v56  ;;  %v3619_v56 = vadd.f32 %v5290_v21, %v3377_v40  ;;  %v3862_v0 = vadd.f32 %v3779_v43, %v3620_v52  ;;  %v3385_v43 = vadd.f32 %v8503_v53, %v8573_v50 }
 0x364   : > { %v8677_v32 = vpop.f32.mrf.mxu1 }
 0x365   : > { %9379 = vst [vmem:[#allocation35_spill] sm:$0xff] %v8677_v32  ;;  %v8691_v32 = vpop.f32.mrf.mxu0  ;;  %v3861_v58 = vadd.f32 %v5318_v31, %v3619_v56  ;;  %v3864_v31 = vadd.f32 %v5321_v12, %v3622_v63  ;;  %v3865_v12 = vadd.f32 %v8647_v37, %v3623_v6  ;;  %v9381_v37 = vld [vmem:[#allocation17_spill] sm:$0xff] }
 0x366   : > { %v8683_v44 = vpop.f32.mrf.mxu1 }
 0x367   : > { %9380 = vst [vmem:[#allocation36_spill] sm:$0xff] %v8683_v44  ;;  %v3858_v44 = vadd.f32 %v3763_v9, %v3616_v17  ;;  %v8702_v40 = vpop.f32.mrf.mxu0  ;;  %v3379_v9 = vadd.f32 %v8479_v28, %v8557_v11  ;;  %v3626_v11 = vadd.f32 %v8639_v39, %v3384_v41 }
 0x368   : > { %v8687_v54 = vpop.f32.mrf.mxu1 }
 0x369   : > { %v8711_v49 = vpop.f32.mrf.mxu0  ;;  %v3621_v10 = vadd.f32 %v3540_v2, %v3379_v9  ;;  %v3868_v53 = vadd.f32 %v8659_v26, %v3626_v11  ;;  %v3386_v26 = vadd.f32 %v8531_v46, %v8587_v27  ;;  %v9384_v27 = vld [vmem:[#allocation28_spill] sm:$0xff] }
 0x36a   : > { %v5345_v13 = vpop.f32.mrf.mxu1 }
 0x36b   : > { %v4102_v30 = vadd.f32 %v5345_v13, %v3860_v4  ;;  %v3382_v13 = vadd.f32 %v8495_v1, %v8567_v19  ;;  %v8720_v23 = vpop.f32.mrf.mxu0  ;;  %v3863_v1 = vadd.f32 %v8653_v48, %v3621_v10  ;;  %v3627_v19 = vadd.f32 %v8643_v60, %v3385_v43 }
 0x36c   : > { %v4005_v3 = vpop.f32.mrf.mxu1  ;;  %v3388_v48 = vadd.f32 %v8521_v38, %v8583_v25  ;;  %v3389_v10 = vadd.f32 %v8541_v61, %v8593_v18 }
 0x36d   : > { %v4100_v35 = vadd.f32 %v4005_v3, %v3858_v44  ;;  %v4133_v17 = vadd.f32 %v8700_v8, %v4102_v30  ;;  %v3624_v15 = vadd.f32 %v8641_v36, %v3382_v13  ;;  %v8734_v50 = vpop.f32.mrf.mxu0 }
 0x36e   : > { %v5346_v34 = vpop.f32.mrf.mxu1 }
 0x36f   : > { %v4103_v33 = vadd.f32 %v5346_v34, %v3861_v58  ;;  %v4131_v47 = vadd.f32 %v8700_v8, %v4100_v35  ;;  %v4157_v57 = vmax.f32 %v4133_v17, 0.0  ;;  %v3383_v58 = vadd.f32 %v9381_v37, %v8577_v14 }
 0x370   : > { %v4008_v21 = vpop.f32.mrf.mxu1  ;;  %v3866_v14 = vadd.f32 %v8665_v16, %v3624_v15  ;;  %v3628_v16 = vadd.f32 %v8651_v59, %v3386_v26  ;;  %v9398_v26 = vld [vmem:[#allocation32_spill] sm:$0xff] }
 0x371   : > { %v4134_v56 = vadd.f32 %v8700_v8, %v4103_v33  ;;  %v4101_v44 = vadd.f32 %v4008_v21, %v3859_v55  ;;  %v4155_v51 = vmax.f32 %v4131_v47, 0.0  ;;  %v3625_v17 = vadd.f32 %v8645_v24, %v3383_v58 }
 0x372   : > { %v5349_v20 = vpop.f32.mrf.mxu1  ;;  %v3630_v21 = vadd.f32 %v8649_v62, %v3388_v48  ;;  %v3869_v24 = vadd.f32 %v8671_v22, %v3627_v19  ;;  %v9385_v22 = vld [vmem:[#allocation11_spill] sm:$0xff]  ;;  %v9396_v48 = vld [vmem:[#allocation22_spill] sm:$0xff] }
 0x373   : > { %v4158_v7 = vmax.f32 %v4134_v56, 0.0  ;;  %v4132_v4 = vadd.f32 %v8700_v8, %v4101_v44  ;;  %v4106_v28 = vadd.f32 %v5349_v20, %v3864_v31  ;;  %v3827_v31 = vpop.f32.mrf.mxu0  ;;  %v3867_v46 = vadd.f32 %v8681_v42, %v3625_v17  ;;  %v9390_v42 = vld [vmem:[#allocation9_spill] sm:$0xff]  ;;  %v9395_v17 = vld [vmem:[#allocation31_spill] sm:$0xff] }
 0x374   : > { %v4021_v5 = vpop.f32.mrf.mxu1  ;;  %v3872_v61 = vadd.f32 %v8691_v32, %v3630_v21  ;;  %v9394_v32 = vld [vmem:[#allocation10_spill] sm:$0xff] }
 0x375   : > { %v4180_v2 = vpack.c.bf16 %v4158_v7, %v4157_v57  ;;  %v4156_v30 = vmax.f32 %v4132_v4, 0.0  ;;  %v4104_v45 = vadd.f32 %v4021_v5, %v3862_v0  ;;  %v4137_v39 = vadd.f32 %v8700_v8, %v4106_v28  ;;  %v9386_v7 = vld [vmem:[#allocation18_spill] sm:$0xff]  ;;  %v5334_v18 = vpop.f32.mrf.mxu0  ;;  %v9388_v5 = vld [vmem:[#allocation29_spill] sm:$0xff] }
 0x376   : > { %v5350_v3 = vpop.f32.mrf.mxu1  ;;  %v3631_v57 = vadd.f32 %v9384_v27, %v3389_v10  ;;  %v3387_v4 = vadd.f32 %v9386_v7, %v9385_v22 }
 0x377   : > { %v4179_v63 = vpack.c.bf16 %v4156_v30, %v4155_v51  ;;  %v4107_v35 = vadd.f32 %v5350_v3, %v3865_v12  ;;  %v4135_v29 = vadd.f32 %v8700_v8, %v4104_v45  ;;  %v4161_v33 = vmax.f32 %v4137_v39, 0.0  ;;  %v9389_v51 = vld [vmem:[#allocation21_spill] sm:$0xff]  ;;  %v9392_v39 = vld [vmem:[#allocation30_spill] sm:$0xff] }
 0x378   : > { %v4024_v52 = vpop.f32.mrf.mxu1  ;;  %v3629_v12 = vadd.f32 %v9388_v5, %v3387_v4  ;;  %v3870_v45 = vadd.f32 %v8702_v40, %v3628_v16  ;;  %v3873_v58 = vadd.f32 %v8711_v49, %v3631_v57  ;;  %v9399_v49 = vld [vmem:[#allocation23_spill] sm:$0xff] }
 0x379   : > { %v4138_v36 = vadd.f32 %v8700_v8, %v4107_v35  ;;  %v4105_v34 = vadd.f32 %v4024_v52, %v3863_v1  ;;  %5371 = vmatprep.mubr.msk.bf16.mxu0 %vm9382_vm2, %v4179_v63  ;;  %v4159_v56 = vmax.f32 %v4135_v29, 0.0  ;;  %v9393_v1 = vld [vmem:[#allocation13_spill] sm:$0xff] }
 0x37a   : > { %v5353_v60 = vpop.f32.mrf.mxu1  ;;  %5372 = vmatmul.mubr.msk.bf16.vlgmr.msra.gmra.mxu0 %vm9383_vm12, %v4180_v2  ;;  %v3392_v2 = vadd.f32 %v9390_v42, %v9389_v51  ;;  %v3390_v19 = vadd.f32 %v9394_v32, %v9393_v1  ;;  %v3871_v21 = vadd.f32 %v8720_v23, %v3629_v12  ;;  %v9404_v23 = vld [vmem:[#allocation12_spill] sm:$0xff] }
 0x37b   : > { %v4162_v55 = vmax.f32 %v4138_v36, 0.0  ;;  %v4136_v6 = vadd.f32 %v8700_v8, %v4105_v34  ;;  %v4110_v9 = vadd.f32 %v5353_v60, %v3868_v53  ;;  %v3830_v53 = vpop.f32.mrf.mxu0  ;;  %v9397_v60 = vld [vmem:[#allocation19_spill] sm:$0xff] }
 0x37c   : > { %v4037_v47 = vpop.f32.mrf.mxu1  ;;  %v3634_v35 = vadd.f32 %v9392_v39, %v3392_v2  ;;  %v3632_v40 = vadd.f32 %v9395_v17, %v3390_v19 }
 0x37d   : > { %v4182_v38 = vpack.c.bf16 %v4162_v55, %v4161_v33  ;;  %v4160_v25 = vmax.f32 %v4136_v6, 0.0  ;;  %v4108_v44 = vadd.f32 %v4037_v47, %v3866_v14  ;;  %v4141_v62 = vadd.f32 %v8700_v8, %v4110_v9 }
 0x37e   : > { %v5354_v41 = vpop.f32.mrf.mxu1  ;;  %v3393_v14 = vadd.f32 %v9397_v60, %v9396_v48  ;;  %v3876_v10 = vadd.f32 %v8734_v50, %v3634_v35  ;;  %v3874_v57 = vadd.f32 %v3827_v31, %v3632_v40  ;;  %v9410_v31 = vld [vmem:[#allocation26_spill] sm:$0xff] }
 0x37f   : > { %v4181_v20 = vpack.c.bf16 %v4160_v25, %v4159_v56  ;;  %v4111_v0 = vadd.f32 %v5354_v41, %v3869_v24  ;;  %v4139_v11 = vadd.f32 %v8700_v8, %v4108_v44  ;;  %v4165_v15 = vmax.f32 %v4141_v62, 0.0  ;;  %v9400_v24 = vld [vmem:[#allocation20_spill] sm:$0xff]  ;;  %v5337_v41 = vpop.f32.mrf.mxu0 }
 0x380   : > { %v4040_v28 = vpop.f32.mrf.mxu1  ;;  %v3635_v47 = vadd.f32 %v9398_v26, %v3393_v14  ;;  %v3391_v56 = vadd.f32 %v9400_v24, %v9399_v49 }
 0x381   : > { %v4142_v59 = vadd.f32 %v8700_v8, %v4111_v0  ;;  %v4109_v13 = vadd.f32 %v4040_v28, %v3867_v46  ;;  %5375 = vmatprep.mubr.msk.bf16.mxu0 %vm9387_vm14, %v4181_v20  ;;  %v4163_v52 = vmax.f32 %v4139_v11, 0.0  ;;  %v9402_v20 = vld [vmem:[#allocation33_spill] sm:$0xff]  ;;  %v9403_v0 = vld [vmem:[#allocation24_spill] sm:$0xff]  ;;  %v9406_v11 = vld [vmem:[#allocation34_spill] sm:$0xff] }
 0x382   : > { %v5357_v30 = vpop.f32.mrf.mxu1  ;;  %5376 = vmatmul.mubr.msk.bf16.gmra.mxu0 %vm9391_vm13, %v4182_v38  ;;  %v3633_v62 = vadd.f32 %v9402_v20, %v3391_v56  ;;  %v3396_v46 = vadd.f32 %v9404_v23, %v9403_v0  ;;  %v3877_v12 = vadd.f32 %v5334_v18, %v3635_v47  ;;  %v9414_v18 = vld [vmem:[#allocation25_spill] sm:$0xff] }
 0x383   : > { %v4166_v43 = vmax.f32 %v4142_v59, 0.0  ;;  %v4140_v3 = vadd.f32 %v8700_v8, %v4109_v13  ;;  %v4114_v63 = vadd.f32 %v5357_v30, %v3872_v61  ;;  %v9407_v13 = vld [vmem:[#allocation16_spill] sm:$0xff]  ;;  %v9408_v61 = vld [vmem:[#allocation14_spill] sm:$0xff] }
 0x384   : > { %v4053_v37 = vpop.f32.mrf.mxu1  ;;  %v3638_v59 = vadd.f32 %v9406_v11, %v3396_v46  ;;  %v3394_v50 = vadd.f32 %v9408_v61, %v9407_v13  ;;  %v3875_v19 = vadd.f32 %v3830_v53, %v3633_v62  ;;  %v8815_v11 = vld [vmem:[%s8936_s6] ss:$0 sm:$0xff] }
 0x385   : > { %v4184_v29 = vpack.c.bf16 %v4166_v43, %v4165_v15  ;;  %v4164_v36 = vmax.f32 %v4140_v3, 0.0  ;;  %v4112_v34 = vadd.f32 %v4053_v37, %v3870_v45  ;;  %v4145_v6 = vadd.f32 %v8700_v8, %v4114_v63  ;;  %v3843_v45 = vpop.f32.mrf.mxu0  ;;  %v9409_v15 = vld [vmem:[#allocation35_spill] sm:$0xff]  ;;  %v9412_v37 = vld [vmem:[#allocation36_spill] sm:$0xff] }
 0x386   : > { %v5358_v33 = vpop.f32.mrf.mxu1  ;;  %v3636_v43 = vadd.f32 %v9409_v15, %v3394_v50  ;;  %v9411_v3 = vld [vmem:[#allocation15_spill] sm:$0xff]  ;;  %v3880_v48 = vadd.f32 %v5337_v41, %v3638_v59 }
 0x387   : > { %v4183_v55 = vpack.c.bf16 %v4164_v36, %v4163_v52  ;;  %v4115_v9 = vadd.f32 %v5358_v33, %v3873_v58  ;;  %v4143_v25 = vadd.f32 %v8700_v8, %v4112_v34  ;;  %v4169_v22 = vmax.f32 %v4145_v6, 0.0  ;;  %v9413_v52 = vld [vmem:[#allocation27_spill] sm:$0xff]  ;;  %v5338_v60 = vpop.f32.mrf.mxu0 }
 0x388   : > { %v4056_v38 = vpop.f32.mrf.mxu1  ;;  %v3397_v63 = vadd.f32 %v9411_v3, %v9410_v31  ;;  %v3878_v53 = vadd.f32 %v3843_v45, %v3636_v43 }
 0x389   : > { %v4146_v44 = vadd.f32 %v8700_v8, %v4115_v9  ;;  %v4113_v16 = vadd.f32 %v4056_v38, %v3871_v21  ;;  %5379 = vmatprep.mubr.msk.bf16.mxu0 %vm9401_vm3, %v4183_v55  ;;  %v4167_v51 = vmax.f32 %v4143_v25, 0.0  ;;  %v3846_v25 = vpop.f32.mrf.mxu0 }
 0x38a   : > { %v5361_v27 = vpop.f32.mrf.mxu1  ;;  %5380 = vmatmul.mubr.msk.bf16.gmra.mxu0 %vm9405_vm5, %v4184_v29  ;;  %v3639_v58 = vadd.f32 %v9412_v37, %v3397_v63  ;;  %v3395_v29 = vadd.f32 %v9414_v18, %v9413_v52 }
 0x38b   : > { %v4170_v7 = vmax.f32 %v4146_v44, 0.0  ;;  %v4144_v4 = vadd.f32 %v8700_v8, %v4113_v16  ;;  %v4118_v28 = vadd.f32 %v5361_v27, %v3876_v10 }
 0x38c   : > { %v4069_v5 = vpop.f32.mrf.mxu1  ;;  %v3637_v14 = vadd.f32 %v8687_v54, %v3395_v29  ;;  %v3881_v47 = vadd.f32 %v5338_v60, %v3639_v58 }
 0x38d   : > { %v4186_v42 = vpack.c.bf16 %v4170_v7, %v4169_v22  ;;  %v4168_v2 = vmax.f32 %v4144_v4, 0.0  ;;  %v4116_v30 = vadd.f32 %v4069_v5, %v3874_v57  ;;  %v4149_v1 = vadd.f32 %v8700_v8, %v4118_v28 }
 0x38e   : > { %v5362_v39 = vpop.f32.mrf.mxu1  ;;  %v3879_v41 = vadd.f32 %v3846_v25, %v3637_v14 }
 0x38f   : > { %v4185_v35 = vpack.c.bf16 %v4168_v2, %v4167_v51  ;;  %v4119_v32 = vadd.f32 %v5362_v39, %v3877_v12  ;;  %v4147_v34 = vadd.f32 %v8700_v8, %v4116_v30  ;;  %v4173_v55 = vmax.f32 %v4149_v1, 0.0 }
 0x390   : > { %v4072_v36 = vpop.f32.mrf.mxu1 }
 0x391   : > { %v4150_v17 = vadd.f32 %v8700_v8, %v4119_v32  ;;  %v4117_v40 = vadd.f32 %v4072_v36, %v3875_v19  ;;  %5383 = vmatprep.mubr.msk.bf16.mxu0 %vm9415_vm11, %v4185_v35  ;;  %v4171_v49 = vmax.f32 %v4147_v34, 0.0 }
 0x392   : > { %v5365_v33 = vpop.f32.mrf.mxu1  ;;  %5384 = vmatmul.mubr.msk.bf16.gmra.mxu0 %vm9416_vm8, %v4186_v42 }
 0x393   : > { %v4174_v6 = vmax.f32 %v4150_v17, 0.0  ;;  %v4148_v9 = vadd.f32 %v8700_v8, %v4117_v40  ;;  %v4122_v21 = vadd.f32 %v5365_v33, %v3880_v48 }
 0x394   : > { %v4085_v26 = vpop.f32.mrf.mxu1 }
 0x395   : > { %v4188_v24 = vpack.c.bf16 %v4174_v6, %v4173_v55  ;;  %v4172_v56 = vmax.f32 %v4148_v9, 0.0  ;;  %v4120_v38 = vadd.f32 %v4085_v26, %v3878_v53  ;;  %v4153_v54 = vadd.f32 %v8700_v8, %v4122_v21 }
 0x396   : > { %v5366_v44 = vpop.f32.mrf.mxu1 }
 0x397   : > { %v4187_v16 = vpack.c.bf16 %v4172_v56, %v4171_v49  ;;  %v4123_v10 = vadd.f32 %v5366_v44, %v3881_v47  ;;  %v4151_v62 = vadd.f32 %v8700_v8, %v4120_v38  ;;  %v4177_v46 = vmax.f32 %v4153_v54, 0.0 }
 0x398   : > { %v4088_v20 = vpop.f32.mrf.mxu1 }
 0x399   : > { %v4154_v0 = vadd.f32 %v8700_v8, %v4123_v10  ;;  %v4121_v23 = vadd.f32 %v4088_v20, %v3879_v41  ;;  %5387 = vmatprep.mubr.msk.bf16.mxu0 %vm9417_vm10, %v4187_v16  ;;  %v4175_v22 = vmax.f32 %v4151_v62, 0.0 }
 0x39a   : > { %5388 = vmatmul.mubr.msk.bf16.gmra.mxu0 %vm9418_vm9, %v4188_v24 }
 0x39b   : > { %v4178_v27 = vmax.f32 %v4154_v0, 0.0  ;;  %v4152_v57 = vadd.f32 %v8700_v8, %v4121_v23 }
 0x39d   : > { %v4190_v7 = vpack.c.bf16 %v4178_v27, %v4177_v46  ;;  %v4176_v4 = vmax.f32 %v4152_v57, 0.0 }
 0x39f   : > { %v4189_v28 = vpack.c.bf16 %v4176_v4, %v4175_v22 }
 0x3a1   : > { %5391 = vmatprep.mubr.msk.bf16.mxu0 %vm9419_vm15, %v4189_v28 }
 0x3a2   : > { %5392 = vmatmul.mubr.msk.bf16.gmra.mxu0 %vm9420_vm4, %v4190_v7 }
 0x43a   : > { %v5373_v59 = vpop.f32.mrf.mxu0 }
 0x43b   : > { %v4293_v13 = vadd.f32 %v5373_v59, %v8815_v11 }
 0x43c   : > { %v4284_v8 = vpop.f32.mrf.mxu0 }
 0x43d   : > { %4381 = vst [vmem:[%s8818_s10 + $0x10] sm:$0xff] %v4293_v13  ;;  %v4285_v61 = vadd.f32 %v8815_v11, %v4284_v8 }
 0x43e   : > { %v5374_v50 = vpop.f32.mrf.mxu0 }
 0x43f   : > { %4379 = vst [vmem:[%s8818_s10] sm:$0xff] %v4285_v61  ;;  %v4296_v5 = vadd.f32 %v5374_v50, %v8815_v11 }
 0x440   : > { %v4287_v12 = vpop.f32.mrf.mxu0 }
 0x441   : > { %4382 = vst [vmem:[%s8818_s10 + $0x18] sm:$0xff] %v4296_v5  ;;  %v4288_v51 = vadd.f32 %v8815_v11, %v4287_v12 }
 0x442   : > { %v5377_v42 = vpop.f32.mrf.mxu0 }
 0x443   : > { %4380 = vst [vmem:[%s8818_s10 + $0x8] sm:$0xff] %v4288_v51  ;;  %v4309_v2 = vadd.f32 %v5377_v42, %v8815_v11 }
 0x444   : > { %v4300_v30 = vpop.f32.mrf.mxu0 }
 0x445   : > { %4385 = vst [vmem:[%s8818_s10 + $0x30] sm:$0xff] %v4309_v2  ;;  %v4301_v45 = vadd.f32 %v8815_v11, %v4300_v30 }
 0x446   : > { %v5378_v15 = vpop.f32.mrf.mxu0 }
 0x447   : > { %4383 = vst [vmem:[%s8818_s10 + $0x20] sm:$0xff] %v4301_v45  ;;  %v4312_v43 = vadd.f32 %v5378_v15, %v8815_v11 }
 0x448   : > { %v4303_v31 = vpop.f32.mrf.mxu0 }
 0x449   : > { %4386 = vst [vmem:[%s8818_s10 + $0x38] sm:$0xff] %v4312_v43  ;;  %v4304_v3 = vadd.f32 %v8815_v11, %v4303_v31 }
 0x44a   : > { %v5381_v63 = vpop.f32.mrf.mxu0 }
 0x44b   : > { %4384 = vst [vmem:[%s8818_s10 + $0x28] sm:$0xff] %v4304_v3  ;;  %v4325_v39 = vadd.f32 %v5381_v63, %v8815_v11 }
 0x44c   : > { %v4316_v35 = vpop.f32.mrf.mxu0 }
 0x44d   : > { %4389 = vst [vmem:[%s8818_s10 + $0x50] sm:$0xff] %v4325_v39  ;;  %v4317_v1 = vadd.f32 %v8815_v11, %v4316_v35 }
 0x44e   : > { %v5382_v32 = vpop.f32.mrf.mxu0 }
 0x44f   : > { %4387 = vst [vmem:[%s8818_s10 + $0x40] sm:$0xff] %v4317_v1  ;;  %v4328_v19 = vadd.f32 %v5382_v32, %v8815_v11 }
 0x450   : > { %v4319_v37 = vpop.f32.mrf.mxu0 }
 0x451   : > { %4390 = vst [vmem:[%s8818_s10 + $0x58] sm:$0xff] %v4328_v19  ;;  %v4320_v58 = vadd.f32 %v8815_v11, %v4319_v37 }
 0x452   : > { %v5385_v52 = vpop.f32.mrf.mxu0 }
 0x453   : > { %4388 = vst [vmem:[%s8818_s10 + $0x48] sm:$0xff] %v4320_v58  ;;  %v4341_v18 = vadd.f32 %v5385_v52, %v8815_v11 }
 0x454   : > { %v4332_v29 = vpop.f32.mrf.mxu0 }
 0x455   : > { %4393 = vst [vmem:[%s8818_s10 + $0x70] sm:$0xff] %v4341_v18  ;;  %v4333_v36 = vadd.f32 %v8815_v11, %v4332_v29 }
 0x456   : > { %v5386_v34 = vpop.f32.mrf.mxu0 }
 0x457   : > { %4391 = vst [vmem:[%s8818_s10 + $0x60] sm:$0xff] %v4333_v36  ;;  %v4344_v17 = vadd.f32 %v5386_v34, %v8815_v11 }
 0x458   : > { %v4335_v40 = vpop.f32.mrf.mxu0 }
 0x459   : > { %4394 = vst [vmem:[%s8818_s10 + $0x78] sm:$0xff] %v4344_v17  ;;  %v4336_v48 = vadd.f32 %v8815_v11, %v4335_v40 }
 0x45a   : > { %v5389_v60 = vpop.f32.mrf.mxu0 }
 0x45b   : > { %4392 = vst [vmem:[%s8818_s10 + $0x68] sm:$0xff] %v4336_v48  ;;  %v4357_v14 = vadd.f32 %v5389_v60, %v8815_v11 }
 0x45c   : > { %v4348_v33 = vpop.f32.mrf.mxu0 }
 0x45d   : > { %4397 = vst [vmem:[%s8818_s10 + $0x90] sm:$0xff] %v4357_v14  ;;  %v4349_v53 = vadd.f32 %v8815_v11, %v4348_v33 }
 0x45e   : > { %v5390_v55 = vpop.f32.mrf.mxu0 }
 0x45f   : > { %4395 = vst [vmem:[%s8818_s10 + $0x80] sm:$0xff] %v4349_v53  ;;  %v4360_v6 = vadd.f32 %v5390_v55, %v8815_v11 }
 0x460   : > { %v4351_v9 = vpop.f32.mrf.mxu0 }
 0x461   : > { %4398 = vst [vmem:[%s8818_s10 + $0x98] sm:$0xff] %v4360_v6  ;;  %v4352_v21 = vadd.f32 %v8815_v11, %v4351_v9 }
 0x462   : > { %v5393_v26 = vpop.f32.mrf.mxu0 }
 0x463   : > { %4396 = vst [vmem:[%s8818_s10 + $0x88] sm:$0xff] %v4352_v21  ;;  %v4373_v47 = vadd.f32 %v5393_v26, %v8815_v11 }
 0x464   : > { %v4364_v49 = vpop.f32.mrf.mxu0 }
 0x465   : > { %4401 = vst [vmem:[%s8818_s10 + $0xb0] sm:$0xff] %v4373_v47  ;;  %v4365_v24 = vadd.f32 %v8815_v11, %v4364_v49 }
 0x466   : > { %v5394_v56 = vpop.f32.mrf.mxu0 }
 0x467   : > { %4399 = vst [vmem:[%s8818_s10 + $0xa0] sm:$0xff] %v4365_v24  ;;  %v4376_v38 = vadd.f32 %v5394_v56, %v8815_v11 }
 0x468   : > { %v4367_v25 = vpop.f32.mrf.mxu0 }
 0x469   : > { %4402 = vst [vmem:[%s8818_s10 + $0xb8] sm:$0xff] %v4376_v38  ;;  %v4368_v44 = vadd.f32 %v8815_v11, %v4367_v25 }
 0x46b   : > { %4400 = vst [vmem:[%s8818_s10 + $0xa8] sm:$0xff] %v4368_v44 }
 0x46c   : > { %5574 = shalt.err (!%p5571_p7)
}
 0x46d   : > { %s5575_s12 = scalar_lea.hbm %s8870_s20, 3072  ;;  %s5579_s16 = scalar_lea.hbm %s8937_s7, 12288 }
 0x46e   : > { %p5576_p9 = scmp.ne.s32.totalorder %s8870_s20, %s5575_s12  ;;  %p5580_p12 = scmp.lt.s32.totalorder %s8870_s20, %s8937_s7 }
 0x46f   : > { %p5581_p13 = scmp.lt.s32.totalorder %s5579_s16, %s5575_s12 }
 0x470   : > { %p5577_p10 = pnand %p5576_p9, %p5751_p3 }
 0x471   : > { %p5582_p0 = por %p5581_p13, %p5580_p12 }
 0x472   : > { %p5578_p11 = pneg %p5577_p10 }
 0x474   : > { %p5583_p1 = pnand %p5582_p0, %p5578_p11 }
 0x476   : > { %5586 = shalt.err (!%p5583_p1)
}
 0x477   : > { %s5658_s17 = smov 128   ;;  %s5659_s18 = smov 8  }
 0x478   : > { %5461 = dma.vmem_to_hbm [thread:$0]  (%p5751_p3), %s8872_s28, 3072, %s8870_s20, %s8879_s21, %s5658_s17, %s5658_s17, %s5659_s18  }
 0x479 PF: > { %p5467_p2 = scmp.ge.s32.totalorder %s5653_s8, 2  ;;  %s4434_s11 = sand.u32 1, %s5625_s24  }
 0x47a   : > { %s4435_s22 = scalar_lea.sflag [#allocation4], %s4434_s11 }
 0x47b   : > { %p5464_p4 = pnand %p5467_p2, %p5760_p8 }
 0x47d   : > { %p5465_p5 = pneg %p5464_p4 }
 0x47f   : > { %5620 = dma.done.wait (%p5465_p5), %s4435_s22, 3072  }
 0x480   : > { %5622 = vsyncadd (%p5465_p5), %s4435_s22, 4294964224  ;;  %s20_s8 = sadd.s32 1, %s5653_s8   ;;  %s9421_s28 = sld [smem:[#allocation6_spill]] }
 0x481   : > { %p17_p6 = scmp.ge.s32.totalorder %s20_s8, 6   ;;  %s9422_s14 = sld [smem:[#allocation7_spill]] }
 0x482   : > { %s9423_s30 = sld [smem:[#allocation8_spill]]  ;;  %s9424_s24 = smov %s5629_s25 }
 0x483   : > { %s9425_s25 = smov %s5633_s26  ;;  %s9426_s26 = smov %s5769_s19 }
 0x484   : > { %s9427_s27 = smov %s5645_s29  ;;  %19 = sbr.rel (!%p17_p6) target bundleno = 5 (0x5), region = 93 }
 0x487   : > { %s9428_s29 = smov %s9422_s14 }
 0x489   :  { %4440 = vsyncpa [#allocation4], 1 }
 0x48a   :  { %4442 = vsyncpa [#allocation4 + $0x1], 1 }

</bundles_post_ra>
